<compile_context>
chip_gen: v7x
topology: tpu7x:2x2x1
jax: 0.10.0
libtpu: 0.0.40
codegen_flags: <defaults>
</compile_context>

<pallas_src>
import math

import jax
import jax.numpy as jnp
from jax.experimental import pallas as pl
from jax.experimental.pallas import tpu as pltpu


# ----------------------------------------------------------------------------
# Host-side parameter packing (done once, outside the hot path)
# ----------------------------------------------------------------------------
def _block_diag(m, n):
    """(r, c) -> (n*r, n*c) block-diagonal with n copies of m on the diagonal."""
    r, c = m.shape
    eye = jnp.eye(n, dtype=m.dtype)
    return (eye[:, None, :, None] * m[None, :, None, :]).reshape(n * r, n * c)


def pack_params(params, b_tile):
    """Fuse / stack PyTorch-shaped params into kernel-ready arrays."""
    blocks = params["blocks"]
    L = blocks[0]["theta_wt"].shape[0]
    Fc = blocks[0]["basis_f"].shape[1]
    neg_pad = jnp.full((1, L - Fc), -1e30, jnp.float32)

    def one(blk):
        # 3 conv taps fused along the contraction axis: (4, H, 3H)
        cw = jnp.stack([
            jnp.concatenate([blk["conv_w"][i][k] for k in range(3)], axis=1)
            for i in range(4)
        ])
        # Compose theta FC with the basis (exact up to fp rounding):
        #   (h @ tw + tb) @ basis == h @ (tw @ basis) + tb @ basis
        w_back = blk["theta_wt"] @ blk["basis_b"]          # (L, L)
        b_back = blk["theta_b"] @ blk["basis_b"]           # (1, L)
        w_fore = blk["theta_wt"] @ blk["basis_f"]          # (L, Fc)
        b_fore = blk["theta_b"] @ blk["basis_f"]           # (1, Fc)
        w_fore = jnp.pad(w_fore, ((0, 0), (0, L - Fc)))    # (L, L), zero-padded
        b_fore = jnp.concatenate([b_fore, neg_pad], axis=1)  # (1, L), -inf padded
        return dict(
            cw=cw,                                          # (4, H, 3H)
            cb=blk["conv_b"],                               # (4, H, 1)
            w_back=_block_diag(w_back, b_tile),             # (TL, TL)
            b_back=jnp.tile(b_back, (1, b_tile)),           # (1, TL)
            w_fore=_block_diag(w_fore, b_tile),             # (TL, TL)
            b_fore=jnp.tile(b_fore, (1, b_tile)),           # (1, TL)
            mw=blk["map_wt"].T,                             # (Fc, H)
            mb=blk["map_b"].T,                              # (Fc, 1)
        )

    per = [one(b) for b in blocks]
    stk = lambda k: jnp.stack([p[k] for p in per])
    return dict(flatten_w=params["flatten_w"], flatten_b=params["flatten_b"],
                cw=stk("cw"), cb=stk("cb"),
                w_back=stk("w_back"), b_back=stk("b_back"),
                w_fore=stk("w_fore"), b_fore=stk("b_fore"),
                mw=stk("mw"), mb=stk("mb"))


def _const_spec(a):
    zeros = (0,) * a.ndim
    return pl.BlockSpec(a.shape, lambda i, z=zeros: z)


# ----------------------------------------------------------------------------
# Fused forward pass (single pallas_call)
# ----------------------------------------------------------------------------
def nbeats_forward(x, params, b_tile=8):
    """Full NBeatsNet forward: returns (backcast residual (B,H,L), forecast (B,F))."""
    B, C, L = x.shape
    H = params["flatten_w"].shape[1]
    blocks = params["blocks"]
    NB = len(blocks)
    Fc = blocks[0]["basis_f"].shape[1]

    b_tile = min(b_tile, B)
    assert B % b_tile == 0, "batch must be a multiple of the batch tile"
    TL = b_tile * L
    n_tiles = B // b_tile
    assert TL % 128 == 0 or n_tiles == 1, "pick b_tile so b_tile*L is lane aligned"
    assert Fc <= L and pl.next_power_of_2(Fc) <= L, "forecast pooling needs F <= L"

    pk = pack_params(params, b_tile)

    # (B, C, L) -> (C, B*L): fold batch into the lane axis (layout plumbing only).
    x2d = jnp.transpose(x, (1, 0, 2)).reshape(C, B * L)

    # Precomputed per-tile invariants (hoisted out of the kernel entirely).
    t_idx = jnp.tile(jnp.arange(L, dtype=jnp.int32), b_tile)[None, :]       # (1, TL)
    m_prev = (t_idx != 0).astype(jnp.float32)          # zero t==0 column of roll(+1)
    m_next = (t_idx != L - 1).astype(jnp.float32)      # zero t==L-1 column of roll(-1)
    sel = (jnp.arange(TL, dtype=jnp.int32)[:, None]
           == jnp.arange(b_tile, dtype=jnp.int32)[None, :] * L
           ).astype(jnp.float32)                       # (TL, b_tile) picks lane s*L

    def kernel(x_ref, mp_ref, mn_ref, sel_ref, fw_ref, fb_ref, cw_ref, cb_ref,
               wb_ref, bb_ref, wf_ref, bf_ref, mw_ref, mb_ref,
               back_ref, fore_ref):
        f32 = jnp.float32
        mp = mp_ref[...]            # (1, TL)
        mn = mn_ref[...]            # (1, TL)
        selm = sel_ref[...]         # (TL, b_tile)

        def shift_prev(a):          # a[:, t-1] within each sample (0 at t == 0)
            return pltpu.roll(a, 1, 1) * mp

        def shift_next(a):          # a[:, t+1] within each sample (0 at t == L-1)
            return pltpu.roll(a, TL - 1, 1) * mn

        # Flatten conv (no activation). Cin is tiny (4) -> keep 3 taps separate.
        xv = x_ref[...]
        h = (jnp.dot(fw_ref[0], shift_prev(xv), preferred_element_type=f32)
             + jnp.dot(fw_ref[1], xv, preferred_element_type=f32)
             + jnp.dot(fw_ref[2], shift_next(xv), preferred_element_type=f32)
             + fb_ref[...])

        backcast = h                                   # (H, TL), stays VMEM-resident
        fc = jnp.zeros((Fc, b_tile), f32)              # forecast accumulator
        for b in range(NB):                            # static unroll: NB == 6, tiny
            hb = backcast
            for i in range(4):                         # 4x (conv k=3 pad=1 + relu)
                hs = jnp.concatenate(
                    [shift_prev(hb), hb, shift_next(hb)], axis=0)         # (3H, TL)
                hb = jnp.maximum(
                    jnp.dot(cw_ref[b, i], hs, preferred_element_type=f32)
                    + cb_ref[b, i], 0.0)
            # theta FC composed with basis on the host -> one matmul each.
            back_pred = jnp.dot(hb, wb_ref[b], preferred_element_type=f32) + bb_ref[b]
            fore_pad = jnp.dot(hb, wf_ref[b], preferred_element_type=f32) + bf_ref[b]
            # Max-pool over the forecast axis: lane-wise tree reduce (XLU rolls);
            # padded lanes hold -1e30 so they never win the max.
            s = 1
            while s < Fc:
                fore_pad = jnp.maximum(fore_pad, pltpu.roll(fore_pad, TL - s, 1))
                s *= 2
            pooled = jnp.dot(fore_pad, selm, preferred_element_type=f32)   # (H, b_tile)
            fc = fc + jnp.dot(mw_ref[b], pooled, preferred_element_type=f32) + mb_ref[b]
            backcast = backcast - back_pred

        back_ref[...] = backcast
        fore_ref[0] = fc

    back2d, fore3d = pl.pallas_call(
        kernel,
        out_shape=(jax.ShapeDtypeStruct((H, B * L), jnp.float32),
                   jax.ShapeDtypeStruct((n_tiles, Fc, b_tile), jnp.float32)),
        grid=(n_tiles,),
        in_specs=[
            pl.BlockSpec((C, TL), lambda i: (0, i)),
            _const_spec(m_prev), _const_spec(m_next), _const_spec(sel),
            _const_spec(pk["flatten_w"]), _const_spec(pk["flatten_b"]),
            _const_spec(pk["cw"]), _const_spec(pk["cb"]),
            _const_spec(pk["w_back"]), _const_spec(pk["b_back"]),
            _const_spec(pk["w_fore"]), _const_spec(pk["b_fore"]),
            _const_spec(pk["mw"]), _const_spec(pk["mb"]),
        ],
        out_specs=(pl.BlockSpec((H, TL), lambda i: (0, i)),
                   pl.BlockSpec((1, Fc, b_tile), lambda i: (i, 0, 0))),
        compiler_params=pltpu.CompilerParams(dimension_semantics=("parallel",)),
    )(x2d, m_prev, m_next, sel,
      pk["flatten_w"], pk["flatten_b"], pk["cw"], pk["cb"],
      pk["w_back"], pk["b_back"], pk["w_fore"], pk["b_fore"],
      pk["mw"], pk["mb"])

    backcast = jnp.transpose(back2d.reshape(H, B, L), (1, 0, 2))   # (B, H, L)
    forecast = jnp.transpose(fore3d, (0, 2, 1)).reshape(B, Fc)      # (B, F)
    return backcast, forecast


# ----------------------------------------------------------------------------
# Parameter setup (deterministic, PyTorch-shaped) and basis functions
# ----------------------------------------------------------------------------
def _linspaces(L, Fc):
    # np.linspace(-L, Fc, L+Fc, endpoint=False) always has step 1.
    ls = jnp.arange(L + Fc, dtype=jnp.float32) - L
    return ls[:L] / (L + Fc), ls[L:] / (L + Fc)


def _trend_basis(p, t):
    return jnp.stack([t ** i for i in range(p)]).astype(jnp.float32)       # (p, len(t))


def _seasonality_basis(p, t):
    p1, p2 = p // 2, p - p // 2
    i1 = jnp.arange(p1, dtype=jnp.float32)[:, None]
    i2 = jnp.arange(p2, dtype=jnp.float32)[:, None]
    s1 = jnp.cos(2.0 * jnp.pi * i1 * t[None, :])
    s2 = jnp.sin(2.0 * jnp.pi * i2 * t[None, :])
    return jnp.concatenate([s1, s2], axis=0).astype(jnp.float32)           # (p, len(t))


def init_params(key, cfg):
    C, H = cfg["input_channels"], cfg["hidden_channels"]
    L, Fc = cfg["backcast_length"], cfg["forecast_length"]
    keys = iter(jax.random.split(key, 256))

    def uni(shape, fan_in):
        bound = 1.0 / math.sqrt(fan_in)
        return jax.random.uniform(next(keys), shape, jnp.float32, -bound, bound)

    b_ls, f_ls = _linspaces(L, Fc)
    params = {}
    # conv1d_flatten: torch weight (H, C, 3) -> stored as (3, H, C)
    params["flatten_w"] = jnp.transpose(uni((H, C, 3), C * 3), (2, 0, 1))
    params["flatten_b"] = uni((H, 1), C * 3)

    blocks = []
    for stack_type, td in zip(cfg["stack_types"], cfg["thetas_dims"]):
        if stack_type == "seasonality":
            p = Fc                                  # SeasonalityBlock overrides thetas_dim
            basis_b = _seasonality_basis(p, b_ls)
            basis_f = _seasonality_basis(p, f_ls)
        else:                                       # trend
            p = td
            assert p <= 4, "thetas_dim is too big."
            basis_b = _trend_basis(p, b_ls)
            basis_f = _trend_basis(p, f_ls)
        for _ in range(cfg["nb_blocks_per_stack"]):
            cw, cb = [], []
            for _ in range(4):
                cw.append(jnp.transpose(uni((H, H, 3), H * 3), (2, 0, 1)))  # (3, H, H)
                cb.append(uni((H, 1), H * 3))
            blk = {
                "conv_w": jnp.stack(cw),            # (4, 3, H, H)
                "conv_b": jnp.stack(cb),            # (4, H, 1)
                "theta_wt": jnp.transpose(uni((p, L), L)),   # (L, p)
                "theta_b": uni((1, p), L),
                "map_wt": jnp.transpose(uni((Fc, H), H)),    # (H, Fc)
                "map_b": uni((1, Fc), H),
                "basis_b": basis_b,                 # (p, L)
                "basis_f": basis_f,                 # (p, Fc)
            }
            blocks.append(blk)
    params["blocks"] = blocks
    return params


# ----------------------------------------------------------------------------
# Pure-JAX reference (for verification only)
# ----------------------------------------------------------------------------
def _conv1d_ref(x, w3, b):
    w = jnp.transpose(w3, (1, 2, 0))                 # (O, I, 3)
    y = jax.lax.conv_general_dilated(x, w, (1,), [(1, 1)],
                                     dimension_numbers=("NCH", "OIH", "NCH"))
    return y + b[None, :, :]


def nbeats_ref(x, params):
    backcast = _conv1d_ref(x, params["flatten_w"], params["flatten_b"])
    B = x.shape[0]
    Fc = params["blocks"][0]["basis_f"].shape[1]
    forecast = jnp.zeros((B, Fc), jnp.float32)
    for blk in params["blocks"]:
        h = backcast
        for i in range(4):
            h = jax.nn.relu(_conv1d_ref(h, blk["conv_w"][i], blk["conv_b"][i]))
        theta = h @ blk["theta_wt"] + blk["theta_b"][0]
        back_pred = theta @ blk["basis_b"]
        fore_seq = theta @ blk["basis_f"]
        pooled = jnp.max(fore_seq, axis=-1)
        fore = pooled @ blk["map_wt"] + blk["map_b"][0]
        backcast = backcast - back_pred
        forecast = forecast + fore
    return backcast, forecast


# ----------------------------------------------------------------------------
if __name__ == "__main__":
    cfg = dict(
        input_channels=4,
        stack_types=("trend", "seasonality"),
        nb_blocks_per_stack=3,
        forecast_length=8,
        backcast_length=16,
        thetas_dims=(4, 8),
        hidden_channels=32,
    )
    key = jax.random.PRNGKey(0)
    k_param, k_x = jax.random.split(key)
    params = init_params(k_param, cfg)

    # 2 batch tiles of 8 samples: b_tile*L = 128 (lane-dense) and an even tile
    # count so the "parallel" grid axis can shard across both v7x TensorCores.
    B = 16
    x = jax.random.normal(
        k_x, (B, cfg["input_channels"], cfg["backcast_length"]), jnp.float32)

    fwd = jax.jit(lambda xx, pp: nbeats_forward(xx, pp, b_tile=8))
    back, fore = fwd(x, params)
    back = jax.block_until_ready(back)
    fore = jax.block_until_ready(fore)

    back_ref, fore_ref = nbeats_ref(x, params)
    assert back.shape == (B, cfg["hidden_channels"], cfg["backcast_length"])
    assert fore.shape == (B, cfg["forecast_length"])
    assert jnp.allclose(back, back_ref, atol=1e-3, rtol=1e-3)
    assert jnp.allclose(fore, fore_ref, atol=1e-3, rtol=1e-3)

    print("KERNEL_OK")
</pallas_src>

<mosaic_0001>
module attributes {stable_mosaic.version = 11 : i64} {
  func.func @kernel(%arg0: i32, %arg1: memref<4x128xf32, #tpu.memory_space<vmem>>, %arg2: memref<1x128xf32, #tpu.memory_space<vmem>>, %arg3: memref<1x128xf32, #tpu.memory_space<vmem>>, %arg4: memref<128x8xf32, #tpu.memory_space<vmem>>, %arg5: memref<3x32x4xf32, #tpu.memory_space<vmem>>, %arg6: memref<32x1xf32, #tpu.memory_space<vmem>>, %arg7: memref<6x4x32x96xf32, #tpu.memory_space<vmem>>, %arg8: memref<6x4x32x1xf32, #tpu.memory_space<vmem>>, %arg9: memref<6x128x128xf32, #tpu.memory_space<vmem>>, %arg10: memref<6x1x128xf32, #tpu.memory_space<vmem>>, %arg11: memref<6x128x128xf32, #tpu.memory_space<vmem>>, %arg12: memref<6x1x128xf32, #tpu.memory_space<vmem>>, %arg13: memref<6x8x32xf32, #tpu.memory_space<vmem>>, %arg14: memref<6x8x1xf32, #tpu.memory_space<vmem>>, %arg15: memref<32x128xf32, #tpu.memory_space<vmem>>, %arg16: memref<1x8x8xf32, #tpu.memory_space<vmem>>) attributes {dimension_semantics = [#tpu.dimension_semantics<parallel>], iteration_bounds = array<i64: 2>, scalar_prefetch = 0 : i64, scratch_operands = 0 : i64, tpu.core_type = #tpu.core_type<tc>, window_params = [{transform_indices = @transform_0, window_bounds = array<i64: 4, 128>}, {pipeline_mode = #tpu.pipeline_mode<synchronous>, transform_indices = @transform_1, window_bounds = array<i64: 1, 128>}, {pipeline_mode = #tpu.pipeline_mode<synchronous>, transform_indices = @transform_2, window_bounds = array<i64: 1, 128>}, {pipeline_mode = #tpu.pipeline_mode<synchronous>, transform_indices = @transform_3, window_bounds = array<i64: 128, 8>}, {pipeline_mode = #tpu.pipeline_mode<synchronous>, transform_indices = @transform_4, window_bounds = array<i64: 3, 32, 4>}, {pipeline_mode = #tpu.pipeline_mode<synchronous>, transform_indices = @transform_5, window_bounds = array<i64: 32, 1>}, {pipeline_mode = #tpu.pipeline_mode<synchronous>, transform_indices = @transform_6, window_bounds = array<i64: 6, 4, 32, 96>}, {pipeline_mode = #tpu.pipeline_mode<synchronous>, transform_indices = @transform_7, window_bounds = array<i64: 6, 4, 32, 1>}, {pipeline_mode = #tpu.pipeline_mode<synchronous>, transform_indices = @transform_8, window_bounds = array<i64: 6, 128, 128>}, {pipeline_mode = #tpu.pipeline_mode<synchronous>, transform_indices = @transform_9, window_bounds = array<i64: 6, 1, 128>}, {pipeline_mode = #tpu.pipeline_mode<synchronous>, transform_indices = @transform_10, window_bounds = array<i64: 6, 128, 128>}, {pipeline_mode = #tpu.pipeline_mode<synchronous>, transform_indices = @transform_11, window_bounds = array<i64: 6, 1, 128>}, {pipeline_mode = #tpu.pipeline_mode<synchronous>, transform_indices = @transform_12, window_bounds = array<i64: 6, 8, 32>}, {pipeline_mode = #tpu.pipeline_mode<synchronous>, transform_indices = @transform_13, window_bounds = array<i64: 6, 8, 1>}, {transform_indices = @transform_14, window_bounds = array<i64: 32, 128>}, {transform_indices = @transform_15, window_bounds = array<i64: 1, 8, 8>}]} {
    %c0 = arith.constant 0 : index
    %c0_0 = arith.constant 0 : index
    %0 = vector.load %arg2[%c0, %c0_0] : memref<1x128xf32, #tpu.memory_space<vmem>>, vector<1x128xf32>
    %c0_1 = arith.constant 0 : index
    %c0_2 = arith.constant 0 : index
    %1 = vector.load %arg3[%c0_1, %c0_2] : memref<1x128xf32, #tpu.memory_space<vmem>>, vector<1x128xf32>
    %c0_3 = arith.constant 0 : index
    %c0_4 = arith.constant 0 : index
    %2 = vector.load %arg4[%c0_3, %c0_4] : memref<128x8xf32, #tpu.memory_space<vmem>>, vector<128x8xf32>
    %c0_5 = arith.constant 0 : index
    %c0_6 = arith.constant 0 : index
    %3 = vector.load %arg1[%c0_5, %c0_6] : memref<4x128xf32, #tpu.memory_space<vmem>>, vector<4x128xf32>
    %c0_7 = arith.constant 0 : index
    %c0_8 = arith.constant 0 : index
    %c0_9 = arith.constant 0 : index
    %4 = vector.load %arg5[%c0_7, %c0_8, %c0_9] : memref<3x32x4xf32, #tpu.memory_space<vmem>>, vector<1x32x4xf32>
    %5 = vector.shape_cast %4 : vector<1x32x4xf32> to vector<32x4xf32>
    %c1_i32 = arith.constant 1 : i32
    %6 = tpu.dynamic_rotate %3 by %c1_i32 dim 1 : vector<4x128xf32>, i32 -> vector<4x128xf32>
    %7 = vector.broadcast %0 : vector<1x128xf32> to vector<4x128xf32>
    %8 = arith.mulf %6, %7 : vector<4x128xf32>
    %cst = arith.constant dense<0.000000e+00> : vector<32x128xf32>
    %9 = tpu.matmul %5, %8, %cst {dimension_numbers = #tpu.dot_dimension_numbers<[1], [0], [0], [1], [0, 0, 1, 1], [], []>} : vector<32x4xf32>, vector<4x128xf32>, vector<32x128xf32> -> vector<32x128xf32>
    %c1 = arith.constant 1 : index
    %c0_10 = arith.constant 0 : index
    %c0_11 = arith.constant 0 : index
    %10 = vector.load %arg5[%c1, %c0_10, %c0_11] : memref<3x32x4xf32, #tpu.memory_space<vmem>>, vector<1x32x4xf32>
    %11 = vector.shape_cast %10 : vector<1x32x4xf32> to vector<32x4xf32>
    %cst_12 = arith.constant dense<0.000000e+00> : vector<32x128xf32>
    %12 = tpu.matmul %11, %3, %cst_12 {dimension_numbers = #tpu.dot_dimension_numbers<[1], [0], [0], [1], [0, 0, 1, 1], [], []>} : vector<32x4xf32>, vector<4x128xf32>, vector<32x128xf32> -> vector<32x128xf32>
    %13 = arith.addf %9, %12 : vector<32x128xf32>
    %c2 = arith.constant 2 : index
    %c0_13 = arith.constant 0 : index
    %c0_14 = arith.constant 0 : index
    %14 = vector.load %arg5[%c2, %c0_13, %c0_14] : memref<3x32x4xf32, #tpu.memory_space<vmem>>, vector<1x32x4xf32>
    %15 = vector.shape_cast %14 : vector<1x32x4xf32> to vector<32x4xf32>
    %c127_i32 = arith.constant 127 : i32
    %16 = tpu.dynamic_rotate %3 by %c127_i32 dim 1 : vector<4x128xf32>, i32 -> vector<4x128xf32>
    %17 = vector.broadcast %1 : vector<1x128xf32> to vector<4x128xf32>
    %18 = arith.mulf %16, %17 : vector<4x128xf32>
    %cst_15 = arith.constant dense<0.000000e+00> : vector<32x128xf32>
    %19 = tpu.matmul %15, %18, %cst_15 {dimension_numbers = #tpu.dot_dimension_numbers<[1], [0], [0], [1], [0, 0, 1, 1], [], []>} : vector<32x4xf32>, vector<4x128xf32>, vector<32x128xf32> -> vector<32x128xf32>
    %20 = arith.addf %13, %19 : vector<32x128xf32>
    %c0_16 = arith.constant 0 : index
    %c0_17 = arith.constant 0 : index
    %21 = vector.load %arg6[%c0_16, %c0_17] : memref<32x1xf32, #tpu.memory_space<vmem>>, vector<32x1xf32>
    %22 = vector.broadcast %21 : vector<32x1xf32> to vector<32x128xf32>
    %23 = arith.addf %20, %22 : vector<32x128xf32>
    %cst_18 = arith.constant 0.000000e+00 : f32
    %24 = vector.broadcast %cst_18 : f32 to vector<8x8xf32>
    %c1_i32_19 = arith.constant 1 : i32
    %25 = tpu.dynamic_rotate %23 by %c1_i32_19 dim 1 : vector<32x128xf32>, i32 -> vector<32x128xf32>
    %26 = vector.broadcast %0 : vector<1x128xf32> to vector<32x128xf32>
    %27 = arith.mulf %25, %26 : vector<32x128xf32>
    %c127_i32_20 = arith.constant 127 : i32
    %28 = tpu.dynamic_rotate %23 by %c127_i32_20 dim 1 : vector<32x128xf32>, i32 -> vector<32x128xf32>
    %29 = vector.broadcast %1 : vector<1x128xf32> to vector<32x128xf32>
    %30 = arith.mulf %28, %29 : vector<32x128xf32>
    %31 = tpu.concatenate %27, %23, %30 in 0 : vector<32x128xf32>, vector<32x128xf32>, vector<32x128xf32> -> vector<96x128xf32>
    %c0_21 = arith.constant 0 : index
    %c0_22 = arith.constant 0 : index
    %c0_23 = arith.constant 0 : index
    %c0_24 = arith.constant 0 : index
    %32 = vector.load %arg7[%c0_21, %c0_22, %c0_23, %c0_24] : memref<6x4x32x96xf32, #tpu.memory_space<vmem>>, vector<1x1x32x96xf32>
    %33 = vector.shape_cast %32 : vector<1x1x32x96xf32> to vector<32x96xf32>
    %cst_25 = arith.constant dense<0.000000e+00> : vector<32x128xf32>
    %34 = tpu.matmul %33, %31, %cst_25 {dimension_numbers = #tpu.dot_dimension_numbers<[1], [0], [0], [1], [0, 0, 1, 1], [], []>} : vector<32x96xf32>, vector<96x128xf32>, vector<32x128xf32> -> vector<32x128xf32>
    %c0_26 = arith.constant 0 : index
    %c0_27 = arith.constant 0 : index
    %c0_28 = arith.constant 0 : index
    %c0_29 = arith.constant 0 : index
    %35 = vector.load %arg8[%c0_26, %c0_27, %c0_28, %c0_29] : memref<6x4x32x1xf32, #tpu.memory_space<vmem>>, vector<1x1x32x1xf32>
    %36 = vector.shape_cast %35 : vector<1x1x32x1xf32> to vector<32x1xf32>
    %37 = vector.broadcast %36 : vector<32x1xf32> to vector<32x128xf32>
    %38 = arith.addf %34, %37 : vector<32x128xf32>
    %cst_30 = arith.constant 0.000000e+00 : f32
    %39 = vector.broadcast %cst_30 : f32 to vector<32x128xf32>
    %40 = arith.maximumf %38, %39 : vector<32x128xf32>
    %c1_i32_31 = arith.constant 1 : i32
    %41 = tpu.dynamic_rotate %40 by %c1_i32_31 dim 1 : vector<32x128xf32>, i32 -> vector<32x128xf32>
    %42 = vector.broadcast %0 : vector<1x128xf32> to vector<32x128xf32>
    %43 = arith.mulf %41, %42 : vector<32x128xf32>
    %c127_i32_32 = arith.constant 127 : i32
    %44 = tpu.dynamic_rotate %40 by %c127_i32_32 dim 1 : vector<32x128xf32>, i32 -> vector<32x128xf32>
    %45 = vector.broadcast %1 : vector<1x128xf32> to vector<32x128xf32>
    %46 = arith.mulf %44, %45 : vector<32x128xf32>
    %47 = tpu.concatenate %43, %40, %46 in 0 : vector<32x128xf32>, vector<32x128xf32>, vector<32x128xf32> -> vector<96x128xf32>
    %c0_33 = arith.constant 0 : index
    %c1_34 = arith.constant 1 : index
    %c0_35 = arith.constant 0 : index
    %c0_36 = arith.constant 0 : index
    %48 = vector.load %arg7[%c0_33, %c1_34, %c0_35, %c0_36] : memref<6x4x32x96xf32, #tpu.memory_space<vmem>>, vector<1x1x32x96xf32>
    %49 = vector.shape_cast %48 : vector<1x1x32x96xf32> to vector<32x96xf32>
    %cst_37 = arith.constant dense<0.000000e+00> : vector<32x128xf32>
    %50 = tpu.matmul %49, %47, %cst_37 {dimension_numbers = #tpu.dot_dimension_numbers<[1], [0], [0], [1], [0, 0, 1, 1], [], []>} : vector<32x96xf32>, vector<96x128xf32>, vector<32x128xf32> -> vector<32x128xf32>
    %c0_38 = arith.constant 0 : index
    %c1_39 = arith.constant 1 : index
    %c0_40 = arith.constant 0 : index
    %c0_41 = arith.constant 0 : index
    %51 = vector.load %arg8[%c0_38, %c1_39, %c0_40, %c0_41] : memref<6x4x32x1xf32, #tpu.memory_space<vmem>>, vector<1x1x32x1xf32>
    %52 = vector.shape_cast %51 : vector<1x1x32x1xf32> to vector<32x1xf32>
    %53 = vector.broadcast %52 : vector<32x1xf32> to vector<32x128xf32>
    %54 = arith.addf %50, %53 : vector<32x128xf32>
    %cst_42 = arith.constant 0.000000e+00 : f32
    %55 = vector.broadcast %cst_42 : f32 to vector<32x128xf32>
    %56 = arith.maximumf %54, %55 : vector<32x128xf32>
    %c1_i32_43 = arith.constant 1 : i32
    %57 = tpu.dynamic_rotate %56 by %c1_i32_43 dim 1 : vector<32x128xf32>, i32 -> vector<32x128xf32>
    %58 = vector.broadcast %0 : vector<1x128xf32> to vector<32x128xf32>
    %59 = arith.mulf %57, %58 : vector<32x128xf32>
    %c127_i32_44 = arith.constant 127 : i32
    %60 = tpu.dynamic_rotate %56 by %c127_i32_44 dim 1 : vector<32x128xf32>, i32 -> vector<32x128xf32>
    %61 = vector.broadcast %1 : vector<1x128xf32> to vector<32x128xf32>
    %62 = arith.mulf %60, %61 : vector<32x128xf32>
    %63 = tpu.concatenate %59, %56, %62 in 0 : vector<32x128xf32>, vector<32x128xf32>, vector<32x128xf32> -> vector<96x128xf32>
    %c0_45 = arith.constant 0 : index
    %c2_46 = arith.constant 2 : index
    %c0_47 = arith.constant 0 : index
    %c0_48 = arith.constant 0 : index
    %64 = vector.load %arg7[%c0_45, %c2_46, %c0_47, %c0_48] : memref<6x4x32x96xf32, #tpu.memory_space<vmem>>, vector<1x1x32x96xf32>
    %65 = vector.shape_cast %64 : vector<1x1x32x96xf32> to vector<32x96xf32>
    %cst_49 = arith.constant dense<0.000000e+00> : vector<32x128xf32>
    %66 = tpu.matmul %65, %63, %cst_49 {dimension_numbers = #tpu.dot_dimension_numbers<[1], [0], [0], [1], [0, 0, 1, 1], [], []>} : vector<32x96xf32>, vector<96x128xf32>, vector<32x128xf32> -> vector<32x128xf32>
    %c0_50 = arith.constant 0 : index
    %c2_51 = arith.constant 2 : index
    %c0_52 = arith.constant 0 : index
    %c0_53 = arith.constant 0 : index
    %67 = vector.load %arg8[%c0_50, %c2_51, %c0_52, %c0_53] : memref<6x4x32x1xf32, #tpu.memory_space<vmem>>, vector<1x1x32x1xf32>
    %68 = vector.shape_cast %67 : vector<1x1x32x1xf32> to vector<32x1xf32>
    %69 = vector.broadcast %68 : vector<32x1xf32> to vector<32x128xf32>
    %70 = arith.addf %66, %69 : vector<32x128xf32>
    %cst_54 = arith.constant 0.000000e+00 : f32
    %71 = vector.broadcast %cst_54 : f32 to vector<32x128xf32>
    %72 = arith.maximumf %70, %71 : vector<32x128xf32>
    %c1_i32_55 = arith.constant 1 : i32
    %73 = tpu.dynamic_rotate %72 by %c1_i32_55 dim 1 : vector<32x128xf32>, i32 -> vector<32x128xf32>
    %74 = vector.broadcast %0 : vector<1x128xf32> to vector<32x128xf32>
    %75 = arith.mulf %73, %74 : vector<32x128xf32>
    %c127_i32_56 = arith.constant 127 : i32
    %76 = tpu.dynamic_rotate %72 by %c127_i32_56 dim 1 : vector<32x128xf32>, i32 -> vector<32x128xf32>
    %77 = vector.broadcast %1 : vector<1x128xf32> to vector<32x128xf32>
    %78 = arith.mulf %76, %77 : vector<32x128xf32>
    %79 = tpu.concatenate %75, %72, %78 in 0 : vector<32x128xf32>, vector<32x128xf32>, vector<32x128xf32> -> vector<96x128xf32>
    %c0_57 = arith.constant 0 : index
    %c3 = arith.constant 3 : index
    %c0_58 = arith.constant 0 : index
    %c0_59 = arith.constant 0 : index
    %80 = vector.load %arg7[%c0_57, %c3, %c0_58, %c0_59] : memref<6x4x32x96xf32, #tpu.memory_space<vmem>>, vector<1x1x32x96xf32>
    %81 = vector.shape_cast %80 : vector<1x1x32x96xf32> to vector<32x96xf32>
    %cst_60 = arith.constant dense<0.000000e+00> : vector<32x128xf32>
    %82 = tpu.matmul %81, %79, %cst_60 {dimension_numbers = #tpu.dot_dimension_numbers<[1], [0], [0], [1], [0, 0, 1, 1], [], []>} : vector<32x96xf32>, vector<96x128xf32>, vector<32x128xf32> -> vector<32x128xf32>
    %c0_61 = arith.constant 0 : index
    %c3_62 = arith.constant 3 : index
    %c0_63 = arith.constant 0 : index
    %c0_64 = arith.constant 0 : index
    %83 = vector.load %arg8[%c0_61, %c3_62, %c0_63, %c0_64] : memref<6x4x32x1xf32, #tpu.memory_space<vmem>>, vector<1x1x32x1xf32>
    %84 = vector.shape_cast %83 : vector<1x1x32x1xf32> to vector<32x1xf32>
    %85 = vector.broadcast %84 : vector<32x1xf32> to vector<32x128xf32>
    %86 = arith.addf %82, %85 : vector<32x128xf32>
    %cst_65 = arith.constant 0.000000e+00 : f32
    %87 = vector.broadcast %cst_65 : f32 to vector<32x128xf32>
    %88 = arith.maximumf %86, %87 : vector<32x128xf32>
    %c0_66 = arith.constant 0 : index
    %c0_67 = arith.constant 0 : index
    %c0_68 = arith.constant 0 : index
    %89 = vector.load %arg9[%c0_66, %c0_67, %c0_68] : memref<6x128x128xf32, #tpu.memory_space<vmem>>, vector<1x128x128xf32>
    %90 = vector.shape_cast %89 : vector<1x128x128xf32> to vector<128x128xf32>
    %cst_69 = arith.constant dense<0.000000e+00> : vector<32x128xf32>
    %91 = tpu.matmul %88, %90, %cst_69 {dimension_numbers = #tpu.dot_dimension_numbers<[1], [0], [0], [1], [0, 0, 1, 1], [], []>} : vector<32x128xf32>, vector<128x128xf32>, vector<32x128xf32> -> vector<32x128xf32>
    %c0_70 = arith.constant 0 : index
    %c0_71 = arith.constant 0 : index
    %c0_72 = arith.constant 0 : index
    %92 = vector.load %arg10[%c0_70, %c0_71, %c0_72] : memref<6x1x128xf32, #tpu.memory_space<vmem>>, vector<1x1x128xf32>
    %93 = vector.shape_cast %92 : vector<1x1x128xf32> to vector<1x128xf32>
    %94 = vector.broadcast %93 : vector<1x128xf32> to vector<32x128xf32>
    %95 = arith.addf %91, %94 : vector<32x128xf32>
    %c0_73 = arith.constant 0 : index
    %c0_74 = arith.constant 0 : index
    %c0_75 = arith.constant 0 : index
    %96 = vector.load %arg11[%c0_73, %c0_74, %c0_75] : memref<6x128x128xf32, #tpu.memory_space<vmem>>, vector<1x128x128xf32>
    %97 = vector.shape_cast %96 : vector<1x128x128xf32> to vector<128x128xf32>
    %cst_76 = arith.constant dense<0.000000e+00> : vector<32x128xf32>
    %98 = tpu.matmul %88, %97, %cst_76 {dimension_numbers = #tpu.dot_dimension_numbers<[1], [0], [0], [1], [0, 0, 1, 1], [], []>} : vector<32x128xf32>, vector<128x128xf32>, vector<32x128xf32> -> vector<32x128xf32>
    %c0_77 = arith.constant 0 : index
    %c0_78 = arith.constant 0 : index
    %c0_79 = arith.constant 0 : index
    %99 = vector.load %arg12[%c0_77, %c0_78, %c0_79] : memref<6x1x128xf32, #tpu.memory_space<vmem>>, vector<1x1x128xf32>
    %100 = vector.shape_cast %99 : vector<1x1x128xf32> to vector<1x128xf32>
    %101 = vector.broadcast %100 : vector<1x128xf32> to vector<32x128xf32>
    %102 = arith.addf %98, %101 : vector<32x128xf32>
    %c127_i32_80 = arith.constant 127 : i32
    %103 = tpu.dynamic_rotate %102 by %c127_i32_80 dim 1 : vector<32x128xf32>, i32 -> vector<32x128xf32>
    %104 = arith.maximumf %102, %103 : vector<32x128xf32>
    %c126_i32 = arith.constant 126 : i32
    %105 = tpu.dynamic_rotate %104 by %c126_i32 dim 1 : vector<32x128xf32>, i32 -> vector<32x128xf32>
    %106 = arith.maximumf %104, %105 : vector<32x128xf32>
    %c124_i32 = arith.constant 124 : i32
    %107 = tpu.dynamic_rotate %106 by %c124_i32 dim 1 : vector<32x128xf32>, i32 -> vector<32x128xf32>
    %108 = arith.maximumf %106, %107 : vector<32x128xf32>
    %cst_81 = arith.constant dense<0.000000e+00> : vector<32x8xf32>
    %109 = tpu.matmul %108, %2, %cst_81 {dimension_numbers = #tpu.dot_dimension_numbers<[1], [0], [0], [1], [0, 0, 1, 1], [], []>} : vector<32x128xf32>, vector<128x8xf32>, vector<32x8xf32> -> vector<32x8xf32>
    %c0_82 = arith.constant 0 : index
    %c0_83 = arith.constant 0 : index
    %c0_84 = arith.constant 0 : index
    %110 = vector.load %arg13[%c0_82, %c0_83, %c0_84] : memref<6x8x32xf32, #tpu.memory_space<vmem>>, vector<1x8x32xf32>
    %111 = vector.shape_cast %110 : vector<1x8x32xf32> to vector<8x32xf32>
    %cst_85 = arith.constant dense<0.000000e+00> : vector<8x8xf32>
    %112 = tpu.matmul %111, %109, %cst_85 {dimension_numbers = #tpu.dot_dimension_numbers<[1], [0], [0], [1], [0, 0, 1, 1], [], []>} : vector<8x32xf32>, vector<32x8xf32>, vector<8x8xf32> -> vector<8x8xf32>
    %113 = arith.addf %24, %112 : vector<8x8xf32>
    %c0_86 = arith.constant 0 : index
    %c0_87 = arith.constant 0 : index
    %c0_88 = arith.constant 0 : index
    %114 = vector.load %arg14[%c0_86, %c0_87, %c0_88] : memref<6x8x1xf32, #tpu.memory_space<vmem>>, vector<1x8x1xf32>
    %115 = vector.shape_cast %114 : vector<1x8x1xf32> to vector<8x1xf32>
    %116 = vector.broadcast %115 : vector<8x1xf32> to vector<8x8xf32>
    %117 = arith.addf %113, %116 : vector<8x8xf32>
    %118 = arith.subf %23, %95 : vector<32x128xf32>
    %c1_i32_89 = arith.constant 1 : i32
    %119 = tpu.dynamic_rotate %118 by %c1_i32_89 dim 1 : vector<32x128xf32>, i32 -> vector<32x128xf32>
    %120 = vector.broadcast %0 : vector<1x128xf32> to vector<32x128xf32>
    %121 = arith.mulf %119, %120 : vector<32x128xf32>
    %c127_i32_90 = arith.constant 127 : i32
    %122 = tpu.dynamic_rotate %118 by %c127_i32_90 dim 1 : vector<32x128xf32>, i32 -> vector<32x128xf32>
    %123 = vector.broadcast %1 : vector<1x128xf32> to vector<32x128xf32>
    %124 = arith.mulf %122, %123 : vector<32x128xf32>
    %125 = tpu.concatenate %121, %118, %124 in 0 : vector<32x128xf32>, vector<32x128xf32>, vector<32x128xf32> -> vector<96x128xf32>
    %c1_91 = arith.constant 1 : index
    %c0_92 = arith.constant 0 : index
    %c0_93 = arith.constant 0 : index
    %c0_94 = arith.constant 0 : index
    %126 = vector.load %arg7[%c1_91, %c0_92, %c0_93, %c0_94] : memref<6x4x32x96xf32, #tpu.memory_space<vmem>>, vector<1x1x32x96xf32>
    %127 = vector.shape_cast %126 : vector<1x1x32x96xf32> to vector<32x96xf32>
    %cst_95 = arith.constant dense<0.000000e+00> : vector<32x128xf32>
    %128 = tpu.matmul %127, %125, %cst_95 {dimension_numbers = #tpu.dot_dimension_numbers<[1], [0], [0], [1], [0, 0, 1, 1], [], []>} : vector<32x96xf32>, vector<96x128xf32>, vector<32x128xf32> -> vector<32x128xf32>
    %c1_96 = arith.constant 1 : index
    %c0_97 = arith.constant 0 : index
    %c0_98 = arith.constant 0 : index
    %c0_99 = arith.constant 0 : index
    %129 = vector.load %arg8[%c1_96, %c0_97, %c0_98, %c0_99] : memref<6x4x32x1xf32, #tpu.memory_space<vmem>>, vector<1x1x32x1xf32>
    %130 = vector.shape_cast %129 : vector<1x1x32x1xf32> to vector<32x1xf32>
    %131 = vector.broadcast %130 : vector<32x1xf32> to vector<32x128xf32>
    %132 = arith.addf %128, %131 : vector<32x128xf32>
    %cst_100 = arith.constant 0.000000e+00 : f32
    %133 = vector.broadcast %cst_100 : f32 to vector<32x128xf32>
    %134 = arith.maximumf %132, %133 : vector<32x128xf32>
    %c1_i32_101 = arith.constant 1 : i32
    %135 = tpu.dynamic_rotate %134 by %c1_i32_101 dim 1 : vector<32x128xf32>, i32 -> vector<32x128xf32>
    %136 = vector.broadcast %0 : vector<1x128xf32> to vector<32x128xf32>
    %137 = arith.mulf %135, %136 : vector<32x128xf32>
    %c127_i32_102 = arith.constant 127 : i32
    %138 = tpu.dynamic_rotate %134 by %c127_i32_102 dim 1 : vector<32x128xf32>, i32 -> vector<32x128xf32>
    %139 = vector.broadcast %1 : vector<1x128xf32> to vector<32x128xf32>
    %140 = arith.mulf %138, %139 : vector<32x128xf32>
    %141 = tpu.concatenate %137, %134, %140 in 0 : vector<32x128xf32>, vector<32x128xf32>, vector<32x128xf32> -> vector<96x128xf32>
    %c1_103 = arith.constant 1 : index
    %c1_104 = arith.constant 1 : index
    %c0_105 = arith.constant 0 : index
    %c0_106 = arith.constant 0 : index
    %142 = vector.load %arg7[%c1_103, %c1_104, %c0_105, %c0_106] : memref<6x4x32x96xf32, #tpu.memory_space<vmem>>, vector<1x1x32x96xf32>
    %143 = vector.shape_cast %142 : vector<1x1x32x96xf32> to vector<32x96xf32>
    %cst_107 = arith.constant dense<0.000000e+00> : vector<32x128xf32>
    %144 = tpu.matmul %143, %141, %cst_107 {dimension_numbers = #tpu.dot_dimension_numbers<[1], [0], [0], [1], [0, 0, 1, 1], [], []>} : vector<32x96xf32>, vector<96x128xf32>, vector<32x128xf32> -> vector<32x128xf32>
    %c1_108 = arith.constant 1 : index
    %c1_109 = arith.constant 1 : index
    %c0_110 = arith.constant 0 : index
    %c0_111 = arith.constant 0 : index
    %145 = vector.load %arg8[%c1_108, %c1_109, %c0_110, %c0_111] : memref<6x4x32x1xf32, #tpu.memory_space<vmem>>, vector<1x1x32x1xf32>
    %146 = vector.shape_cast %145 : vector<1x1x32x1xf32> to vector<32x1xf32>
    %147 = vector.broadcast %146 : vector<32x1xf32> to vector<32x128xf32>
    %148 = arith.addf %144, %147 : vector<32x128xf32>
    %cst_112 = arith.constant 0.000000e+00 : f32
    %149 = vector.broadcast %cst_112 : f32 to vector<32x128xf32>
    %150 = arith.maximumf %148, %149 : vector<32x128xf32>
    %c1_i32_113 = arith.constant 1 : i32
    %151 = tpu.dynamic_rotate %150 by %c1_i32_113 dim 1 : vector<32x128xf32>, i32 -> vector<32x128xf32>
    %152 = vector.broadcast %0 : vector<1x128xf32> to vector<32x128xf32>
    %153 = arith.mulf %151, %152 : vector<32x128xf32>
    %c127_i32_114 = arith.constant 127 : i32
    %154 = tpu.dynamic_rotate %150 by %c127_i32_114 dim 1 : vector<32x128xf32>, i32 -> vector<32x128xf32>
    %155 = vector.broadcast %1 : vector<1x128xf32> to vector<32x128xf32>
    %156 = arith.mulf %154, %155 : vector<32x128xf32>
    %157 = tpu.concatenate %153, %150, %156 in 0 : vector<32x128xf32>, vector<32x128xf32>, vector<32x128xf32> -> vector<96x128xf32>
    %c1_115 = arith.constant 1 : index
    %c2_116 = arith.constant 2 : index
    %c0_117 = arith.constant 0 : index
    %c0_118 = arith.constant 0 : index
    %158 = vector.load %arg7[%c1_115, %c2_116, %c0_117, %c0_118] : memref<6x4x32x96xf32, #tpu.memory_space<vmem>>, vector<1x1x32x96xf32>
    %159 = vector.shape_cast %158 : vector<1x1x32x96xf32> to vector<32x96xf32>
    %cst_119 = arith.constant dense<0.000000e+00> : vector<32x128xf32>
    %160 = tpu.matmul %159, %157, %cst_119 {dimension_numbers = #tpu.dot_dimension_numbers<[1], [0], [0], [1], [0, 0, 1, 1], [], []>} : vector<32x96xf32>, vector<96x128xf32>, vector<32x128xf32> -> vector<32x128xf32>
    %c1_120 = arith.constant 1 : index
    %c2_121 = arith.constant 2 : index
    %c0_122 = arith.constant 0 : index
    %c0_123 = arith.constant 0 : index
    %161 = vector.load %arg8[%c1_120, %c2_121, %c0_122, %c0_123] : memref<6x4x32x1xf32, #tpu.memory_space<vmem>>, vector<1x1x32x1xf32>
    %162 = vector.shape_cast %161 : vector<1x1x32x1xf32> to vector<32x1xf32>
    %163 = vector.broadcast %162 : vector<32x1xf32> to vector<32x128xf32>
    %164 = arith.addf %160, %163 : vector<32x128xf32>
    %cst_124 = arith.constant 0.000000e+00 : f32
    %165 = vector.broadcast %cst_124 : f32 to vector<32x128xf32>
    %166 = arith.maximumf %164, %165 : vector<32x128xf32>
    %c1_i32_125 = arith.constant 1 : i32
    %167 = tpu.dynamic_rotate %166 by %c1_i32_125 dim 1 : vector<32x128xf32>, i32 -> vector<32x128xf32>
    %168 = vector.broadcast %0 : vector<1x128xf32> to vector<32x128xf32>
    %169 = arith.mulf %167, %168 : vector<32x128xf32>
    %c127_i32_126 = arith.constant 127 : i32
    %170 = tpu.dynamic_rotate %166 by %c127_i32_126 dim 1 : vector<32x128xf32>, i32 -> vector<32x128xf32>
    %171 = vector.broadcast %1 : vector<1x128xf32> to vector<32x128xf32>
    %172 = arith.mulf %170, %171 : vector<32x128xf32>
    %173 = tpu.concatenate %169, %166, %172 in 0 : vector<32x128xf32>, vector<32x128xf32>, vector<32x128xf32> -> vector<96x128xf32>
    %c1_127 = arith.constant 1 : index
    %c3_128 = arith.constant 3 : index
    %c0_129 = arith.constant 0 : index
    %c0_130 = arith.constant 0 : index
    %174 = vector.load %arg7[%c1_127, %c3_128, %c0_129, %c0_130] : memref<6x4x32x96xf32, #tpu.memory_space<vmem>>, vector<1x1x32x96xf32>
    %175 = vector.shape_cast %174 : vector<1x1x32x96xf32> to vector<32x96xf32>
    %cst_131 = arith.constant dense<0.000000e+00> : vector<32x128xf32>
    %176 = tpu.matmul %175, %173, %cst_131 {dimension_numbers = #tpu.dot_dimension_numbers<[1], [0], [0], [1], [0, 0, 1, 1], [], []>} : vector<32x96xf32>, vector<96x128xf32>, vector<32x128xf32> -> vector<32x128xf32>
    %c1_132 = arith.constant 1 : index
    %c3_133 = arith.constant 3 : index
    %c0_134 = arith.constant 0 : index
    %c0_135 = arith.constant 0 : index
    %177 = vector.load %arg8[%c1_132, %c3_133, %c0_134, %c0_135] : memref<6x4x32x1xf32, #tpu.memory_space<vmem>>, vector<1x1x32x1xf32>
    %178 = vector.shape_cast %177 : vector<1x1x32x1xf32> to vector<32x1xf32>
    %179 = vector.broadcast %178 : vector<32x1xf32> to vector<32x128xf32>
    %180 = arith.addf %176, %179 : vector<32x128xf32>
    %cst_136 = arith.constant 0.000000e+00 : f32
    %181 = vector.broadcast %cst_136 : f32 to vector<32x128xf32>
    %182 = arith.maximumf %180, %181 : vector<32x128xf32>
    %c1_137 = arith.constant 1 : index
    %c0_138 = arith.constant 0 : index
    %c0_139 = arith.constant 0 : index
    %183 = vector.load %arg9[%c1_137, %c0_138, %c0_139] : memref<6x128x128xf32, #tpu.memory_space<vmem>>, vector<1x128x128xf32>
    %184 = vector.shape_cast %183 : vector<1x128x128xf32> to vector<128x128xf32>
    %cst_140 = arith.constant dense<0.000000e+00> : vector<32x128xf32>
    %185 = tpu.matmul %182, %184, %cst_140 {dimension_numbers = #tpu.dot_dimension_numbers<[1], [0], [0], [1], [0, 0, 1, 1], [], []>} : vector<32x128xf32>, vector<128x128xf32>, vector<32x128xf32> -> vector<32x128xf32>
    %c1_141 = arith.constant 1 : index
    %c0_142 = arith.constant 0 : index
    %c0_143 = arith.constant 0 : index
    %186 = vector.load %arg10[%c1_141, %c0_142, %c0_143] : memref<6x1x128xf32, #tpu.memory_space<vmem>>, vector<1x1x128xf32>
    %187 = vector.shape_cast %186 : vector<1x1x128xf32> to vector<1x128xf32>
    %188 = vector.broadcast %187 : vector<1x128xf32> to vector<32x128xf32>
    %189 = arith.addf %185, %188 : vector<32x128xf32>
    %c1_144 = arith.constant 1 : index
    %c0_145 = arith.constant 0 : index
    %c0_146 = arith.constant 0 : index
    %190 = vector.load %arg11[%c1_144, %c0_145, %c0_146] : memref<6x128x128xf32, #tpu.memory_space<vmem>>, vector<1x128x128xf32>
    %191 = vector.shape_cast %190 : vector<1x128x128xf32> to vector<128x128xf32>
    %cst_147 = arith.constant dense<0.000000e+00> : vector<32x128xf32>
    %192 = tpu.matmul %182, %191, %cst_147 {dimension_numbers = #tpu.dot_dimension_numbers<[1], [0], [0], [1], [0, 0, 1, 1], [], []>} : vector<32x128xf32>, vector<128x128xf32>, vector<32x128xf32> -> vector<32x128xf32>
    %c1_148 = arith.constant 1 : index
    %c0_149 = arith.constant 0 : index
    %c0_150 = arith.constant 0 : index
    %193 = vector.load %arg12[%c1_148, %c0_149, %c0_150] : memref<6x1x128xf32, #tpu.memory_space<vmem>>, vector<1x1x128xf32>
    %194 = vector.shape_cast %193 : vector<1x1x128xf32> to vector<1x128xf32>
    %195 = vector.broadcast %194 : vector<1x128xf32> to vector<32x128xf32>
    %196 = arith.addf %192, %195 : vector<32x128xf32>
    %c127_i32_151 = arith.constant 127 : i32
    %197 = tpu.dynamic_rotate %196 by %c127_i32_151 dim 1 : vector<32x128xf32>, i32 -> vector<32x128xf32>
    %198 = arith.maximumf %196, %197 : vector<32x128xf32>
    %c126_i32_152 = arith.constant 126 : i32
    %199 = tpu.dynamic_rotate %198 by %c126_i32_152 dim 1 : vector<32x128xf32>, i32 -> vector<32x128xf32>
    %200 = arith.maximumf %198, %199 : vector<32x128xf32>
    %c124_i32_153 = arith.constant 124 : i32
    %201 = tpu.dynamic_rotate %200 by %c124_i32_153 dim 1 : vector<32x128xf32>, i32 -> vector<32x128xf32>
    %202 = arith.maximumf %200, %201 : vector<32x128xf32>
    %cst_154 = arith.constant dense<0.000000e+00> : vector<32x8xf32>
    %203 = tpu.matmul %202, %2, %cst_154 {dimension_numbers = #tpu.dot_dimension_numbers<[1], [0], [0], [1], [0, 0, 1, 1], [], []>} : vector<32x128xf32>, vector<128x8xf32>, vector<32x8xf32> -> vector<32x8xf32>
    %c1_155 = arith.constant 1 : index
    %c0_156 = arith.constant 0 : index
    %c0_157 = arith.constant 0 : index
    %204 = vector.load %arg13[%c1_155, %c0_156, %c0_157] : memref<6x8x32xf32, #tpu.memory_space<vmem>>, vector<1x8x32xf32>
    %205 = vector.shape_cast %204 : vector<1x8x32xf32> to vector<8x32xf32>
    %cst_158 = arith.constant dense<0.000000e+00> : vector<8x8xf32>
    %206 = tpu.matmul %205, %203, %cst_158 {dimension_numbers = #tpu.dot_dimension_numbers<[1], [0], [0], [1], [0, 0, 1, 1], [], []>} : vector<8x32xf32>, vector<32x8xf32>, vector<8x8xf32> -> vector<8x8xf32>
    %207 = arith.addf %117, %206 : vector<8x8xf32>
    %c1_159 = arith.constant 1 : index
    %c0_160 = arith.constant 0 : index
    %c0_161 = arith.constant 0 : index
    %208 = vector.load %arg14[%c1_159, %c0_160, %c0_161] : memref<6x8x1xf32, #tpu.memory_space<vmem>>, vector<1x8x1xf32>
    %209 = vector.shape_cast %208 : vector<1x8x1xf32> to vector<8x1xf32>
    %210 = vector.broadcast %209 : vector<8x1xf32> to vector<8x8xf32>
    %211 = arith.addf %207, %210 : vector<8x8xf32>
    %212 = arith.subf %118, %189 : vector<32x128xf32>
    %c1_i32_162 = arith.constant 1 : i32
    %213 = tpu.dynamic_rotate %212 by %c1_i32_162 dim 1 : vector<32x128xf32>, i32 -> vector<32x128xf32>
    %214 = vector.broadcast %0 : vector<1x128xf32> to vector<32x128xf32>
    %215 = arith.mulf %213, %214 : vector<32x128xf32>
    %c127_i32_163 = arith.constant 127 : i32
    %216 = tpu.dynamic_rotate %212 by %c127_i32_163 dim 1 : vector<32x128xf32>, i32 -> vector<32x128xf32>
    %217 = vector.broadcast %1 : vector<1x128xf32> to vector<32x128xf32>
    %218 = arith.mulf %216, %217 : vector<32x128xf32>
    %219 = tpu.concatenate %215, %212, %218 in 0 : vector<32x128xf32>, vector<32x128xf32>, vector<32x128xf32> -> vector<96x128xf32>
    %c2_164 = arith.constant 2 : index
    %c0_165 = arith.constant 0 : index
    %c0_166 = arith.constant 0 : index
    %c0_167 = arith.constant 0 : index
    %220 = vector.load %arg7[%c2_164, %c0_165, %c0_166, %c0_167] : memref<6x4x32x96xf32, #tpu.memory_space<vmem>>, vector<1x1x32x96xf32>
    %221 = vector.shape_cast %220 : vector<1x1x32x96xf32> to vector<32x96xf32>
    %cst_168 = arith.constant dense<0.000000e+00> : vector<32x128xf32>
    %222 = tpu.matmul %221, %219, %cst_168 {dimension_numbers = #tpu.dot_dimension_numbers<[1], [0], [0], [1], [0, 0, 1, 1], [], []>} : vector<32x96xf32>, vector<96x128xf32>, vector<32x128xf32> -> vector<32x128xf32>
    %c2_169 = arith.constant 2 : index
    %c0_170 = arith.constant 0 : index
    %c0_171 = arith.constant 0 : index
    %c0_172 = arith.constant 0 : index
    %223 = vector.load %arg8[%c2_169, %c0_170, %c0_171, %c0_172] : memref<6x4x32x1xf32, #tpu.memory_space<vmem>>, vector<1x1x32x1xf32>
    %224 = vector.shape_cast %223 : vector<1x1x32x1xf32> to vector<32x1xf32>
    %225 = vector.broadcast %224 : vector<32x1xf32> to vector<32x128xf32>
    %226 = arith.addf %222, %225 : vector<32x128xf32>
    %cst_173 = arith.constant 0.000000e+00 : f32
    %227 = vector.broadcast %cst_173 : f32 to vector<32x128xf32>
    %228 = arith.maximumf %226, %227 : vector<32x128xf32>
    %c1_i32_174 = arith.constant 1 : i32
    %229 = tpu.dynamic_rotate %228 by %c1_i32_174 dim 1 : vector<32x128xf32>, i32 -> vector<32x128xf32>
    %230 = vector.broadcast %0 : vector<1x128xf32> to vector<32x128xf32>
    %231 = arith.mulf %229, %230 : vector<32x128xf32>
    %c127_i32_175 = arith.constant 127 : i32
    %232 = tpu.dynamic_rotate %228 by %c127_i32_175 dim 1 : vector<32x128xf32>, i32 -> vector<32x128xf32>
    %233 = vector.broadcast %1 : vector<1x128xf32> to vector<32x128xf32>
    %234 = arith.mulf %232, %233 : vector<32x128xf32>
    %235 = tpu.concatenate %231, %228, %234 in 0 : vector<32x128xf32>, vector<32x128xf32>, vector<32x128xf32> -> vector<96x128xf32>
    %c2_176 = arith.constant 2 : index
    %c1_177 = arith.constant 1 : index
    %c0_178 = arith.constant 0 : index
    %c0_179 = arith.constant 0 : index
    %236 = vector.load %arg7[%c2_176, %c1_177, %c0_178, %c0_179] : memref<6x4x32x96xf32, #tpu.memory_space<vmem>>, vector<1x1x32x96xf32>
    %237 = vector.shape_cast %236 : vector<1x1x32x96xf32> to vector<32x96xf32>
    %cst_180 = arith.constant dense<0.000000e+00> : vector<32x128xf32>
    %238 = tpu.matmul %237, %235, %cst_180 {dimension_numbers = #tpu.dot_dimension_numbers<[1], [0], [0], [1], [0, 0, 1, 1], [], []>} : vector<32x96xf32>, vector<96x128xf32>, vector<32x128xf32> -> vector<32x128xf32>
    %c2_181 = arith.constant 2 : index
    %c1_182 = arith.constant 1 : index
    %c0_183 = arith.constant 0 : index
    %c0_184 = arith.constant 0 : index
    %239 = vector.load %arg8[%c2_181, %c1_182, %c0_183, %c0_184] : memref<6x4x32x1xf32, #tpu.memory_space<vmem>>, vector<1x1x32x1xf32>
    %240 = vector.shape_cast %239 : vector<1x1x32x1xf32> to vector<32x1xf32>
    %241 = vector.broadcast %240 : vector<32x1xf32> to vector<32x128xf32>
    %242 = arith.addf %238, %241 : vector<32x128xf32>
    %cst_185 = arith.constant 0.000000e+00 : f32
    %243 = vector.broadcast %cst_185 : f32 to vector<32x128xf32>
    %244 = arith.maximumf %242, %243 : vector<32x128xf32>
    %c1_i32_186 = arith.constant 1 : i32
    %245 = tpu.dynamic_rotate %244 by %c1_i32_186 dim 1 : vector<32x128xf32>, i32 -> vector<32x128xf32>
    %246 = vector.broadcast %0 : vector<1x128xf32> to vector<32x128xf32>
    %247 = arith.mulf %245, %246 : vector<32x128xf32>
    %c127_i32_187 = arith.constant 127 : i32
    %248 = tpu.dynamic_rotate %244 by %c127_i32_187 dim 1 : vector<32x128xf32>, i32 -> vector<32x128xf32>
    %249 = vector.broadcast %1 : vector<1x128xf32> to vector<32x128xf32>
    %250 = arith.mulf %248, %249 : vector<32x128xf32>
    %251 = tpu.concatenate %247, %244, %250 in 0 : vector<32x128xf32>, vector<32x128xf32>, vector<32x128xf32> -> vector<96x128xf32>
    %c2_188 = arith.constant 2 : index
    %c2_189 = arith.constant 2 : index
    %c0_190 = arith.constant 0 : index
    %c0_191 = arith.constant 0 : index
    %252 = vector.load %arg7[%c2_188, %c2_189, %c0_190, %c0_191] : memref<6x4x32x96xf32, #tpu.memory_space<vmem>>, vector<1x1x32x96xf32>
    %253 = vector.shape_cast %252 : vector<1x1x32x96xf32> to vector<32x96xf32>
    %cst_192 = arith.constant dense<0.000000e+00> : vector<32x128xf32>
    %254 = tpu.matmul %253, %251, %cst_192 {dimension_numbers = #tpu.dot_dimension_numbers<[1], [0], [0], [1], [0, 0, 1, 1], [], []>} : vector<32x96xf32>, vector<96x128xf32>, vector<32x128xf32> -> vector<32x128xf32>
    %c2_193 = arith.constant 2 : index
    %c2_194 = arith.constant 2 : index
    %c0_195 = arith.constant 0 : index
    %c0_196 = arith.constant 0 : index
    %255 = vector.load %arg8[%c2_193, %c2_194, %c0_195, %c0_196] : memref<6x4x32x1xf32, #tpu.memory_space<vmem>>, vector<1x1x32x1xf32>
    %256 = vector.shape_cast %255 : vector<1x1x32x1xf32> to vector<32x1xf32>
    %257 = vector.broadcast %256 : vector<32x1xf32> to vector<32x128xf32>
    %258 = arith.addf %254, %257 : vector<32x128xf32>
    %cst_197 = arith.constant 0.000000e+00 : f32
    %259 = vector.broadcast %cst_197 : f32 to vector<32x128xf32>
    %260 = arith.maximumf %258, %259 : vector<32x128xf32>
    %c1_i32_198 = arith.constant 1 : i32
    %261 = tpu.dynamic_rotate %260 by %c1_i32_198 dim 1 : vector<32x128xf32>, i32 -> vector<32x128xf32>
    %262 = vector.broadcast %0 : vector<1x128xf32> to vector<32x128xf32>
    %263 = arith.mulf %261, %262 : vector<32x128xf32>
    %c127_i32_199 = arith.constant 127 : i32
    %264 = tpu.dynamic_rotate %260 by %c127_i32_199 dim 1 : vector<32x128xf32>, i32 -> vector<32x128xf32>
    %265 = vector.broadcast %1 : vector<1x128xf32> to vector<32x128xf32>
    %266 = arith.mulf %264, %265 : vector<32x128xf32>
    %267 = tpu.concatenate %263, %260, %266 in 0 : vector<32x128xf32>, vector<32x128xf32>, vector<32x128xf32> -> vector<96x128xf32>
    %c2_200 = arith.constant 2 : index
    %c3_201 = arith.constant 3 : index
    %c0_202 = arith.constant 0 : index
    %c0_203 = arith.constant 0 : index
    %268 = vector.load %arg7[%c2_200, %c3_201, %c0_202, %c0_203] : memref<6x4x32x96xf32, #tpu.memory_space<vmem>>, vector<1x1x32x96xf32>
    %269 = vector.shape_cast %268 : vector<1x1x32x96xf32> to vector<32x96xf32>
    %cst_204 = arith.constant dense<0.000000e+00> : vector<32x128xf32>
    %270 = tpu.matmul %269, %267, %cst_204 {dimension_numbers = #tpu.dot_dimension_numbers<[1], [0], [0], [1], [0, 0, 1, 1], [], []>} : vector<32x96xf32>, vector<96x128xf32>, vector<32x128xf32> -> vector<32x128xf32>
    %c2_205 = arith.constant 2 : index
    %c3_206 = arith.constant 3 : index
    %c0_207 = arith.constant 0 : index
    %c0_208 = arith.constant 0 : index
    %271 = vector.load %arg8[%c2_205, %c3_206, %c0_207, %c0_208] : memref<6x4x32x1xf32, #tpu.memory_space<vmem>>, vector<1x1x32x1xf32>
    %272 = vector.shape_cast %271 : vector<1x1x32x1xf32> to vector<32x1xf32>
    %273 = vector.broadcast %272 : vector<32x1xf32> to vector<32x128xf32>
    %274 = arith.addf %270, %273 : vector<32x128xf32>
    %cst_209 = arith.constant 0.000000e+00 : f32
    %275 = vector.broadcast %cst_209 : f32 to vector<32x128xf32>
    %276 = arith.maximumf %274, %275 : vector<32x128xf32>
    %c2_210 = arith.constant 2 : index
    %c0_211 = arith.constant 0 : index
    %c0_212 = arith.constant 0 : index
    %277 = vector.load %arg9[%c2_210, %c0_211, %c0_212] : memref<6x128x128xf32, #tpu.memory_space<vmem>>, vector<1x128x128xf32>
    %278 = vector.shape_cast %277 : vector<1x128x128xf32> to vector<128x128xf32>
    %cst_213 = arith.constant dense<0.000000e+00> : vector<32x128xf32>
    %279 = tpu.matmul %276, %278, %cst_213 {dimension_numbers = #tpu.dot_dimension_numbers<[1], [0], [0], [1], [0, 0, 1, 1], [], []>} : vector<32x128xf32>, vector<128x128xf32>, vector<32x128xf32> -> vector<32x128xf32>
    %c2_214 = arith.constant 2 : index
    %c0_215 = arith.constant 0 : index
    %c0_216 = arith.constant 0 : index
    %280 = vector.load %arg10[%c2_214, %c0_215, %c0_216] : memref<6x1x128xf32, #tpu.memory_space<vmem>>, vector<1x1x128xf32>
    %281 = vector.shape_cast %280 : vector<1x1x128xf32> to vector<1x128xf32>
    %282 = vector.broadcast %281 : vector<1x128xf32> to vector<32x128xf32>
    %283 = arith.addf %279, %282 : vector<32x128xf32>
    %c2_217 = arith.constant 2 : index
    %c0_218 = arith.constant 0 : index
    %c0_219 = arith.constant 0 : index
    %284 = vector.load %arg11[%c2_217, %c0_218, %c0_219] : memref<6x128x128xf32, #tpu.memory_space<vmem>>, vector<1x128x128xf32>
    %285 = vector.shape_cast %284 : vector<1x128x128xf32> to vector<128x128xf32>
    %cst_220 = arith.constant dense<0.000000e+00> : vector<32x128xf32>
    %286 = tpu.matmul %276, %285, %cst_220 {dimension_numbers = #tpu.dot_dimension_numbers<[1], [0], [0], [1], [0, 0, 1, 1], [], []>} : vector<32x128xf32>, vector<128x128xf32>, vector<32x128xf32> -> vector<32x128xf32>
    %c2_221 = arith.constant 2 : index
    %c0_222 = arith.constant 0 : index
    %c0_223 = arith.constant 0 : index
    %287 = vector.load %arg12[%c2_221, %c0_222, %c0_223] : memref<6x1x128xf32, #tpu.memory_space<vmem>>, vector<1x1x128xf32>
    %288 = vector.shape_cast %287 : vector<1x1x128xf32> to vector<1x128xf32>
    %289 = vector.broadcast %288 : vector<1x128xf32> to vector<32x128xf32>
    %290 = arith.addf %286, %289 : vector<32x128xf32>
    %c127_i32_224 = arith.constant 127 : i32
    %291 = tpu.dynamic_rotate %290 by %c127_i32_224 dim 1 : vector<32x128xf32>, i32 -> vector<32x128xf32>
    %292 = arith.maximumf %290, %291 : vector<32x128xf32>
    %c126_i32_225 = arith.constant 126 : i32
    %293 = tpu.dynamic_rotate %292 by %c126_i32_225 dim 1 : vector<32x128xf32>, i32 -> vector<32x128xf32>
    %294 = arith.maximumf %292, %293 : vector<32x128xf32>
    %c124_i32_226 = arith.constant 124 : i32
    %295 = tpu.dynamic_rotate %294 by %c124_i32_226 dim 1 : vector<32x128xf32>, i32 -> vector<32x128xf32>
    %296 = arith.maximumf %294, %295 : vector<32x128xf32>
    %cst_227 = arith.constant dense<0.000000e+00> : vector<32x8xf32>
    %297 = tpu.matmul %296, %2, %cst_227 {dimension_numbers = #tpu.dot_dimension_numbers<[1], [0], [0], [1], [0, 0, 1, 1], [], []>} : vector<32x128xf32>, vector<128x8xf32>, vector<32x8xf32> -> vector<32x8xf32>
    %c2_228 = arith.constant 2 : index
    %c0_229 = arith.constant 0 : index
    %c0_230 = arith.constant 0 : index
    %298 = vector.load %arg13[%c2_228, %c0_229, %c0_230] : memref<6x8x32xf32, #tpu.memory_space<vmem>>, vector<1x8x32xf32>
    %299 = vector.shape_cast %298 : vector<1x8x32xf32> to vector<8x32xf32>
    %cst_231 = arith.constant dense<0.000000e+00> : vector<8x8xf32>
    %300 = tpu.matmul %299, %297, %cst_231 {dimension_numbers = #tpu.dot_dimension_numbers<[1], [0], [0], [1], [0, 0, 1, 1], [], []>} : vector<8x32xf32>, vector<32x8xf32>, vector<8x8xf32> -> vector<8x8xf32>
    %301 = arith.addf %211, %300 : vector<8x8xf32>
    %c2_232 = arith.constant 2 : index
    %c0_233 = arith.constant 0 : index
    %c0_234 = arith.constant 0 : index
    %302 = vector.load %arg14[%c2_232, %c0_233, %c0_234] : memref<6x8x1xf32, #tpu.memory_space<vmem>>, vector<1x8x1xf32>
    %303 = vector.shape_cast %302 : vector<1x8x1xf32> to vector<8x1xf32>
    %304 = vector.broadcast %303 : vector<8x1xf32> to vector<8x8xf32>
    %305 = arith.addf %301, %304 : vector<8x8xf32>
    %306 = arith.subf %212, %283 : vector<32x128xf32>
    %c1_i32_235 = arith.constant 1 : i32
    %307 = tpu.dynamic_rotate %306 by %c1_i32_235 dim 1 : vector<32x128xf32>, i32 -> vector<32x128xf32>
    %308 = vector.broadcast %0 : vector<1x128xf32> to vector<32x128xf32>
    %309 = arith.mulf %307, %308 : vector<32x128xf32>
    %c127_i32_236 = arith.constant 127 : i32
    %310 = tpu.dynamic_rotate %306 by %c127_i32_236 dim 1 : vector<32x128xf32>, i32 -> vector<32x128xf32>
    %311 = vector.broadcast %1 : vector<1x128xf32> to vector<32x128xf32>
    %312 = arith.mulf %310, %311 : vector<32x128xf32>
    %313 = tpu.concatenate %309, %306, %312 in 0 : vector<32x128xf32>, vector<32x128xf32>, vector<32x128xf32> -> vector<96x128xf32>
    %c3_237 = arith.constant 3 : index
    %c0_238 = arith.constant 0 : index
    %c0_239 = arith.constant 0 : index
    %c0_240 = arith.constant 0 : index
    %314 = vector.load %arg7[%c3_237, %c0_238, %c0_239, %c0_240] : memref<6x4x32x96xf32, #tpu.memory_space<vmem>>, vector<1x1x32x96xf32>
    %315 = vector.shape_cast %314 : vector<1x1x32x96xf32> to vector<32x96xf32>
    %cst_241 = arith.constant dense<0.000000e+00> : vector<32x128xf32>
    %316 = tpu.matmul %315, %313, %cst_241 {dimension_numbers = #tpu.dot_dimension_numbers<[1], [0], [0], [1], [0, 0, 1, 1], [], []>} : vector<32x96xf32>, vector<96x128xf32>, vector<32x128xf32> -> vector<32x128xf32>
    %c3_242 = arith.constant 3 : index
    %c0_243 = arith.constant 0 : index
    %c0_244 = arith.constant 0 : index
    %c0_245 = arith.constant 0 : index
    %317 = vector.load %arg8[%c3_242, %c0_243, %c0_244, %c0_245] : memref<6x4x32x1xf32, #tpu.memory_space<vmem>>, vector<1x1x32x1xf32>
    %318 = vector.shape_cast %317 : vector<1x1x32x1xf32> to vector<32x1xf32>
    %319 = vector.broadcast %318 : vector<32x1xf32> to vector<32x128xf32>
    %320 = arith.addf %316, %319 : vector<32x128xf32>
    %cst_246 = arith.constant 0.000000e+00 : f32
    %321 = vector.broadcast %cst_246 : f32 to vector<32x128xf32>
    %322 = arith.maximumf %320, %321 : vector<32x128xf32>
    %c1_i32_247 = arith.constant 1 : i32
    %323 = tpu.dynamic_rotate %322 by %c1_i32_247 dim 1 : vector<32x128xf32>, i32 -> vector<32x128xf32>
    %324 = vector.broadcast %0 : vector<1x128xf32> to vector<32x128xf32>
    %325 = arith.mulf %323, %324 : vector<32x128xf32>
    %c127_i32_248 = arith.constant 127 : i32
    %326 = tpu.dynamic_rotate %322 by %c127_i32_248 dim 1 : vector<32x128xf32>, i32 -> vector<32x128xf32>
    %327 = vector.broadcast %1 : vector<1x128xf32> to vector<32x128xf32>
    %328 = arith.mulf %326, %327 : vector<32x128xf32>
    %329 = tpu.concatenate %325, %322, %328 in 0 : vector<32x128xf32>, vector<32x128xf32>, vector<32x128xf32> -> vector<96x128xf32>
    %c3_249 = arith.constant 3 : index
    %c1_250 = arith.constant 1 : index
    %c0_251 = arith.constant 0 : index
    %c0_252 = arith.constant 0 : index
    %330 = vector.load %arg7[%c3_249, %c1_250, %c0_251, %c0_252] : memref<6x4x32x96xf32, #tpu.memory_space<vmem>>, vector<1x1x32x96xf32>
    %331 = vector.shape_cast %330 : vector<1x1x32x96xf32> to vector<32x96xf32>
    %cst_253 = arith.constant dense<0.000000e+00> : vector<32x128xf32>
    %332 = tpu.matmul %331, %329, %cst_253 {dimension_numbers = #tpu.dot_dimension_numbers<[1], [0], [0], [1], [0, 0, 1, 1], [], []>} : vector<32x96xf32>, vector<96x128xf32>, vector<32x128xf32> -> vector<32x128xf32>
    %c3_254 = arith.constant 3 : index
    %c1_255 = arith.constant 1 : index
    %c0_256 = arith.constant 0 : index
    %c0_257 = arith.constant 0 : index
    %333 = vector.load %arg8[%c3_254, %c1_255, %c0_256, %c0_257] : memref<6x4x32x1xf32, #tpu.memory_space<vmem>>, vector<1x1x32x1xf32>
    %334 = vector.shape_cast %333 : vector<1x1x32x1xf32> to vector<32x1xf32>
    %335 = vector.broadcast %334 : vector<32x1xf32> to vector<32x128xf32>
    %336 = arith.addf %332, %335 : vector<32x128xf32>
    %cst_258 = arith.constant 0.000000e+00 : f32
    %337 = vector.broadcast %cst_258 : f32 to vector<32x128xf32>
    %338 = arith.maximumf %336, %337 : vector<32x128xf32>
    %c1_i32_259 = arith.constant 1 : i32
    %339 = tpu.dynamic_rotate %338 by %c1_i32_259 dim 1 : vector<32x128xf32>, i32 -> vector<32x128xf32>
    %340 = vector.broadcast %0 : vector<1x128xf32> to vector<32x128xf32>
    %341 = arith.mulf %339, %340 : vector<32x128xf32>
    %c127_i32_260 = arith.constant 127 : i32
    %342 = tpu.dynamic_rotate %338 by %c127_i32_260 dim 1 : vector<32x128xf32>, i32 -> vector<32x128xf32>
    %343 = vector.broadcast %1 : vector<1x128xf32> to vector<32x128xf32>
    %344 = arith.mulf %342, %343 : vector<32x128xf32>
    %345 = tpu.concatenate %341, %338, %344 in 0 : vector<32x128xf32>, vector<32x128xf32>, vector<32x128xf32> -> vector<96x128xf32>
    %c3_261 = arith.constant 3 : index
    %c2_262 = arith.constant 2 : index
    %c0_263 = arith.constant 0 : index
    %c0_264 = arith.constant 0 : index
    %346 = vector.load %arg7[%c3_261, %c2_262, %c0_263, %c0_264] : memref<6x4x32x96xf32, #tpu.memory_space<vmem>>, vector<1x1x32x96xf32>
    %347 = vector.shape_cast %346 : vector<1x1x32x96xf32> to vector<32x96xf32>
    %cst_265 = arith.constant dense<0.000000e+00> : vector<32x128xf32>
    %348 = tpu.matmul %347, %345, %cst_265 {dimension_numbers = #tpu.dot_dimension_numbers<[1], [0], [0], [1], [0, 0, 1, 1], [], []>} : vector<32x96xf32>, vector<96x128xf32>, vector<32x128xf32> -> vector<32x128xf32>
    %c3_266 = arith.constant 3 : index
    %c2_267 = arith.constant 2 : index
    %c0_268 = arith.constant 0 : index
    %c0_269 = arith.constant 0 : index
    %349 = vector.load %arg8[%c3_266, %c2_267, %c0_268, %c0_269] : memref<6x4x32x1xf32, #tpu.memory_space<vmem>>, vector<1x1x32x1xf32>
    %350 = vector.shape_cast %349 : vector<1x1x32x1xf32> to vector<32x1xf32>
    %351 = vector.broadcast %350 : vector<32x1xf32> to vector<32x128xf32>
    %352 = arith.addf %348, %351 : vector<32x128xf32>
    %cst_270 = arith.constant 0.000000e+00 : f32
    %353 = vector.broadcast %cst_270 : f32 to vector<32x128xf32>
    %354 = arith.maximumf %352, %353 : vector<32x128xf32>
    %c1_i32_271 = arith.constant 1 : i32
    %355 = tpu.dynamic_rotate %354 by %c1_i32_271 dim 1 : vector<32x128xf32>, i32 -> vector<32x128xf32>
    %356 = vector.broadcast %0 : vector<1x128xf32> to vector<32x128xf32>
    %357 = arith.mulf %355, %356 : vector<32x128xf32>
    %c127_i32_272 = arith.constant 127 : i32
    %358 = tpu.dynamic_rotate %354 by %c127_i32_272 dim 1 : vector<32x128xf32>, i32 -> vector<32x128xf32>
    %359 = vector.broadcast %1 : vector<1x128xf32> to vector<32x128xf32>
    %360 = arith.mulf %358, %359 : vector<32x128xf32>
    %361 = tpu.concatenate %357, %354, %360 in 0 : vector<32x128xf32>, vector<32x128xf32>, vector<32x128xf32> -> vector<96x128xf32>
    %c3_273 = arith.constant 3 : index
    %c3_274 = arith.constant 3 : index
    %c0_275 = arith.constant 0 : index
    %c0_276 = arith.constant 0 : index
    %362 = vector.load %arg7[%c3_273, %c3_274, %c0_275, %c0_276] : memref<6x4x32x96xf32, #tpu.memory_space<vmem>>, vector<1x1x32x96xf32>
    %363 = vector.shape_cast %362 : vector<1x1x32x96xf32> to vector<32x96xf32>
    %cst_277 = arith.constant dense<0.000000e+00> : vector<32x128xf32>
    %364 = tpu.matmul %363, %361, %cst_277 {dimension_numbers = #tpu.dot_dimension_numbers<[1], [0], [0], [1], [0, 0, 1, 1], [], []>} : vector<32x96xf32>, vector<96x128xf32>, vector<32x128xf32> -> vector<32x128xf32>
    %c3_278 = arith.constant 3 : index
    %c3_279 = arith.constant 3 : index
    %c0_280 = arith.constant 0 : index
    %c0_281 = arith.constant 0 : index
    %365 = vector.load %arg8[%c3_278, %c3_279, %c0_280, %c0_281] : memref<6x4x32x1xf32, #tpu.memory_space<vmem>>, vector<1x1x32x1xf32>
    %366 = vector.shape_cast %365 : vector<1x1x32x1xf32> to vector<32x1xf32>
    %367 = vector.broadcast %366 : vector<32x1xf32> to vector<32x128xf32>
    %368 = arith.addf %364, %367 : vector<32x128xf32>
    %cst_282 = arith.constant 0.000000e+00 : f32
    %369 = vector.broadcast %cst_282 : f32 to vector<32x128xf32>
    %370 = arith.maximumf %368, %369 : vector<32x128xf32>
    %c3_283 = arith.constant 3 : index
    %c0_284 = arith.constant 0 : index
    %c0_285 = arith.constant 0 : index
    %371 = vector.load %arg9[%c3_283, %c0_284, %c0_285] : memref<6x128x128xf32, #tpu.memory_space<vmem>>, vector<1x128x128xf32>
    %372 = vector.shape_cast %371 : vector<1x128x128xf32> to vector<128x128xf32>
    %cst_286 = arith.constant dense<0.000000e+00> : vector<32x128xf32>
    %373 = tpu.matmul %370, %372, %cst_286 {dimension_numbers = #tpu.dot_dimension_numbers<[1], [0], [0], [1], [0, 0, 1, 1], [], []>} : vector<32x128xf32>, vector<128x128xf32>, vector<32x128xf32> -> vector<32x128xf32>
    %c3_287 = arith.constant 3 : index
    %c0_288 = arith.constant 0 : index
    %c0_289 = arith.constant 0 : index
    %374 = vector.load %arg10[%c3_287, %c0_288, %c0_289] : memref<6x1x128xf32, #tpu.memory_space<vmem>>, vector<1x1x128xf32>
    %375 = vector.shape_cast %374 : vector<1x1x128xf32> to vector<1x128xf32>
    %376 = vector.broadcast %375 : vector<1x128xf32> to vector<32x128xf32>
    %377 = arith.addf %373, %376 : vector<32x128xf32>
    %c3_290 = arith.constant 3 : index
    %c0_291 = arith.constant 0 : index
    %c0_292 = arith.constant 0 : index
    %378 = vector.load %arg11[%c3_290, %c0_291, %c0_292] : memref<6x128x128xf32, #tpu.memory_space<vmem>>, vector<1x128x128xf32>
    %379 = vector.shape_cast %378 : vector<1x128x128xf32> to vector<128x128xf32>
    %cst_293 = arith.constant dense<0.000000e+00> : vector<32x128xf32>
    %380 = tpu.matmul %370, %379, %cst_293 {dimension_numbers = #tpu.dot_dimension_numbers<[1], [0], [0], [1], [0, 0, 1, 1], [], []>} : vector<32x128xf32>, vector<128x128xf32>, vector<32x128xf32> -> vector<32x128xf32>
    %c3_294 = arith.constant 3 : index
    %c0_295 = arith.constant 0 : index
    %c0_296 = arith.constant 0 : index
    %381 = vector.load %arg12[%c3_294, %c0_295, %c0_296] : memref<6x1x128xf32, #tpu.memory_space<vmem>>, vector<1x1x128xf32>
    %382 = vector.shape_cast %381 : vector<1x1x128xf32> to vector<1x128xf32>
    %383 = vector.broadcast %382 : vector<1x128xf32> to vector<32x128xf32>
    %384 = arith.addf %380, %383 : vector<32x128xf32>
    %c127_i32_297 = arith.constant 127 : i32
    %385 = tpu.dynamic_rotate %384 by %c127_i32_297 dim 1 : vector<32x128xf32>, i32 -> vector<32x128xf32>
    %386 = arith.maximumf %384, %385 : vector<32x128xf32>
    %c126_i32_298 = arith.constant 126 : i32
    %387 = tpu.dynamic_rotate %386 by %c126_i32_298 dim 1 : vector<32x128xf32>, i32 -> vector<32x128xf32>
    %388 = arith.maximumf %386, %387 : vector<32x128xf32>
    %c124_i32_299 = arith.constant 124 : i32
    %389 = tpu.dynamic_rotate %388 by %c124_i32_299 dim 1 : vector<32x128xf32>, i32 -> vector<32x128xf32>
    %390 = arith.maximumf %388, %389 : vector<32x128xf32>
    %cst_300 = arith.constant dense<0.000000e+00> : vector<32x8xf32>
    %391 = tpu.matmul %390, %2, %cst_300 {dimension_numbers = #tpu.dot_dimension_numbers<[1], [0], [0], [1], [0, 0, 1, 1], [], []>} : vector<32x128xf32>, vector<128x8xf32>, vector<32x8xf32> -> vector<32x8xf32>
    %c3_301 = arith.constant 3 : index
    %c0_302 = arith.constant 0 : index
    %c0_303 = arith.constant 0 : index
    %392 = vector.load %arg13[%c3_301, %c0_302, %c0_303] : memref<6x8x32xf32, #tpu.memory_space<vmem>>, vector<1x8x32xf32>
    %393 = vector.shape_cast %392 : vector<1x8x32xf32> to vector<8x32xf32>
    %cst_304 = arith.constant dense<0.000000e+00> : vector<8x8xf32>
    %394 = tpu.matmul %393, %391, %cst_304 {dimension_numbers = #tpu.dot_dimension_numbers<[1], [0], [0], [1], [0, 0, 1, 1], [], []>} : vector<8x32xf32>, vector<32x8xf32>, vector<8x8xf32> -> vector<8x8xf32>
    %395 = arith.addf %305, %394 : vector<8x8xf32>
    %c3_305 = arith.constant 3 : index
    %c0_306 = arith.constant 0 : index
    %c0_307 = arith.constant 0 : index
    %396 = vector.load %arg14[%c3_305, %c0_306, %c0_307] : memref<6x8x1xf32, #tpu.memory_space<vmem>>, vector<1x8x1xf32>
    %397 = vector.shape_cast %396 : vector<1x8x1xf32> to vector<8x1xf32>
    %398 = vector.broadcast %397 : vector<8x1xf32> to vector<8x8xf32>
    %399 = arith.addf %395, %398 : vector<8x8xf32>
    %400 = arith.subf %306, %377 : vector<32x128xf32>
    %c1_i32_308 = arith.constant 1 : i32
    %401 = tpu.dynamic_rotate %400 by %c1_i32_308 dim 1 : vector<32x128xf32>, i32 -> vector<32x128xf32>
    %402 = vector.broadcast %0 : vector<1x128xf32> to vector<32x128xf32>
    %403 = arith.mulf %401, %402 : vector<32x128xf32>
    %c127_i32_309 = arith.constant 127 : i32
    %404 = tpu.dynamic_rotate %400 by %c127_i32_309 dim 1 : vector<32x128xf32>, i32 -> vector<32x128xf32>
    %405 = vector.broadcast %1 : vector<1x128xf32> to vector<32x128xf32>
    %406 = arith.mulf %404, %405 : vector<32x128xf32>
    %407 = tpu.concatenate %403, %400, %406 in 0 : vector<32x128xf32>, vector<32x128xf32>, vector<32x128xf32> -> vector<96x128xf32>
    %c4 = arith.constant 4 : index
    %c0_310 = arith.constant 0 : index
    %c0_311 = arith.constant 0 : index
    %c0_312 = arith.constant 0 : index
    %408 = vector.load %arg7[%c4, %c0_310, %c0_311, %c0_312] : memref<6x4x32x96xf32, #tpu.memory_space<vmem>>, vector<1x1x32x96xf32>
    %409 = vector.shape_cast %408 : vector<1x1x32x96xf32> to vector<32x96xf32>
    %cst_313 = arith.constant dense<0.000000e+00> : vector<32x128xf32>
    %410 = tpu.matmul %409, %407, %cst_313 {dimension_numbers = #tpu.dot_dimension_numbers<[1], [0], [0], [1], [0, 0, 1, 1], [], []>} : vector<32x96xf32>, vector<96x128xf32>, vector<32x128xf32> -> vector<32x128xf32>
    %c4_314 = arith.constant 4 : index
    %c0_315 = arith.constant 0 : index
    %c0_316 = arith.constant 0 : index
    %c0_317 = arith.constant 0 : index
    %411 = vector.load %arg8[%c4_314, %c0_315, %c0_316, %c0_317] : memref<6x4x32x1xf32, #tpu.memory_space<vmem>>, vector<1x1x32x1xf32>
    %412 = vector.shape_cast %411 : vector<1x1x32x1xf32> to vector<32x1xf32>
    %413 = vector.broadcast %412 : vector<32x1xf32> to vector<32x128xf32>
    %414 = arith.addf %410, %413 : vector<32x128xf32>
    %cst_318 = arith.constant 0.000000e+00 : f32
    %415 = vector.broadcast %cst_318 : f32 to vector<32x128xf32>
    %416 = arith.maximumf %414, %415 : vector<32x128xf32>
    %c1_i32_319 = arith.constant 1 : i32
    %417 = tpu.dynamic_rotate %416 by %c1_i32_319 dim 1 : vector<32x128xf32>, i32 -> vector<32x128xf32>
    %418 = vector.broadcast %0 : vector<1x128xf32> to vector<32x128xf32>
    %419 = arith.mulf %417, %418 : vector<32x128xf32>
    %c127_i32_320 = arith.constant 127 : i32
    %420 = tpu.dynamic_rotate %416 by %c127_i32_320 dim 1 : vector<32x128xf32>, i32 -> vector<32x128xf32>
    %421 = vector.broadcast %1 : vector<1x128xf32> to vector<32x128xf32>
    %422 = arith.mulf %420, %421 : vector<32x128xf32>
    %423 = tpu.concatenate %419, %416, %422 in 0 : vector<32x128xf32>, vector<32x128xf32>, vector<32x128xf32> -> vector<96x128xf32>
    %c4_321 = arith.constant 4 : index
    %c1_322 = arith.constant 1 : index
    %c0_323 = arith.constant 0 : index
    %c0_324 = arith.constant 0 : index
    %424 = vector.load %arg7[%c4_321, %c1_322, %c0_323, %c0_324] : memref<6x4x32x96xf32, #tpu.memory_space<vmem>>, vector<1x1x32x96xf32>
    %425 = vector.shape_cast %424 : vector<1x1x32x96xf32> to vector<32x96xf32>
    %cst_325 = arith.constant dense<0.000000e+00> : vector<32x128xf32>
    %426 = tpu.matmul %425, %423, %cst_325 {dimension_numbers = #tpu.dot_dimension_numbers<[1], [0], [0], [1], [0, 0, 1, 1], [], []>} : vector<32x96xf32>, vector<96x128xf32>, vector<32x128xf32> -> vector<32x128xf32>
    %c4_326 = arith.constant 4 : index
    %c1_327 = arith.constant 1 : index
    %c0_328 = arith.constant 0 : index
    %c0_329 = arith.constant 0 : index
    %427 = vector.load %arg8[%c4_326, %c1_327, %c0_328, %c0_329] : memref<6x4x32x1xf32, #tpu.memory_space<vmem>>, vector<1x1x32x1xf32>
    %428 = vector.shape_cast %427 : vector<1x1x32x1xf32> to vector<32x1xf32>
    %429 = vector.broadcast %428 : vector<32x1xf32> to vector<32x128xf32>
    %430 = arith.addf %426, %429 : vector<32x128xf32>
    %cst_330 = arith.constant 0.000000e+00 : f32
    %431 = vector.broadcast %cst_330 : f32 to vector<32x128xf32>
    %432 = arith.maximumf %430, %431 : vector<32x128xf32>
    %c1_i32_331 = arith.constant 1 : i32
    %433 = tpu.dynamic_rotate %432 by %c1_i32_331 dim 1 : vector<32x128xf32>, i32 -> vector<32x128xf32>
    %434 = vector.broadcast %0 : vector<1x128xf32> to vector<32x128xf32>
    %435 = arith.mulf %433, %434 : vector<32x128xf32>
    %c127_i32_332 = arith.constant 127 : i32
    %436 = tpu.dynamic_rotate %432 by %c127_i32_332 dim 1 : vector<32x128xf32>, i32 -> vector<32x128xf32>
    %437 = vector.broadcast %1 : vector<1x128xf32> to vector<32x128xf32>
    %438 = arith.mulf %436, %437 : vector<32x128xf32>
    %439 = tpu.concatenate %435, %432, %438 in 0 : vector<32x128xf32>, vector<32x128xf32>, vector<32x128xf32> -> vector<96x128xf32>
    %c4_333 = arith.constant 4 : index
    %c2_334 = arith.constant 2 : index
    %c0_335 = arith.constant 0 : index
    %c0_336 = arith.constant 0 : index
    %440 = vector.load %arg7[%c4_333, %c2_334, %c0_335, %c0_336] : memref<6x4x32x96xf32, #tpu.memory_space<vmem>>, vector<1x1x32x96xf32>
    %441 = vector.shape_cast %440 : vector<1x1x32x96xf32> to vector<32x96xf32>
    %cst_337 = arith.constant dense<0.000000e+00> : vector<32x128xf32>
    %442 = tpu.matmul %441, %439, %cst_337 {dimension_numbers = #tpu.dot_dimension_numbers<[1], [0], [0], [1], [0, 0, 1, 1], [], []>} : vector<32x96xf32>, vector<96x128xf32>, vector<32x128xf32> -> vector<32x128xf32>
    %c4_338 = arith.constant 4 : index
    %c2_339 = arith.constant 2 : index
    %c0_340 = arith.constant 0 : index
    %c0_341 = arith.constant 0 : index
    %443 = vector.load %arg8[%c4_338, %c2_339, %c0_340, %c0_341] : memref<6x4x32x1xf32, #tpu.memory_space<vmem>>, vector<1x1x32x1xf32>
    %444 = vector.shape_cast %443 : vector<1x1x32x1xf32> to vector<32x1xf32>
    %445 = vector.broadcast %444 : vector<32x1xf32> to vector<32x128xf32>
    %446 = arith.addf %442, %445 : vector<32x128xf32>
    %cst_342 = arith.constant 0.000000e+00 : f32
    %447 = vector.broadcast %cst_342 : f32 to vector<32x128xf32>
    %448 = arith.maximumf %446, %447 : vector<32x128xf32>
    %c1_i32_343 = arith.constant 1 : i32
    %449 = tpu.dynamic_rotate %448 by %c1_i32_343 dim 1 : vector<32x128xf32>, i32 -> vector<32x128xf32>
    %450 = vector.broadcast %0 : vector<1x128xf32> to vector<32x128xf32>
    %451 = arith.mulf %449, %450 : vector<32x128xf32>
    %c127_i32_344 = arith.constant 127 : i32
    %452 = tpu.dynamic_rotate %448 by %c127_i32_344 dim 1 : vector<32x128xf32>, i32 -> vector<32x128xf32>
    %453 = vector.broadcast %1 : vector<1x128xf32> to vector<32x128xf32>
    %454 = arith.mulf %452, %453 : vector<32x128xf32>
    %455 = tpu.concatenate %451, %448, %454 in 0 : vector<32x128xf32>, vector<32x128xf32>, vector<32x128xf32> -> vector<96x128xf32>
    %c4_345 = arith.constant 4 : index
    %c3_346 = arith.constant 3 : index
    %c0_347 = arith.constant 0 : index
    %c0_348 = arith.constant 0 : index
    %456 = vector.load %arg7[%c4_345, %c3_346, %c0_347, %c0_348] : memref<6x4x32x96xf32, #tpu.memory_space<vmem>>, vector<1x1x32x96xf32>
    %457 = vector.shape_cast %456 : vector<1x1x32x96xf32> to vector<32x96xf32>
    %cst_349 = arith.constant dense<0.000000e+00> : vector<32x128xf32>
    %458 = tpu.matmul %457, %455, %cst_349 {dimension_numbers = #tpu.dot_dimension_numbers<[1], [0], [0], [1], [0, 0, 1, 1], [], []>} : vector<32x96xf32>, vector<96x128xf32>, vector<32x128xf32> -> vector<32x128xf32>
    %c4_350 = arith.constant 4 : index
    %c3_351 = arith.constant 3 : index
    %c0_352 = arith.constant 0 : index
    %c0_353 = arith.constant 0 : index
    %459 = vector.load %arg8[%c4_350, %c3_351, %c0_352, %c0_353] : memref<6x4x32x1xf32, #tpu.memory_space<vmem>>, vector<1x1x32x1xf32>
    %460 = vector.shape_cast %459 : vector<1x1x32x1xf32> to vector<32x1xf32>
    %461 = vector.broadcast %460 : vector<32x1xf32> to vector<32x128xf32>
    %462 = arith.addf %458, %461 : vector<32x128xf32>
    %cst_354 = arith.constant 0.000000e+00 : f32
    %463 = vector.broadcast %cst_354 : f32 to vector<32x128xf32>
    %464 = arith.maximumf %462, %463 : vector<32x128xf32>
    %c4_355 = arith.constant 4 : index
    %c0_356 = arith.constant 0 : index
    %c0_357 = arith.constant 0 : index
    %465 = vector.load %arg9[%c4_355, %c0_356, %c0_357] : memref<6x128x128xf32, #tpu.memory_space<vmem>>, vector<1x128x128xf32>
    %466 = vector.shape_cast %465 : vector<1x128x128xf32> to vector<128x128xf32>
    %cst_358 = arith.constant dense<0.000000e+00> : vector<32x128xf32>
    %467 = tpu.matmul %464, %466, %cst_358 {dimension_numbers = #tpu.dot_dimension_numbers<[1], [0], [0], [1], [0, 0, 1, 1], [], []>} : vector<32x128xf32>, vector<128x128xf32>, vector<32x128xf32> -> vector<32x128xf32>
    %c4_359 = arith.constant 4 : index
    %c0_360 = arith.constant 0 : index
    %c0_361 = arith.constant 0 : index
    %468 = vector.load %arg10[%c4_359, %c0_360, %c0_361] : memref<6x1x128xf32, #tpu.memory_space<vmem>>, vector<1x1x128xf32>
    %469 = vector.shape_cast %468 : vector<1x1x128xf32> to vector<1x128xf32>
    %470 = vector.broadcast %469 : vector<1x128xf32> to vector<32x128xf32>
    %471 = arith.addf %467, %470 : vector<32x128xf32>
    %c4_362 = arith.constant 4 : index
    %c0_363 = arith.constant 0 : index
    %c0_364 = arith.constant 0 : index
    %472 = vector.load %arg11[%c4_362, %c0_363, %c0_364] : memref<6x128x128xf32, #tpu.memory_space<vmem>>, vector<1x128x128xf32>
    %473 = vector.shape_cast %472 : vector<1x128x128xf32> to vector<128x128xf32>
    %cst_365 = arith.constant dense<0.000000e+00> : vector<32x128xf32>
    %474 = tpu.matmul %464, %473, %cst_365 {dimension_numbers = #tpu.dot_dimension_numbers<[1], [0], [0], [1], [0, 0, 1, 1], [], []>} : vector<32x128xf32>, vector<128x128xf32>, vector<32x128xf32> -> vector<32x128xf32>
    %c4_366 = arith.constant 4 : index
    %c0_367 = arith.constant 0 : index
    %c0_368 = arith.constant 0 : index
    %475 = vector.load %arg12[%c4_366, %c0_367, %c0_368] : memref<6x1x128xf32, #tpu.memory_space<vmem>>, vector<1x1x128xf32>
    %476 = vector.shape_cast %475 : vector<1x1x128xf32> to vector<1x128xf32>
    %477 = vector.broadcast %476 : vector<1x128xf32> to vector<32x128xf32>
    %478 = arith.addf %474, %477 : vector<32x128xf32>
    %c127_i32_369 = arith.constant 127 : i32
    %479 = tpu.dynamic_rotate %478 by %c127_i32_369 dim 1 : vector<32x128xf32>, i32 -> vector<32x128xf32>
    %480 = arith.maximumf %478, %479 : vector<32x128xf32>
    %c126_i32_370 = arith.constant 126 : i32
    %481 = tpu.dynamic_rotate %480 by %c126_i32_370 dim 1 : vector<32x128xf32>, i32 -> vector<32x128xf32>
    %482 = arith.maximumf %480, %481 : vector<32x128xf32>
    %c124_i32_371 = arith.constant 124 : i32
    %483 = tpu.dynamic_rotate %482 by %c124_i32_371 dim 1 : vector<32x128xf32>, i32 -> vector<32x128xf32>
    %484 = arith.maximumf %482, %483 : vector<32x128xf32>
    %cst_372 = arith.constant dense<0.000000e+00> : vector<32x8xf32>
    %485 = tpu.matmul %484, %2, %cst_372 {dimension_numbers = #tpu.dot_dimension_numbers<[1], [0], [0], [1], [0, 0, 1, 1], [], []>} : vector<32x128xf32>, vector<128x8xf32>, vector<32x8xf32> -> vector<32x8xf32>
    %c4_373 = arith.constant 4 : index
    %c0_374 = arith.constant 0 : index
    %c0_375 = arith.constant 0 : index
    %486 = vector.load %arg13[%c4_373, %c0_374, %c0_375] : memref<6x8x32xf32, #tpu.memory_space<vmem>>, vector<1x8x32xf32>
    %487 = vector.shape_cast %486 : vector<1x8x32xf32> to vector<8x32xf32>
    %cst_376 = arith.constant dense<0.000000e+00> : vector<8x8xf32>
    %488 = tpu.matmul %487, %485, %cst_376 {dimension_numbers = #tpu.dot_dimension_numbers<[1], [0], [0], [1], [0, 0, 1, 1], [], []>} : vector<8x32xf32>, vector<32x8xf32>, vector<8x8xf32> -> vector<8x8xf32>
    %489 = arith.addf %399, %488 : vector<8x8xf32>
    %c4_377 = arith.constant 4 : index
    %c0_378 = arith.constant 0 : index
    %c0_379 = arith.constant 0 : index
    %490 = vector.load %arg14[%c4_377, %c0_378, %c0_379] : memref<6x8x1xf32, #tpu.memory_space<vmem>>, vector<1x8x1xf32>
    %491 = vector.shape_cast %490 : vector<1x8x1xf32> to vector<8x1xf32>
    %492 = vector.broadcast %491 : vector<8x1xf32> to vector<8x8xf32>
    %493 = arith.addf %489, %492 : vector<8x8xf32>
    %494 = arith.subf %400, %471 : vector<32x128xf32>
    %c1_i32_380 = arith.constant 1 : i32
    %495 = tpu.dynamic_rotate %494 by %c1_i32_380 dim 1 : vector<32x128xf32>, i32 -> vector<32x128xf32>
    %496 = vector.broadcast %0 : vector<1x128xf32> to vector<32x128xf32>
    %497 = arith.mulf %495, %496 : vector<32x128xf32>
    %c127_i32_381 = arith.constant 127 : i32
    %498 = tpu.dynamic_rotate %494 by %c127_i32_381 dim 1 : vector<32x128xf32>, i32 -> vector<32x128xf32>
    %499 = vector.broadcast %1 : vector<1x128xf32> to vector<32x128xf32>
    %500 = arith.mulf %498, %499 : vector<32x128xf32>
    %501 = tpu.concatenate %497, %494, %500 in 0 : vector<32x128xf32>, vector<32x128xf32>, vector<32x128xf32> -> vector<96x128xf32>
    %c5 = arith.constant 5 : index
    %c0_382 = arith.constant 0 : index
    %c0_383 = arith.constant 0 : index
    %c0_384 = arith.constant 0 : index
    %502 = vector.load %arg7[%c5, %c0_382, %c0_383, %c0_384] : memref<6x4x32x96xf32, #tpu.memory_space<vmem>>, vector<1x1x32x96xf32>
    %503 = vector.shape_cast %502 : vector<1x1x32x96xf32> to vector<32x96xf32>
    %cst_385 = arith.constant dense<0.000000e+00> : vector<32x128xf32>
    %504 = tpu.matmul %503, %501, %cst_385 {dimension_numbers = #tpu.dot_dimension_numbers<[1], [0], [0], [1], [0, 0, 1, 1], [], []>} : vector<32x96xf32>, vector<96x128xf32>, vector<32x128xf32> -> vector<32x128xf32>
    %c5_386 = arith.constant 5 : index
    %c0_387 = arith.constant 0 : index
    %c0_388 = arith.constant 0 : index
    %c0_389 = arith.constant 0 : index
    %505 = vector.load %arg8[%c5_386, %c0_387, %c0_388, %c0_389] : memref<6x4x32x1xf32, #tpu.memory_space<vmem>>, vector<1x1x32x1xf32>
    %506 = vector.shape_cast %505 : vector<1x1x32x1xf32> to vector<32x1xf32>
    %507 = vector.broadcast %506 : vector<32x1xf32> to vector<32x128xf32>
    %508 = arith.addf %504, %507 : vector<32x128xf32>
    %cst_390 = arith.constant 0.000000e+00 : f32
    %509 = vector.broadcast %cst_390 : f32 to vector<32x128xf32>
    %510 = arith.maximumf %508, %509 : vector<32x128xf32>
    %c1_i32_391 = arith.constant 1 : i32
    %511 = tpu.dynamic_rotate %510 by %c1_i32_391 dim 1 : vector<32x128xf32>, i32 -> vector<32x128xf32>
    %512 = vector.broadcast %0 : vector<1x128xf32> to vector<32x128xf32>
    %513 = arith.mulf %511, %512 : vector<32x128xf32>
    %c127_i32_392 = arith.constant 127 : i32
    %514 = tpu.dynamic_rotate %510 by %c127_i32_392 dim 1 : vector<32x128xf32>, i32 -> vector<32x128xf32>
    %515 = vector.broadcast %1 : vector<1x128xf32> to vector<32x128xf32>
    %516 = arith.mulf %514, %515 : vector<32x128xf32>
    %517 = tpu.concatenate %513, %510, %516 in 0 : vector<32x128xf32>, vector<32x128xf32>, vector<32x128xf32> -> vector<96x128xf32>
    %c5_393 = arith.constant 5 : index
    %c1_394 = arith.constant 1 : index
    %c0_395 = arith.constant 0 : index
    %c0_396 = arith.constant 0 : index
    %518 = vector.load %arg7[%c5_393, %c1_394, %c0_395, %c0_396] : memref<6x4x32x96xf32, #tpu.memory_space<vmem>>, vector<1x1x32x96xf32>
    %519 = vector.shape_cast %518 : vector<1x1x32x96xf32> to vector<32x96xf32>
    %cst_397 = arith.constant dense<0.000000e+00> : vector<32x128xf32>
    %520 = tpu.matmul %519, %517, %cst_397 {dimension_numbers = #tpu.dot_dimension_numbers<[1], [0], [0], [1], [0, 0, 1, 1], [], []>} : vector<32x96xf32>, vector<96x128xf32>, vector<32x128xf32> -> vector<32x128xf32>
    %c5_398 = arith.constant 5 : index
    %c1_399 = arith.constant 1 : index
    %c0_400 = arith.constant 0 : index
    %c0_401 = arith.constant 0 : index
    %521 = vector.load %arg8[%c5_398, %c1_399, %c0_400, %c0_401] : memref<6x4x32x1xf32, #tpu.memory_space<vmem>>, vector<1x1x32x1xf32>
    %522 = vector.shape_cast %521 : vector<1x1x32x1xf32> to vector<32x1xf32>
    %523 = vector.broadcast %522 : vector<32x1xf32> to vector<32x128xf32>
    %524 = arith.addf %520, %523 : vector<32x128xf32>
    %cst_402 = arith.constant 0.000000e+00 : f32
    %525 = vector.broadcast %cst_402 : f32 to vector<32x128xf32>
    %526 = arith.maximumf %524, %525 : vector<32x128xf32>
    %c1_i32_403 = arith.constant 1 : i32
    %527 = tpu.dynamic_rotate %526 by %c1_i32_403 dim 1 : vector<32x128xf32>, i32 -> vector<32x128xf32>
    %528 = vector.broadcast %0 : vector<1x128xf32> to vector<32x128xf32>
    %529 = arith.mulf %527, %528 : vector<32x128xf32>
    %c127_i32_404 = arith.constant 127 : i32
    %530 = tpu.dynamic_rotate %526 by %c127_i32_404 dim 1 : vector<32x128xf32>, i32 -> vector<32x128xf32>
    %531 = vector.broadcast %1 : vector<1x128xf32> to vector<32x128xf32>
    %532 = arith.mulf %530, %531 : vector<32x128xf32>
    %533 = tpu.concatenate %529, %526, %532 in 0 : vector<32x128xf32>, vector<32x128xf32>, vector<32x128xf32> -> vector<96x128xf32>
    %c5_405 = arith.constant 5 : index
    %c2_406 = arith.constant 2 : index
    %c0_407 = arith.constant 0 : index
    %c0_408 = arith.constant 0 : index
    %534 = vector.load %arg7[%c5_405, %c2_406, %c0_407, %c0_408] : memref<6x4x32x96xf32, #tpu.memory_space<vmem>>, vector<1x1x32x96xf32>
    %535 = vector.shape_cast %534 : vector<1x1x32x96xf32> to vector<32x96xf32>
    %cst_409 = arith.constant dense<0.000000e+00> : vector<32x128xf32>
    %536 = tpu.matmul %535, %533, %cst_409 {dimension_numbers = #tpu.dot_dimension_numbers<[1], [0], [0], [1], [0, 0, 1, 1], [], []>} : vector<32x96xf32>, vector<96x128xf32>, vector<32x128xf32> -> vector<32x128xf32>
    %c5_410 = arith.constant 5 : index
    %c2_411 = arith.constant 2 : index
    %c0_412 = arith.constant 0 : index
    %c0_413 = arith.constant 0 : index
    %537 = vector.load %arg8[%c5_410, %c2_411, %c0_412, %c0_413] : memref<6x4x32x1xf32, #tpu.memory_space<vmem>>, vector<1x1x32x1xf32>
    %538 = vector.shape_cast %537 : vector<1x1x32x1xf32> to vector<32x1xf32>
    %539 = vector.broadcast %538 : vector<32x1xf32> to vector<32x128xf32>
    %540 = arith.addf %536, %539 : vector<32x128xf32>
    %cst_414 = arith.constant 0.000000e+00 : f32
    %541 = vector.broadcast %cst_414 : f32 to vector<32x128xf32>
    %542 = arith.maximumf %540, %541 : vector<32x128xf32>
    %c1_i32_415 = arith.constant 1 : i32
    %543 = tpu.dynamic_rotate %542 by %c1_i32_415 dim 1 : vector<32x128xf32>, i32 -> vector<32x128xf32>
    %544 = vector.broadcast %0 : vector<1x128xf32> to vector<32x128xf32>
    %545 = arith.mulf %543, %544 : vector<32x128xf32>
    %c127_i32_416 = arith.constant 127 : i32
    %546 = tpu.dynamic_rotate %542 by %c127_i32_416 dim 1 : vector<32x128xf32>, i32 -> vector<32x128xf32>
    %547 = vector.broadcast %1 : vector<1x128xf32> to vector<32x128xf32>
    %548 = arith.mulf %546, %547 : vector<32x128xf32>
    %549 = tpu.concatenate %545, %542, %548 in 0 : vector<32x128xf32>, vector<32x128xf32>, vector<32x128xf32> -> vector<96x128xf32>
    %c5_417 = arith.constant 5 : index
    %c3_418 = arith.constant 3 : index
    %c0_419 = arith.constant 0 : index
    %c0_420 = arith.constant 0 : index
    %550 = vector.load %arg7[%c5_417, %c3_418, %c0_419, %c0_420] : memref<6x4x32x96xf32, #tpu.memory_space<vmem>>, vector<1x1x32x96xf32>
    %551 = vector.shape_cast %550 : vector<1x1x32x96xf32> to vector<32x96xf32>
    %cst_421 = arith.constant dense<0.000000e+00> : vector<32x128xf32>
    %552 = tpu.matmul %551, %549, %cst_421 {dimension_numbers = #tpu.dot_dimension_numbers<[1], [0], [0], [1], [0, 0, 1, 1], [], []>} : vector<32x96xf32>, vector<96x128xf32>, vector<32x128xf32> -> vector<32x128xf32>
    %c5_422 = arith.constant 5 : index
    %c3_423 = arith.constant 3 : index
    %c0_424 = arith.constant 0 : index
    %c0_425 = arith.constant 0 : index
    %553 = vector.load %arg8[%c5_422, %c3_423, %c0_424, %c0_425] : memref<6x4x32x1xf32, #tpu.memory_space<vmem>>, vector<1x1x32x1xf32>
    %554 = vector.shape_cast %553 : vector<1x1x32x1xf32> to vector<32x1xf32>
    %555 = vector.broadcast %554 : vector<32x1xf32> to vector<32x128xf32>
    %556 = arith.addf %552, %555 : vector<32x128xf32>
    %cst_426 = arith.constant 0.000000e+00 : f32
    %557 = vector.broadcast %cst_426 : f32 to vector<32x128xf32>
    %558 = arith.maximumf %556, %557 : vector<32x128xf32>
    %c5_427 = arith.constant 5 : index
    %c0_428 = arith.constant 0 : index
    %c0_429 = arith.constant 0 : index
    %559 = vector.load %arg9[%c5_427, %c0_428, %c0_429] : memref<6x128x128xf32, #tpu.memory_space<vmem>>, vector<1x128x128xf32>
    %560 = vector.shape_cast %559 : vector<1x128x128xf32> to vector<128x128xf32>
    %cst_430 = arith.constant dense<0.000000e+00> : vector<32x128xf32>
    %561 = tpu.matmul %558, %560, %cst_430 {dimension_numbers = #tpu.dot_dimension_numbers<[1], [0], [0], [1], [0, 0, 1, 1], [], []>} : vector<32x128xf32>, vector<128x128xf32>, vector<32x128xf32> -> vector<32x128xf32>
    %c5_431 = arith.constant 5 : index
    %c0_432 = arith.constant 0 : index
    %c0_433 = arith.constant 0 : index
    %562 = vector.load %arg10[%c5_431, %c0_432, %c0_433] : memref<6x1x128xf32, #tpu.memory_space<vmem>>, vector<1x1x128xf32>
    %563 = vector.shape_cast %562 : vector<1x1x128xf32> to vector<1x128xf32>
    %564 = vector.broadcast %563 : vector<1x128xf32> to vector<32x128xf32>
    %565 = arith.addf %561, %564 : vector<32x128xf32>
    %c5_434 = arith.constant 5 : index
    %c0_435 = arith.constant 0 : index
    %c0_436 = arith.constant 0 : index
    %566 = vector.load %arg11[%c5_434, %c0_435, %c0_436] : memref<6x128x128xf32, #tpu.memory_space<vmem>>, vector<1x128x128xf32>
    %567 = vector.shape_cast %566 : vector<1x128x128xf32> to vector<128x128xf32>
    %cst_437 = arith.constant dense<0.000000e+00> : vector<32x128xf32>
    %568 = tpu.matmul %558, %567, %cst_437 {dimension_numbers = #tpu.dot_dimension_numbers<[1], [0], [0], [1], [0, 0, 1, 1], [], []>} : vector<32x128xf32>, vector<128x128xf32>, vector<32x128xf32> -> vector<32x128xf32>
    %c5_438 = arith.constant 5 : index
    %c0_439 = arith.constant 0 : index
    %c0_440 = arith.constant 0 : index
    %569 = vector.load %arg12[%c5_438, %c0_439, %c0_440] : memref<6x1x128xf32, #tpu.memory_space<vmem>>, vector<1x1x128xf32>
    %570 = vector.shape_cast %569 : vector<1x1x128xf32> to vector<1x128xf32>
    %571 = vector.broadcast %570 : vector<1x128xf32> to vector<32x128xf32>
    %572 = arith.addf %568, %571 : vector<32x128xf32>
    %c127_i32_441 = arith.constant 127 : i32
    %573 = tpu.dynamic_rotate %572 by %c127_i32_441 dim 1 : vector<32x128xf32>, i32 -> vector<32x128xf32>
    %574 = arith.maximumf %572, %573 : vector<32x128xf32>
    %c126_i32_442 = arith.constant 126 : i32
    %575 = tpu.dynamic_rotate %574 by %c126_i32_442 dim 1 : vector<32x128xf32>, i32 -> vector<32x128xf32>
    %576 = arith.maximumf %574, %575 : vector<32x128xf32>
    %c124_i32_443 = arith.constant 124 : i32
    %577 = tpu.dynamic_rotate %576 by %c124_i32_443 dim 1 : vector<32x128xf32>, i32 -> vector<32x128xf32>
    %578 = arith.maximumf %576, %577 : vector<32x128xf32>
    %cst_444 = arith.constant dense<0.000000e+00> : vector<32x8xf32>
    %579 = tpu.matmul %578, %2, %cst_444 {dimension_numbers = #tpu.dot_dimension_numbers<[1], [0], [0], [1], [0, 0, 1, 1], [], []>} : vector<32x128xf32>, vector<128x8xf32>, vector<32x8xf32> -> vector<32x8xf32>
    %c5_445 = arith.constant 5 : index
    %c0_446 = arith.constant 0 : index
    %c0_447 = arith.constant 0 : index
    %580 = vector.load %arg13[%c5_445, %c0_446, %c0_447] : memref<6x8x32xf32, #tpu.memory_space<vmem>>, vector<1x8x32xf32>
    %581 = vector.shape_cast %580 : vector<1x8x32xf32> to vector<8x32xf32>
    %cst_448 = arith.constant dense<0.000000e+00> : vector<8x8xf32>
    %582 = tpu.matmul %581, %579, %cst_448 {dimension_numbers = #tpu.dot_dimension_numbers<[1], [0], [0], [1], [0, 0, 1, 1], [], []>} : vector<8x32xf32>, vector<32x8xf32>, vector<8x8xf32> -> vector<8x8xf32>
    %583 = arith.addf %493, %582 : vector<8x8xf32>
    %c5_449 = arith.constant 5 : index
    %c0_450 = arith.constant 0 : index
    %c0_451 = arith.constant 0 : index
    %584 = vector.load %arg14[%c5_449, %c0_450, %c0_451] : memref<6x8x1xf32, #tpu.memory_space<vmem>>, vector<1x8x1xf32>
    %585 = vector.shape_cast %584 : vector<1x8x1xf32> to vector<8x1xf32>
    %586 = vector.broadcast %585 : vector<8x1xf32> to vector<8x8xf32>
    %587 = arith.addf %583, %586 : vector<8x8xf32>
    %588 = arith.subf %494, %565 : vector<32x128xf32>
    %c0_452 = arith.constant 0 : index
    %c0_453 = arith.constant 0 : index
    %589 = vector.load %arg15[%c0_452, %c0_453] : memref<32x128xf32, #tpu.memory_space<vmem>>, vector<32x128xf32>
    tpu.vector_store %arg15[%c0_452, %c0_453], %588 {strides = array<i32>} : memref<32x128xf32, #tpu.memory_space<vmem>>, vector<32x128xf32>,
    %c0_454 = arith.constant 0 : index
    %c0_455 = arith.constant 0 : index
    %c0_456 = arith.constant 0 : index
    %590 = vector.load %arg16[%c0_454, %c0_455, %c0_456] : memref<1x8x8xf32, #tpu.memory_space<vmem>>, vector<1x8x8xf32>
    %591 = vector.shape_cast %590 : vector<1x8x8xf32> to vector<8x8xf32>
    %592 = vector.shape_cast %587 : vector<8x8xf32> to vector<1x8x8xf32>
    tpu.vector_store %arg16[%c0_454, %c0_455, %c0_456], %592 {strides = array<i32>} : memref<1x8x8xf32, #tpu.memory_space<vmem>>, vector<1x8x8xf32>,
    return
  }
  func.func @transform_0(%arg0: i32) -> (i32, i32) {
    %c0_i32 = arith.constant 0 : i32
    %c0_i32_0 = arith.constant 0 : i32
    return %c0_i32, %arg0 : i32, i32
  }
  func.func @transform_1(%arg0: i32) -> (i32, i32) {
    %c0_i32 = arith.constant 0 : i32
    %c0_i32_0 = arith.constant 0 : i32
    %c0_i32_1 = arith.constant 0 : i32
    return %c0_i32, %c0_i32_0 : i32, i32
  }
  func.func @transform_2(%arg0: i32) -> (i32, i32) {
    %c0_i32 = arith.constant 0 : i32
    %c0_i32_0 = arith.constant 0 : i32
    %c0_i32_1 = arith.constant 0 : i32
    return %c0_i32, %c0_i32_0 : i32, i32
  }
  func.func @transform_3(%arg0: i32) -> (i32, i32) {
    %c0_i32 = arith.constant 0 : i32
    %c0_i32_0 = arith.constant 0 : i32
    %c0_i32_1 = arith.constant 0 : i32
    return %c0_i32, %c0_i32_0 : i32, i32
  }
  func.func @transform_4(%arg0: i32) -> (i32, i32, i32) {
    %c0_i32 = arith.constant 0 : i32
    %c0_i32_0 = arith.constant 0 : i32
    %c0_i32_1 = arith.constant 0 : i32
    %c0_i32_2 = arith.constant 0 : i32
    return %c0_i32, %c0_i32_0, %c0_i32_1 : i32, i32, i32
  }
  func.func @transform_5(%arg0: i32) -> (i32, i32) {
    %c0_i32 = arith.constant 0 : i32
    %c0_i32_0 = arith.constant 0 : i32
    %c0_i32_1 = arith.constant 0 : i32
    return %c0_i32, %c0_i32_0 : i32, i32
  }
  func.func @transform_6(%arg0: i32) -> (i32, i32, i32, i32) {
    %c0_i32 = arith.constant 0 : i32
    %c0_i32_0 = arith.constant 0 : i32
    %c0_i32_1 = arith.constant 0 : i32
    %c0_i32_2 = arith.constant 0 : i32
    %c0_i32_3 = arith.constant 0 : i32
    return %c0_i32, %c0_i32_0, %c0_i32_1, %c0_i32_2 : i32, i32, i32, i32
  }
  func.func @transform_7(%arg0: i32) -> (i32, i32, i32, i32) {
    %c0_i32 = arith.constant 0 : i32
    %c0_i32_0 = arith.constant 0 : i32
    %c0_i32_1 = arith.constant 0 : i32
    %c0_i32_2 = arith.constant 0 : i32
    %c0_i32_3 = arith.constant 0 : i32
    return %c0_i32, %c0_i32_0, %c0_i32_1, %c0_i32_2 : i32, i32, i32, i32
  }
  func.func @transform_8(%arg0: i32) -> (i32, i32, i32) {
    %c0_i32 = arith.constant 0 : i32
    %c0_i32_0 = arith.constant 0 : i32
    %c0_i32_1 = arith.constant 0 : i32
    %c0_i32_2 = arith.constant 0 : i32
    return %c0_i32, %c0_i32_0, %c0_i32_1 : i32, i32, i32
  }
  func.func @transform_9(%arg0: i32) -> (i32, i32, i32) {
    %c0_i32 = arith.constant 0 : i32
    %c0_i32_0 = arith.constant 0 : i32
    %c0_i32_1 = arith.constant 0 : i32
    %c0_i32_2 = arith.constant 0 : i32
    return %c0_i32, %c0_i32_0, %c0_i32_1 : i32, i32, i32
  }
  func.func @transform_10(%arg0: i32) -> (i32, i32, i32) {
    %c0_i32 = arith.constant 0 : i32
    %c0_i32_0 = arith.constant 0 : i32
    %c0_i32_1 = arith.constant 0 : i32
    %c0_i32_2 = arith.constant 0 : i32
    return %c0_i32, %c0_i32_0, %c0_i32_1 : i32, i32, i32
  }
  func.func @transform_11(%arg0: i32) -> (i32, i32, i32) {
    %c0_i32 = arith.constant 0 : i32
    %c0_i32_0 = arith.constant 0 : i32
    %c0_i32_1 = arith.constant 0 : i32
    %c0_i32_2 = arith.constant 0 : i32
    return %c0_i32, %c0_i32_0, %c0_i32_1 : i32, i32, i32
  }
  func.func @transform_12(%arg0: i32) -> (i32, i32, i32) {
    %c0_i32 = arith.constant 0 : i32
    %c0_i32_0 = arith.constant 0 : i32
    %c0_i32_1 = arith.constant 0 : i32
    %c0_i32_2 = arith.constant 0 : i32
    return %c0_i32, %c0_i32_0, %c0_i32_1 : i32, i32, i32
  }
  func.func @transform_13(%arg0: i32) -> (i32, i32, i32) {
    %c0_i32 = arith.constant 0 : i32
    %c0_i32_0 = arith.constant 0 : i32
    %c0_i32_1 = arith.constant 0 : i32
    %c0_i32_2 = arith.constant 0 : i32
    return %c0_i32, %c0_i32_0, %c0_i32_1 : i32, i32, i32
  }
  func.func @transform_14(%arg0: i32) -> (i32, i32) {
    %c0_i32 = arith.constant 0 : i32
    %c0_i32_0 = arith.constant 0 : i32
    return %c0_i32, %arg0 : i32, i32
  }
  func.func @transform_15(%arg0: i32) -> (i32, i32, i32) {
    %c0_i32 = arith.constant 0 : i32
    %c0_i32_0 = arith.constant 0 : i32
    %c0_i32_1 = arith.constant 0 : i32
    return %arg0, %c0_i32, %c0_i32_0 : i32, i32, i32
  }
}

</mosaic_0001>

<bundles_post_ra>
// kernel: _lambda_.1
= control target key start
LH: loop header
LB: loop body
LE: loop exit
PB: predicated region body
PF: predicated region fallthrough
CT: control target
= control target key end

     0   :  { %s13973_s0 = inlined_call_operand.vmem [shape: f32[4,256], index: 0, kind: input, shape index: {}]   ;;  %s13974_s1 = inlined_call_operand.vmem [shape: f32[1,128], index: 1, kind: input, shape index: {}]   ;;  %s13975_s2 = inlined_call_operand.vmem [shape: f32[1,128], index: 2, kind: input, shape index: {}]   ;;  %s13976_s3 = inlined_call_operand.vmem [shape: f32[128,8], index: 3, kind: input, shape index: {}]   ;;  %s13977_s4 = inlined_call_operand.vmem [shape: f32[3,32,4], index: 4, kind: input, shape index: {}]   ;;  %s13978_s5 = inlined_call_operand.vmem [shape: f32[32,1], index: 5, kind: input, shape index: {}]   ;;  %s13979_s6 = inlined_call_operand.vmem [shape: f32[6,4,32,96], index: 6, kind: input, shape index: {}]   ;;  %s13980_s7 = inlined_call_operand.vmem [shape: f32[6,4,32,1], index: 7, kind: input, shape index: {}]   ;;  %s13981_s8 = inlined_call_operand.vmem [shape: f32[6,128,128], index: 8, kind: input, shape index: {}]   ;;  %s13982_s9 = inlined_call_operand.vmem [shape: f32[6,1,128], index: 9, kind: input, shape index: {}]   ;;  %s13983_s10 = inlined_call_operand.vmem [shape: f32[6,128,128], index: 10, kind: input, shape index: {}]   ;;  %s13984_s11 = inlined_call_operand.vmem [shape: f32[6,1,128], index: 11, kind: input, shape index: {}]   ;;  %s13985_s12 = inlined_call_operand.vmem [shape: f32[6,8,32], index: 12, kind: input, shape index: {}]   ;;  %s13986_s13 = inlined_call_operand.vmem [shape: f32[6,8,1], index: 13, kind: input, shape index: {}]   ;;  %s13987_s14 = inlined_call_operand.vmem [shape: f32[32,256], index: 14, kind: output, shape index: {0}]   ;;  %s13988_s15 = inlined_call_operand.vmem [shape: f32[2,8,8], index: 15, kind: output, shape index: {1}]  }
   0x1   :  { %14000 = sst [smem:[#allocation6_spill]] %s13973_s0 }
   0x2   :  { %14001 = sst [smem:[#allocation7_spill]] %s13976_s3 }
   0x3   :  { %14002 = sst [smem:[#allocation8_spill]] %s13977_s4 }
   0x4   :  { %s11636_s18 = smov 0   ;;  %s11638_s19 = smov 0  }
   0x5   :  { %s11640_s20 = smov 0  }
   0x6 LB: > { %14003 = sst [smem:[#allocation3_spill]] %s11542_s19  ;;  %s11649_s21 = sadd.s32 4294967295, %s11546_s20   ;;  %s11546_s20 = sphi %s11640_s20, %s14014_s20   ;;  %s11542_s19 = sphi %s11638_s19, %s14016_s19   ;;  %s11538_s18 = sphi %s11636_s18, %s14015_s18  }
   0x7   : > { %s11651_s22 = sadd.s32 1, %s11546_s20   ;;  %s332_s24 = sadd.s32 1, %s11542_s19 }
   0x8   : > { %14004 = sst [smem:[#allocation4_spill]] %s11651_s22  ;;  %s329_s23 = ssub.s32 %s11546_s20, %s11651_s22 }
   0x9   : > { %p330_p0 = scmp.eq.s32.totalorder %s329_s23, 0  ;;  %p342_p1 = scmp.ne.s32.totalorder %s11542_s19, %s11538_s18 }
   0xa   : > { %p343_p2 = scmp.eq.s32.totalorder %s11649_s21, 1  ;;  %p7312_p3 = scmp.ge.s32.totalorder %s11546_s20, 1 }
   0xb   : > { %s11659_s25 = scalar_select %p330_p0, %s11542_s19, %s332_s24  }
   0xc   : > { %p11661_p4 = por %p343_p2, %p342_p1  ;;  %p439_p5 = scmp.lt.s32.totalorder %s11546_s20, 3 }
   0xd   : > { %14005 = sst [smem:[#allocation5_spill]] %s11659_s25 }
   0xe   : > { %p440_p6 = pnand %p7312_p3, %p439_p5 }
   0xf   : > { %p489_p7 = scmp.lt.s32.totalorder (!%p440_p6), %s11649_s21, 1  ;;  %s14007_s4 = sld [smem:[#allocation8_spill]] (!%p440_p6)  ;;  %vm534_vm0 = vcmask (!%p440_p6), 31744   ;;  %vm547_vm1 = vcmask (!%p440_p6), 1043456   ;;  %v854_v4 = vld [vmem:[%s13978_s5] sm:$0xff] (!%p440_p6)  ;;  %v11549_v6 = vmov (!%p440_p6), 0  }
  0x10   : > { %443 = sbr.rel (%p440_p6) target bundleno = 13442 (0x3482), region = 76  ;;  %s14008_s0 = sld [smem:[#allocation6_spill]] (!%p440_p6)  ;;  %11334 = vset.pattern.permute.xlu1 (!%p440_p6), %v11549_v6  ;;  %v855_v8 = vld [vmem:[%s13978_s5 + $0x8] sm:$0xff] (!%p440_p6)  ;;  %11335 = vset.pattern.permute.xlu0 (!%p440_p6), %v11549_v6  ;;  %v856_v10 = vld [vmem:[%s13978_s5 + $0x10] sm:$0xff] (!%p440_p6)  ;;  %v857_v11 = vld [vmem:[%s13978_s5 + $0x18] sm:$0xff] (!%p440_p6)  ;;  %vm934_vm2 = vcmask (!%p440_p6), 785408  }
  0x11   : > { %s13994_s30 = smov (!%p440_p6), 1   ;;  %860 = vperm.xlu1 (!%p440_p6), %11334, %v854_v4   ;;  %s13992_s22 = smov (!%p440_p6), 127   ;;  %v11716_v12 = vld [vmem:[%s13974_s1] ss:$0 sm:$0xff] (!%p440_p6)  ;;  %v911_v44 = vld [vmem:[%s13980_s7 + $0x8] sm:$0xff] (!%p440_p6)  ;;  %v913_v47 = vld [vmem:[%s13980_s7 + $0x18] sm:$0xff] (!%p440_p6) }
  0x12   : > { %v11725_v16 = vld [vmem:[%s13975_s2] ss:$0 sm:$0xff] (!%p440_p6)  ;;  %v912_v48 = vld [vmem:[%s13980_s7 + $0x10] sm:$0xff] (!%p440_p6)  ;;  %s14010_s28 = smov (!%p440_p6), 1   ;;  %s13996_s25 = smov (!%p440_p6), 126   ;;  %vm11554_vm3 = vmmov (!%p440_p6), 0  }
  0x13   : > { %v906_v45 = vld [vmem:[%s13979_s6] sm:$0xff] (!%p440_p6)  ;;  %s14011_s3 = sld [smem:[#allocation7_spill]] (!%p440_p6)  ;;  %vm1845_vm4 = vcmask (!%p440_p6), 261120   ;;  %s14012_s23 = smov (!%p440_p6), 126   ;;  %vm7172_vm5 = vcmask (!%p440_p6), 64512  }
  0x14   : > { %v910_v46 = vld [vmem:[%s13980_s7] sm:$0xff] (!%p440_p6)  ;;  %s480_s16 = sand.u32 (!%p440_p6), 1, %s11538_s18  }
  0x15   : > { %v7317_v0 = vld [vmem:[%s14007_s4 + $0x20] sm:$0xff] (!%p440_p6)  ;;  %v7318_v3 = vld [vmem:[%s14007_s4 + $0x28] sm:$0xff] (!%p440_p6)  ;;  %v7319_v5 = vld [vmem:[%s14007_s4 + $0x30] sm:$0xff] (!%p440_p6)  ;;  %865 = vperm.xlu1 (!%p440_p6), %11334, %v855_v8  }
  0x16   : > { %8614 = vmatprep.mubr.msk.f32.mxu1 (!%p440_p6), %vm534_vm0, %v7317_v0  ;;  %v7331_v1 = vld [vmem:[%s14007_s4 + $0x40] sm:$0xff] (!%p440_p6)  ;;  %v7320_v7 = vld [vmem:[%s14007_s4 + $0x38] sm:$0xff] (!%p440_p6)  ;;  %v517_v15 = vld [vmem:[%s14007_s4 + $0x8] sm:$0xff] (!%p440_p6) }
  0x17   : > { %s11671_s29 = scalar_select %p489_p7, %s11649_s21, 1  ;;  %8630 = vmatprep.mubr.msk.f32.mxu0 %vm534_vm0, %v7331_v1  ;;  %v516_v9 = vld [vmem:[%s14007_s4] sm:$0xff]  ;;  %v518_v17 = vld [vmem:[%s14007_s4 + $0x10] sm:$0xff]  ;;  %v519_v20 = vld [vmem:[%s14007_s4 + $0x18] sm:$0xff] }
  0x18   : > { %v7332_v21 = vld [vmem:[%s14007_s4 + $0x48] sm:$0xff]  ;;  %v7333_v22 = vld [vmem:[%s14007_s4 + $0x50] sm:$0xff]  ;;  %v7334_v23 = vld [vmem:[%s14007_s4 + $0x58] sm:$0xff]  ;;  %s7313_s4 = sshll.u32 %s480_s16, 5 }
  0x19   : > { %s7314_s17 = sshll.u32 %s11671_s29, 2  ;;  %875 = vperm.xlu1 %11334, %v857_v11   ;;  %v908_v8 = vld [vmem:[%s13979_s6 + $0x10] sm:$0xff]  ;;  %s13907_s18 = scalar_lea.vmem [#allocation2], %s7313_s4 }
  0x1a   : > { %s492_s24 = scalar_lea.vmem %s14008_s0, %s7314_s17  ;;  %s14009_s17 = smov 127  }
  0x1b   : > { %v515_v2 = vld [vmem:[%s492_s24] sm:$0xf] }
  0x1c   : > { %520 = vrot.lane.b32.xlu0 %v515_v2, %s13994_s30  ;;  %8612 = vmatprep.subr.msk.mxu1 %vm547_vm1, %v515_v2 }
  0x1d   : > { %8613 = vmatpush3.msk.msra.mxu1 %vm547_vm1, %v515_v2 }
  0x1e   : > { %8615 = vmatmul.mubr.msk.f32.vlgmr.msra.gmra.mrb[0].mxu1 %vm534_vm0, %v7318_v3 }
  0x1f   : > { %8617 = vmatprep.mubr.msk.f32.mxu1 %vm534_vm0, %v7319_v5 }
  0x20   : > { %741 = vrot.lane.b32.xlu0 %v515_v2, %s13992_s22 }
  0x22   : > { %8618 = vmatmul.mubr.msk.f32.gmra.mrb[2].mxu1 %vm534_vm0, %v7320_v7  ;;  %v907_v7 = vld [vmem:[%s13979_s6 + $0x8] sm:$0xff] }
  0x23   : > { %8622 = vmatprep.mubr.msk.f32.mxu1 %vm534_vm0, %v516_v9  ;;  %v909_v9 = vld [vmem:[%s13979_s6 + $0x18] sm:$0xff] }
  0x24   : > { %870 = vperm.xlu0 %11335, %v856_v10  }
  0x8e   : > { %v521_v13 = vpop.permute.xlu0 %520 }
  0x8f   : > { %v528_v14 = vmul.f32 %v11716_v12, %v521_v13 }
  0x90   : > { %v861_v24 = vpop.permute.xlu1 %860 }
  0x91   : > { %8620 = vmatprep.subr.msk.mxu1 %vm547_vm1, %v528_v14 }
  0x92   : > { %v742_v18 = vpop.permute.xlu0 %741  ;;  %8621 = vmatpush3.msk.msra.mxu1 %vm547_vm1, %v528_v14 }
  0x93   : > { %8623 = vmatmul.mubr.msk.f32.vlgmr.msra.gmra.mrb[0].mxu1 %vm534_vm0, %v517_v15  ;;  %v749_v19 = vmul.f32 %v11725_v16, %v742_v18 }
  0x94   : > { %8625 = vmatprep.mubr.msk.f32.mxu1 %vm534_vm0, %v518_v17  ;;  %v866_v27 = vpop.permute.xlu1 %865 }
  0x95   : > { %8628 = vmatprep.subr.msk.mxu0 %vm547_vm1, %v749_v19 }
  0x96   : > { %8629 = vmatpush3.msk.msra.mxu0 %vm547_vm1, %v749_v19 }
  0x97   : > { %8626 = vmatmul.mubr.msk.f32.gmra.mrb[2].mxu1 %vm534_vm0, %v519_v20  ;;  %8631 = vmatmul.mubr.msk.f32.vlgmr.msra.gmra.mrb[0].mxu0 %vm534_vm0, %v7332_v21 }
  0x98   : > { %8633 = vmatprep.mubr.msk.f32.mxu0 %vm534_vm0, %v7333_v22  ;;  %v876_v40 = vpop.permute.xlu1 %875  ;;  %8660 = vmatprep.mubr.msk.f32.mxu1 %vm934_vm2, %v906_v45 }
  0x9b   : > { %8634 = vmatmul.mubr.msk.f32.gmra.mrb[2].mxu0 %vm534_vm0, %v7334_v23 }
  0xa3   : > { %v871_v39 = vpop.permute.xlu0 %870 }
 0x166   : > { %v8624_v25 = vpop.f32.mrb[0].mxu1 }
 0x167   : > { %v717_v26 = vpop.f32.mrb[1].mxu1 }
 0x16a   : > { %v8627_v28 = vpop.f32.mrb[2].mxu1  ;;  %v8632_v29 = vpop.f32.mrb[0].mxu0 }
 0x16b   : > { %v11294_v30 = vadd.f32 %v8632_v29, %v8624_v25  ;;  %v727_v31 = vpop.f32.mrb[3].mxu1  ;;  %v831_v32 = vpop.f32.mrb[1].mxu0 }
 0x16c   : > { %v11295_v33 = vadd.f32 %v831_v32, %v717_v26  ;;  %v7349_v32 = vld [vmem:[%s13980_s7 + $0x20] sm:$0xff] }
 0x16d   : > { %v11753_v34 = vadd.f32 %v11294_v30, %v866_v27  ;;  %v7350_v30 = vld [vmem:[%s13980_s7 + $0x28] sm:$0xff] }
 0x16e   : > { %v11755_v35 = vadd.f32 %v11295_v33, %v861_v24  ;;  %v8635_v36 = vpop.f32.mrb[2].mxu0  ;;  %v7352_v33 = vld [vmem:[%s13980_s7 + $0x38] sm:$0xff] }
 0x16f   : > { %v11296_v37 = vadd.f32 %v8635_v36, %v8627_v28  ;;  %v841_v38 = vpop.f32.mrb[3].mxu0  ;;  %884 = vrot.lane.b32.xlu0 %v11753_v34, %s13994_s30  ;;  %v7351_v36 = vld [vmem:[%s13980_s7 + $0x30] sm:$0xff] }
 0x170   : > { %v11297_v41 = vadd.f32 %v841_v38, %v727_v31  ;;  %882 = vrot.lane.b32.xlu1 %v11755_v35, %s13994_s30  ;;  %v10114_v61 = vpack.c.bf16 %v11753_v34, %v11755_v35  ;;  %v7345_v31 = vld [vmem:[%s13979_s6 + $0x20] sm:$0xff] }
 0x171   : > { %v11761_v42 = vadd.f32 %v11296_v37, %v876_v40  ;;  %8690 = vmatprep.mubr.msk.f32.mxu0 %vm934_vm2, %v7345_v31 }
 0x172   : > { %v11763_v43 = vadd.f32 %v11297_v41, %v871_v39 }
 0x173   : > { %888 = vrot.lane.b32.xlu0 %v11761_v42, %s13994_s30 }
 0x174   : > { %886 = vrot.lane.b32.xlu1 %v11763_v43, %s13994_s30  ;;  %v10118_v0 = vpack.c.bf16 %v11761_v42, %v11763_v43 }
 0x177   : > { %896 = vrot.lane.b32.xlu0 %v11753_v34, %s13992_s22 }
 0x178   : > { %894 = vrot.lane.b32.xlu1 %v11755_v35, %s13992_s22 }
 0x17b   : > { %900 = vrot.lane.b32.xlu0 %v11761_v42, %s13992_s22 }
 0x17c   : > { %898 = vrot.lane.b32.xlu1 %v11763_v43, %s13992_s22 }
 0x17f   : > { %921 = vperm.xlu0 %11335, %v911_v44  }
 0x180   : > { %916 = vperm.xlu1 %11334, %v910_v46  }
 0x183   : > { %931 = vperm.xlu0 %11335, %v913_v47  }
 0x184   : > { %926 = vperm.xlu1 %11334, %v912_v48  }
 0x1e1   : > { %v885_v49 = vpop.permute.xlu0 %884 }
 0x1e2   : > { %v891_v50 = vmul.f32 %v11716_v12, %v885_v49  ;;  %v883_v51 = vpop.permute.xlu1 %882 }
 0x1e3   : > { %v890_v52 = vmul.f32 %v11716_v12, %v883_v51 }
 0x1e5   : > { %v10106_v53 = vpack.c.bf16 %v891_v50, %v890_v52  ;;  %v889_v54 = vpop.permute.xlu0 %888 }
 0x1e6   : > { %v893_v55 = vmul.f32 %v11716_v12, %v889_v54  ;;  %v887_v56 = vpop.permute.xlu1 %886 }
 0x1e7   : > { %v892_v57 = vmul.f32 %v11716_v12, %v887_v56  ;;  %10107 = vmatprep.subr.bf16.mxu1 %v10106_v53 }
 0x1e8   : > { %10109 = vmatpush3.bf16.msra.mxu1 %v10106_v53 }
 0x1e9   : > { %v10110_v58 = vpack.c.bf16 %v893_v55, %v892_v57  ;;  %v897_v59 = vpop.permute.xlu0 %896 }
 0x1ea   : > { %v895_v60 = vpop.permute.xlu1 %894  ;;  %v903_v62 = vmul.f32 %v11725_v16, %v897_v59  ;;  %v7346_v59 = vld [vmem:[%s13979_s6 + $0x28] sm:$0xff] }
 0x1eb   : > { %10111 = vmatprep.subr.bf16.mxu1 %v10110_v58  ;;  %v902_v63 = vmul.f32 %v11725_v16, %v895_v60  ;;  %v7347_v60 = vld [vmem:[%s13979_s6 + $0x30] sm:$0xff] }
 0x1ec   : > { %10113 = vmatpush3.bf16.msra.mxu1 %v10110_v58 }
 0x1ed   : > { %10115 = vmatprep.subr.bf16.mxu1 %v10114_v61  ;;  %v901_v1 = vpop.permute.xlu0 %900  ;;  %v10122_v3 = vpack.c.bf16 %v903_v62, %v902_v63 }
 0x1ee   : > { %v899_v2 = vpop.permute.xlu1 %898  ;;  %v905_v4 = vmul.f32 %v11725_v16, %v901_v1 }
 0x1ef   : > { %v904_v5 = vmul.f32 %v11725_v16, %v899_v2 }
 0x1f0   : > { %10117 = vmatpush3.bf16.msra.mxu1 %v10114_v61  ;;  %v7348_v61 = vld [vmem:[%s13979_s6 + $0x38] sm:$0xff] }
 0x1f1   : > { %10119 = vmatprep.subr.bf16.mxu1 %v10118_v0  ;;  %v10126_v6 = vpack.c.bf16 %v905_v4, %v904_v5 }
 0x1f4   : > { %10121 = vmatpush3.bf16.msra.mxu1 %v10118_v0 }
 0x1f5   : > { %10123 = vmatprep.subr.bf16.mxu1 %v10122_v3 }
 0x1f8   : > { %10125 = vmatpush3.bf16.msra.mxu1 %v10122_v3 }
 0x1f9   : > { %10127 = vmatprep.subr.bf16.mxu1 %v10126_v6 }
 0x1fc   : > { %10129 = vmatpush3.bf16.msra.mxu1 %v10126_v6 }
 0x1fe   : > { %v922_v10 = vpop.permute.xlu0 %921 }
 0x1ff   : > { %8661 = vmatmul.mubr.msk.f32.vlgmr.msra.gmra.mrb[4].mxu1 %vm934_vm2, %v907_v7  ;;  %v917_v11 = vpop.permute.xlu1 %916 }
 0x200   : > { %8663 = vmatprep.mubr.msk.f32.mxu1 %vm934_vm2, %v908_v8 }
 0x202   : > { %v932_v19 = vpop.permute.xlu0 %931 }
 0x203   : > { %8664 = vmatmul.mubr.msk.f32.gmra.mrb[6].mxu1 %vm934_vm2, %v909_v9  ;;  %v927_v22 = vpop.permute.xlu1 %926 }
 0x2d2   : > { %v8662_v13 = vpop.f32.mrb[4].mxu1 }
 0x2d3   : > { %v1019_v14 = vadd.f32 %v8662_v13, %v922_v10  ;;  %v1013_v15 = vpop.f32.mrb[5].mxu1 }
 0x2d4   : > { %v1014_v17 = vadd.f32 %v1013_v15, %v917_v11 }
 0x2d5   : > { %v1033_v18 = vmax.f32 %v1019_v14, 0.0 }
 0x2d6   : > { %v1032_v20 = vmax.f32 %v1014_v17, 0.0  ;;  %v8665_v21 = vpop.f32.mrb[6].mxu1 }
 0x2d7   : > { %v1029_v23 = vadd.f32 %v8665_v21, %v932_v19  ;;  %1038 = vrot.lane.b32.xlu0 %v1033_v18, %s13994_s30  ;;  %v1023_v24 = vpop.f32.mrb[7].mxu1  ;;  %v7357_v19 = vld [vmem:[%s13979_s6 + $0x40] sm:$0xff]  ;;  %v7364_v21 = vld [vmem:[%s13980_s7 + $0x58] sm:$0xff] }
 0x2d8   : > { %v1024_v25 = vadd.f32 %v1023_v24, %v927_v22  ;;  %1036 = vrot.lane.b32.xlu1 %v1032_v20, %s13994_s30  ;;  %v10138_v26 = vpack.c.bf16 %v1033_v18, %v1032_v20  ;;  %8720 = vmatprep.mubr.msk.f32.mxu1 %vm934_vm2, %v7357_v19  ;;  %v7363_v22 = vld [vmem:[%s13980_s7 + $0x50] sm:$0xff] }
 0x2d9   : > { %v1035_v27 = vmax.f32 %v1029_v23, 0.0 }
 0x2da   : > { %v1034_v28 = vmax.f32 %v1024_v25, 0.0 }
 0x2db   : > { %1042 = vrot.lane.b32.xlu0 %v1035_v27, %s13994_s30 }
 0x2dc   : > { %1040 = vrot.lane.b32.xlu1 %v1034_v28, %s13994_s30  ;;  %v10142_v29 = vpack.c.bf16 %v1035_v27, %v1034_v28 }
 0x2df   : > { %1050 = vrot.lane.b32.xlu0 %v1033_v18, %s13992_s22  ;;  %v7362_v18 = vld [vmem:[%s13980_s7 + $0x48] sm:$0xff] }
 0x2e0   : > { %1048 = vrot.lane.b32.xlu1 %v1032_v20, %s13992_s22  ;;  %v7361_v20 = vld [vmem:[%s13980_s7 + $0x40] sm:$0xff] }
 0x2e3   : > { %1054 = vrot.lane.b32.xlu0 %v1035_v27, %s13992_s22 }
 0x2e4   : > { %1052 = vrot.lane.b32.xlu1 %v1034_v28, %s13992_s22  ;;  %s13998_s22 = smov 124  }
 0x2e7   : > { %1077 = vperm.xlu0 %11335, %v7350_v30  }
 0x2e8   : > { %1072 = vperm.xlu1 %11334, %v7349_v32  }
 0x2eb   : > { %1087 = vperm.xlu0 %11335, %v7352_v33  }
 0x2ec   : > { %1082 = vperm.xlu1 %11334, %v7351_v36  }
 0x349   : > { %v1039_v37 = vpop.permute.xlu0 %1038 }
 0x34a   : > { %v1045_v38 = vmul.f32 %v11716_v12, %v1039_v37  ;;  %v1037_v39 = vpop.permute.xlu1 %1036 }
 0x34b   : > { %v1044_v40 = vmul.f32 %v11716_v12, %v1037_v39 }
 0x34d   : > { %v10130_v41 = vpack.c.bf16 %v1045_v38, %v1044_v40  ;;  %v1043_v44 = vpop.permute.xlu0 %1042 }
 0x34e   : > { %v1047_v45 = vmul.f32 %v11716_v12, %v1043_v44  ;;  %v1041_v46 = vpop.permute.xlu1 %1040 }
 0x34f   : > { %v1046_v47 = vmul.f32 %v11716_v12, %v1041_v46  ;;  %10131 = vmatprep.subr.bf16.mxu0 %v10130_v41 }
 0x350   : > { %10133 = vmatpush3.bf16.msra.mxu0 %v10130_v41 }
 0x351   : > { %v10134_v48 = vpack.c.bf16 %v1047_v45, %v1046_v47  ;;  %v1051_v49 = vpop.permute.xlu0 %1050  ;;  %v7358_v47 = vld [vmem:[%s13979_s6 + $0x48] sm:$0xff] }
 0x352   : > { %v1049_v50 = vpop.permute.xlu1 %1048  ;;  %v1057_v51 = vmul.f32 %v11725_v16, %v1051_v49  ;;  %v7360_v49 = vld [vmem:[%s13979_s6 + $0x58] sm:$0xff] }
 0x353   : > { %10135 = vmatprep.subr.bf16.mxu0 %v10134_v48  ;;  %v1056_v52 = vmul.f32 %v11725_v16, %v1049_v50 }
 0x354   : > { %10137 = vmatpush3.bf16.msra.mxu0 %v10134_v48  ;;  %v7359_v48 = vld [vmem:[%s13979_s6 + $0x50] sm:$0xff] }
 0x355   : > { %10139 = vmatprep.subr.bf16.mxu0 %v10138_v26  ;;  %v1055_v53 = vpop.permute.xlu0 %1054  ;;  %v10146_v55 = vpack.c.bf16 %v1057_v51, %v1056_v52 }
 0x356   : > { %v1053_v54 = vpop.permute.xlu1 %1052  ;;  %v1059_v56 = vmul.f32 %v11725_v16, %v1055_v53 }
 0x357   : > { %v1058_v57 = vmul.f32 %v11725_v16, %v1053_v54 }
 0x358   : > { %10141 = vmatpush3.bf16.msra.mxu0 %v10138_v26 }
 0x359   : > { %10143 = vmatprep.subr.bf16.mxu0 %v10142_v29  ;;  %v10150_v58 = vpack.c.bf16 %v1059_v56, %v1058_v57 }
 0x35c   : > { %10145 = vmatpush3.bf16.msra.mxu0 %v10142_v29 }
 0x35d   : > { %10147 = vmatprep.subr.bf16.mxu0 %v10146_v55 }
 0x360   : > { %10149 = vmatpush3.bf16.msra.mxu0 %v10146_v55 }
 0x361   : > { %10151 = vmatprep.subr.bf16.mxu0 %v10150_v58 }
 0x364   : > { %10153 = vmatpush3.bf16.msra.mxu0 %v10150_v58 }
 0x366   : > { %v1078_v62 = vpop.permute.xlu0 %1077 }
 0x367   : > { %8691 = vmatmul.mubr.msk.f32.vlgmr.msra.gmra.mrb[4].mxu0 %vm934_vm2, %v7346_v59  ;;  %v1073_v63 = vpop.permute.xlu1 %1072 }
 0x368   : > { %8693 = vmatprep.mubr.msk.f32.mxu0 %vm934_vm2, %v7347_v60 }
 0x36a   : > { %v1088_v5 = vpop.permute.xlu0 %1087 }
 0x36b   : > { %8694 = vmatmul.mubr.msk.f32.gmra.mrb[6].mxu0 %vm934_vm2, %v7348_v61  ;;  %v1083_v8 = vpop.permute.xlu1 %1082 }
 0x43a   : > { %v8692_v0 = vpop.f32.mrb[4].mxu0 }
 0x43b   : > { %v1174_v1 = vadd.f32 %v8692_v0, %v1078_v62  ;;  %v1168_v2 = vpop.f32.mrb[5].mxu0 }
 0x43c   : > { %v1169_v3 = vadd.f32 %v1168_v2, %v1073_v63 }
 0x43d   : > { %v1188_v4 = vmax.f32 %v1174_v1, 0.0 }
 0x43e   : > { %v1187_v6 = vmax.f32 %v1169_v3, 0.0  ;;  %v8695_v7 = vpop.f32.mrb[6].mxu0 }
 0x43f   : > { %v1184_v9 = vadd.f32 %v8695_v7, %v1088_v5  ;;  %1193 = vrot.lane.b32.xlu0 %v1188_v4, %s13994_s30  ;;  %v1178_v10 = vpop.f32.mrb[7].mxu0  ;;  %v7369_v5 = vld [vmem:[%s13979_s6 + $0x60] sm:$0xff]  ;;  %v7376_v7 = vld [vmem:[%s13980_s7 + $0x78] sm:$0xff] }
 0x440   : > { %v1179_v11 = vadd.f32 %v1178_v10, %v1083_v8  ;;  %1191 = vrot.lane.b32.xlu1 %v1187_v6, %s13994_s30  ;;  %v10162_v13 = vpack.c.bf16 %v1188_v4, %v1187_v6  ;;  %8750 = vmatprep.mubr.msk.f32.mxu0 %vm934_vm2, %v7369_v5  ;;  %v7375_v8 = vld [vmem:[%s13980_s7 + $0x70] sm:$0xff]  ;;  %v1502_v10 = vld [vmem:[%s13981_s8 + $0x8] sm:$0xff]  ;;  %v1617_v5 = vld [vmem:[%s13983_s10 + $0x40] sm:$0xff] }
 0x441   : > { %v1190_v14 = vmax.f32 %v1184_v9, 0.0  ;;  %v1501_v9 = vld [vmem:[%s13981_s8] sm:$0xff] }
 0x442   : > { %v1189_v15 = vmax.f32 %v1179_v11, 0.0  ;;  %v10202_v11 = vpack.c.bf16 %v1502_v10, %v1501_v9  ;;  %v1620_v9 = vld [vmem:[%s13983_s10 + $0x58] sm:$0xff] }
 0x443   : > { %1197 = vrot.lane.b32.xlu0 %v1190_v14, %s13994_s30 }
 0x444   : > { %1195 = vrot.lane.b32.xlu1 %v1189_v15, %s13994_s30  ;;  %v10166_v17 = vpack.c.bf16 %v1190_v14, %v1189_v15 }
 0x447   : > { %1205 = vrot.lane.b32.xlu0 %v1188_v4, %s14009_s17  ;;  %v7374_v4 = vld [vmem:[%s13980_s7 + $0x68] sm:$0xff] }
 0x448   : > { %1203 = vrot.lane.b32.xlu1 %v1187_v6, %s14009_s17  ;;  %v7373_v6 = vld [vmem:[%s13980_s7 + $0x60] sm:$0xff] }
 0x44b   : > { %1209 = vrot.lane.b32.xlu0 %v1190_v14, %s14009_s17  ;;  %v1504_v14 = vld [vmem:[%s13981_s8 + $0x18] sm:$0xff] }
 0x44c   : > { %1207 = vrot.lane.b32.xlu1 %v1189_v15, %s14009_s17 }
 0x44f   : > { %1232 = vperm.xlu0 %11335, %v7362_v18   ;;  %v1506_v18 = vld [vmem:[%s13981_s8 + $0x28] sm:$0xff] }
 0x450   : > { %1227 = vperm.xlu1 %11334, %v7361_v20   ;;  %v1507_v20 = vld [vmem:[%s13981_s8 + $0x30] sm:$0xff] }
 0x453   : > { %1242 = vperm.xlu0 %11335, %v7364_v21   ;;  %v1508_v21 = vld [vmem:[%s13981_s8 + $0x38] sm:$0xff] }
 0x454   : > { %1237 = vperm.xlu1 %11334, %v7363_v22   ;;  %v10214_v22 = vpack.c.bf16 %v1508_v21, %v1507_v20  ;;  %v1624_v20 = vld [vmem:[%s13983_s10 + $0x78] sm:$0xff] }
 0x4b1   : > { %v1194_v23 = vpop.permute.xlu0 %1193 }
 0x4b2   : > { %v1200_v24 = vmul.f32 %v11716_v12, %v1194_v23  ;;  %v1192_v25 = vpop.permute.xlu1 %1191  ;;  %v1509_v23 = vld [vmem:[%s13981_s8 + $0x40] sm:$0xff] }
 0x4b3   : > { %v1199_v26 = vmul.f32 %v11716_v12, %v1192_v25 }
 0x4b5   : > { %v10154_v27 = vpack.c.bf16 %v1200_v24, %v1199_v26  ;;  %v1198_v28 = vpop.permute.xlu0 %1197  ;;  %v1510_v24 = vld [vmem:[%s13981_s8 + $0x48] sm:$0xff]  ;;  %v1511_v26 = vld [vmem:[%s13981_s8 + $0x50] sm:$0xff] }
 0x4b6   : > { %v1202_v29 = vmul.f32 %v11716_v12, %v1198_v28  ;;  %v1196_v30 = vpop.permute.xlu1 %1195  ;;  %v10218_v25 = vpack.c.bf16 %v1510_v24, %v1509_v23 }
 0x4b7   : > { %v1201_v31 = vmul.f32 %v11716_v12, %v1196_v30  ;;  %10155 = vmatprep.subr.bf16.mxu1 %v10154_v27  ;;  %v1514_v30 = vld [vmem:[%s13981_s8 + $0x68] sm:$0xff] }
 0x4b8   : > { %10157 = vmatpush3.bf16.msra.mxu1 %v10154_v27  ;;  %v1512_v27 = vld [vmem:[%s13981_s8 + $0x58] sm:$0xff] }
 0x4b9   : > { %v10158_v32 = vpack.c.bf16 %v1202_v29, %v1201_v31  ;;  %v1206_v33 = vpop.permute.xlu0 %1205  ;;  %v10222_v28 = vpack.c.bf16 %v1512_v27, %v1511_v26  ;;  %v1513_v29 = vld [vmem:[%s13981_s8 + $0x60] sm:$0xff] }
 0x4ba   : > { %v1204_v36 = vpop.permute.xlu1 %1203  ;;  %v1212_v37 = vmul.f32 %v11725_v16, %v1206_v33  ;;  %v10226_v31 = vpack.c.bf16 %v1514_v30, %v1513_v29 }
 0x4bb   : > { %10159 = vmatprep.subr.bf16.mxu1 %v10158_v32  ;;  %v1211_v38 = vmul.f32 %v11725_v16, %v1204_v36 }
 0x4bc   : > { %10161 = vmatpush3.bf16.msra.mxu1 %v10158_v32 }
 0x4bd   : > { %10163 = vmatprep.subr.bf16.mxu1 %v10162_v13  ;;  %v1210_v39 = vpop.permute.xlu0 %1209  ;;  %v10170_v41 = vpack.c.bf16 %v1212_v37, %v1211_v38 }
 0x4be   : > { %v1208_v40 = vpop.permute.xlu1 %1207  ;;  %v1214_v44 = vmul.f32 %v11725_v16, %v1210_v39 }
 0x4bf   : > { %v1213_v45 = vmul.f32 %v11725_v16, %v1208_v40 }
 0x4c0   : > { %10165 = vmatpush3.bf16.msra.mxu1 %v10162_v13  ;;  %v1503_v13 = vld [vmem:[%s13981_s8 + $0x10] sm:$0xff] }
 0x4c1   : > { %10167 = vmatprep.subr.bf16.mxu1 %v10166_v17  ;;  %v10174_v46 = vpack.c.bf16 %v1214_v44, %v1213_v45  ;;  %v10206_v15 = vpack.c.bf16 %v1504_v14, %v1503_v13  ;;  %v1622_v13 = vld [vmem:[%s13983_s10 + $0x68] sm:$0xff] }
 0x4c4   : > { %10169 = vmatpush3.bf16.msra.mxu1 %v10166_v17  ;;  %v1505_v17 = vld [vmem:[%s13981_s8 + $0x20] sm:$0xff] }
 0x4c5   : > { %10171 = vmatprep.subr.bf16.mxu1 %v10170_v41  ;;  %v10210_v19 = vpack.c.bf16 %v1506_v18, %v1505_v17  ;;  %v1516_v17 = vld [vmem:[%s13981_s8 + $0x78] sm:$0xff]  ;;  %v1623_v18 = vld [vmem:[%s13983_s10 + $0x70] sm:$0xff] }
 0x4c6   : > { %v10262_v21 = vpack.c.bf16 %v1624_v20, %v1623_v18  ;;  %v508_v18 = vld [vmem:[%s14011_s3 + $0x48] sm:$0xff]  ;;  %v509_v20 = vld [vmem:[%s14011_s3 + $0x50] sm:$0xff] }
 0x4c8   : > { %10173 = vmatpush3.bf16.msra.mxu1 %v10170_v41 }
 0x4c9   : > { %10175 = vmatprep.subr.bf16.mxu1 %v10174_v46 }
 0x4cc   : > { %10177 = vmatpush3.bf16.msra.mxu1 %v10174_v46 }
 0x4cd   : > { %10203 = vmatprep.subr.bf16.mxu1 %v10202_v11 }
 0x4ce   : > { %v1233_v50 = vpop.permute.xlu0 %1232 }
 0x4cf   : > { %8721 = vmatmul.mubr.msk.f32.vlgmr.msra.gmra.mrb[8].mxu1 %vm934_vm2, %v7358_v47  ;;  %v1228_v51 = vpop.permute.xlu1 %1227 }
 0x4d0   : > { %8723 = vmatprep.mubr.msk.f32.mxu1 %vm934_vm2, %v7359_v48  ;;  %10205 = vmatpush3.bf16.msra.mxu1 %v10202_v11  ;;  %v1621_v11 = vld [vmem:[%s13983_s10 + $0x60] sm:$0xff] }
 0x4d1   : > { %10207 = vmatprep.subr.bf16.mxu1 %v10206_v15  ;;  %v10258_v14 = vpack.c.bf16 %v1622_v13, %v1621_v11  ;;  %v505_v13 = vld [vmem:[%s14011_s3 + $0x30] sm:$0xff] }
 0x4d2   : > { %v1243_v57 = vpop.permute.xlu0 %1242 }
 0x4d3   : > { %8724 = vmatmul.mubr.msk.f32.gmra.mrb[10].mxu1 %vm934_vm2, %v7360_v49  ;;  %v1238_v60 = vpop.permute.xlu1 %1237 }
 0x4d4   : > { %10209 = vmatpush3.bf16.msra.mxu1 %v10206_v15  ;;  %v1515_v15 = vld [vmem:[%s13981_s8 + $0x70] sm:$0xff] }
 0x4d5   : > { %10211 = vmatprep.subr.bf16.mxu1 %v10210_v19 }
 0x4d8   : > { %10213 = vmatpush3.bf16.msra.mxu1 %v10210_v19  ;;  %v10230_v19 = vpack.c.bf16 %v1516_v17, %v1515_v15  ;;  %v507_v17 = vld [vmem:[%s14011_s3 + $0x40] sm:$0xff] }
 0x4d9   : > { %10215 = vmatprep.subr.bf16.mxu1 %v10214_v22 }
 0x4dc   : > { %10217 = vmatpush3.bf16.msra.mxu1 %v10214_v22 }
 0x4dd   : > { %10219 = vmatprep.subr.bf16.mxu1 %v10218_v25 }
 0x4e0   : > { %10221 = vmatpush3.bf16.msra.mxu1 %v10218_v25 }
 0x4e1   : > { %10223 = vmatprep.subr.bf16.mxu1 %v10222_v28 }
 0x4e4   : > { %10225 = vmatpush3.bf16.msra.mxu1 %v10222_v28 }
 0x4e5   : > { %10227 = vmatprep.subr.bf16.mxu1 %v10226_v31 }
 0x4e8   : > { %10229 = vmatpush3.bf16.msra.mxu1 %v10226_v31 }
 0x4e9   : > { %10231 = vmatprep.subr.bf16.mxu1 %v10230_v19 }
 0x4ec   : > { %10233 = vmatpush3.bf16.msra.mxu1 %v10230_v19  ;;  %v12113_v19 = vpack.c.bf16 %v508_v18, %v507_v17 }
 0x5a2   : > { %v8722_v52 = vpop.f32.mrb[8].mxu1 }
 0x5a3   : > { %v1329_v53 = vadd.f32 %v8722_v52, %v1233_v50  ;;  %v1323_v54 = vpop.f32.mrb[9].mxu1 }
 0x5a4   : > { %v1324_v55 = vadd.f32 %v1323_v54, %v1228_v51  ;;  %v1609_v54 = vld [vmem:[%s13983_s10] sm:$0xff] }
 0x5a5   : > { %v1343_v56 = vmax.f32 %v1329_v53, 0.0 }
 0x5a6   : > { %v1342_v58 = vmax.f32 %v1324_v55, 0.0  ;;  %v8725_v59 = vpop.f32.mrb[10].mxu1  ;;  %v1610_v55 = vld [vmem:[%s13983_s10 + $0x8] sm:$0xff] }
 0x5a7   : > { %v1339_v61 = vadd.f32 %v8725_v59, %v1243_v57  ;;  %1348 = vrot.lane.b32.xlu0 %v1343_v56, %s14010_s28  ;;  %v1333_v62 = vpop.f32.mrb[11].mxu1  ;;  %v10234_v57 = vpack.c.bf16 %v1610_v55, %v1609_v54  ;;  %v7370_v59 = vld [vmem:[%s13979_s6 + $0x68] sm:$0xff] }
 0x5a8   : > { %v1334_v63 = vadd.f32 %v1333_v62, %v1238_v60  ;;  %1346 = vrot.lane.b32.xlu1 %v1342_v58, %s14010_s28  ;;  %v11907_v0 = vpack.c.bf16 %v1343_v56, %v1342_v58  ;;  %v7371_v60 = vld [vmem:[%s13979_s6 + $0x70] sm:$0xff]  ;;  %v1613_v62 = vld [vmem:[%s13983_s10 + $0x20] sm:$0xff] }
 0x5a9   : > { %v1345_v1 = vmax.f32 %v1339_v61, 0.0 }
 0x5aa   : > { %v1344_v2 = vmax.f32 %v1334_v63, 0.0  ;;  %v1614_v63 = vld [vmem:[%s13983_s10 + $0x28] sm:$0xff] }
 0x5ab   : > { %1352 = vrot.lane.b32.xlu0 %v1345_v1, %s14010_s28 }
 0x5ac   : > { %1350 = vrot.lane.b32.xlu1 %v1344_v2, %s14010_s28  ;;  %v11911_v3 = vpack.c.bf16 %v1345_v1, %v1344_v2 }
 0x5af   : > { %1360 = vrot.lane.b32.xlu0 %v1343_v56, %s14009_s17 }
 0x5b0   : > { %1358 = vrot.lane.b32.xlu1 %v1342_v58, %s14009_s17  ;;  %v1611_v58 = vld [vmem:[%s13983_s10 + $0x10] sm:$0xff] }
 0x5b3   : > { %1364 = vrot.lane.b32.xlu0 %v1345_v1, %s14009_s17  ;;  %v10242_v1 = vpack.c.bf16 %v1614_v63, %v1613_v62 }
 0x5b4   : > { %1362 = vrot.lane.b32.xlu1 %v1344_v2, %s14009_s17  ;;  %v1615_v2 = vld [vmem:[%s13983_s10 + $0x30] sm:$0xff] }
 0x5b7   : > { %1387 = vperm.xlu0 %11335, %v7374_v4  }
 0x5b8   : > { %1382 = vperm.xlu1 %11334, %v7373_v6   ;;  %v1618_v6 = vld [vmem:[%s13983_s10 + $0x48] sm:$0xff] }
 0x5bb   : > { %1397 = vperm.xlu0 %11335, %v7376_v7   ;;  %v10250_v7 = vpack.c.bf16 %v1618_v6, %v1617_v5  ;;  %v501_v5 = vld [vmem:[%s14011_s3 + $0x10] sm:$0xff] }
 0x5bc   : > { %1392 = vperm.xlu1 %11334, %v7375_v8   ;;  %v1619_v8 = vld [vmem:[%s13983_s10 + $0x50] sm:$0xff] }
 0x5bd   : > { %v10254_v10 = vpack.c.bf16 %v1620_v9, %v1619_v8  ;;  %v503_v9 = vld [vmem:[%s14011_s3 + $0x20] sm:$0xff] }
 0x619   : > { %v1349_v32 = vpop.permute.xlu0 %1348 }
 0x61a   : > { %v1355_v33 = vmul.f32 %v11716_v12, %v1349_v32  ;;  %v1347_v36 = vpop.permute.xlu1 %1346 }
 0x61b   : > { %v1354_v37 = vmul.f32 %v11716_v12, %v1347_v36 }
 0x61d   : > { %v10178_v38 = vpack.c.bf16 %v1355_v33, %v1354_v37  ;;  %v1353_v39 = vpop.permute.xlu0 %1352 }
 0x61e   : > { %v1357_v40 = vmul.f32 %v11716_v12, %v1353_v39  ;;  %v1351_v41 = vpop.permute.xlu1 %1350 }
 0x61f   : > { %v1356_v44 = vmul.f32 %v11716_v12, %v1351_v41  ;;  %10179 = vmatprep.subr.bf16.mxu0 %v10178_v38 }
 0x620   : > { %10181 = vmatpush3.bf16.msra.mxu0 %v10178_v38 }
 0x621   : > { %v10182_v45 = vpack.c.bf16 %v1357_v40, %v1356_v44  ;;  %v1361_v46 = vpop.permute.xlu0 %1360  ;;  %v7382_v40 = vld [vmem:[%s13984_s11] ss:$0 sm:$0xff] }
 0x622   : > { %v1359_v47 = vpop.permute.xlu1 %1358  ;;  %v1367_v48 = vmul.f32 %v11725_v16, %v1361_v46 }
 0x623   : > { %10183 = vmatprep.subr.bf16.mxu0 %v10182_v45  ;;  %v1366_v49 = vmul.f32 %v11725_v16, %v1359_v47 }
 0x624   : > { %10185 = vmatpush3.bf16.msra.mxu0 %v10182_v45 }
 0x625   : > { %10187 = vmatprep.subr.bf16.mxu0 %v11907_v0  ;;  %v1365_v50 = vpop.permute.xlu0 %1364  ;;  %v10194_v12 = vpack.c.bf16 %v1367_v48, %v1366_v49 }
 0x626   : > { %v1363_v51 = vpop.permute.xlu1 %1362  ;;  %v1369_v52 = vmul.f32 %v11725_v16, %v1365_v50 }
 0x627   : > { %v1368_v53 = vmul.f32 %v11725_v16, %v1363_v51  ;;  %v1612_v16 = vld [vmem:[%s13983_s10 + $0x18] sm:$0xff] }
 0x628   : > { %10189 = vmatpush3.bf16.msra.mxu0 %v11907_v0  ;;  %v10238_v61 = vpack.c.bf16 %v1612_v16, %v1611_v58  ;;  %v7372_v0 = vld [vmem:[%s13979_s6 + $0x78] sm:$0xff] }
 0x629   : > { %10191 = vmatprep.subr.bf16.mxu0 %v11911_v3  ;;  %v10198_v56 = vpack.c.bf16 %v1369_v52, %v1368_v53 }
 0x62c   : > { %10193 = vmatpush3.bf16.msra.mxu0 %v11911_v3  ;;  %v1616_v3 = vld [vmem:[%s13983_s10 + $0x38] sm:$0xff] }
 0x62d   : > { %10195 = vmatprep.subr.bf16.mxu0 %v10194_v12  ;;  %v10246_v4 = vpack.c.bf16 %v1616_v3, %v1615_v2  ;;  %v499_v3 = vld [vmem:[%s14011_s3] sm:$0xff] }
 0x630   : > { %10197 = vmatpush3.bf16.msra.mxu0 %v10194_v12 }
 0x631   : > { %10199 = vmatprep.subr.bf16.mxu0 %v10198_v56 }
 0x634   : > { %10201 = vmatpush3.bf16.msra.mxu0 %v10198_v56 }
 0x635   : > { %10235 = vmatprep.subr.bf16.mxu0 %v10234_v57 }
 0x636   : > { %v1388_v22 = vpop.permute.xlu0 %1387 }
 0x637   : > { %8751 = vmatmul.mubr.msk.f32.vlgmr.msra.gmra.mrb[8].mxu0 %vm934_vm2, %v7370_v59  ;;  %v1383_v23 = vpop.permute.xlu1 %1382 }
 0x638   : > { %8753 = vmatprep.mubr.msk.f32.mxu0 %vm934_vm2, %v7371_v60  ;;  %10237 = vmatpush3.bf16.msra.mxu0 %v10234_v57 }
 0x639   : > { %10239 = vmatprep.subr.bf16.mxu0 %v10238_v61 }
 0x63a   : > { %v1398_v28 = vpop.permute.xlu0 %1397 }
 0x63b   : > { %8754 = vmatmul.mubr.msk.f32.gmra.mrb[10].mxu0 %vm934_vm2, %v7372_v0  ;;  %v1393_v31 = vpop.permute.xlu1 %1392 }
 0x63c   : > { %10241 = vmatpush3.bf16.msra.mxu0 %v10238_v61 }
 0x63d   : > { %10243 = vmatprep.subr.bf16.mxu0 %v10242_v1 }
 0x640   : > { %10245 = vmatpush3.bf16.msra.mxu0 %v10242_v1 }
 0x641   : > { %10247 = vmatprep.subr.bf16.mxu0 %v10246_v4 }
 0x644   : > { %10249 = vmatpush3.bf16.msra.mxu0 %v10246_v4  ;;  %v500_v4 = vld [vmem:[%s14011_s3 + $0x8] sm:$0xff] }
 0x645   : > { %10251 = vmatprep.subr.bf16.mxu0 %v10250_v7  ;;  %v12077_v6 = vpack.c.bf16 %v500_v4, %v499_v3 }
 0x647   : > { %10267 = vmatprep.subr.bf16.mxu1 %v12077_v6 }
 0x648   : > { %10253 = vmatpush3.bf16.msra.mxu0 %v10250_v7  ;;  %v502_v7 = vld [vmem:[%s14011_s3 + $0x18] sm:$0xff] }
 0x649   : > { %10255 = vmatprep.subr.bf16.mxu0 %v10254_v10  ;;  %v12082_v8 = vpack.c.bf16 %v502_v7, %v501_v5  ;;  %v12203_v5 = vld [vmem:[%s13974_s1] ss:$0 sm:$0xff] }
 0x64c   : > { %10257 = vmatpush3.bf16.msra.mxu0 %v10254_v10  ;;  %v504_v10 = vld [vmem:[%s14011_s3 + $0x28] sm:$0xff] }
 0x64d   : > { %10259 = vmatprep.subr.bf16.mxu0 %v10258_v14  ;;  %v12093_v11 = vpack.c.bf16 %v504_v10, %v503_v9 }
 0x650   : > { %10261 = vmatpush3.bf16.msra.mxu0 %v10258_v14  ;;  %v506_v14 = vld [vmem:[%s14011_s3 + $0x38] sm:$0xff] }
 0x651   : > { %10263 = vmatprep.subr.bf16.mxu0 %v10262_v21  ;;  %v12103_v15 = vpack.c.bf16 %v506_v14, %v505_v13 }
 0x654   : > { %10265 = vmatpush3.bf16.msra.mxu0 %v10262_v21  ;;  %v510_v21 = vld [vmem:[%s14011_s3 + $0x58] sm:$0xff] }
 0x70a   : > { %v8752_v24 = vpop.f32.mrb[8].mxu0 }
 0x70b   : > { %v1484_v25 = vadd.f32 %v8752_v24, %v1388_v22  ;;  %v1478_v26 = vpop.f32.mrb[9].mxu0  ;;  %v12123_v22 = vpack.c.bf16 %v510_v21, %v509_v20  ;;  %v512_v24 = vld [vmem:[%s14011_s3 + $0x68] sm:$0xff] }
 0x70c   : > { %v1479_v27 = vadd.f32 %v1478_v26, %v1383_v23  ;;  %v511_v23 = vld [vmem:[%s14011_s3 + $0x60] sm:$0xff]  ;;  %v513_v26 = vld [vmem:[%s14011_s3 + $0x70] sm:$0xff] }
 0x70d   : > { %v1498_v32 = vmax.f32 %v1484_v25, 0.0  ;;  %v12133_v25 = vpack.c.bf16 %v512_v24, %v511_v23  ;;  %v1838_v23 = vld [vmem:[%s13985_s12] sm:$0xff] }
 0x70e   : > { %v1497_v29 = vmax.f32 %v1479_v27, 0.0  ;;  %v8755_v30 = vpop.f32.mrb[10].mxu0  ;;  %v514_v27 = vld [vmem:[%s14011_s3 + $0x78] sm:$0xff] }
 0x70f   : > { %v1494_v33 = vadd.f32 %v8755_v30, %v1398_v28  ;;  %v1488_v36 = vpop.f32.mrb[11].mxu0  ;;  %v12144_v28 = vpack.c.bf16 %v514_v27, %v513_v26  ;;  %v7384_v26 = vld [vmem:[%s13979_s6 + $0x80] sm:$0xff] }
 0x710   : > { %v1489_v37 = vadd.f32 %v1488_v36, %v1393_v31  ;;  %8788 = vmatprep.mubr.f32.mxu1 %v1497_v29  ;;  %8826 = vmatprep.mubr.f32.mxu0 %v1497_v29 }
 0x711   : > { %8789 = vmatmul.mubr.f32.vlgmr.msra.gmra.mrb[12].mxu1 %v1498_v32  ;;  %8827 = vmatmul.mubr.f32.vlgmr.msra.gmra.mrb[12].mxu0 %v1498_v32  ;;  %v1500_v39 = vmax.f32 %v1494_v33, 0.0  ;;  %v7381_v32 = vld [vmem:[%s13982_s9] ss:$0 sm:$0xff] }
 0x712   : > { %v1499_v38 = vmax.f32 %v1489_v37, 0.0  ;;  %10269 = vmatpush3.bf16.msra.mxu1 %v12077_v6 }
 0x713   : > { %10271 = vmatprep.subr.bf16.mxu1 %v12082_v8 }
 0x714   : > { %8791 = vmatprep.mubr.f32.mxu1 %v1499_v38  ;;  %8829 = vmatprep.mubr.f32.mxu0 %v1499_v38 }
 0x715   : > { %8792 = vmatmul.mubr.f32.gmra.mrb[14].mxu1 %v1500_v39  ;;  %8830 = vmatmul.mubr.f32.gmra.mrb[14].mxu0 %v1500_v39 }
 0x716   : > { %10273 = vmatpush3.bf16.msra.mxu1 %v12082_v8 }
 0x717   : > { %10275 = vmatprep.subr.bf16.mxu1 %v12093_v11 }
 0x71a   : > { %10277 = vmatpush3.bf16.msra.mxu1 %v12093_v11 }
 0x71b   : > { %10279 = vmatprep.subr.bf16.mxu1 %v12103_v15 }
 0x71e   : > { %10281 = vmatpush3.bf16.msra.mxu1 %v12103_v15 }
 0x71f   : > { %10283 = vmatprep.subr.bf16.mxu1 %v12113_v19 }
 0x722   : > { %10285 = vmatpush3.bf16.msra.mxu1 %v12113_v19 }
 0x723   : > { %10287 = vmatprep.subr.bf16.mxu1 %v12123_v22 }
 0x726   : > { %10289 = vmatpush3.bf16.msra.mxu1 %v12123_v22 }
 0x727   : > { %10291 = vmatprep.subr.bf16.mxu1 %v12133_v25 }
 0x72a   : > { %10293 = vmatpush3.bf16.msra.mxu1 %v12133_v25 }
 0x72b   : > { %10295 = vmatprep.subr.bf16.mxu1 %v12144_v28 }
 0x72e   : > { %10297 = vmatpush3.bf16.msra.mxu1 %v12144_v28 }
 0x7e4   : > { %v12056_v41 = vpop.f32.mrb[12].mxu1  ;;  %v8828_v44 = vpop.f32.mrb[12].mxu0 }
 0x7e5   : > { %v1704_v45 = vadd.f32 %v8828_v44, %v7382_v40  ;;  %v12058_v46 = vpop.f32.mrb[13].mxu1  ;;  %v1698_v47 = vpop.f32.mrb[13].mxu0 }
 0x7e6   : > { %v1699_v48 = vadd.f32 %v7382_v40, %v1698_v47  ;;  %v1591_v38 = vadd.f32 %v7381_v32, %v12058_v46 }
 0x7e8   : > { %v11336_v49 = vpack.i.bf16 %v1704_v45, %v1699_v48  ;;  %v12060_v50 = vpop.f32.mrb[14].mxu1  ;;  %v8831_v51 = vpop.f32.mrb[14].mxu0 }
 0x7e9   : > { %v1714_v12 = vadd.f32 %v8831_v51, %v7382_v40  ;;  %v12062_v52 = vpop.f32.mrb[15].mxu1  ;;  %v1708_v53 = vpop.f32.mrb[15].mxu0 }
 0x7ea   : > { %v1709_v54 = vadd.f32 %v7382_v40, %v1708_v53  ;;  %11337 = vrot.lane.b32.xlu1 %v11336_v49, %s14009_s17  ;;  %v12155_v49 = vsub.f32 %v11755_v35, %v1591_v38  ;;  %v1601_v51 = vadd.f32 %v7381_v32, %v12062_v52  ;;  %v1606_v53 = vadd.f32 %v12060_v50, %v7381_v32 }
 0x7ec   : > { %v11341_v55 = vpack.i.bf16 %v1714_v12, %v1709_v54  ;;  %v12173_v35 = vsub.f32 %v11761_v42, %v1606_v53  ;;  %v7389_v42 = vld [vmem:[%s13980_s7 + $0x88] sm:$0xff] }
 0x7ee   : > { %11342 = vrot.lane.b32.xlu0 %v11341_v55, %s14009_s17 }
 0x85c   : > { %v11338_v56 = vpop.permute.xlu1 %11337 }
 0x85d   : > { %v11340_v57 = vunpack.i.h.bf16 %v11338_v56  ;;  %v11339_v58 = vunpack.i.l.bf16 %v11338_v56 }
 0x85f   : > { %v1726_v16 = vmax.f32 %v1704_v45, %v11340_v57  ;;  %v1725_v59 = vmax.f32 %v1699_v48, %v11339_v58  ;;  %v1596_v48 = vadd.f32 %v12056_v41, %v7381_v32  ;;  %v7391_v41 = vld [vmem:[%s13980_s7 + $0x98] sm:$0xff]  ;;  %v12223_v32 = vld [vmem:[%s13975_s2] ss:$0 sm:$0xff] }
 0x860   : > { %v11343_v60 = vpop.permute.xlu0 %11342 }
 0x861   : > { %v11345_v61 = vunpack.i.h.bf16 %v11343_v60  ;;  %v11344_v62 = vunpack.i.l.bf16 %v11343_v60  ;;  %v11346_v63 = vpack.i.bf16 %v1726_v16, %v1725_v59  ;;  %v12162_v46 = vsub.f32 %v11753_v34, %v1596_v48  ;;  %v7388_v34 = vld [vmem:[%s13980_s7 + $0x80] sm:$0xff]  ;;  %v7385_v48 = vld [vmem:[%s13979_s6 + $0x88] sm:$0xff] }
 0x863   : > { %v1728_v0 = vmax.f32 %v1714_v12, %v11345_v61  ;;  %v1727_v1 = vmax.f32 %v1709_v54, %v11344_v62  ;;  %11347 = vrot.lane.b32.xlu1 %v11346_v63, %s13996_s25  ;;  %v12166_v54 = vsub.f32 %v11763_v43, %v1601_v51  ;;  %v7390_v43 = vld [vmem:[%s13980_s7 + $0x90] sm:$0xff]  ;;  %v11553_v62 = vmov 0.0|0.0  }
 0x864   : > { %10298 = vmatprep.subr.bf16.mxu0 %v11553_v62  ;;  %v11555_v63 = vmov 0.0   ;;  %v7386_v51 = vld [vmem:[%s13979_s6 + $0x90] sm:$0xff] }
 0x865   : > { %v11351_v2 = vpack.i.bf16 %v1728_v0, %v1727_v1  ;;  %8878 = vmatprep.mubr.msk.f32.mxu0 %vm11554_vm3, %v11555_v63 }
 0x867   : > { %11352 = vrot.lane.b32.xlu0 %v11351_v2, %s13996_s25  ;;  %s14013_s25 = smov 124  }
 0x8d5   : > { %v11348_v29 = vpop.permute.xlu1 %11347 }
 0x8d6   : > { %v11350_v30 = vunpack.i.h.bf16 %v11348_v29  ;;  %v11349_v31 = vunpack.i.l.bf16 %v11348_v29 }
 0x8d8   : > { %v1738_v33 = vmax.f32 %v1726_v16, %v11350_v30  ;;  %v1737_v36 = vmax.f32 %v1725_v59, %v11349_v31  ;;  %v10312_v30 = vpack.c.bf16 %v12162_v46, %v12155_v49 }
 0x8d9   : > { %v11353_v37 = vpop.permute.xlu0 %11352 }
 0x8da   : > { %v11355_v39 = vunpack.i.h.bf16 %v11353_v37  ;;  %v11354_v40 = vunpack.i.l.bf16 %v11353_v37  ;;  %v11356_v44 = vpack.i.bf16 %v1738_v33, %v1737_v36 }
 0x8dc   : > { %v1740_v45 = vmax.f32 %v1728_v0, %v11355_v39  ;;  %v1739_v47 = vmax.f32 %v1727_v1, %v11354_v40  ;;  %11357 = vrot.lane.b32.xlu1 %v11356_v44, %s13998_s22 }
 0x8de   : > { %v11361_v12 = vpack.i.bf16 %v1740_v45, %v1739_v47 }
 0x8e0   : > { %11362 = vrot.lane.b32.xlu0 %v11361_v12, %s13998_s22  ;;  %1923 = vrot.lane.b32.xlu1 %v12155_v49, %s14010_s28  ;;  %v7387_v12 = vld [vmem:[%s13979_s6 + $0x98] sm:$0xff] }
 0x8e4   : > { %1925 = vrot.lane.b32.xlu0 %v12162_v46, %s14010_s28  ;;  %1927 = vrot.lane.b32.xlu1 %v12166_v54, %s14010_s28 }
 0x8e8   : > { %1929 = vrot.lane.b32.xlu0 %v12173_v35, %s14010_s28  ;;  %1935 = vrot.lane.b32.xlu1 %v12155_v49, %s14009_s17 }
 0x8ec   : > { %1937 = vrot.lane.b32.xlu0 %v12162_v46, %s14009_s17  ;;  %1939 = vrot.lane.b32.xlu1 %v12166_v54, %s14009_s17 }
 0x8f0   : > { %1941 = vrot.lane.b32.xlu0 %v12173_v35, %s14009_s17  ;;  %1959 = vperm.xlu1 %11334, %v7388_v34  }
 0x8f4   : > { %1964 = vperm.xlu0 %11335, %v7389_v42   ;;  %1969 = vperm.xlu1 %11334, %v7390_v43  }
 0x8f8   : > { %1974 = vperm.xlu0 %11335, %v7391_v41  }
 0x94e   : > { %v11358_v50 = vpop.permute.xlu1 %11357 }
 0x94f   : > { %v11360_v52 = vunpack.i.h.bf16 %v11358_v50  ;;  %v11359_v55 = vunpack.i.l.bf16 %v11358_v50 }
 0x951   : > { %v1750_v56 = vmax.f32 %v1738_v33, %v11360_v52  ;;  %v1749_v57 = vmax.f32 %v1737_v36, %v11359_v55  ;;  %v10316_v36 = vpack.c.bf16 %v12173_v35, %v12166_v54 }
 0x952   : > { %v11363_v58 = vpop.permute.xlu0 %11362  ;;  %v1924_v1 = vpop.permute.xlu1 %1923 }
 0x953   : > { %v11365_v16 = vunpack.i.h.bf16 %v11363_v58  ;;  %v11364_v59 = vunpack.i.l.bf16 %v11363_v58  ;;  %8864 = vmatprep.mubr.f32.mxu1 %v1749_v57  ;;  %v1931_v13 = vmul.f32 %v12203_v5, %v1924_v1 }
 0x954   : > { %8865 = vmatmul.mubr.f32.vlgmr.msra.gmra.mrb[16].mxu1 %v1750_v56 }
 0x955   : > { %v1751_v60 = vmax.f32 %v1739_v47, %v11364_v59  ;;  %v1752_v61 = vmax.f32 %v1740_v45, %v11365_v16 }
 0x956   : > { %v1926_v0 = vpop.permute.xlu0 %1925  ;;  %v1928_v17 = vpop.permute.xlu1 %1927 }
 0x957   : > { %8867 = vmatprep.mubr.f32.mxu1 %v1751_v60  ;;  %v1932_v7 = vmul.f32 %v12203_v5, %v1926_v0  ;;  %v1933_v24 = vmul.f32 %v12203_v5, %v1928_v17 }
 0x958   : > { %8868 = vmatmul.mubr.f32.gmra.mrb[18].mxu1 %v1752_v61 }
 0x959   : > { %v10304_v20 = vpack.c.bf16 %v1932_v7, %v1931_v13  ;;  %v7401_v7 = vld [vmem:[%s13980_s7 + $0xa8] sm:$0xff]  ;;  %v7403_v13 = vld [vmem:[%s13980_s7 + $0xb8] sm:$0xff] }
 0x95a   : > { %v1930_v9 = vpop.permute.xlu0 %1929  ;;  %v1936_v31 = vpop.permute.xlu1 %1935 }
 0x95b   : > { %v1934_v21 = vmul.f32 %v12203_v5, %v1930_v9  ;;  %v1943_v38 = vmul.f32 %v12223_v32, %v1936_v31  ;;  %v7396_v9 = vld [vmem:[%s13979_s6 + $0xa0] sm:$0xff] }
 0x95c   : > { %8935 = vmatprep.mubr.msk.f32.mxu1 %vm934_vm2, %v7396_v9  ;;  %v7412_v9 = vld [vmem:[%s13980_s7 + $0xc0] sm:$0xff] }
 0x95d   : > { %v10308_v27 = vpack.c.bf16 %v1934_v21, %v1933_v24 }
 0x95e   : > { %v1938_v29 = vpop.permute.xlu0 %1937  ;;  %v1940_v39 = vpop.permute.xlu1 %1939 }
 0x95f   : > { %v1944_v33 = vmul.f32 %v12223_v32, %v1938_v29  ;;  %v1945_v45 = vmul.f32 %v12223_v32, %v1940_v39 }
 0x961   : > { %v10320_v40 = vpack.c.bf16 %v1944_v33, %v1943_v38 }
 0x962   : > { %v1942_v37 = vpop.permute.xlu0 %1941 }
 0x963   : > { %v1946_v44 = vmul.f32 %v12223_v32, %v1942_v37 }
 0x965   : > { %v10324_v47 = vpack.c.bf16 %v1946_v44, %v1945_v45 }
 0x96f   : > { %v1960_v43 = vpop.permute.xlu1 %1959 }
 0x973   : > { %v1965_v42 = vpop.permute.xlu0 %1964  ;;  %v1970_v59 = vpop.permute.xlu1 %1969 }
 0x977   : > { %v1975_v57 = vpop.permute.xlu0 %1974 }
 0xa27   : > { %v8866_v2 = vpop.f32.mrb[16].mxu1 }
 0xa28   : > { %v1819_v3 = vpop.f32.mrb[17].mxu1 }
 0xa29   : > { %v10299_v4 = vpack.c.bf16 %v8866_v2, %v1819_v3 }
 0xa2b   : > { %v8869_v10 = vpop.f32.mrb[18].mxu1  ;;  %10300 = vmatpush3.bf16.msra.mxu0 %v10299_v4 }
 0xa2c   : > { %v1829_v14 = vpop.f32.mrb[19].mxu1  ;;  %10301 = vmatprep.subr.bf16.mxu0 %v11553_v62 }
 0xa2d   : > { %v10302_v18 = vpack.c.bf16 %v8869_v10, %v1829_v14  ;;  %v7400_v10 = vld [vmem:[%s13980_s7 + $0xa0] sm:$0xff]  ;;  %v7402_v14 = vld [vmem:[%s13980_s7 + $0xb0] sm:$0xff] }
 0xa2f   : > { %10303 = vmatpush3.bf16.msra.mxu0 %v10302_v18 }
 0xa30   : > { %10305 = vmatprep.subr.bf16.mxu0 %v10304_v20 }
 0xa32   : > { %8879 = vmatmul.mubr.msk.f32.vlgmr.msra.gmra.mrb[16].mxu0 %vm1845_vm4, %v1838_v23 }
 0xa33   : > { %10307 = vmatpush3.bf16.msra.mxu0 %v10304_v20  ;;  %8905 = vmatprep.mubr.msk.f32.mxu0 %vm934_vm2, %v7384_v26 }
 0xa34   : > { %10309 = vmatprep.subr.bf16.mxu0 %v10308_v27 }
 0xa37   : > { %10311 = vmatpush3.bf16.msra.mxu0 %v10308_v27 }
 0xa38   : > { %10313 = vmatprep.subr.bf16.mxu0 %v10312_v30 }
 0xa3b   : > { %10315 = vmatpush3.bf16.msra.mxu0 %v10312_v30 }
 0xa3c   : > { %10317 = vmatprep.subr.bf16.mxu0 %v10316_v36 }
 0xa3f   : > { %10319 = vmatpush3.bf16.msra.mxu0 %v10316_v36 }
 0xa40   : > { %10321 = vmatprep.subr.bf16.mxu0 %v10320_v40 }
 0xa43   : > { %10323 = vmatpush3.bf16.msra.mxu0 %v10320_v40 }
 0xa44   : > { %10325 = vmatprep.subr.bf16.mxu0 %v10324_v47 }
 0xa47   : > { %10327 = vmatpush3.bf16.msra.mxu0 %v10324_v47 }
 0xa4a   : > { %8906 = vmatmul.mubr.msk.f32.vlgmr.msra.gmra.mrb[18].mxu0 %vm934_vm2, %v7385_v48  ;;  %v7397_v48 = vld [vmem:[%s13979_s6 + $0xa8] sm:$0xff] }
 0xa4b   : > { %8908 = vmatprep.mubr.msk.f32.mxu0 %vm934_vm2, %v7386_v51  ;;  %v7398_v51 = vld [vmem:[%s13979_s6 + $0xb0] sm:$0xff] }
 0xa4e   : > { %8909 = vmatmul.mubr.msk.f32.gmra.mrb[20].mxu0 %vm934_vm2, %v7387_v12  ;;  %v7399_v12 = vld [vmem:[%s13979_s6 + $0xb8] sm:$0xff] }
 0xb05   : > { %v12243_v53 = vpop.f32.mrb[16].mxu0 }
 0xb06   : > { %v8880_v34 = vpop.f32.mrb[17].mxu0 }
 0xb1d   : > { %v8907_v41 = vpop.f32.mrb[18].mxu0 }
 0xb1e   : > { %v2061_v50 = vadd.f32 %v8907_v41, %v1965_v42  ;;  %v2055_v52 = vpop.f32.mrb[19].mxu0 }
 0xb1f   : > { %v2056_v55 = vadd.f32 %v2055_v52, %v1960_v43 }
 0xb20   : > { %v2075_v56 = vmax.f32 %v2061_v50, 0.0 }
 0xb21   : > { %v2074_v58 = vmax.f32 %v2056_v55, 0.0  ;;  %v8910_v16 = vpop.f32.mrb[20].mxu0 }
 0xb22   : > { %v2071_v60 = vadd.f32 %v8910_v16, %v1975_v57  ;;  %2080 = vrot.lane.b32.xlu0 %v2075_v56, %s14010_s28  ;;  %v2065_v61 = vpop.f32.mrb[21].mxu0 }
 0xb23   : > { %v2066_v0 = vadd.f32 %v2065_v61, %v1970_v59  ;;  %2078 = vrot.lane.b32.xlu1 %v2074_v58, %s14010_s28  ;;  %v10336_v1 = vpack.c.bf16 %v2075_v56, %v2074_v58 }
 0xb24   : > { %v2077_v2 = vmax.f32 %v2071_v60, 0.0 }
 0xb25   : > { %v2076_v3 = vmax.f32 %v2066_v0, 0.0 }
 0xb26   : > { %2084 = vrot.lane.b32.xlu0 %v2077_v2, %s14010_s28 }
 0xb27   : > { %2082 = vrot.lane.b32.xlu1 %v2076_v3, %s14010_s28  ;;  %v10340_v4 = vpack.c.bf16 %v2077_v2, %v2076_v3 }
 0xb2a   : > { %2092 = vrot.lane.b32.xlu0 %v2075_v56, %s14009_s17 }
 0xb2b   : > { %2090 = vrot.lane.b32.xlu1 %v2074_v58, %s14009_s17 }
 0xb2e   : > { %2096 = vrot.lane.b32.xlu0 %v2077_v2, %s14009_s17 }
 0xb2f   : > { %2094 = vrot.lane.b32.xlu1 %v2076_v3, %s14009_s17 }
 0xb32   : > { %2119 = vperm.xlu0 %11335, %v7401_v7   ;;  %v7408_v7 = vld [vmem:[%s13979_s6 + $0xc0] sm:$0xff] }
 0xb33   : > { %2114 = vperm.xlu1 %11334, %v7400_v10   ;;  %8965 = vmatprep.mubr.msk.f32.mxu0 %vm934_vm2, %v7408_v7  ;;  %v7415_v10 = vld [vmem:[%s13980_s7 + $0xd8] sm:$0xff]  ;;  %v7424_v7 = vld [vmem:[%s13980_s7 + $0xe0] sm:$0xff] }
 0xb36   : > { %2129 = vperm.xlu0 %11335, %v7403_v13   ;;  %v7414_v13 = vld [vmem:[%s13980_s7 + $0xd0] sm:$0xff] }
 0xb37   : > { %2124 = vperm.xlu1 %11334, %v7402_v14  }
 0xb94   : > { %v2081_v17 = vpop.permute.xlu0 %2080 }
 0xb95   : > { %v2087_v18 = vmul.f32 %v12203_v5, %v2081_v17  ;;  %v2079_v20 = vpop.permute.xlu1 %2078 }
 0xb96   : > { %v2086_v21 = vmul.f32 %v12203_v5, %v2079_v20 }
 0xb98   : > { %v10328_v23 = vpack.c.bf16 %v2087_v18, %v2086_v21  ;;  %v2085_v24 = vpop.permute.xlu0 %2084 }
 0xb99   : > { %v2089_v26 = vmul.f32 %v12203_v5, %v2085_v24  ;;  %v2083_v27 = vpop.permute.xlu1 %2082 }
 0xb9a   : > { %v2088_v29 = vmul.f32 %v12203_v5, %v2083_v27  ;;  %10329 = vmatprep.subr.bf16.mxu1 %v10328_v23 }
 0xb9b   : > { %10331 = vmatpush3.bf16.msra.mxu1 %v10328_v23 }
 0xb9c   : > { %v10332_v30 = vpack.c.bf16 %v2089_v26, %v2088_v29  ;;  %v2093_v31 = vpop.permute.xlu0 %2092 }
 0xb9d   : > { %v2091_v33 = vpop.permute.xlu1 %2090  ;;  %v2099_v36 = vmul.f32 %v12223_v32, %v2093_v31 }
 0xb9e   : > { %10333 = vmatprep.subr.bf16.mxu1 %v10332_v30  ;;  %v2098_v37 = vmul.f32 %v12223_v32, %v2091_v33 }
 0xb9f   : > { %10335 = vmatpush3.bf16.msra.mxu1 %v10332_v30 }
 0xba0   : > { %10337 = vmatprep.subr.bf16.mxu1 %v10336_v1  ;;  %v2097_v38 = vpop.permute.xlu0 %2096  ;;  %v10344_v40 = vpack.c.bf16 %v2099_v36, %v2098_v37 }
 0xba1   : > { %v2095_v39 = vpop.permute.xlu1 %2094  ;;  %v2101_v44 = vmul.f32 %v12223_v32, %v2097_v38 }
 0xba2   : > { %v2100_v45 = vmul.f32 %v12223_v32, %v2095_v39 }
 0xba3   : > { %10339 = vmatpush3.bf16.msra.mxu1 %v10336_v1 }
 0xba4   : > { %10341 = vmatprep.subr.bf16.mxu1 %v10340_v4  ;;  %v10348_v47 = vpack.c.bf16 %v2101_v44, %v2100_v45 }
 0xba7   : > { %10343 = vmatpush3.bf16.msra.mxu1 %v10340_v4  ;;  %v7413_v4 = vld [vmem:[%s13980_s7 + $0xc8] sm:$0xff] }
 0xba8   : > { %10345 = vmatprep.subr.bf16.mxu1 %v10344_v40 }
 0xbab   : > { %10347 = vmatpush3.bf16.msra.mxu1 %v10344_v40 }
 0xbac   : > { %10349 = vmatprep.subr.bf16.mxu1 %v10348_v47 }
 0xbaf   : > { %10351 = vmatpush3.bf16.msra.mxu1 %v10348_v47  ;;  %v7409_v47 = vld [vmem:[%s13979_s6 + $0xc8] sm:$0xff] }
 0xbb1   : > { %v2120_v34 = vpop.permute.xlu0 %2119 }
 0xbb2   : > { %8936 = vmatmul.mubr.msk.f32.vlgmr.msra.gmra.mrb[20].mxu1 %vm934_vm2, %v7397_v48  ;;  %v2115_v42 = vpop.permute.xlu1 %2114  ;;  %v7410_v48 = vld [vmem:[%s13979_s6 + $0xd0] sm:$0xff] }
 0xbb3   : > { %8938 = vmatprep.mubr.msk.f32.mxu1 %vm934_vm2, %v7398_v51  ;;  %v7411_v51 = vld [vmem:[%s13979_s6 + $0xd8] sm:$0xff] }
 0xbb5   : > { %v2130_v56 = vpop.permute.xlu0 %2129 }
 0xbb6   : > { %8939 = vmatmul.mubr.msk.f32.gmra.mrb[22].mxu1 %vm934_vm2, %v7399_v12  ;;  %v2125_v16 = vpop.permute.xlu1 %2124 }
 0xc85   : > { %v8937_v43 = vpop.f32.mrb[20].mxu1 }
 0xc86   : > { %v2216_v41 = vadd.f32 %v8937_v43, %v2120_v34  ;;  %v2210_v50 = vpop.f32.mrb[21].mxu1 }
 0xc87   : > { %v2211_v52 = vadd.f32 %v2210_v50, %v2115_v42 }
 0xc88   : > { %v2230_v55 = vmax.f32 %v2216_v41, 0.0 }
 0xc89   : > { %v2229_v57 = vmax.f32 %v2211_v52, 0.0  ;;  %v8940_v58 = vpop.f32.mrb[22].mxu1 }
 0xc8a   : > { %v2226_v59 = vadd.f32 %v8940_v58, %v2130_v56  ;;  %2235 = vrot.lane.b32.xlu0 %v2230_v55, %s14010_s28  ;;  %v2220_v60 = vpop.f32.mrb[23].mxu1 }
 0xc8b   : > { %v2221_v61 = vadd.f32 %v2220_v60, %v2125_v16  ;;  %2233 = vrot.lane.b32.xlu1 %v2229_v57, %s14010_s28  ;;  %v10360_v0 = vpack.c.bf16 %v2230_v55, %v2229_v57 }
 0xc8c   : > { %v2232_v1 = vmax.f32 %v2226_v59, 0.0 }
 0xc8d   : > { %v2231_v2 = vmax.f32 %v2221_v61, 0.0 }
 0xc8e   : > { %2239 = vrot.lane.b32.xlu0 %v2232_v1, %s14010_s28 }
 0xc8f   : > { %2237 = vrot.lane.b32.xlu1 %v2231_v2, %s14010_s28  ;;  %v10364_v3 = vpack.c.bf16 %v2232_v1, %v2231_v2 }
 0xc92   : > { %2247 = vrot.lane.b32.xlu0 %v2230_v55, %s14009_s17 }
 0xc93   : > { %2245 = vrot.lane.b32.xlu1 %v2229_v57, %s14009_s17 }
 0xc96   : > { %2251 = vrot.lane.b32.xlu0 %v2232_v1, %s14009_s17 }
 0xc97   : > { %2249 = vrot.lane.b32.xlu1 %v2231_v2, %s14009_s17 }
 0xc9a   : > { %2274 = vperm.xlu0 %11335, %v7413_v4   ;;  %v7420_v4 = vld [vmem:[%s13979_s6 + $0xe0] sm:$0xff] }
 0xc9b   : > { %2269 = vperm.xlu1 %11334, %v7412_v9   ;;  %8995 = vmatprep.mubr.msk.f32.mxu1 %vm934_vm2, %v7420_v4  ;;  %v7427_v9 = vld [vmem:[%s13980_s7 + $0xf8] sm:$0xff]  ;;  %v7451_v4 = vld [vmem:[%s13983_s10 + $0x88] sm:$0xff] }
 0xc9e   : > { %2284 = vperm.xlu0 %11335, %v7415_v10   ;;  %v7426_v10 = vld [vmem:[%s13980_s7 + $0xf0] sm:$0xff] }
 0xc9f   : > { %2279 = vperm.xlu1 %11334, %v7414_v13   ;;  %v7432_v13 = vld [vmem:[%s13981_s8 + $0x80] sm:$0xff] }
 0xcfc   : > { %v2236_v14 = vpop.permute.xlu0 %2235 }
 0xcfd   : > { %v2242_v17 = vmul.f32 %v12203_v5, %v2236_v14  ;;  %v2234_v18 = vpop.permute.xlu1 %2233  ;;  %v7433_v14 = vld [vmem:[%s13981_s8 + $0x88] sm:$0xff] }
 0xcfe   : > { %v2241_v20 = vmul.f32 %v12203_v5, %v2234_v18  ;;  %v7434_v18 = vld [vmem:[%s13981_s8 + $0x90] sm:$0xff] }
 0xd00   : > { %v10352_v21 = vpack.c.bf16 %v2242_v17, %v2241_v20  ;;  %v2240_v23 = vpop.permute.xlu0 %2239  ;;  %v10400_v17 = vpack.c.bf16 %v7433_v14, %v7432_v13  ;;  %v7435_v20 = vld [vmem:[%s13981_s8 + $0x98] sm:$0xff]  ;;  %v7422_v13 = vld [vmem:[%s13979_s6 + $0xf0] sm:$0xff] }
 0xd01   : > { %v2244_v24 = vmul.f32 %v12203_v5, %v2240_v23  ;;  %v2238_v26 = vpop.permute.xlu1 %2237  ;;  %v7436_v23 = vld [vmem:[%s13981_s8 + $0xa0] sm:$0xff] }
 0xd02   : > { %v2243_v27 = vmul.f32 %v12203_v5, %v2238_v26  ;;  %10353 = vmatprep.subr.bf16.mxu0 %v10352_v21 }
 0xd03   : > { %10355 = vmatpush3.bf16.msra.mxu0 %v10352_v21  ;;  %v10404_v21 = vpack.c.bf16 %v7435_v20, %v7434_v18  ;;  %v7455_v18 = vld [vmem:[%s13983_s10 + $0xa8] sm:$0xff]  ;;  %v7423_v20 = vld [vmem:[%s13979_s6 + $0xf8] sm:$0xff] }
 0xd04   : > { %v10356_v29 = vpack.c.bf16 %v2244_v24, %v2243_v27  ;;  %v2248_v30 = vpop.permute.xlu0 %2247  ;;  %v7437_v24 = vld [vmem:[%s13981_s8 + $0xa8] sm:$0xff]  ;;  %v7438_v27 = vld [vmem:[%s13981_s8 + $0xb0] sm:$0xff] }
 0xd05   : > { %v2246_v31 = vpop.permute.xlu1 %2245  ;;  %v2254_v33 = vmul.f32 %v12223_v32, %v2248_v30  ;;  %v10408_v26 = vpack.c.bf16 %v7437_v24, %v7436_v23  ;;  %v7456_v23 = vld [vmem:[%s13983_s10 + $0xb0] sm:$0xff]  ;;  %v7457_v24 = vld [vmem:[%s13983_s10 + $0xb8] sm:$0xff] }
 0xd06   : > { %10357 = vmatprep.subr.bf16.mxu0 %v10356_v29  ;;  %v2253_v36 = vmul.f32 %v12223_v32, %v2246_v31  ;;  %v7440_v31 = vld [vmem:[%s13981_s8 + $0xc0] sm:$0xff] }
 0xd07   : > { %10359 = vmatpush3.bf16.msra.mxu0 %v10356_v29  ;;  %v7439_v29 = vld [vmem:[%s13981_s8 + $0xb8] sm:$0xff] }
 0xd08   : > { %10361 = vmatprep.subr.bf16.mxu0 %v10360_v0  ;;  %v2252_v37 = vpop.permute.xlu0 %2251  ;;  %v10368_v39 = vpack.c.bf16 %v2254_v33, %v2253_v36  ;;  %v10412_v30 = vpack.c.bf16 %v7439_v29, %v7438_v27  ;;  %v7441_v33 = vld [vmem:[%s13981_s8 + $0xc8] sm:$0xff]  ;;  %v7458_v27 = vld [vmem:[%s13983_s10 + $0xc0] sm:$0xff] }
 0xd09   : > { %v2250_v38 = vpop.permute.xlu1 %2249  ;;  %v2256_v40 = vmul.f32 %v12223_v32, %v2252_v37  ;;  %v10416_v36 = vpack.c.bf16 %v7441_v33, %v7440_v31  ;;  %v7442_v37 = vld [vmem:[%s13981_s8 + $0xd0] sm:$0xff]  ;;  %v7459_v29 = vld [vmem:[%s13983_s10 + $0xc8] sm:$0xff]  ;;  %v7461_v33 = vld [vmem:[%s13983_s10 + $0xd8] sm:$0xff] }
 0xd0a   : > { %v2255_v44 = vmul.f32 %v12223_v32, %v2250_v38  ;;  %v7443_v38 = vld [vmem:[%s13981_s8 + $0xd8] sm:$0xff]  ;;  %v7460_v31 = vld [vmem:[%s13983_s10 + $0xd0] sm:$0xff] }
 0xd0b   : > { %10363 = vmatpush3.bf16.msra.mxu0 %v10360_v0 }
 0xd0c   : > { %10365 = vmatprep.subr.bf16.mxu0 %v10364_v3  ;;  %v10372_v45 = vpack.c.bf16 %v2256_v40, %v2255_v44  ;;  %v7444_v40 = vld [vmem:[%s13981_s8 + $0xe0] sm:$0xff]  ;;  %v7445_v44 = vld [vmem:[%s13981_s8 + $0xe8] sm:$0xff] }
 0xd0f   : > { %10367 = vmatpush3.bf16.msra.mxu0 %v10364_v3  ;;  %v7425_v3 = vld [vmem:[%s13980_s7 + $0xe8] sm:$0xff] }
 0xd10   : > { %10369 = vmatprep.subr.bf16.mxu0 %v10368_v39 }
 0xd13   : > { %10371 = vmatpush3.bf16.msra.mxu0 %v10368_v39  ;;  %v10420_v39 = vpack.c.bf16 %v7443_v38, %v7442_v37  ;;  %v7462_v37 = vld [vmem:[%s13983_s10 + $0xe0] sm:$0xff]  ;;  %v7463_v38 = vld [vmem:[%s13983_s10 + $0xe8] sm:$0xff] }
 0xd14   : > { %10373 = vmatprep.subr.bf16.mxu0 %v10372_v45 }
 0xd17   : > { %10375 = vmatpush3.bf16.msra.mxu0 %v10372_v45  ;;  %v10424_v45 = vpack.c.bf16 %v7445_v44, %v7444_v40  ;;  %v7446_v40 = vld [vmem:[%s13981_s8 + $0xf0] sm:$0xff]  ;;  %v7447_v44 = vld [vmem:[%s13981_s8 + $0xf8] sm:$0xff] }
 0xd18   : > { %10401 = vmatprep.subr.bf16.mxu0 %v10400_v17 }
 0xd19   : > { %v2275_v12 = vpop.permute.xlu0 %2274 }
 0xd1a   : > { %8966 = vmatmul.mubr.msk.f32.vlgmr.msra.gmra.mrb[22].mxu0 %vm934_vm2, %v7409_v47  ;;  %v2270_v34 = vpop.permute.xlu1 %2269 }
 0xd1b   : > { %8968 = vmatprep.mubr.msk.f32.mxu0 %vm934_vm2, %v7410_v48  ;;  %10403 = vmatpush3.bf16.msra.mxu0 %v10400_v17  ;;  %v7454_v17 = vld [vmem:[%s13983_s10 + $0xa0] sm:$0xff] }
 0xd1c   : > { %10405 = vmatprep.subr.bf16.mxu0 %v10404_v21 }
 0xd1d   : > { %v2285_v55 = vpop.permute.xlu0 %2284 }
 0xd1e   : > { %8969 = vmatmul.mubr.msk.f32.gmra.mrb[24].mxu0 %vm934_vm2, %v7411_v51  ;;  %v2280_v58 = vpop.permute.xlu1 %2279 }
 0xd1f   : > { %10407 = vmatpush3.bf16.msra.mxu0 %v10404_v21  ;;  %v10440_v21 = vpack.c.bf16 %v7455_v18, %v7454_v17 }
 0xd20   : > { %10409 = vmatprep.subr.bf16.mxu0 %v10408_v26 }
 0xd23   : > { %10411 = vmatpush3.bf16.msra.mxu0 %v10408_v26  ;;  %v10444_v26 = vpack.c.bf16 %v7457_v24, %v7456_v23 }
 0xd24   : > { %10413 = vmatprep.subr.bf16.mxu0 %v10412_v30 }
 0xd27   : > { %10415 = vmatpush3.bf16.msra.mxu0 %v10412_v30  ;;  %v10448_v30 = vpack.c.bf16 %v7459_v29, %v7458_v27 }
 0xd28   : > { %10417 = vmatprep.subr.bf16.mxu0 %v10416_v36 }
 0xd2b   : > { %10419 = vmatpush3.bf16.msra.mxu0 %v10416_v36  ;;  %v10452_v36 = vpack.c.bf16 %v7461_v33, %v7460_v31 }
 0xd2c   : > { %10421 = vmatprep.subr.bf16.mxu0 %v10420_v39 }
 0xd2f   : > { %10423 = vmatpush3.bf16.msra.mxu0 %v10420_v39  ;;  %v10456_v39 = vpack.c.bf16 %v7463_v38, %v7462_v37 }
 0xd30   : > { %10425 = vmatprep.subr.bf16.mxu0 %v10424_v45 }
 0xd33   : > { %10427 = vmatpush3.bf16.msra.mxu0 %v10424_v45  ;;  %v7464_v45 = vld [vmem:[%s13983_s10 + $0xf0] sm:$0xff] }
 0xded   : > { %v8967_v42 = vpop.f32.mrb[22].mxu0 }
 0xdee   : > { %v2371_v43 = vadd.f32 %v8967_v42, %v2275_v12  ;;  %v2365_v41 = vpop.f32.mrb[23].mxu0 }
 0xdef   : > { %v2366_v50 = vadd.f32 %v2365_v41, %v2270_v34 }
 0xdf0   : > { %v2385_v52 = vmax.f32 %v2371_v43, 0.0 }
 0xdf1   : > { %v2384_v56 = vmax.f32 %v2366_v50, 0.0  ;;  %v8970_v57 = vpop.f32.mrb[24].mxu0 }
 0xdf2   : > { %v2381_v16 = vadd.f32 %v8970_v57, %v2285_v55  ;;  %2390 = vrot.lane.b32.xlu0 %v2385_v52, %s14010_s28  ;;  %v2375_v59 = vpop.f32.mrb[25].mxu0 }
 0xdf3   : > { %v2376_v60 = vadd.f32 %v2375_v59, %v2280_v58  ;;  %2388 = vrot.lane.b32.xlu1 %v2384_v56, %s14010_s28  ;;  %v12335_v61 = vpack.c.bf16 %v2385_v52, %v2384_v56 }
 0xdf4   : > { %v2387_v0 = vmax.f32 %v2381_v16, 0.0 }
 0xdf5   : > { %v2386_v1 = vmax.f32 %v2376_v60, 0.0 }
 0xdf6   : > { %2394 = vrot.lane.b32.xlu0 %v2387_v0, %s14010_s28 }
 0xdf7   : > { %2392 = vrot.lane.b32.xlu1 %v2386_v1, %s14010_s28  ;;  %v12339_v2 = vpack.c.bf16 %v2387_v0, %v2386_v1 }
 0xdfa   : > { %2402 = vrot.lane.b32.xlu0 %v2385_v52, %s14009_s17 }
 0xdfb   : > { %2400 = vrot.lane.b32.xlu1 %v2384_v56, %s14009_s17 }
 0xdfe   : > { %2406 = vrot.lane.b32.xlu0 %v2387_v0, %s14009_s17 }
 0xdff   : > { %2404 = vrot.lane.b32.xlu1 %v2386_v1, %s14009_s17 }
 0xe02   : > { %2429 = vperm.xlu0 %11335, %v7425_v3   ;;  %v7450_v3 = vld [vmem:[%s13983_s10 + $0x80] sm:$0xff] }
 0xe03   : > { %2424 = vperm.xlu1 %11334, %v7424_v7  }
 0xe06   : > { %2439 = vperm.xlu0 %11335, %v7427_v9   ;;  %v7452_v9 = vld [vmem:[%s13983_s10 + $0x90] sm:$0xff] }
 0xe07   : > { %2434 = vperm.xlu1 %11334, %v7426_v10   ;;  %v7421_v10 = vld [vmem:[%s13979_s6 + $0xe8] sm:$0xff] }
 0xe64   : > { %v2391_v47 = vpop.permute.xlu0 %2390 }
 0xe65   : > { %v2397_v48 = vmul.f32 %v12203_v5, %v2391_v47  ;;  %v2389_v51 = vpop.permute.xlu1 %2388  ;;  %v10428_v47 = vpack.c.bf16 %v7447_v44, %v7446_v40 }
 0xe66   : > { %v2396_v12 = vmul.f32 %v12203_v5, %v2389_v51 }
 0xe67   : > { %10429 = vmatprep.subr.bf16.mxu0 %v10428_v47 }
 0xe68   : > { %v10376_v34 = vpack.c.bf16 %v2397_v48, %v2396_v12  ;;  %v2395_v42 = vpop.permute.xlu0 %2394  ;;  %v7465_v48 = vld [vmem:[%s13983_s10 + $0xf8] sm:$0xff]  ;;  %10431 = vmatpush3.bf16.msra.mxu0 %v10428_v47 }
 0xe69   : > { %v2399_v43 = vmul.f32 %v12203_v5, %v2395_v42  ;;  %v2393_v41 = vpop.permute.xlu1 %2392  ;;  %v10460_v51 = vpack.c.bf16 %v7465_v48, %v7464_v45  ;;  %10465 = vmatprep.subr.bf16.mxu0 %v12077_v6 }
 0xe6a   : > { %v2398_v50 = vmul.f32 %v12203_v5, %v2393_v41  ;;  %10377 = vmatprep.subr.bf16.mxu1 %v10376_v34 }
 0xe6b   : > { %10379 = vmatpush3.bf16.msra.mxu1 %v10376_v34 }
 0xe6c   : > { %v10380_v52 = vpack.c.bf16 %v2399_v43, %v2398_v50  ;;  %v2403_v55 = vpop.permute.xlu0 %2402 }
 0xe6d   : > { %v2401_v56 = vpop.permute.xlu1 %2400  ;;  %v2409_v57 = vmul.f32 %v12223_v32, %v2403_v55 }
 0xe6e   : > { %10381 = vmatprep.subr.bf16.mxu1 %v10380_v52  ;;  %v2408_v58 = vmul.f32 %v12223_v32, %v2401_v56 }
 0xe6f   : > { %10383 = vmatpush3.bf16.msra.mxu1 %v10380_v52 }
 0xe70   : > { %10385 = vmatprep.subr.bf16.mxu1 %v12335_v61  ;;  %v2407_v16 = vpop.permute.xlu0 %2406  ;;  %v10392_v60 = vpack.c.bf16 %v2409_v57, %v2408_v58 }
 0xe71   : > { %v2405_v59 = vpop.permute.xlu1 %2404  ;;  %v2411_v0 = vmul.f32 %v12223_v32, %v2407_v16 }
 0xe72   : > { %v2410_v1 = vmul.f32 %v12223_v32, %v2405_v59 }
 0xe73   : > { %10387 = vmatpush3.bf16.msra.mxu1 %v12335_v61  ;;  %v10432_v61 = vpack.c.bf16 %v7451_v4, %v7450_v3  ;;  %v7467_v3 = vld [vmem:[%s13984_s11 + $0x1] ss:$0 sm:$0xff] }
 0xe74   : > { %10389 = vmatprep.subr.bf16.mxu1 %v12339_v2  ;;  %v10396_v7 = vpack.c.bf16 %v2411_v0, %v2410_v1 }
 0xe77   : > { %10391 = vmatpush3.bf16.msra.mxu1 %v12339_v2  ;;  %v7453_v2 = vld [vmem:[%s13983_s10 + $0x98] sm:$0xff] }
 0xe78   : > { %10393 = vmatprep.subr.bf16.mxu1 %v10392_v60  ;;  %v10436_v14 = vpack.c.bf16 %v7453_v2, %v7452_v9 }
 0xe7b   : > { %10395 = vmatpush3.bf16.msra.mxu1 %v10392_v60 }
 0xe7c   : > { %10397 = vmatprep.subr.bf16.mxu1 %v10396_v7 }
 0xe7f   : > { %10399 = vmatpush3.bf16.msra.mxu1 %v10396_v7 }
 0xe80   : > { %10433 = vmatprep.subr.bf16.mxu1 %v10432_v61 }
 0xe81   : > { %v2430_v12 = vpop.permute.xlu0 %2429 }
 0xe82   : > { %8996 = vmatmul.mubr.msk.f32.vlgmr.msra.gmra.mrb[24].mxu1 %vm934_vm2, %v7421_v10  ;;  %v2425_v34 = vpop.permute.xlu1 %2424 }
 0xe83   : > { %8998 = vmatprep.mubr.msk.f32.mxu1 %vm934_vm2, %v7422_v13  ;;  %10435 = vmatpush3.bf16.msra.mxu1 %v10432_v61 }
 0xe84   : > { %10437 = vmatprep.subr.bf16.mxu1 %v10436_v14 }
 0xe85   : > { %v2440_v52 = vpop.permute.xlu0 %2439 }
 0xe86   : > { %8999 = vmatmul.mubr.msk.f32.gmra.mrb[26].mxu1 %vm934_vm2, %v7423_v20  ;;  %v2435_v57 = vpop.permute.xlu1 %2434 }
 0xe87   : > { %10439 = vmatpush3.bf16.msra.mxu1 %v10436_v14 }
 0xe88   : > { %10441 = vmatprep.subr.bf16.mxu1 %v10440_v21 }
 0xe8b   : > { %10443 = vmatpush3.bf16.msra.mxu1 %v10440_v21 }
 0xe8c   : > { %10445 = vmatprep.subr.bf16.mxu1 %v10444_v26 }
 0xe8f   : > { %10447 = vmatpush3.bf16.msra.mxu1 %v10444_v26 }
 0xe90   : > { %10449 = vmatprep.subr.bf16.mxu1 %v10448_v30 }
 0xe93   : > { %10451 = vmatpush3.bf16.msra.mxu1 %v10448_v30 }
 0xe94   : > { %10453 = vmatprep.subr.bf16.mxu1 %v10452_v36 }
 0xe97   : > { %10455 = vmatpush3.bf16.msra.mxu1 %v10452_v36 }
 0xe98   : > { %10457 = vmatprep.subr.bf16.mxu1 %v10456_v39 }
 0xe9b   : > { %10459 = vmatpush3.bf16.msra.mxu1 %v10456_v39 }
 0xe9c   : > { %10461 = vmatprep.subr.bf16.mxu1 %v10460_v51 }
 0xe9f   : > { %10463 = vmatpush3.bf16.msra.mxu1 %v10460_v51  ;;  %v7449_v51 = vld [vmem:[%s13982_s9 + $0x1] ss:$0 sm:$0xff] }
 0xea0   : > { %10496 = vmatprep.subr.bf16.mxu1 %v11553_v62 }
 0xf55   : > { %v8997_v42 = vpop.f32.mrb[24].mxu1 }
 0xf56   : > { %v2526_v43 = vadd.f32 %v8997_v42, %v2430_v12  ;;  %v2520_v41 = vpop.f32.mrb[25].mxu1 }
 0xf57   : > { %v2521_v50 = vadd.f32 %v2520_v41, %v2425_v34 }
 0xf58   : > { %v2540_v58 = vmax.f32 %v2526_v43, 0.0 }
 0xf59   : > { %v2539_v55 = vmax.f32 %v2521_v50, 0.0  ;;  %v9000_v56 = vpop.f32.mrb[26].mxu1 }
 0xf5a   : > { %v2536_v16 = vadd.f32 %v9000_v56, %v2440_v52  ;;  %v2530_v59 = vpop.f32.mrb[27].mxu1 }
 0xf5b   : > { %v2531_v60 = vadd.f32 %v2530_v59, %v2435_v57  ;;  %9033 = vmatprep.mubr.f32.mxu0 %v2539_v55  ;;  %9071 = vmatprep.mubr.f32.mxu1 %v2539_v55 }
 0xf5c   : > { %9034 = vmatmul.mubr.f32.vlgmr.msra.gmra.mrb[26].mxu0 %v2540_v58  ;;  %9072 = vmatmul.mubr.f32.vlgmr.msra.gmra.mrb[28].mxu1 %v2540_v58  ;;  %v2542_v1 = vmax.f32 %v2536_v16, 0.0 }
 0xf5d   : > { %v2541_v0 = vmax.f32 %v2531_v60, 0.0  ;;  %10467 = vmatpush3.bf16.msra.mxu0 %v12077_v6 }
 0xf5e   : > { %10469 = vmatprep.subr.bf16.mxu0 %v12082_v8 }
 0xf5f   : > { %9036 = vmatprep.mubr.f32.mxu0 %v2541_v0  ;;  %9074 = vmatprep.mubr.f32.mxu1 %v2541_v0 }
 0xf60   : > { %9037 = vmatmul.mubr.f32.gmra.mrb[28].mxu0 %v2542_v1  ;;  %9075 = vmatmul.mubr.f32.gmra.mrb[30].mxu1 %v2542_v1 }
 0xf61   : > { %10471 = vmatpush3.bf16.msra.mxu0 %v12082_v8  ;;  %9123 = vmatprep.mubr.msk.f32.mxu1 %vm11554_vm3, %v11555_v63 }
 0xf62   : > { %10473 = vmatprep.subr.bf16.mxu0 %v12093_v11 }
 0xf65   : > { %10475 = vmatpush3.bf16.msra.mxu0 %v12093_v11 }
 0xf66   : > { %10477 = vmatprep.subr.bf16.mxu0 %v12103_v15 }
 0xf69   : > { %10479 = vmatpush3.bf16.msra.mxu0 %v12103_v15 }
 0xf6a   : > { %10481 = vmatprep.subr.bf16.mxu0 %v12113_v19 }
 0xf6d   : > { %10483 = vmatpush3.bf16.msra.mxu0 %v12113_v19 }
 0xf6e   : > { %10485 = vmatprep.subr.bf16.mxu0 %v12123_v22 }
 0xf71   : > { %10487 = vmatpush3.bf16.msra.mxu0 %v12123_v22 }
 0xf72   : > { %10489 = vmatprep.subr.bf16.mxu0 %v12133_v25 }
 0xf75   : > { %10491 = vmatpush3.bf16.msra.mxu0 %v12133_v25 }
 0xf76   : > { %10493 = vmatprep.subr.bf16.mxu0 %v12144_v28 }
 0xf79   : > { %10495 = vmatpush3.bf16.msra.mxu0 %v12144_v28 }
0x102f   : > { %v9035_v4 = vpop.f32.mrb[26].mxu0  ;;  %v9073_v7 = vpop.f32.mrb[28].mxu1 }
0x1030   : > { %v2750_v61 = vadd.f32 %v9073_v7, %v7467_v3  ;;  %v2634_v9 = vpop.f32.mrb[27].mxu0  ;;  %v2744_v2 = vpop.f32.mrb[29].mxu1  ;;  %v2640_v57 = vadd.f32 %v9035_v4, %v7449_v51 }
0x1031   : > { %v2745_v10 = vadd.f32 %v7467_v3, %v2744_v2  ;;  %v2635_v43 = vadd.f32 %v7449_v51, %v2634_v9 }
0x1032   : > { %v12518_v60 = vsub.f32 %v12162_v46, %v2640_v57  ;;  %v7475_v46 = vld [vmem:[%s13980_s7 + $0x100] sm:$0xff]  ;;  %v7472_v57 = vld [vmem:[%s13979_s6 + $0x108] sm:$0xff] }
0x1033   : > { %v11366_v13 = vpack.i.bf16 %v2750_v61, %v2745_v10  ;;  %v9038_v14 = vpop.f32.mrb[28].mxu0  ;;  %v9076_v17 = vpop.f32.mrb[30].mxu1  ;;  %v12512_v58 = vsub.f32 %v12155_v49, %v2635_v43 }
0x1034   : > { %v2760_v18 = vadd.f32 %v9076_v17, %v7467_v3  ;;  %v2644_v20 = vpop.f32.mrb[29].mxu0  ;;  %v2754_v21 = vpop.f32.mrb[31].mxu1  ;;  %v2650_v0 = vadd.f32 %v9038_v14, %v7449_v51 }
0x1035   : > { %v2755_v23 = vadd.f32 %v7467_v3, %v2754_v21  ;;  %11367 = vrot.lane.b32.xlu1 %v11366_v13, %s14009_s17  ;;  %v2645_v16 = vadd.f32 %v7449_v51, %v2644_v20  ;;  %v7478_v3 = vld [vmem:[%s13980_s7 + $0x118] sm:$0xff]  ;;  %v10510_v51 = vpack.c.bf16 %v12518_v60, %v12512_v58 }
0x1036   : > { %v12528_v49 = vsub.f32 %v12173_v35, %v2650_v0  ;;  %v7477_v35 = vld [vmem:[%s13980_s7 + $0x110] sm:$0xff] }
0x1037   : > { %v11371_v24 = vpack.i.bf16 %v2760_v18, %v2755_v23  ;;  %v12521_v1 = vsub.f32 %v12166_v54, %v2645_v16  ;;  %v7476_v54 = vld [vmem:[%s13980_s7 + $0x108] sm:$0xff]  ;;  %v7473_v16 = vld [vmem:[%s13979_s6 + $0x110] sm:$0xff] }
0x1039   : > { %11372 = vrot.lane.b32.xlu0 %v11371_v24, %s14009_s17 }
0x10a7   : > { %v11368_v26 = vpop.permute.xlu1 %11367 }
0x10a8   : > { %v11370_v27 = vunpack.i.h.bf16 %v11368_v26  ;;  %v11369_v29 = vunpack.i.l.bf16 %v11368_v26 }
0x10aa   : > { %v2772_v30 = vmax.f32 %v2750_v61, %v11370_v27  ;;  %v2771_v31 = vmax.f32 %v2745_v10, %v11369_v29 }
0x10ab   : > { %v11373_v33 = vpop.permute.xlu0 %11372 }
0x10ac   : > { %v11375_v36 = vunpack.i.h.bf16 %v11373_v33  ;;  %v11374_v37 = vunpack.i.l.bf16 %v11373_v33  ;;  %v11376_v38 = vpack.i.bf16 %v2772_v30, %v2771_v31 }
0x10ae   : > { %v2774_v39 = vmax.f32 %v2760_v18, %v11375_v36  ;;  %v2773_v40 = vmax.f32 %v2755_v23, %v11374_v37  ;;  %11377 = vrot.lane.b32.xlu1 %v11376_v38, %s14012_s23 }
0x10b0   : > { %v11381_v44 = vpack.i.bf16 %v2774_v39, %v2773_v40 }
0x10b2   : > { %11382 = vrot.lane.b32.xlu0 %v11381_v44, %s14012_s23 }
0x1120   : > { %v11378_v45 = vpop.permute.xlu1 %11377 }
0x1121   : > { %v11380_v47 = vunpack.i.h.bf16 %v11378_v45  ;;  %v11379_v48 = vunpack.i.l.bf16 %v11378_v45  ;;  %v7471_v45 = vld [vmem:[%s13979_s6 + $0x100] sm:$0xff] }
0x1123   : > { %v2784_v12 = vmax.f32 %v2772_v30, %v11380_v47  ;;  %v2783_v34 = vmax.f32 %v2771_v31, %v11379_v48 }
0x1124   : > { %v11383_v42 = vpop.permute.xlu0 %11382 }
0x1125   : > { %v11385_v41 = vunpack.i.h.bf16 %v11383_v42  ;;  %v11384_v50 = vunpack.i.l.bf16 %v11383_v42  ;;  %v11386_v52 = vpack.i.bf16 %v2784_v12, %v2783_v34 }
0x1127   : > { %v2786_v55 = vmax.f32 %v2774_v39, %v11385_v41  ;;  %v2785_v56 = vmax.f32 %v2773_v40, %v11384_v50  ;;  %11387 = vrot.lane.b32.xlu1 %v11386_v52, %s14013_s25  ;;  %v7468_v40 = vld [vmem:[%s13985_s12 + $0x8] sm:$0xff] }
0x1129   : > { %v11391_v59 = vpack.i.bf16 %v2786_v55, %v2785_v56 }
0x112b   : > { %11392 = vrot.lane.b32.xlu0 %v11391_v59, %s14013_s25  ;;  %2972 = vrot.lane.b32.xlu1 %v12512_v58, %s14010_s28 }
0x112f   : > { %2974 = vrot.lane.b32.xlu0 %v12518_v60, %s14010_s28  ;;  %2976 = vrot.lane.b32.xlu1 %v12521_v1, %s14010_s28 }
0x1133   : > { %2978 = vrot.lane.b32.xlu0 %v12528_v49, %s14010_s28  ;;  %2984 = vrot.lane.b32.xlu1 %v12512_v58, %s14009_s17 }
0x1137   : > { %2986 = vrot.lane.b32.xlu0 %v12518_v60, %s14009_s17  ;;  %2988 = vrot.lane.b32.xlu1 %v12521_v1, %s14009_s17 }
0x113b   : > { %2990 = vrot.lane.b32.xlu0 %v12528_v49, %s14009_s17  ;;  %3008 = vperm.xlu1 %11334, %v7475_v46  }
0x113f   : > { %3013 = vperm.xlu0 %11335, %v7476_v54   ;;  %3018 = vperm.xlu1 %11334, %v7477_v35  }
0x1143   : > { %3023 = vperm.xlu0 %11335, %v7478_v3  }
0x1199   : > { %v11388_v4 = vpop.permute.xlu1 %11387 }
0x119a   : > { %v11390_v7 = vunpack.i.h.bf16 %v11388_v4  ;;  %v11389_v61 = vunpack.i.l.bf16 %v11388_v4 }
0x119c   : > { %v2796_v9 = vmax.f32 %v2784_v12, %v11390_v7  ;;  %v2795_v2 = vmax.f32 %v2783_v34, %v11389_v61  ;;  %v10514_v34 = vpack.c.bf16 %v12528_v49, %v12521_v1 }
0x119d   : > { %v11393_v10 = vpop.permute.xlu0 %11392  ;;  %v2973_v21 = vpop.permute.xlu1 %2972 }
0x119e   : > { %v11395_v13 = vunpack.i.h.bf16 %v11393_v10  ;;  %v11394_v14 = vunpack.i.l.bf16 %v11393_v10  ;;  %9109 = vmatprep.mubr.f32.mxu0 %v2795_v2  ;;  %v2980_v31 = vmul.f32 %v12203_v5, %v2973_v21 }
0x119f   : > { %9110 = vmatmul.mubr.f32.vlgmr.msra.gmra.mrb[30].mxu0 %v2796_v9 }
0x11a0   : > { %v2797_v17 = vmax.f32 %v2785_v56, %v11394_v14  ;;  %v2798_v18 = vmax.f32 %v2786_v55, %v11395_v13 }
0x11a1   : > { %v2975_v20 = vpop.permute.xlu0 %2974  ;;  %v2977_v36 = vpop.permute.xlu1 %2976 }
0x11a2   : > { %9112 = vmatprep.mubr.f32.mxu0 %v2797_v17  ;;  %v2981_v27 = vmul.f32 %v12203_v5, %v2975_v20  ;;  %v2982_v44 = vmul.f32 %v12203_v5, %v2977_v36  ;;  %v12614_v36 = vld [vmem:[%s13974_s1] ss:$0 sm:$0xff] }
0x11a3   : > { %9113 = vmatmul.mubr.f32.gmra.mrb[32].mxu0 %v2798_v18 }
0x11a4   : > { %v10502_v38 = vpack.c.bf16 %v2981_v27, %v2980_v31  ;;  %v7483_v27 = vld [vmem:[%s13979_s6 + $0x120] sm:$0xff]  ;;  %v7489_v31 = vld [vmem:[%s13980_s7 + $0x130] sm:$0xff] }
0x11a5   : > { %v2979_v29 = vpop.permute.xlu0 %2978  ;;  %v2985_v12 = vpop.permute.xlu1 %2984  ;;  %9180 = vmatprep.mubr.msk.f32.mxu0 %vm934_vm2, %v7483_v27  ;;  %v7495_v27 = vld [vmem:[%s13979_s6 + $0x140] sm:$0xff] }
0x11a6   : > { %v2983_v39 = vmul.f32 %v12203_v5, %v2979_v29  ;;  %v2992_v43 = vmul.f32 %v12223_v32, %v2985_v12  ;;  %v7487_v29 = vld [vmem:[%s13980_s7 + $0x120] sm:$0xff] }
0x11a8   : > { %v10506_v47 = vpack.c.bf16 %v2983_v39, %v2982_v44 }
0x11a9   : > { %v2987_v48 = vpop.permute.xlu0 %2986  ;;  %v2989_v41 = vpop.permute.xlu1 %2988 }
0x11aa   : > { %v2993_v5 = vmul.f32 %v12223_v32, %v2987_v48  ;;  %v2994_v55 = vmul.f32 %v12223_v32, %v2989_v41 }
0x11ac   : > { %v10518_v50 = vpack.c.bf16 %v2993_v5, %v2992_v43 }
0x11ad   : > { %v2991_v42 = vpop.permute.xlu0 %2990 }
0x11ae   : > { %v2995_v52 = vmul.f32 %v12223_v32, %v2991_v42  ;;  %v7474_v32 = vld [vmem:[%s13979_s6 + $0x118] sm:$0xff] }
0x11b0   : > { %v10522_v56 = vpack.c.bf16 %v2995_v52, %v2994_v55 }
0x11ba   : > { %v3009_v54 = vpop.permute.xlu1 %3008 }
0x11be   : > { %v3014_v46 = vpop.permute.xlu0 %3013  ;;  %v3019_v13 = vpop.permute.xlu1 %3018 }
0x11c2   : > { %v3024_v9 = vpop.permute.xlu0 %3023 }
0x1272   : > { %v9111_v23 = vpop.f32.mrb[30].mxu0 }
0x1273   : > { %v2865_v24 = vpop.f32.mrb[31].mxu0 }
0x1274   : > { %v10497_v26 = vpack.c.bf16 %v9111_v23, %v2865_v24 }
0x1276   : > { %v9114_v30 = vpop.f32.mrb[32].mxu0  ;;  %10498 = vmatpush3.bf16.msra.mxu1 %v10497_v26  ;;  %v7488_v26 = vld [vmem:[%s13980_s7 + $0x128] sm:$0xff] }
0x1277   : > { %v2875_v33 = vpop.f32.mrb[33].mxu0  ;;  %10499 = vmatprep.subr.bf16.mxu1 %v11553_v62 }
0x1278   : > { %v10500_v37 = vpack.c.bf16 %v9114_v30, %v2875_v33  ;;  %v7490_v30 = vld [vmem:[%s13980_s7 + $0x138] sm:$0xff] }
0x127a   : > { %10501 = vmatpush3.bf16.msra.mxu1 %v10500_v37 }
0x127b   : > { %10503 = vmatprep.subr.bf16.mxu1 %v10502_v38 }
0x127d   : > { %9124 = vmatmul.mubr.msk.f32.vlgmr.msra.gmra.mrb[32].mxu1 %vm1845_vm4, %v7468_v40 }
0x127e   : > { %10505 = vmatpush3.bf16.msra.mxu1 %v10502_v38  ;;  %9150 = vmatprep.mubr.msk.f32.mxu1 %vm934_vm2, %v7471_v45 }
0x127f   : > { %10507 = vmatprep.subr.bf16.mxu1 %v10506_v47 }
0x1282   : > { %10509 = vmatpush3.bf16.msra.mxu1 %v10506_v47 }
0x1283   : > { %10511 = vmatprep.subr.bf16.mxu1 %v10510_v51 }
0x1286   : > { %10513 = vmatpush3.bf16.msra.mxu1 %v10510_v51 }
0x1287   : > { %10515 = vmatprep.subr.bf16.mxu1 %v10514_v34 }
0x128a   : > { %10517 = vmatpush3.bf16.msra.mxu1 %v10514_v34  ;;  %v12623_v34 = vld [vmem:[%s13975_s2] ss:$0 sm:$0xff] }
0x128b   : > { %10519 = vmatprep.subr.bf16.mxu1 %v10518_v50 }
0x128e   : > { %10521 = vmatpush3.bf16.msra.mxu1 %v10518_v50 }
0x128f   : > { %10523 = vmatprep.subr.bf16.mxu1 %v10522_v56 }
0x1292   : > { %10525 = vmatpush3.bf16.msra.mxu1 %v10522_v56 }
0x1295   : > { %9151 = vmatmul.mubr.msk.f32.vlgmr.msra.gmra.mrb[34].mxu1 %vm934_vm2, %v7472_v57 }
0x1296   : > { %9153 = vmatprep.mubr.msk.f32.mxu1 %vm934_vm2, %v7473_v16  ;;  %v7484_v16 = vld [vmem:[%s13979_s6 + $0x128] sm:$0xff] }
0x1299   : > { %9154 = vmatmul.mubr.msk.f32.gmra.mrb[36].mxu1 %vm934_vm2, %v7474_v32  ;;  %v7485_v32 = vld [vmem:[%s13979_s6 + $0x130] sm:$0xff] }
0x129a   : > { %9210 = vmatprep.mubr.msk.f32.mxu1 %vm934_vm2, %v7495_v27  ;;  %v7507_v27 = vld [vmem:[%s13979_s6 + $0x160] sm:$0xff] }
0x1350   : > { %v12585_v59 = vpop.f32.mrb[32].mxu1 }
0x1351   : > { %v9125_v0 = vpop.f32.mrb[33].mxu1 }
0x1352   : > { %v7486_v0 = vld [vmem:[%s13979_s6 + $0x138] sm:$0xff] }
0x1368   : > { %v9152_v35 = vpop.f32.mrb[34].mxu1 }
0x1369   : > { %v3110_v3 = vadd.f32 %v9152_v35, %v3014_v46  ;;  %v3104_v4 = vpop.f32.mrb[35].mxu1 }
0x136a   : > { %v3105_v7 = vadd.f32 %v3104_v4, %v3009_v54 }
0x136b   : > { %v3124_v61 = vmax.f32 %v3110_v3, 0.0 }
0x136c   : > { %v3123_v2 = vmax.f32 %v3105_v7, 0.0  ;;  %v9155_v10 = vpop.f32.mrb[36].mxu1 }
0x136d   : > { %v3120_v14 = vadd.f32 %v9155_v10, %v3024_v9  ;;  %3129 = vrot.lane.b32.xlu0 %v3124_v61, %s14010_s28  ;;  %v3114_v17 = vpop.f32.mrb[37].mxu1 }
0x136e   : > { %v3115_v18 = vadd.f32 %v3114_v17, %v3019_v13  ;;  %3127 = vrot.lane.b32.xlu1 %v3123_v2, %s14010_s28  ;;  %v10534_v20 = vpack.c.bf16 %v3124_v61, %v3123_v2 }
0x136f   : > { %v3126_v21 = vmax.f32 %v3120_v14, 0.0 }
0x1370   : > { %v3125_v23 = vmax.f32 %v3115_v18, 0.0 }
0x1371   : > { %3133 = vrot.lane.b32.xlu0 %v3126_v21, %s14010_s28 }
0x1372   : > { %3131 = vrot.lane.b32.xlu1 %v3125_v23, %s14010_s28  ;;  %v10538_v24 = vpack.c.bf16 %v3126_v21, %v3125_v23 }
0x1375   : > { %3141 = vrot.lane.b32.xlu0 %v3124_v61, %s14009_s17 }
0x1376   : > { %3139 = vrot.lane.b32.xlu1 %v3123_v2, %s14009_s17 }
0x1379   : > { %3145 = vrot.lane.b32.xlu0 %v3126_v21, %s14009_s17 }
0x137a   : > { %3143 = vrot.lane.b32.xlu1 %v3125_v23, %s14009_s17 }
0x137d   : > { %3168 = vperm.xlu0 %11335, %v7488_v26   ;;  %v7500_v26 = vld [vmem:[%s13980_s7 + $0x148] sm:$0xff] }
0x137e   : > { %3163 = vperm.xlu1 %11334, %v7487_v29   ;;  %v7499_v29 = vld [vmem:[%s13980_s7 + $0x140] sm:$0xff] }
0x1381   : > { %3178 = vperm.xlu0 %11335, %v7490_v30   ;;  %v7502_v30 = vld [vmem:[%s13980_s7 + $0x158] sm:$0xff] }
0x1382   : > { %3173 = vperm.xlu1 %11334, %v7489_v31   ;;  %v7501_v31 = vld [vmem:[%s13980_s7 + $0x150] sm:$0xff] }
0x13df   : > { %v3130_v33 = vpop.permute.xlu0 %3129 }
0x13e0   : > { %v3136_v37 = vmul.f32 %v12614_v36, %v3130_v33  ;;  %v3128_v38 = vpop.permute.xlu1 %3127 }
0x13e1   : > { %v3135_v39 = vmul.f32 %v12614_v36, %v3128_v38 }
0x13e3   : > { %v10526_v40 = vpack.c.bf16 %v3136_v37, %v3135_v39  ;;  %v3134_v44 = vpop.permute.xlu0 %3133 }
0x13e4   : > { %v3138_v45 = vmul.f32 %v12614_v36, %v3134_v44  ;;  %v3132_v47 = vpop.permute.xlu1 %3131 }
0x13e5   : > { %v3137_v48 = vmul.f32 %v12614_v36, %v3132_v47  ;;  %10527 = vmatprep.subr.bf16.mxu0 %v10526_v40 }
0x13e6   : > { %10529 = vmatpush3.bf16.msra.mxu0 %v10526_v40 }
0x13e7   : > { %v10530_v51 = vpack.c.bf16 %v3138_v45, %v3137_v48  ;;  %v3142_v12 = vpop.permute.xlu0 %3141 }
0x13e8   : > { %v3140_v5 = vpop.permute.xlu1 %3139  ;;  %v3148_v42 = vmul.f32 %v12623_v34, %v3142_v12 }
0x13e9   : > { %10531 = vmatprep.subr.bf16.mxu0 %v10530_v51  ;;  %v3147_v43 = vmul.f32 %v12623_v34, %v3140_v5 }
0x13ea   : > { %10533 = vmatpush3.bf16.msra.mxu0 %v10530_v51 }
0x13eb   : > { %10535 = vmatprep.subr.bf16.mxu0 %v10534_v20  ;;  %v3146_v41 = vpop.permute.xlu0 %3145  ;;  %v10542_v52 = vpack.c.bf16 %v3148_v42, %v3147_v43 }
0x13ec   : > { %v3144_v50 = vpop.permute.xlu1 %3143  ;;  %v3150_v55 = vmul.f32 %v12623_v34, %v3146_v41 }
0x13ed   : > { %v3149_v56 = vmul.f32 %v12623_v34, %v3144_v50 }
0x13ee   : > { %10537 = vmatpush3.bf16.msra.mxu0 %v10534_v20 }
0x13ef   : > { %10539 = vmatprep.subr.bf16.mxu0 %v10538_v24  ;;  %v10546_v57 = vpack.c.bf16 %v3150_v55, %v3149_v56 }
0x13f2   : > { %10541 = vmatpush3.bf16.msra.mxu0 %v10538_v24 }
0x13f3   : > { %10543 = vmatprep.subr.bf16.mxu0 %v10542_v52 }
0x13f6   : > { %10545 = vmatpush3.bf16.msra.mxu0 %v10542_v52 }
0x13f7   : > { %10547 = vmatprep.subr.bf16.mxu0 %v10546_v57 }
0x13fa   : > { %10549 = vmatpush3.bf16.msra.mxu0 %v10546_v57 }
0x13fc   : > { %v3169_v46 = vpop.permute.xlu0 %3168 }
0x13fd   : > { %9181 = vmatmul.mubr.msk.f32.vlgmr.msra.gmra.mrb[34].mxu0 %vm934_vm2, %v7484_v16  ;;  %v3164_v54 = vpop.permute.xlu1 %3163  ;;  %v7496_v16 = vld [vmem:[%s13979_s6 + $0x148] sm:$0xff] }
0x13fe   : > { %9183 = vmatprep.mubr.msk.f32.mxu0 %vm934_vm2, %v7485_v32  ;;  %v7497_v32 = vld [vmem:[%s13979_s6 + $0x150] sm:$0xff] }
0x1400   : > { %v3179_v9 = vpop.permute.xlu0 %3178 }
0x1401   : > { %9184 = vmatmul.mubr.msk.f32.gmra.mrb[36].mxu0 %vm934_vm2, %v7486_v0  ;;  %v3174_v13 = vpop.permute.xlu1 %3173  ;;  %v7498_v0 = vld [vmem:[%s13979_s6 + $0x158] sm:$0xff] }
0x1402   : > { %9240 = vmatprep.mubr.msk.f32.mxu0 %vm934_vm2, %v7507_v27  ;;  %v7537_v27 = vld [vmem:[%s13983_s10 + $0x100] sm:$0xff] }
0x14d0   : > { %v9182_v35 = vpop.f32.mrb[34].mxu0 }
0x14d1   : > { %v3265_v3 = vadd.f32 %v9182_v35, %v3169_v46  ;;  %v3259_v4 = vpop.f32.mrb[35].mxu0 }
0x14d2   : > { %v3260_v7 = vadd.f32 %v3259_v4, %v3164_v54 }
0x14d3   : > { %v3279_v61 = vmax.f32 %v3265_v3, 0.0 }
0x14d4   : > { %v3278_v2 = vmax.f32 %v3260_v7, 0.0  ;;  %v9185_v10 = vpop.f32.mrb[36].mxu0 }
0x14d5   : > { %v3275_v14 = vadd.f32 %v9185_v10, %v3179_v9  ;;  %3284 = vrot.lane.b32.xlu0 %v3279_v61, %s14010_s28  ;;  %v3269_v17 = vpop.f32.mrb[37].mxu0 }
0x14d6   : > { %v3270_v18 = vadd.f32 %v3269_v17, %v3174_v13  ;;  %3282 = vrot.lane.b32.xlu1 %v3278_v2, %s14010_s28  ;;  %v10558_v20 = vpack.c.bf16 %v3279_v61, %v3278_v2 }
0x14d7   : > { %v3281_v21 = vmax.f32 %v3275_v14, 0.0 }
0x14d8   : > { %v3280_v23 = vmax.f32 %v3270_v18, 0.0 }
0x14d9   : > { %3288 = vrot.lane.b32.xlu0 %v3281_v21, %s14010_s28 }
0x14da   : > { %3286 = vrot.lane.b32.xlu1 %v3280_v23, %s14010_s28  ;;  %v10562_v24 = vpack.c.bf16 %v3281_v21, %v3280_v23 }
0x14dd   : > { %3296 = vrot.lane.b32.xlu0 %v3279_v61, %s14009_s17 }
0x14de   : > { %3294 = vrot.lane.b32.xlu1 %v3278_v2, %s14009_s17 }
0x14e1   : > { %3300 = vrot.lane.b32.xlu0 %v3281_v21, %s14009_s17 }
0x14e2   : > { %3298 = vrot.lane.b32.xlu1 %v3280_v23, %s14009_s17 }
0x14e5   : > { %3323 = vperm.xlu0 %11335, %v7500_v26   ;;  %v7512_v26 = vld [vmem:[%s13980_s7 + $0x168] sm:$0xff] }
0x14e6   : > { %3318 = vperm.xlu1 %11334, %v7499_v29   ;;  %v7511_v29 = vld [vmem:[%s13980_s7 + $0x160] sm:$0xff] }
0x14e9   : > { %3333 = vperm.xlu0 %11335, %v7502_v30   ;;  %v7514_v30 = vld [vmem:[%s13980_s7 + $0x178] sm:$0xff] }
0x14ea   : > { %3328 = vperm.xlu1 %11334, %v7501_v31   ;;  %v7513_v31 = vld [vmem:[%s13980_s7 + $0x170] sm:$0xff] }
0x1547   : > { %v3285_v33 = vpop.permute.xlu0 %3284 }
0x1548   : > { %v3291_v37 = vmul.f32 %v12614_v36, %v3285_v33  ;;  %v3283_v38 = vpop.permute.xlu1 %3282  ;;  %v7519_v33 = vld [vmem:[%s13981_s8 + $0x100] sm:$0xff] }
0x1549   : > { %v3290_v39 = vmul.f32 %v12614_v36, %v3283_v38 }
0x154b   : > { %v10550_v40 = vpack.c.bf16 %v3291_v37, %v3290_v39  ;;  %v3289_v44 = vpop.permute.xlu0 %3288  ;;  %v7520_v37 = vld [vmem:[%s13981_s8 + $0x108] sm:$0xff]  ;;  %v7521_v39 = vld [vmem:[%s13981_s8 + $0x110] sm:$0xff] }
0x154c   : > { %v3293_v45 = vmul.f32 %v12614_v36, %v3289_v44  ;;  %v3287_v47 = vpop.permute.xlu1 %3286  ;;  %v10598_v38 = vpack.c.bf16 %v7520_v37, %v7519_v33  ;;  %v7508_v33 = vld [vmem:[%s13979_s6 + $0x168] sm:$0xff]  ;;  %v7509_v37 = vld [vmem:[%s13979_s6 + $0x170] sm:$0xff] }
0x154d   : > { %v3292_v48 = vmul.f32 %v12614_v36, %v3287_v47  ;;  %10551 = vmatprep.subr.bf16.mxu1 %v10550_v40  ;;  %v7524_v47 = vld [vmem:[%s13981_s8 + $0x128] sm:$0xff] }
0x154e   : > { %10553 = vmatpush3.bf16.msra.mxu1 %v10550_v40  ;;  %v7522_v40 = vld [vmem:[%s13981_s8 + $0x118] sm:$0xff] }
0x154f   : > { %v10554_v51 = vpack.c.bf16 %v3293_v45, %v3292_v48  ;;  %v3297_v12 = vpop.permute.xlu0 %3296  ;;  %v10602_v44 = vpack.c.bf16 %v7522_v40, %v7521_v39  ;;  %v7523_v45 = vld [vmem:[%s13981_s8 + $0x120] sm:$0xff]  ;;  %v7542_v40 = vld [vmem:[%s13983_s10 + $0x128] sm:$0xff] }
0x1550   : > { %v3295_v5 = vpop.permute.xlu1 %3294  ;;  %v3303_v42 = vmul.f32 %v12623_v34, %v3297_v12  ;;  %v10606_v48 = vpack.c.bf16 %v7524_v47, %v7523_v45  ;;  %v7526_v12 = vld [vmem:[%s13981_s8 + $0x138] sm:$0xff]  ;;  %v7541_v39 = vld [vmem:[%s13983_s10 + $0x120] sm:$0xff]  ;;  %v7543_v47 = vld [vmem:[%s13983_s10 + $0x130] sm:$0xff] }
0x1551   : > { %10555 = vmatprep.subr.bf16.mxu1 %v10554_v51  ;;  %v3302_v43 = vmul.f32 %v12623_v34, %v3295_v5  ;;  %v10638_v45 = vpack.c.bf16 %v7542_v40, %v7541_v39 }
0x1552   : > { %10557 = vmatpush3.bf16.msra.mxu1 %v10554_v51  ;;  %v7525_v51 = vld [vmem:[%s13981_s8 + $0x130] sm:$0xff] }
0x1553   : > { %10559 = vmatprep.subr.bf16.mxu1 %v10558_v20  ;;  %v3301_v41 = vpop.permute.xlu0 %3300  ;;  %v10566_v52 = vpack.c.bf16 %v3303_v42, %v3302_v43  ;;  %v10610_v5 = vpack.c.bf16 %v7526_v12, %v7525_v51  ;;  %v7527_v42 = vld [vmem:[%s13981_s8 + $0x140] sm:$0xff]  ;;  %v7528_v43 = vld [vmem:[%s13981_s8 + $0x148] sm:$0xff] }
0x1554   : > { %v3299_v50 = vpop.permute.xlu1 %3298  ;;  %v3305_v55 = vmul.f32 %v12623_v34, %v3301_v41  ;;  %v10614_v41 = vpack.c.bf16 %v7528_v43, %v7527_v42  ;;  %v7545_v12 = vld [vmem:[%s13983_s10 + $0x140] sm:$0xff]  ;;  %v7547_v43 = vld [vmem:[%s13983_s10 + $0x150] sm:$0xff] }
0x1555   : > { %v3304_v56 = vmul.f32 %v12623_v34, %v3299_v50  ;;  %v7529_v50 = vld [vmem:[%s13981_s8 + $0x150] sm:$0xff] }
0x1556   : > { %10561 = vmatpush3.bf16.msra.mxu1 %v10558_v20 }
0x1557   : > { %10563 = vmatprep.subr.bf16.mxu1 %v10562_v24  ;;  %v10570_v57 = vpack.c.bf16 %v3305_v55, %v3304_v56  ;;  %v7531_v56 = vld [vmem:[%s13981_s8 + $0x160] sm:$0xff] }
0x155a   : > { %10565 = vmatpush3.bf16.msra.mxu1 %v10562_v24 }
0x155b   : > { %10567 = vmatprep.subr.bf16.mxu1 %v10566_v52 }
0x155e   : > { %10569 = vmatpush3.bf16.msra.mxu1 %v10566_v52  ;;  %v7530_v52 = vld [vmem:[%s13981_s8 + $0x158] sm:$0xff] }
0x155f   : > { %10571 = vmatprep.subr.bf16.mxu1 %v10570_v57  ;;  %v10618_v55 = vpack.c.bf16 %v7530_v52, %v7529_v50  ;;  %v7549_v52 = vld [vmem:[%s13983_s10 + $0x160] sm:$0xff] }
0x1562   : > { %10573 = vmatpush3.bf16.msra.mxu1 %v10570_v57  ;;  %v7532_v57 = vld [vmem:[%s13981_s8 + $0x168] sm:$0xff] }
0x1563   : > { %10599 = vmatprep.subr.bf16.mxu1 %v10598_v38 }
0x1564   : > { %v3324_v46 = vpop.permute.xlu0 %3323 }
0x1565   : > { %9211 = vmatmul.mubr.msk.f32.vlgmr.msra.gmra.mrb[38].mxu1 %vm934_vm2, %v7496_v16  ;;  %v3319_v54 = vpop.permute.xlu1 %3318  ;;  %v10622_v16 = vpack.c.bf16 %v7532_v57, %v7531_v56  ;;  %v7533_v57 = vld [vmem:[%s13981_s8 + $0x170] sm:$0xff] }
0x1566   : > { %9213 = vmatprep.mubr.msk.f32.mxu1 %vm934_vm2, %v7497_v32  ;;  %10601 = vmatpush3.bf16.msra.mxu1 %v10598_v38 }
0x1567   : > { %10603 = vmatprep.subr.bf16.mxu1 %v10602_v44 }
0x1568   : > { %v3334_v9 = vpop.permute.xlu0 %3333 }
0x1569   : > { %9214 = vmatmul.mubr.msk.f32.gmra.mrb[40].mxu1 %vm934_vm2, %v7498_v0  ;;  %v3329_v13 = vpop.permute.xlu1 %3328 }
0x156a   : > { %10605 = vmatpush3.bf16.msra.mxu1 %v10602_v44  ;;  %v7510_v44 = vld [vmem:[%s13979_s6 + $0x178] sm:$0xff] }
0x156b   : > { %10607 = vmatprep.subr.bf16.mxu1 %v10606_v48 }
0x156e   : > { %10609 = vmatpush3.bf16.msra.mxu1 %v10606_v48  ;;  %v7544_v48 = vld [vmem:[%s13983_s10 + $0x138] sm:$0xff] }
0x156f   : > { %10611 = vmatprep.subr.bf16.mxu1 %v10610_v5  ;;  %v10642_v51 = vpack.c.bf16 %v7544_v48, %v7543_v47 }
0x1572   : > { %10613 = vmatpush3.bf16.msra.mxu1 %v10610_v5  ;;  %v7546_v5 = vld [vmem:[%s13983_s10 + $0x148] sm:$0xff] }
0x1573   : > { %10615 = vmatprep.subr.bf16.mxu1 %v10614_v41  ;;  %v10646_v42 = vpack.c.bf16 %v7546_v5, %v7545_v12 }
0x1576   : > { %10617 = vmatpush3.bf16.msra.mxu1 %v10614_v41  ;;  %v7548_v41 = vld [vmem:[%s13983_s10 + $0x158] sm:$0xff] }
0x1577   : > { %10619 = vmatprep.subr.bf16.mxu1 %v10618_v55  ;;  %v10650_v50 = vpack.c.bf16 %v7548_v41, %v7547_v43 }
0x157a   : > { %10621 = vmatpush3.bf16.msra.mxu1 %v10618_v55  ;;  %v7550_v55 = vld [vmem:[%s13983_s10 + $0x168] sm:$0xff] }
0x157b   : > { %10623 = vmatprep.subr.bf16.mxu1 %v10622_v16  ;;  %v10654_v56 = vpack.c.bf16 %v7550_v55, %v7549_v52 }
0x157e   : > { %10625 = vmatpush3.bf16.msra.mxu1 %v10622_v16  ;;  %v7534_v16 = vld [vmem:[%s13981_s8 + $0x178] sm:$0xff] }
0x1638   : > { %v9212_v35 = vpop.f32.mrb[38].mxu1 }
0x1639   : > { %v3420_v3 = vadd.f32 %v9212_v35, %v3324_v46  ;;  %v3414_v4 = vpop.f32.mrb[39].mxu1 }
0x163a   : > { %v3415_v7 = vadd.f32 %v3414_v4, %v3319_v54 }
0x163b   : > { %v3434_v61 = vmax.f32 %v3420_v3, 0.0 }
0x163c   : > { %v3433_v2 = vmax.f32 %v3415_v7, 0.0  ;;  %v9215_v10 = vpop.f32.mrb[40].mxu1 }
0x163d   : > { %v3430_v14 = vadd.f32 %v9215_v10, %v3334_v9  ;;  %3439 = vrot.lane.b32.xlu0 %v3434_v61, %s14010_s28  ;;  %v3424_v17 = vpop.f32.mrb[41].mxu1 }
0x163e   : > { %v3425_v18 = vadd.f32 %v3424_v17, %v3329_v13  ;;  %3437 = vrot.lane.b32.xlu1 %v3433_v2, %s14010_s28  ;;  %v12687_v20 = vpack.c.bf16 %v3434_v61, %v3433_v2 }
0x163f   : > { %v3436_v21 = vmax.f32 %v3430_v14, 0.0 }
0x1640   : > { %v3435_v23 = vmax.f32 %v3425_v18, 0.0 }
0x1641   : > { %3443 = vrot.lane.b32.xlu0 %v3436_v21, %s14010_s28 }
0x1642   : > { %3441 = vrot.lane.b32.xlu1 %v3435_v23, %s14010_s28  ;;  %v12691_v24 = vpack.c.bf16 %v3436_v21, %v3435_v23 }
0x1645   : > { %3451 = vrot.lane.b32.xlu0 %v3434_v61, %s14009_s17 }
0x1646   : > { %3449 = vrot.lane.b32.xlu1 %v3433_v2, %s14009_s17 }
0x1649   : > { %3455 = vrot.lane.b32.xlu0 %v3436_v21, %s14009_s17 }
0x164a   : > { %3453 = vrot.lane.b32.xlu1 %v3435_v23, %s14009_s17 }
0x164d   : > { %3478 = vperm.xlu0 %11335, %v7512_v26  }
0x164e   : > { %3473 = vperm.xlu1 %11334, %v7511_v29   ;;  %v7538_v29 = vld [vmem:[%s13983_s10 + $0x108] sm:$0xff] }
0x1651   : > { %3488 = vperm.xlu0 %11335, %v7514_v30  }
0x1652   : > { %3483 = vperm.xlu1 %11334, %v7513_v31   ;;  %v7539_v31 = vld [vmem:[%s13983_s10 + $0x110] sm:$0xff] }
0x16af   : > { %v3440_v32 = vpop.permute.xlu0 %3439 }
0x16b0   : > { %v3446_v0 = vmul.f32 %v12614_v36, %v3440_v32  ;;  %v3438_v46 = vpop.permute.xlu1 %3437  ;;  %v7551_v32 = vld [vmem:[%s13983_s10 + $0x170] sm:$0xff] }
0x16b1   : > { %v3445_v54 = vmul.f32 %v12614_v36, %v3438_v46  ;;  %v7552_v46 = vld [vmem:[%s13983_s10 + $0x178] sm:$0xff] }
0x16b3   : > { %v10574_v35 = vpack.c.bf16 %v3446_v0, %v3445_v54  ;;  %v3444_v3 = vpop.permute.xlu0 %3443  ;;  %v10626_v0 = vpack.c.bf16 %v7534_v16, %v7533_v57  ;;  %v10658_v54 = vpack.c.bf16 %v7552_v46, %v7551_v32 }
0x16b4   : > { %v3448_v4 = vmul.f32 %v12614_v36, %v3444_v3  ;;  %v3442_v7 = vpop.permute.xlu1 %3441 }
0x16b5   : > { %v3447_v61 = vmul.f32 %v12614_v36, %v3442_v7  ;;  %10575 = vmatprep.subr.bf16.mxu0 %v10574_v35  ;;  %10627 = vmatprep.subr.bf16.mxu1 %v10626_v0 }
0x16b6   : > { %10577 = vmatpush3.bf16.msra.mxu0 %v10574_v35  ;;  %10629 = vmatpush3.bf16.msra.mxu1 %v10626_v0 }
0x16b7   : > { %v10578_v9 = vpack.c.bf16 %v3448_v4, %v3447_v61  ;;  %v3452_v2 = vpop.permute.xlu0 %3451  ;;  %10663 = vmatprep.subr.bf16.mxu1 %v12077_v6 }
0x16b8   : > { %v3450_v10 = vpop.permute.xlu1 %3449  ;;  %v3458_v13 = vmul.f32 %v12623_v34, %v3452_v2 }
0x16b9   : > { %10579 = vmatprep.subr.bf16.mxu0 %v10578_v9  ;;  %v3457_v14 = vmul.f32 %v12623_v34, %v3450_v10 }
0x16ba   : > { %10581 = vmatpush3.bf16.msra.mxu0 %v10578_v9 }
0x16bb   : > { %10583 = vmatprep.subr.bf16.mxu0 %v12687_v20  ;;  %v3456_v17 = vpop.permute.xlu0 %3455  ;;  %v10590_v21 = vpack.c.bf16 %v3458_v13, %v3457_v14 }
0x16bc   : > { %v3454_v18 = vpop.permute.xlu1 %3453  ;;  %v3460_v23 = vmul.f32 %v12623_v34, %v3456_v17 }
0x16bd   : > { %v3459_v26 = vmul.f32 %v12623_v34, %v3454_v18 }
0x16be   : > { %10585 = vmatpush3.bf16.msra.mxu0 %v12687_v20  ;;  %v10630_v20 = vpack.c.bf16 %v7538_v29, %v7537_v27  ;;  %v7554_v29 = vld [vmem:[%s13984_s11 + $0x2] ss:$0 sm:$0xff] }
0x16bf   : > { %10587 = vmatprep.subr.bf16.mxu0 %v12691_v24  ;;  %v10594_v30 = vpack.c.bf16 %v3460_v23, %v3459_v26 }
0x16c2   : > { %10589 = vmatpush3.bf16.msra.mxu0 %v12691_v24  ;;  %v7540_v24 = vld [vmem:[%s13983_s10 + $0x118] sm:$0xff] }
0x16c3   : > { %10591 = vmatprep.subr.bf16.mxu0 %v10590_v21  ;;  %v10634_v38 = vpack.c.bf16 %v7540_v24, %v7539_v31 }
0x16c6   : > { %10593 = vmatpush3.bf16.msra.mxu0 %v10590_v21 }
0x16c7   : > { %10595 = vmatprep.subr.bf16.mxu0 %v10594_v30 }
0x16ca   : > { %10597 = vmatpush3.bf16.msra.mxu0 %v10594_v30 }
0x16cb   : > { %10631 = vmatprep.subr.bf16.mxu0 %v10630_v20 }
0x16cc   : > { %v3479_v35 = vpop.permute.xlu0 %3478 }
0x16cd   : > { %9241 = vmatmul.mubr.msk.f32.vlgmr.msra.gmra.mrb[38].mxu0 %vm934_vm2, %v7508_v33  ;;  %v3474_v3 = vpop.permute.xlu1 %3473 }
0x16ce   : > { %9243 = vmatprep.mubr.msk.f32.mxu0 %vm934_vm2, %v7509_v37  ;;  %10633 = vmatpush3.bf16.msra.mxu0 %v10630_v20 }
0x16cf   : > { %10635 = vmatprep.subr.bf16.mxu0 %v10634_v38 }
0x16d0   : > { %v3489_v2 = vpop.permute.xlu0 %3488 }
0x16d1   : > { %9244 = vmatmul.mubr.msk.f32.gmra.mrb[40].mxu0 %vm934_vm2, %v7510_v44  ;;  %v3484_v14 = vpop.permute.xlu1 %3483 }
0x16d2   : > { %10637 = vmatpush3.bf16.msra.mxu0 %v10634_v38 }
0x16d3   : > { %10639 = vmatprep.subr.bf16.mxu0 %v10638_v45 }
0x16d6   : > { %10641 = vmatpush3.bf16.msra.mxu0 %v10638_v45 }
0x16d7   : > { %10643 = vmatprep.subr.bf16.mxu0 %v10642_v51 }
0x16da   : > { %10645 = vmatpush3.bf16.msra.mxu0 %v10642_v51 }
0x16db   : > { %10647 = vmatprep.subr.bf16.mxu0 %v10646_v42 }
0x16de   : > { %10649 = vmatpush3.bf16.msra.mxu0 %v10646_v42 }
0x16df   : > { %10651 = vmatprep.subr.bf16.mxu0 %v10650_v50 }
0x16e2   : > { %10653 = vmatpush3.bf16.msra.mxu0 %v10650_v50 }
0x16e3   : > { %10655 = vmatprep.subr.bf16.mxu0 %v10654_v56 }
0x16e6   : > { %10657 = vmatpush3.bf16.msra.mxu0 %v10654_v56 }
0x16e7   : > { %10659 = vmatprep.subr.bf16.mxu0 %v10658_v54 }
0x16ea   : > { %10661 = vmatpush3.bf16.msra.mxu0 %v10658_v54 }
0x16eb   : > { %10694 = vmatprep.subr.bf16.mxu0 %v11553_v62 }
0x17a0   : > { %v9242_v4 = vpop.f32.mrb[38].mxu0 }
0x17a1   : > { %v3575_v7 = vadd.f32 %v9242_v4, %v3479_v35  ;;  %v3569_v61 = vpop.f32.mrb[39].mxu0  ;;  %v7536_v35 = vld [vmem:[%s13982_s9 + $0x2] ss:$0 sm:$0xff] }
0x17a2   : > { %v3570_v9 = vadd.f32 %v3569_v61, %v3474_v3 }
0x17a3   : > { %v3589_v17 = vmax.f32 %v3575_v7, 0.0 }
0x17a4   : > { %v3588_v10 = vmax.f32 %v3570_v9, 0.0  ;;  %v9245_v13 = vpop.f32.mrb[40].mxu0 }
0x17a5   : > { %v3585_v18 = vadd.f32 %v9245_v13, %v3489_v2  ;;  %v3579_v21 = vpop.f32.mrb[41].mxu0 }
0x17a6   : > { %v3580_v23 = vadd.f32 %v3579_v21, %v3484_v14  ;;  %9278 = vmatprep.mubr.f32.mxu1 %v3588_v10  ;;  %9316 = vmatprep.mubr.f32.mxu0 %v3588_v10 }
0x17a7   : > { %9279 = vmatmul.mubr.f32.vlgmr.msra.gmra.mrb[42].mxu1 %v3589_v17  ;;  %9317 = vmatmul.mubr.f32.vlgmr.msra.gmra.mrb[42].mxu0 %v3589_v17  ;;  %v3591_v27 = vmax.f32 %v3585_v18, 0.0 }
0x17a8   : > { %v3590_v26 = vmax.f32 %v3580_v23, 0.0  ;;  %10665 = vmatpush3.bf16.msra.mxu1 %v12077_v6 }
0x17a9   : > { %10667 = vmatprep.subr.bf16.mxu1 %v12082_v8 }
0x17aa   : > { %9281 = vmatprep.mubr.f32.mxu1 %v3590_v26  ;;  %9319 = vmatprep.mubr.f32.mxu0 %v3590_v26 }
0x17ab   : > { %9282 = vmatmul.mubr.f32.gmra.mrb[44].mxu1 %v3591_v27  ;;  %9320 = vmatmul.mubr.f32.gmra.mrb[44].mxu0 %v3591_v27 }
0x17ac   : > { %10669 = vmatpush3.bf16.msra.mxu1 %v12082_v8  ;;  %9368 = vmatprep.mubr.msk.f32.mxu0 %vm11554_vm3, %v11555_v63 }
0x17ad   : > { %10671 = vmatprep.subr.bf16.mxu1 %v12093_v11 }
0x17b0   : > { %10673 = vmatpush3.bf16.msra.mxu1 %v12093_v11 }
0x17b1   : > { %10675 = vmatprep.subr.bf16.mxu1 %v12103_v15 }
0x17b4   : > { %10677 = vmatpush3.bf16.msra.mxu1 %v12103_v15 }
0x17b5   : > { %10679 = vmatprep.subr.bf16.mxu1 %v12113_v19 }
0x17b8   : > { %10681 = vmatpush3.bf16.msra.mxu1 %v12113_v19 }
0x17b9   : > { %10683 = vmatprep.subr.bf16.mxu1 %v12123_v22 }
0x17bc   : > { %10685 = vmatpush3.bf16.msra.mxu1 %v12123_v22 }
0x17bd   : > { %10687 = vmatprep.subr.bf16.mxu1 %v12133_v25 }
0x17c0   : > { %10689 = vmatpush3.bf16.msra.mxu1 %v12133_v25 }
0x17c1   : > { %10691 = vmatprep.subr.bf16.mxu1 %v12144_v28 }
0x17c4   : > { %10693 = vmatpush3.bf16.msra.mxu1 %v12144_v28 }
0x187a   : > { %v9280_v30 = vpop.f32.mrb[42].mxu1  ;;  %v9318_v20 = vpop.f32.mrb[42].mxu0 }
0x187b   : > { %v3799_v31 = vadd.f32 %v9318_v20, %v7554_v29  ;;  %v3683_v24 = vpop.f32.mrb[43].mxu1  ;;  %v3793_v33 = vpop.f32.mrb[43].mxu0  ;;  %v3689_v17 = vadd.f32 %v9280_v30, %v7536_v35  ;;  %v7565_v30 = vld [vmem:[%s13980_s7 + $0x198] sm:$0xff] }
0x187c   : > { %v3794_v37 = vadd.f32 %v7554_v29, %v3793_v33  ;;  %v3684_v61 = vadd.f32 %v7536_v35, %v3683_v24 }
0x187d   : > { %v12870_v26 = vsub.f32 %v12518_v60, %v3689_v17  ;;  %v7562_v60 = vld [vmem:[%s13980_s7 + $0x180] sm:$0xff] }
0x187e   : > { %v11396_v38 = vpack.i.bf16 %v3799_v31, %v3794_v37  ;;  %v9283_v39 = vpop.f32.mrb[44].mxu1  ;;  %v9321_v40 = vpop.f32.mrb[44].mxu0  ;;  %v12864_v18 = vsub.f32 %v12512_v58, %v3684_v61 }
0x187f   : > { %v3809_v44 = vadd.f32 %v9321_v40, %v7554_v29  ;;  %v3693_v45 = vpop.f32.mrb[45].mxu1  ;;  %v3803_v47 = vpop.f32.mrb[45].mxu0  ;;  %v3699_v27 = vadd.f32 %v9283_v39, %v7536_v35 }
0x1880   : > { %v3804_v48 = vadd.f32 %v7554_v29, %v3803_v47  ;;  %11397 = vrot.lane.b32.xlu1 %v11396_v38, %s14009_s17  ;;  %v3694_v21 = vadd.f32 %v7536_v35, %v3693_v45 }
0x1881   : > { %v12880_v58 = vsub.f32 %v12528_v49, %v3699_v27  ;;  %v7564_v49 = vld [vmem:[%s13980_s7 + $0x190] sm:$0xff] }
0x1882   : > { %v11401_v51 = vpack.i.bf16 %v3809_v44, %v3804_v48  ;;  %v12873_v29 = vsub.f32 %v12521_v1, %v3694_v21  ;;  %v7563_v1 = vld [vmem:[%s13980_s7 + $0x188] sm:$0xff]  ;;  %v7560_v27 = vld [vmem:[%s13979_s6 + $0x190] sm:$0xff] }
0x1884   : > { %11402 = vrot.lane.b32.xlu0 %v11401_v51, %s14009_s17  ;;  %v10712_v61 = vpack.c.bf16 %v12880_v58, %v12873_v29 }
0x18f2   : > { %v11398_v12 = vpop.permute.xlu1 %11397 }
0x18f3   : > { %v11400_v5 = vunpack.i.h.bf16 %v11398_v12  ;;  %v11399_v42 = vunpack.i.l.bf16 %v11398_v12 }
0x18f5   : > { %v3821_v43 = vmax.f32 %v3799_v31, %v11400_v5  ;;  %v3820_v41 = vmax.f32 %v3794_v37, %v11399_v42 }
0x18f6   : > { %v11403_v50 = vpop.permute.xlu0 %11402 }
0x18f7   : > { %v11405_v52 = vunpack.i.h.bf16 %v11403_v50  ;;  %v11404_v55 = vunpack.i.l.bf16 %v11403_v50  ;;  %v11406_v56 = vpack.i.bf16 %v3821_v43, %v3820_v41 }
0x18f9   : > { %v3823_v57 = vmax.f32 %v3809_v44, %v11405_v52  ;;  %v3822_v16 = vmax.f32 %v3804_v48, %v11404_v55  ;;  %11407 = vrot.lane.b32.xlu1 %v11406_v56, %s14012_s23 }
0x18fb   : > { %v11411_v32 = vpack.i.bf16 %v3823_v57, %v3822_v16 }
0x18fd   : > { %11412 = vrot.lane.b32.xlu0 %v11411_v32, %s14012_s23  ;;  %v7555_v32 = vld [vmem:[%s13985_s12 + $0x10] sm:$0xff] }
0x196b   : > { %v11408_v0 = vpop.permute.xlu1 %11407 }
0x196c   : > { %v11410_v46 = vunpack.i.h.bf16 %v11408_v0  ;;  %v11409_v54 = vunpack.i.l.bf16 %v11408_v0 }
0x196e   : > { %v3833_v3 = vmax.f32 %v3821_v43, %v11410_v46  ;;  %v3832_v4 = vmax.f32 %v3820_v41, %v11409_v54  ;;  %v7558_v46 = vld [vmem:[%s13979_s6 + $0x180] sm:$0xff] }
0x196f   : > { %v11413_v7 = vpop.permute.xlu0 %11412 }
0x1970   : > { %v11415_v9 = vunpack.i.h.bf16 %v11413_v7  ;;  %v11414_v2 = vunpack.i.l.bf16 %v11413_v7  ;;  %v11416_v10 = vpack.i.bf16 %v3833_v3, %v3832_v4 }
0x1972   : > { %v3835_v13 = vmax.f32 %v3823_v57, %v11415_v9  ;;  %v3834_v14 = vmax.f32 %v3822_v16, %v11414_v2  ;;  %11417 = vrot.lane.b32.xlu1 %v11416_v10, %s14013_s25 }
0x1974   : > { %v11421_v23 = vpack.i.bf16 %v3835_v13, %v3834_v14 }
0x1976   : > { %11422 = vrot.lane.b32.xlu0 %v11421_v23, %s14013_s25  ;;  %4021 = vrot.lane.b32.xlu1 %v12864_v18, %s14010_s28  ;;  %v7559_v23 = vld [vmem:[%s13979_s6 + $0x188] sm:$0xff] }
0x197a   : > { %4023 = vrot.lane.b32.xlu0 %v12870_v26, %s14010_s28  ;;  %4025 = vrot.lane.b32.xlu1 %v12873_v29, %s14010_s28 }
0x197e   : > { %4027 = vrot.lane.b32.xlu0 %v12880_v58, %s14010_s28  ;;  %4033 = vrot.lane.b32.xlu1 %v12864_v18, %s14009_s17 }
0x1982   : > { %4035 = vrot.lane.b32.xlu0 %v12870_v26, %s14009_s17  ;;  %4037 = vrot.lane.b32.xlu1 %v12873_v29, %s14009_s17 }
0x1986   : > { %4039 = vrot.lane.b32.xlu0 %v12880_v58, %s14009_s17  ;;  %4057 = vperm.xlu1 %11334, %v7562_v60   ;;  %v7561_v60 = vld [vmem:[%s13979_s6 + $0x198] sm:$0xff] }
0x198a   : > { %4062 = vperm.xlu0 %11335, %v7563_v1   ;;  %4067 = vperm.xlu1 %11334, %v7564_v49  }
0x198e   : > { %4072 = vperm.xlu0 %11335, %v7565_v30  }
0x19e4   : > { %v11418_v20 = vpop.permute.xlu1 %11417 }
0x19e5   : > { %v11420_v31 = vunpack.i.h.bf16 %v11418_v20  ;;  %v11419_v24 = vunpack.i.l.bf16 %v11418_v20 }
0x19e7   : > { %v3845_v33 = vmax.f32 %v3833_v3, %v11420_v31  ;;  %v3844_v37 = vmax.f32 %v3832_v4, %v11419_v24  ;;  %v10708_v3 = vpack.c.bf16 %v12870_v26, %v12864_v18 }
0x19e8   : > { %v11423_v38 = vpop.permute.xlu0 %11422  ;;  %v4022_v48 = vpop.permute.xlu1 %4021 }
0x19e9   : > { %v11425_v39 = vunpack.i.h.bf16 %v11423_v38  ;;  %v11424_v40 = vunpack.i.l.bf16 %v11423_v38  ;;  %9354 = vmatprep.mubr.f32.mxu1 %v3844_v37  ;;  %v4029_v50 = vmul.f32 %v12614_v36, %v4022_v48 }
0x19ea   : > { %9355 = vmatmul.mubr.f32.vlgmr.msra.gmra.mrb[46].mxu1 %v3845_v33 }
0x19eb   : > { %v3846_v44 = vmax.f32 %v3834_v14, %v11424_v40  ;;  %v3847_v45 = vmax.f32 %v3835_v13, %v11425_v39 }
0x19ec   : > { %v4024_v47 = vpop.permute.xlu0 %4023  ;;  %v4026_v55 = vpop.permute.xlu1 %4025 }
0x19ed   : > { %9357 = vmatprep.mubr.f32.mxu1 %v3846_v44  ;;  %v4030_v42 = vmul.f32 %v12614_v36, %v4024_v47  ;;  %v4031_v0 = vmul.f32 %v12614_v36, %v4026_v55  ;;  %v7577_v55 = vld [vmem:[%s13980_s7 + $0x1b8] sm:$0xff] }
0x19ee   : > { %9358 = vmatmul.mubr.f32.gmra.mrb[48].mxu1 %v3847_v45 }
0x19ef   : > { %v10700_v57 = vpack.c.bf16 %v4030_v42, %v4029_v50  ;;  %v7570_v50 = vld [vmem:[%s13979_s6 + $0x1a0] sm:$0xff] }
0x19f0   : > { %v4028_v43 = vpop.permute.xlu0 %4027  ;;  %v4034_v4 = vpop.permute.xlu1 %4033  ;;  %9425 = vmatprep.mubr.msk.f32.mxu1 %vm934_vm2, %v7570_v50  ;;  %v7586_v50 = vld [vmem:[%s13980_s7 + $0x1c0] sm:$0xff] }
0x19f1   : > { %v4032_v16 = vmul.f32 %v12614_v36, %v4028_v43  ;;  %v4041_v2 = vmul.f32 %v12623_v34, %v4034_v4 }
0x19f3   : > { %v10704_v54 = vpack.c.bf16 %v4032_v16, %v4031_v0 }
0x19f4   : > { %v4036_v35 = vpop.permute.xlu0 %4035  ;;  %v4038_v10 = vpop.permute.xlu1 %4037 }
0x19f5   : > { %v4042_v7 = vmul.f32 %v12623_v34, %v4036_v35  ;;  %v4043_v17 = vmul.f32 %v12623_v34, %v4038_v10 }
0x19f7   : > { %v10716_v13 = vpack.c.bf16 %v4042_v7, %v4041_v2 }
0x19f8   : > { %v4040_v9 = vpop.permute.xlu0 %4039 }
0x19f9   : > { %v4044_v14 = vmul.f32 %v12623_v34, %v4040_v9 }
0x19fb   : > { %v10720_v21 = vpack.c.bf16 %v4044_v14, %v4043_v17 }
0x1a05   : > { %v4058_v20 = vpop.permute.xlu1 %4057 }
0x1a09   : > { %v4063_v30 = vpop.permute.xlu0 %4062  ;;  %v4068_v45 = vpop.permute.xlu1 %4067 }
0x1a0d   : > { %v4073_v39 = vpop.permute.xlu0 %4072 }
0x1abd   : > { %v9356_v51 = vpop.f32.mrb[46].mxu1 }
0x1abe   : > { %v3914_v12 = vpop.f32.mrb[47].mxu1 }
0x1abf   : > { %v10695_v5 = vpack.c.bf16 %v9356_v51, %v3914_v12 }
0x1ac1   : > { %v9359_v41 = vpop.f32.mrb[48].mxu1  ;;  %10696 = vmatpush3.bf16.msra.mxu0 %v10695_v5 }
0x1ac2   : > { %v3924_v52 = vpop.f32.mrb[49].mxu1  ;;  %10697 = vmatprep.subr.bf16.mxu0 %v11553_v62 }
0x1ac3   : > { %v10698_v56 = vpack.c.bf16 %v9359_v41, %v3924_v52  ;;  %v7575_v41 = vld [vmem:[%s13980_s7 + $0x1a8] sm:$0xff]  ;;  %v7574_v52 = vld [vmem:[%s13980_s7 + $0x1a0] sm:$0xff] }
0x1ac5   : > { %10699 = vmatpush3.bf16.msra.mxu0 %v10698_v56  ;;  %v7576_v56 = vld [vmem:[%s13980_s7 + $0x1b0] sm:$0xff] }
0x1ac6   : > { %10701 = vmatprep.subr.bf16.mxu0 %v10700_v57 }
0x1ac8   : > { %9369 = vmatmul.mubr.msk.f32.vlgmr.msra.gmra.mrb[46].mxu0 %vm1845_vm4, %v7555_v32 }
0x1ac9   : > { %10703 = vmatpush3.bf16.msra.mxu0 %v10700_v57  ;;  %9395 = vmatprep.mubr.msk.f32.mxu0 %vm934_vm2, %v7558_v46 }
0x1aca   : > { %10705 = vmatprep.subr.bf16.mxu0 %v10704_v54 }
0x1acd   : > { %10707 = vmatpush3.bf16.msra.mxu0 %v10704_v54 }
0x1ace   : > { %10709 = vmatprep.subr.bf16.mxu0 %v10708_v3 }
0x1ad1   : > { %10711 = vmatpush3.bf16.msra.mxu0 %v10708_v3 }
0x1ad2   : > { %10713 = vmatprep.subr.bf16.mxu0 %v10712_v61 }
0x1ad5   : > { %10715 = vmatpush3.bf16.msra.mxu0 %v10712_v61 }
0x1ad6   : > { %10717 = vmatprep.subr.bf16.mxu0 %v10716_v13 }
0x1ad9   : > { %10719 = vmatpush3.bf16.msra.mxu0 %v10716_v13 }
0x1ada   : > { %10721 = vmatprep.subr.bf16.mxu0 %v10720_v21 }
0x1add   : > { %10723 = vmatpush3.bf16.msra.mxu0 %v10720_v21 }
0x1ae0   : > { %9396 = vmatmul.mubr.msk.f32.vlgmr.msra.gmra.mrb[48].mxu0 %vm934_vm2, %v7559_v23 }
0x1ae1   : > { %9398 = vmatprep.mubr.msk.f32.mxu0 %vm934_vm2, %v7560_v27  ;;  %v7571_v27 = vld [vmem:[%s13979_s6 + $0x1a8] sm:$0xff] }
0x1ae4   : > { %9399 = vmatmul.mubr.msk.f32.gmra.mrb[50].mxu0 %vm934_vm2, %v7561_v60  ;;  %v7572_v60 = vld [vmem:[%s13979_s6 + $0x1b0] sm:$0xff] }
0x1b9b   : > { %v12937_v1 = vpop.f32.mrb[46].mxu0 }
0x1b9c   : > { %v9370_v49 = vpop.f32.mrb[47].mxu0 }
0x1bb3   : > { %v9397_v31 = vpop.f32.mrb[48].mxu0 }
0x1bb4   : > { %v4159_v24 = vadd.f32 %v9397_v31, %v4063_v30  ;;  %v4153_v33 = vpop.f32.mrb[49].mxu0 }
0x1bb5   : > { %v4154_v37 = vadd.f32 %v4153_v33, %v4058_v20 }
0x1bb6   : > { %v4173_v38 = vmax.f32 %v4159_v24, 0.0 }
0x1bb7   : > { %v4172_v40 = vmax.f32 %v4154_v37, 0.0  ;;  %v9400_v44 = vpop.f32.mrb[50].mxu0 }
0x1bb8   : > { %v4169_v47 = vadd.f32 %v9400_v44, %v4073_v39  ;;  %4178 = vrot.lane.b32.xlu0 %v4173_v38, %s14010_s28  ;;  %v4163_v48 = vpop.f32.mrb[51].mxu0 }
0x1bb9   : > { %v4164_v51 = vadd.f32 %v4163_v48, %v4068_v45  ;;  %4176 = vrot.lane.b32.xlu1 %v4172_v40, %s14010_s28  ;;  %v10732_v12 = vpack.c.bf16 %v4173_v38, %v4172_v40 }
0x1bba   : > { %v4175_v5 = vmax.f32 %v4169_v47, 0.0 }
0x1bbb   : > { %v4174_v42 = vmax.f32 %v4164_v51, 0.0 }
0x1bbc   : > { %4182 = vrot.lane.b32.xlu0 %v4175_v5, %s14010_s28 }
0x1bbd   : > { %4180 = vrot.lane.b32.xlu1 %v4174_v42, %s14010_s28  ;;  %v10736_v43 = vpack.c.bf16 %v4175_v5, %v4174_v42 }
0x1bc0   : > { %4190 = vrot.lane.b32.xlu0 %v4173_v38, %s14009_s17 }
0x1bc1   : > { %4188 = vrot.lane.b32.xlu1 %v4172_v40, %s14009_s17 }
0x1bc4   : > { %4194 = vrot.lane.b32.xlu0 %v4175_v5, %s14009_s17 }
0x1bc5   : > { %4192 = vrot.lane.b32.xlu1 %v4174_v42, %s14009_s17 }
0x1bc8   : > { %4217 = vperm.xlu0 %11335, %v7575_v41   ;;  %v7582_v41 = vld [vmem:[%s13979_s6 + $0x1c0] sm:$0xff] }
0x1bc9   : > { %4212 = vperm.xlu1 %11334, %v7574_v52   ;;  %9455 = vmatprep.mubr.msk.f32.mxu0 %vm934_vm2, %v7582_v41  ;;  %v7589_v52 = vld [vmem:[%s13980_s7 + $0x1d8] sm:$0xff]  ;;  %v7599_v41 = vld [vmem:[%s13980_s7 + $0x1e8] sm:$0xff] }
0x1bcc   : > { %4227 = vperm.xlu0 %11335, %v7577_v55   ;;  %v7588_v55 = vld [vmem:[%s13980_s7 + $0x1d0] sm:$0xff] }
0x1bcd   : > { %4222 = vperm.xlu1 %11334, %v7576_v56  }
0x1c2a   : > { %v4179_v57 = vpop.permute.xlu0 %4178 }
0x1c2b   : > { %v4185_v16 = vmul.f32 %v12614_v36, %v4179_v57  ;;  %v4177_v32 = vpop.permute.xlu1 %4176  ;;  %v13010_v57 = vld [vmem:[%s13974_s1] ss:$0 sm:$0xff] }
0x1c2c   : > { %v4184_v0 = vmul.f32 %v12614_v36, %v4177_v32 }
0x1c2e   : > { %v10724_v46 = vpack.c.bf16 %v4185_v16, %v4184_v0  ;;  %v4183_v54 = vpop.permute.xlu0 %4182 }
0x1c2f   : > { %v4187_v35 = vmul.f32 %v12614_v36, %v4183_v54  ;;  %v4181_v3 = vpop.permute.xlu1 %4180 }
0x1c30   : > { %v4186_v4 = vmul.f32 %v12614_v36, %v4181_v3  ;;  %10725 = vmatprep.subr.bf16.mxu1 %v10724_v46 }
0x1c31   : > { %10727 = vmatpush3.bf16.msra.mxu1 %v10724_v46 }
0x1c32   : > { %v10728_v7 = vpack.c.bf16 %v4187_v35, %v4186_v4  ;;  %v4191_v61 = vpop.permute.xlu0 %4190 }
0x1c33   : > { %v4189_v9 = vpop.permute.xlu1 %4188  ;;  %v4197_v2 = vmul.f32 %v12623_v34, %v4191_v61 }
0x1c34   : > { %10729 = vmatprep.subr.bf16.mxu1 %v10728_v7  ;;  %v4196_v10 = vmul.f32 %v12623_v34, %v4189_v9 }
0x1c35   : > { %10731 = vmatpush3.bf16.msra.mxu1 %v10728_v7 }
0x1c36   : > { %10733 = vmatprep.subr.bf16.mxu1 %v10732_v12  ;;  %v4195_v13 = vpop.permute.xlu0 %4194  ;;  %v10740_v17 = vpack.c.bf16 %v4197_v2, %v4196_v10  ;;  %v13019_v2 = vld [vmem:[%s13975_s2] ss:$0 sm:$0xff] }
0x1c37   : > { %v4193_v14 = vpop.permute.xlu1 %4192  ;;  %v4199_v21 = vmul.f32 %v12623_v34, %v4195_v13 }
0x1c38   : > { %v4198_v36 = vmul.f32 %v12623_v34, %v4193_v14  ;;  %v7573_v34 = vld [vmem:[%s13979_s6 + $0x1b8] sm:$0xff] }
0x1c39   : > { %10735 = vmatpush3.bf16.msra.mxu1 %v10732_v12 }
0x1c3a   : > { %10737 = vmatprep.subr.bf16.mxu1 %v10736_v43  ;;  %v10744_v23 = vpack.c.bf16 %v4199_v21, %v4198_v36 }
0x1c3d   : > { %10739 = vmatpush3.bf16.msra.mxu1 %v10736_v43  ;;  %v7587_v43 = vld [vmem:[%s13980_s7 + $0x1c8] sm:$0xff] }
0x1c3e   : > { %10741 = vmatprep.subr.bf16.mxu1 %v10740_v17 }
0x1c41   : > { %10743 = vmatpush3.bf16.msra.mxu1 %v10740_v17 }
0x1c42   : > { %10745 = vmatprep.subr.bf16.mxu1 %v10744_v23 }
0x1c45   : > { %10747 = vmatpush3.bf16.msra.mxu1 %v10744_v23 }
0x1c47   : > { %v4218_v49 = vpop.permute.xlu0 %4217 }
0x1c48   : > { %9426 = vmatmul.mubr.msk.f32.vlgmr.msra.gmra.mrb[50].mxu1 %vm934_vm2, %v7571_v27  ;;  %v4213_v30 = vpop.permute.xlu1 %4212 }
0x1c49   : > { %9428 = vmatprep.mubr.msk.f32.mxu1 %vm934_vm2, %v7572_v60  ;;  %v7583_v60 = vld [vmem:[%s13979_s6 + $0x1c8] sm:$0xff] }
0x1c4b   : > { %v4228_v38 = vpop.permute.xlu0 %4227 }
0x1c4c   : > { %9429 = vmatmul.mubr.msk.f32.gmra.mrb[52].mxu1 %vm934_vm2, %v7573_v34  ;;  %v4223_v44 = vpop.permute.xlu1 %4222  ;;  %v7584_v34 = vld [vmem:[%s13979_s6 + $0x1d0] sm:$0xff] }
0x1d1b   : > { %v9427_v20 = vpop.f32.mrb[50].mxu1 }
0x1d1c   : > { %v4314_v31 = vadd.f32 %v9427_v20, %v4218_v49  ;;  %v4308_v24 = vpop.f32.mrb[51].mxu1  ;;  %v7585_v49 = vld [vmem:[%s13979_s6 + $0x1d8] sm:$0xff] }
0x1d1d   : > { %v4309_v33 = vadd.f32 %v4308_v24, %v4213_v30 }
0x1d1e   : > { %v4328_v37 = vmax.f32 %v4314_v31, 0.0 }
0x1d1f   : > { %v4327_v39 = vmax.f32 %v4309_v33, 0.0  ;;  %v9430_v40 = vpop.f32.mrb[52].mxu1 }
0x1d20   : > { %v4324_v45 = vadd.f32 %v9430_v40, %v4228_v38  ;;  %4333 = vrot.lane.b32.xlu0 %v4328_v37, %s14010_s28  ;;  %v4318_v47 = vpop.f32.mrb[53].mxu1 }
0x1d21   : > { %v4319_v48 = vadd.f32 %v4318_v47, %v4223_v44  ;;  %4331 = vrot.lane.b32.xlu1 %v4327_v39, %s14010_s28  ;;  %v10756_v51 = vpack.c.bf16 %v4328_v37, %v4327_v39 }
0x1d22   : > { %v4330_v12 = vmax.f32 %v4324_v45, 0.0 }
0x1d23   : > { %v4329_v5 = vmax.f32 %v4319_v48, 0.0 }
0x1d24   : > { %4337 = vrot.lane.b32.xlu0 %v4330_v12, %s14010_s28 }
0x1d25   : > { %4335 = vrot.lane.b32.xlu1 %v4329_v5, %s14010_s28  ;;  %v10760_v42 = vpack.c.bf16 %v4330_v12, %v4329_v5 }
0x1d28   : > { %4345 = vrot.lane.b32.xlu0 %v4328_v37, %s14009_s17 }
0x1d29   : > { %4343 = vrot.lane.b32.xlu1 %v4327_v39, %s14009_s17 }
0x1d2c   : > { %4349 = vrot.lane.b32.xlu0 %v4330_v12, %s14009_s17 }
0x1d2d   : > { %4347 = vrot.lane.b32.xlu1 %v4329_v5, %s14009_s17 }
0x1d30   : > { %4372 = vperm.xlu0 %11335, %v7587_v43  }
0x1d31   : > { %4367 = vperm.xlu1 %11334, %v7586_v50   ;;  %v7594_v50 = vld [vmem:[%s13979_s6 + $0x1e0] sm:$0xff] }
0x1d32   : > { %9485 = vmatprep.mubr.msk.f32.mxu1 %vm934_vm2, %v7594_v50 }
0x1d34   : > { %4382 = vperm.xlu0 %11335, %v7589_v52   ;;  %v7598_v52 = vld [vmem:[%s13980_s7 + $0x1e0] sm:$0xff] }
0x1d35   : > { %4377 = vperm.xlu1 %11334, %v7588_v55   ;;  %v7601_v55 = vld [vmem:[%s13980_s7 + $0x1f8] sm:$0xff] }
0x1d92   : > { %v4334_v56 = vpop.permute.xlu0 %4333 }
0x1d93   : > { %v4340_v16 = vmul.f32 %v13010_v57, %v4334_v56  ;;  %v4332_v32 = vpop.permute.xlu1 %4331  ;;  %v7600_v56 = vld [vmem:[%s13980_s7 + $0x1f0] sm:$0xff] }
0x1d94   : > { %v4339_v0 = vmul.f32 %v13010_v57, %v4332_v32  ;;  %v7607_v32 = vld [vmem:[%s13981_s8 + $0x188] sm:$0xff] }
0x1d96   : > { %v10748_v46 = vpack.c.bf16 %v4340_v16, %v4339_v0  ;;  %v4338_v54 = vpop.permute.xlu0 %4337  ;;  %v7606_v16 = vld [vmem:[%s13981_s8 + $0x180] sm:$0xff] }
0x1d97   : > { %v4342_v35 = vmul.f32 %v13010_v57, %v4338_v54  ;;  %v4336_v3 = vpop.permute.xlu1 %4335  ;;  %v10796_v0 = vpack.c.bf16 %v7607_v32, %v7606_v16  ;;  %v7609_v54 = vld [vmem:[%s13981_s8 + $0x198] sm:$0xff]  ;;  %v7626_v16 = vld [vmem:[%s13983_s10 + $0x190] sm:$0xff]  ;;  %v7595_v32 = vld [vmem:[%s13979_s6 + $0x1e8] sm:$0xff] }
0x1d98   : > { %v4341_v4 = vmul.f32 %v13010_v57, %v4336_v3  ;;  %10749 = vmatprep.subr.bf16.mxu0 %v10748_v46  ;;  %v7610_v3 = vld [vmem:[%s13981_s8 + $0x1a0] sm:$0xff] }
0x1d99   : > { %10751 = vmatpush3.bf16.msra.mxu0 %v10748_v46  ;;  %v7608_v46 = vld [vmem:[%s13981_s8 + $0x190] sm:$0xff] }
0x1d9a   : > { %v10752_v7 = vpack.c.bf16 %v4342_v35, %v4341_v4  ;;  %v4346_v61 = vpop.permute.xlu0 %4345  ;;  %v10800_v35 = vpack.c.bf16 %v7609_v54, %v7608_v46  ;;  %v7611_v4 = vld [vmem:[%s13981_s8 + $0x1a8] sm:$0xff]  ;;  %v7628_v54 = vld [vmem:[%s13983_s10 + $0x1a0] sm:$0xff] }
0x1d9b   : > { %v4344_v9 = vpop.permute.xlu1 %4343  ;;  %v4352_v10 = vmul.f32 %v13019_v2, %v4346_v61  ;;  %v7612_v61 = vld [vmem:[%s13981_s8 + $0x1b0] sm:$0xff] }
0x1d9c   : > { %10753 = vmatprep.subr.bf16.mxu0 %v10752_v7  ;;  %v4351_v13 = vmul.f32 %v13019_v2, %v4344_v9  ;;  %v7613_v9 = vld [vmem:[%s13981_s8 + $0x1b8] sm:$0xff] }
0x1d9d   : > { %10755 = vmatpush3.bf16.msra.mxu0 %v10752_v7  ;;  %v10804_v7 = vpack.c.bf16 %v7611_v4, %v7610_v3  ;;  %v7597_v3 = vld [vmem:[%s13979_s6 + $0x1f8] sm:$0xff] }
0x1d9e   : > { %10757 = vmatprep.subr.bf16.mxu0 %v10756_v51  ;;  %v4350_v14 = vpop.permute.xlu0 %4349  ;;  %v10764_v21 = vpack.c.bf16 %v4352_v10, %v4351_v13  ;;  %v10808_v10 = vpack.c.bf16 %v7613_v9, %v7612_v61  ;;  %v7614_v13 = vld [vmem:[%s13981_s8 + $0x1c0] sm:$0xff]  ;;  %v7631_v61 = vld [vmem:[%s13983_s10 + $0x1b8] sm:$0xff] }
0x1d9f   : > { %v4348_v17 = vpop.permute.xlu1 %4347  ;;  %v4354_v36 = vmul.f32 %v13019_v2, %v4350_v14  ;;  %v7615_v14 = vld [vmem:[%s13981_s8 + $0x1c8] sm:$0xff] }
0x1da0   : > { %v4353_v23 = vmul.f32 %v13019_v2, %v4348_v17  ;;  %v10812_v17 = vpack.c.bf16 %v7615_v14, %v7614_v13  ;;  %v7633_v13 = vld [vmem:[%s13983_s10 + $0x1c8] sm:$0xff] }
0x1da1   : > { %10759 = vmatpush3.bf16.msra.mxu0 %v10756_v51 }
0x1da2   : > { %10761 = vmatprep.subr.bf16.mxu0 %v10760_v42  ;;  %v10768_v27 = vpack.c.bf16 %v4354_v36, %v4353_v23  ;;  %v7617_v36 = vld [vmem:[%s13981_s8 + $0x1d8] sm:$0xff] }
0x1da5   : > { %10763 = vmatpush3.bf16.msra.mxu0 %v10760_v42 }
0x1da6   : > { %10765 = vmatprep.subr.bf16.mxu0 %v10764_v21 }
0x1da9   : > { %10767 = vmatpush3.bf16.msra.mxu0 %v10764_v21  ;;  %v7616_v21 = vld [vmem:[%s13981_s8 + $0x1d0] sm:$0xff] }
0x1daa   : > { %10769 = vmatprep.subr.bf16.mxu0 %v10768_v27  ;;  %v10816_v23 = vpack.c.bf16 %v7617_v36, %v7616_v21  ;;  %v7635_v21 = vld [vmem:[%s13983_s10 + $0x1d8] sm:$0xff] }
0x1dad   : > { %10771 = vmatpush3.bf16.msra.mxu0 %v10768_v27  ;;  %v7618_v27 = vld [vmem:[%s13981_s8 + $0x1e0] sm:$0xff] }
0x1dae   : > { %10797 = vmatprep.subr.bf16.mxu0 %v10796_v0 }
0x1daf   : > { %v4373_v30 = vpop.permute.xlu0 %4372 }
0x1db0   : > { %9456 = vmatmul.mubr.msk.f32.vlgmr.msra.gmra.mrb[52].mxu0 %vm934_vm2, %v7583_v60  ;;  %v4368_v20 = vpop.permute.xlu1 %4367  ;;  %v7619_v60 = vld [vmem:[%s13981_s8 + $0x1e8] sm:$0xff] }
0x1db1   : > { %9458 = vmatprep.mubr.msk.f32.mxu0 %vm934_vm2, %v7584_v34  ;;  %10799 = vmatpush3.bf16.msra.mxu0 %v10796_v0  ;;  %v10820_v34 = vpack.c.bf16 %v7619_v60, %v7618_v27  ;;  %v7596_v0 = vld [vmem:[%s13979_s6 + $0x1f0] sm:$0xff]  ;;  %v7637_v27 = vld [vmem:[%s13983_s10 + $0x1e8] sm:$0xff] }
0x1db2   : > { %10801 = vmatprep.subr.bf16.mxu0 %v10800_v35 }
0x1db3   : > { %v4383_v39 = vpop.permute.xlu0 %4382 }
0x1db4   : > { %9459 = vmatmul.mubr.msk.f32.gmra.mrb[54].mxu0 %vm934_vm2, %v7585_v49  ;;  %v4378_v45 = vpop.permute.xlu1 %4377 }
0x1db5   : > { %10803 = vmatpush3.bf16.msra.mxu0 %v10800_v35  ;;  %v7629_v35 = vld [vmem:[%s13983_s10 + $0x1a8] sm:$0xff] }
0x1db6   : > { %10805 = vmatprep.subr.bf16.mxu0 %v10804_v7  ;;  %v10836_v4 = vpack.c.bf16 %v7629_v35, %v7628_v54 }
0x1db9   : > { %10807 = vmatpush3.bf16.msra.mxu0 %v10804_v7  ;;  %v7630_v7 = vld [vmem:[%s13983_s10 + $0x1b0] sm:$0xff] }
0x1dba   : > { %10809 = vmatprep.subr.bf16.mxu0 %v10808_v10  ;;  %v10840_v9 = vpack.c.bf16 %v7631_v61, %v7630_v7 }
0x1dbd   : > { %10811 = vmatpush3.bf16.msra.mxu0 %v10808_v10  ;;  %v7632_v10 = vld [vmem:[%s13983_s10 + $0x1c0] sm:$0xff] }
0x1dbe   : > { %10813 = vmatprep.subr.bf16.mxu0 %v10812_v17  ;;  %v10844_v14 = vpack.c.bf16 %v7633_v13, %v7632_v10 }
0x1dc1   : > { %10815 = vmatpush3.bf16.msra.mxu0 %v10812_v17  ;;  %v7634_v17 = vld [vmem:[%s13983_s10 + $0x1d0] sm:$0xff] }
0x1dc2   : > { %10817 = vmatprep.subr.bf16.mxu0 %v10816_v23  ;;  %v10848_v36 = vpack.c.bf16 %v7635_v21, %v7634_v17 }
0x1dc5   : > { %10819 = vmatpush3.bf16.msra.mxu0 %v10816_v23  ;;  %v7636_v23 = vld [vmem:[%s13983_s10 + $0x1e0] sm:$0xff] }
0x1dc6   : > { %10821 = vmatprep.subr.bf16.mxu0 %v10820_v34  ;;  %v10852_v60 = vpack.c.bf16 %v7637_v27, %v7636_v23 }
0x1dc9   : > { %10823 = vmatpush3.bf16.msra.mxu0 %v10820_v34  ;;  %v7620_v34 = vld [vmem:[%s13981_s8 + $0x1f0] sm:$0xff] }
0x1e83   : > { %v9457_v31 = vpop.f32.mrb[52].mxu0 }
0x1e84   : > { %v4469_v24 = vadd.f32 %v9457_v31, %v4373_v30  ;;  %v4463_v33 = vpop.f32.mrb[53].mxu0 }
0x1e85   : > { %v4464_v37 = vadd.f32 %v4463_v33, %v4368_v20 }
0x1e86   : > { %v4483_v38 = vmax.f32 %v4469_v24, 0.0 }
0x1e87   : > { %v4482_v40 = vmax.f32 %v4464_v37, 0.0  ;;  %v9460_v44 = vpop.f32.mrb[54].mxu0 }
0x1e88   : > { %v4479_v47 = vadd.f32 %v9460_v44, %v4383_v39  ;;  %4488 = vrot.lane.b32.xlu0 %v4483_v38, %s14010_s28  ;;  %v4473_v48 = vpop.f32.mrb[55].mxu0 }
0x1e89   : > { %v4474_v51 = vadd.f32 %v4473_v48, %v4378_v45  ;;  %4486 = vrot.lane.b32.xlu1 %v4482_v40, %s14010_s28  ;;  %v13039_v12 = vpack.c.bf16 %v4483_v38, %v4482_v40 }
0x1e8a   : > { %v4485_v5 = vmax.f32 %v4479_v47, 0.0 }
0x1e8b   : > { %v4484_v42 = vmax.f32 %v4474_v51, 0.0 }
0x1e8c   : > { %4492 = vrot.lane.b32.xlu0 %v4485_v5, %s14010_s28 }
0x1e8d   : > { %4490 = vrot.lane.b32.xlu1 %v4484_v42, %s14010_s28  ;;  %v13043_v43 = vpack.c.bf16 %v4485_v5, %v4484_v42 }
0x1e90   : > { %4500 = vrot.lane.b32.xlu0 %v4483_v38, %s14009_s17 }
0x1e91   : > { %4498 = vrot.lane.b32.xlu1 %v4482_v40, %s14009_s17 }
0x1e94   : > { %4504 = vrot.lane.b32.xlu0 %v4485_v5, %s14009_s17 }
0x1e95   : > { %4502 = vrot.lane.b32.xlu1 %v4484_v42, %s14009_s17 }
0x1e98   : > { %4527 = vperm.xlu0 %11335, %v7599_v41  }
0x1e99   : > { %4522 = vperm.xlu1 %11334, %v7598_v52   ;;  %v7624_v52 = vld [vmem:[%s13983_s10 + $0x180] sm:$0xff] }
0x1e9c   : > { %4537 = vperm.xlu0 %11335, %v7601_v55   ;;  %v7625_v55 = vld [vmem:[%s13983_s10 + $0x188] sm:$0xff] }
0x1e9d   : > { %4532 = vperm.xlu1 %11334, %v7600_v56  }
0x1efa   : > { %v4489_v49 = vpop.permute.xlu0 %4488 }
0x1efb   : > { %v4495_v30 = vmul.f32 %v13010_v57, %v4489_v49  ;;  %v4487_v20 = vpop.permute.xlu1 %4486  ;;  %v7621_v49 = vld [vmem:[%s13981_s8 + $0x1f8] sm:$0xff] }
0x1efc   : > { %v4494_v31 = vmul.f32 %v13010_v57, %v4487_v20  ;;  %v10824_v20 = vpack.c.bf16 %v7621_v49, %v7620_v34 }
0x1efe   : > { %v10772_v24 = vpack.c.bf16 %v4495_v30, %v4494_v31  ;;  %v4493_v33 = vpop.permute.xlu0 %4492  ;;  %v7638_v30 = vld [vmem:[%s13983_s10 + $0x1f0] sm:$0xff]  ;;  %v7639_v31 = vld [vmem:[%s13983_s10 + $0x1f8] sm:$0xff]  ;;  %10825 = vmatprep.subr.bf16.mxu0 %v10824_v20 }
0x1eff   : > { %v4497_v37 = vmul.f32 %v13010_v57, %v4493_v33  ;;  %v4491_v38 = vpop.permute.xlu1 %4490  ;;  %10827 = vmatpush3.bf16.msra.mxu0 %v10824_v20 }
0x1f00   : > { %v4496_v39 = vmul.f32 %v13010_v57, %v4491_v38  ;;  %10773 = vmatprep.subr.bf16.mxu1 %v10772_v24  ;;  %10861 = vmatprep.subr.bf16.mxu0 %v12077_v6 }
0x1f01   : > { %10775 = vmatpush3.bf16.msra.mxu1 %v10772_v24  ;;  %v10856_v24 = vpack.c.bf16 %v7639_v31, %v7638_v30 }
0x1f02   : > { %v10776_v40 = vpack.c.bf16 %v4497_v37, %v4496_v39  ;;  %v4501_v44 = vpop.permute.xlu0 %4500 }
0x1f03   : > { %v4499_v45 = vpop.permute.xlu1 %4498  ;;  %v4507_v47 = vmul.f32 %v13019_v2, %v4501_v44 }
0x1f04   : > { %10777 = vmatprep.subr.bf16.mxu1 %v10776_v40  ;;  %v4506_v48 = vmul.f32 %v13019_v2, %v4499_v45 }
0x1f05   : > { %10779 = vmatpush3.bf16.msra.mxu1 %v10776_v40 }
0x1f06   : > { %10781 = vmatprep.subr.bf16.mxu1 %v13039_v12  ;;  %v4505_v51 = vpop.permute.xlu0 %4504  ;;  %v10788_v42 = vpack.c.bf16 %v4507_v47, %v4506_v48 }
0x1f07   : > { %v4503_v5 = vpop.permute.xlu1 %4502  ;;  %v4509_v41 = vmul.f32 %v13019_v2, %v4505_v51 }
0x1f08   : > { %v4508_v50 = vmul.f32 %v13019_v2, %v4503_v5 }
0x1f09   : > { %10783 = vmatpush3.bf16.msra.mxu1 %v13039_v12  ;;  %v10828_v12 = vpack.c.bf16 %v7625_v55, %v7624_v52 }
0x1f0a   : > { %10785 = vmatprep.subr.bf16.mxu1 %v13043_v43  ;;  %v10792_v56 = vpack.c.bf16 %v4509_v41, %v4508_v50 }
0x1f0d   : > { %10787 = vmatpush3.bf16.msra.mxu1 %v13043_v43  ;;  %v7627_v43 = vld [vmem:[%s13983_s10 + $0x198] sm:$0xff] }
0x1f0e   : > { %10789 = vmatprep.subr.bf16.mxu1 %v10788_v42  ;;  %v10832_v46 = vpack.c.bf16 %v7627_v43, %v7626_v16 }
0x1f11   : > { %10791 = vmatpush3.bf16.msra.mxu1 %v10788_v42 }
0x1f12   : > { %10793 = vmatprep.subr.bf16.mxu1 %v10792_v56 }
0x1f15   : > { %10795 = vmatpush3.bf16.msra.mxu1 %v10792_v56  ;;  %v7641_v56 = vld [vmem:[%s13984_s11 + $0x3] ss:$0 sm:$0xff] }
0x1f16   : > { %10829 = vmatprep.subr.bf16.mxu1 %v10828_v12 }
0x1f17   : > { %v4528_v33 = vpop.permute.xlu0 %4527 }
0x1f18   : > { %9486 = vmatmul.mubr.msk.f32.vlgmr.msra.gmra.mrb[54].mxu1 %vm934_vm2, %v7595_v32  ;;  %v4523_v37 = vpop.permute.xlu1 %4522 }
0x1f19   : > { %9488 = vmatprep.mubr.msk.f32.mxu1 %vm934_vm2, %v7596_v0  ;;  %10831 = vmatpush3.bf16.msra.mxu1 %v10828_v12 }
0x1f1a   : > { %10833 = vmatprep.subr.bf16.mxu1 %v10832_v46 }
0x1f1b   : > { %v4538_v45 = vpop.permute.xlu0 %4537 }
0x1f1c   : > { %9489 = vmatmul.mubr.msk.f32.gmra.mrb[56].mxu1 %vm934_vm2, %v7597_v3  ;;  %v4533_v51 = vpop.permute.xlu1 %4532 }
0x1f1d   : > { %10835 = vmatpush3.bf16.msra.mxu1 %v10832_v46 }
0x1f1e   : > { %10837 = vmatprep.subr.bf16.mxu1 %v10836_v4 }
0x1f21   : > { %10839 = vmatpush3.bf16.msra.mxu1 %v10836_v4 }
0x1f22   : > { %10841 = vmatprep.subr.bf16.mxu1 %v10840_v9 }
0x1f25   : > { %10843 = vmatpush3.bf16.msra.mxu1 %v10840_v9 }
0x1f26   : > { %10845 = vmatprep.subr.bf16.mxu1 %v10844_v14 }
0x1f29   : > { %10847 = vmatpush3.bf16.msra.mxu1 %v10844_v14 }
0x1f2a   : > { %10849 = vmatprep.subr.bf16.mxu1 %v10848_v36 }
0x1f2d   : > { %10851 = vmatpush3.bf16.msra.mxu1 %v10848_v36 }
0x1f2e   : > { %10853 = vmatprep.subr.bf16.mxu1 %v10852_v60 }
0x1f31   : > { %10855 = vmatpush3.bf16.msra.mxu1 %v10852_v60 }
0x1f32   : > { %10857 = vmatprep.subr.bf16.mxu1 %v10856_v24 }
0x1f35   : > { %10859 = vmatpush3.bf16.msra.mxu1 %v10856_v24 }
0x1f36   : > { %10892 = vmatprep.subr.bf16.mxu1 %v11553_v62 }
0x1feb   : > { %v9487_v38 = vpop.f32.mrb[54].mxu1 }
0x1fec   : > { %v4624_v39 = vadd.f32 %v9487_v38, %v4528_v33  ;;  %v4618_v40 = vpop.f32.mrb[55].mxu1 }
0x1fed   : > { %v4619_v44 = vadd.f32 %v4618_v40, %v4523_v37  ;;  %v7623_v37 = vld [vmem:[%s13982_s9 + $0x3] ss:$0 sm:$0xff] }
0x1fee   : > { %v4638_v5 = vmax.f32 %v4624_v39, 0.0 }
0x1fef   : > { %v4637_v47 = vmax.f32 %v4619_v44, 0.0  ;;  %v9490_v48 = vpop.f32.mrb[56].mxu1 }
0x1ff0   : > { %v4634_v42 = vadd.f32 %v9490_v48, %v4538_v45  ;;  %v4628_v41 = vpop.f32.mrb[57].mxu1 }
0x1ff1   : > { %v4629_v50 = vadd.f32 %v4628_v41, %v4533_v51  ;;  %9523 = vmatprep.mubr.f32.mxu0 %v4637_v47  ;;  %9561 = vmatprep.mubr.f32.mxu1 %v4637_v47 }
0x1ff2   : > { %9524 = vmatmul.mubr.f32.vlgmr.msra.gmra.mrb[56].mxu0 %v4638_v5  ;;  %9562 = vmatmul.mubr.f32.vlgmr.msra.gmra.mrb[58].mxu1 %v4638_v5  ;;  %v4640_v55 = vmax.f32 %v4634_v42, 0.0 }
0x1ff3   : > { %v4639_v52 = vmax.f32 %v4629_v50, 0.0  ;;  %10863 = vmatpush3.bf16.msra.mxu0 %v12077_v6 }
0x1ff4   : > { %10865 = vmatprep.subr.bf16.mxu0 %v12082_v8 }
0x1ff5   : > { %9526 = vmatprep.mubr.f32.mxu0 %v4639_v52  ;;  %9564 = vmatprep.mubr.f32.mxu1 %v4639_v52 }
0x1ff6   : > { %9527 = vmatmul.mubr.f32.gmra.mrb[58].mxu0 %v4640_v55  ;;  %9565 = vmatmul.mubr.f32.gmra.mrb[60].mxu1 %v4640_v55 }
0x1ff7   : > { %10867 = vmatpush3.bf16.msra.mxu0 %v12082_v8  ;;  %9613 = vmatprep.mubr.msk.f32.mxu1 %vm11554_vm3, %v11555_v63 }
0x1ff8   : > { %10869 = vmatprep.subr.bf16.mxu0 %v12093_v11 }
0x1ffb   : > { %10871 = vmatpush3.bf16.msra.mxu0 %v12093_v11 }
0x1ffc   : > { %10873 = vmatprep.subr.bf16.mxu0 %v12103_v15 }
0x1fff   : > { %10875 = vmatpush3.bf16.msra.mxu0 %v12103_v15 }
0x2000   : > { %10877 = vmatprep.subr.bf16.mxu0 %v12113_v19 }
0x2003   : > { %10879 = vmatpush3.bf16.msra.mxu0 %v12113_v19 }
0x2004   : > { %10881 = vmatprep.subr.bf16.mxu0 %v12123_v22 }
0x2007   : > { %10883 = vmatpush3.bf16.msra.mxu0 %v12123_v22 }
0x2008   : > { %10885 = vmatprep.subr.bf16.mxu0 %v12133_v25 }
0x200b   : > { %10887 = vmatpush3.bf16.msra.mxu0 %v12133_v25 }
0x200c   : > { %10889 = vmatprep.subr.bf16.mxu0 %v12144_v28 }
0x200f   : > { %10891 = vmatpush3.bf16.msra.mxu0 %v12144_v28 }
0x20c5   : > { %v9525_v12 = vpop.f32.mrb[56].mxu0  ;;  %v9563_v16 = vpop.f32.mrb[58].mxu1 }
0x20c6   : > { %v4848_v43 = vadd.f32 %v9563_v16, %v7641_v56  ;;  %v4732_v32 = vpop.f32.mrb[57].mxu0  ;;  %v4842_v0 = vpop.f32.mrb[59].mxu1  ;;  %v4738_v42 = vadd.f32 %v9525_v12, %v7623_v37  ;;  %v7652_v12 = vld [vmem:[%s13980_s7 + $0x218] sm:$0xff] }
0x20c7   : > { %v4843_v46 = vadd.f32 %v7641_v56, %v4842_v0  ;;  %v4733_v44 = vadd.f32 %v7623_v37, %v4732_v32 }
0x20c8   : > { %v13222_v55 = vsub.f32 %v12870_v26, %v4738_v42  ;;  %v7649_v26 = vld [vmem:[%s13980_s7 + $0x200] sm:$0xff] }
0x20c9   : > { %v11426_v54 = vpack.i.bf16 %v4848_v43, %v4843_v46  ;;  %v9528_v35 = vpop.f32.mrb[58].mxu0  ;;  %v9566_v3 = vpop.f32.mrb[60].mxu1  ;;  %v13216_v41 = vsub.f32 %v12864_v18, %v4733_v44 }
0x20ca   : > { %v4858_v4 = vadd.f32 %v9566_v3, %v7641_v56  ;;  %v4742_v7 = vpop.f32.mrb[59].mxu0  ;;  %v4852_v61 = vpop.f32.mrb[61].mxu1 }
0x20cb   : > { %v4853_v9 = vadd.f32 %v7641_v56, %v4852_v61  ;;  %11427 = vrot.lane.b32.xlu1 %v11426_v54, %s14009_s17  ;;  %v4743_v50 = vadd.f32 %v7623_v37, %v4742_v7  ;;  %v4748_v56 = vadd.f32 %v9528_v35, %v7623_v37 }
0x20cd   : > { %v11431_v10 = vpack.i.bf16 %v4858_v4, %v4853_v9  ;;  %v13225_v16 = vsub.f32 %v12873_v29, %v4743_v50  ;;  %v13232_v18 = vsub.f32 %v12880_v58, %v4748_v56  ;;  %v7650_v29 = vld [vmem:[%s13980_s7 + $0x208] sm:$0xff]  ;;  %v7651_v58 = vld [vmem:[%s13980_s7 + $0x210] sm:$0xff] }
0x20ce   : > { %v7646_v56 = vld [vmem:[%s13979_s6 + $0x208] sm:$0xff] }
0x20cf   : > { %11432 = vrot.lane.b32.xlu0 %v11431_v10, %s14009_s17 }
0x213d   : > { %v11428_v13 = vpop.permute.xlu1 %11427 }
0x213e   : > { %v11430_v14 = vunpack.i.h.bf16 %v11428_v13  ;;  %v11429_v17 = vunpack.i.l.bf16 %v11428_v13 }
0x2140   : > { %v4870_v21 = vmax.f32 %v4848_v43, %v11430_v14  ;;  %v4869_v36 = vmax.f32 %v4843_v46, %v11429_v17 }
0x2141   : > { %v11433_v23 = vpop.permute.xlu0 %11432 }
0x2142   : > { %v11435_v27 = vunpack.i.h.bf16 %v11433_v23  ;;  %v11434_v60 = vunpack.i.l.bf16 %v11433_v23  ;;  %v11436_v34 = vpack.i.bf16 %v4870_v21, %v4869_v36 }
0x2144   : > { %v4872_v49 = vmax.f32 %v4858_v4, %v11435_v27  ;;  %v4871_v30 = vmax.f32 %v4853_v9, %v11434_v60  ;;  %11437 = vrot.lane.b32.xlu1 %v11436_v34, %s14012_s23 }
0x2146   : > { %v11441_v20 = vpack.i.bf16 %v4872_v49, %v4871_v30 }
0x2148   : > { %11442 = vrot.lane.b32.xlu0 %v11441_v20, %s14012_s23 }
0x21b6   : > { %v11438_v31 = vpop.permute.xlu1 %11437 }
0x21b7   : > { %v11440_v24 = vunpack.i.h.bf16 %v11438_v31  ;;  %v11439_v33 = vunpack.i.l.bf16 %v11438_v31  ;;  %v7642_v31 = vld [vmem:[%s13985_s12 + $0x18] sm:$0xff] }
0x21b9   : > { %v4882_v38 = vmax.f32 %v4870_v21, %v11440_v24  ;;  %v4881_v39 = vmax.f32 %v4869_v36, %v11439_v33  ;;  %v7645_v33 = vld [vmem:[%s13979_s6 + $0x200] sm:$0xff] }
0x21ba   : > { %v11443_v40 = vpop.permute.xlu0 %11442 }
0x21bb   : > { %v11445_v45 = vunpack.i.h.bf16 %v11443_v40  ;;  %v11444_v47 = vunpack.i.l.bf16 %v11443_v40  ;;  %v11446_v48 = vpack.i.bf16 %v4882_v38, %v4881_v39 }
0x21bd   : > { %v4884_v51 = vmax.f32 %v4872_v49, %v11445_v45  ;;  %v4883_v5 = vmax.f32 %v4871_v30, %v11444_v47  ;;  %11447 = vrot.lane.b32.xlu1 %v11446_v48, %s14013_s25  ;;  %v10910_v45 = vpack.c.bf16 %v13232_v18, %v13225_v16 }
0x21bf   : > { %v11451_v52 = vpack.i.bf16 %v4884_v51, %v4883_v5 }
0x21c1   : > { %11452 = vrot.lane.b32.xlu0 %v11451_v52, %s14013_s25  ;;  %5070 = vrot.lane.b32.xlu1 %v13216_v41, %s14010_s28 }
0x21c5   : > { %5072 = vrot.lane.b32.xlu0 %v13222_v55, %s14010_s28  ;;  %5074 = vrot.lane.b32.xlu1 %v13225_v16, %s14010_s28 }
0x21c9   : > { %5076 = vrot.lane.b32.xlu0 %v13232_v18, %s14010_s28  ;;  %5082 = vrot.lane.b32.xlu1 %v13216_v41, %s14009_s17 }
0x21cd   : > { %5084 = vrot.lane.b32.xlu0 %v13222_v55, %s14009_s17  ;;  %5086 = vrot.lane.b32.xlu1 %v13225_v16, %s14009_s17 }
0x21d1   : > { %5088 = vrot.lane.b32.xlu0 %v13232_v18, %s14009_s17  ;;  %5106 = vperm.xlu1 %11334, %v7649_v26   ;;  %v7647_v26 = vld [vmem:[%s13979_s6 + $0x210] sm:$0xff] }
0x21d5   : > { %5111 = vperm.xlu0 %11335, %v7650_v29   ;;  %5116 = vperm.xlu1 %11334, %v7651_v58   ;;  %v7648_v29 = vld [vmem:[%s13979_s6 + $0x218] sm:$0xff] }
0x21d9   : > { %5121 = vperm.xlu0 %11335, %v7652_v12  }
0x222f   : > { %v11448_v43 = vpop.permute.xlu1 %11447 }
0x2230   : > { %v11450_v32 = vunpack.i.h.bf16 %v11448_v43  ;;  %v11449_v0 = vunpack.i.l.bf16 %v11448_v43 }
0x2232   : > { %v4894_v46 = vmax.f32 %v4882_v38, %v11450_v32  ;;  %v4893_v54 = vmax.f32 %v4881_v39, %v11449_v0  ;;  %v10906_v39 = vpack.c.bf16 %v13222_v55, %v13216_v41 }
0x2233   : > { %v11453_v35 = vpop.permute.xlu0 %11452  ;;  %v5071_v10 = vpop.permute.xlu1 %5070 }
0x2234   : > { %v11455_v3 = vunpack.i.h.bf16 %v11453_v35  ;;  %v11454_v4 = vunpack.i.l.bf16 %v11453_v35  ;;  %9599 = vmatprep.mubr.f32.mxu0 %v4893_v54  ;;  %v5078_v27 = vmul.f32 %v13010_v57, %v5071_v10 }
0x2235   : > { %9600 = vmatmul.mubr.f32.vlgmr.msra.gmra.mrb[60].mxu0 %v4894_v46 }
0x2236   : > { %v4895_v7 = vmax.f32 %v4883_v5, %v11454_v4  ;;  %v4896_v61 = vmax.f32 %v4884_v51, %v11455_v3 }
0x2237   : > { %v5073_v9 = vpop.permute.xlu0 %5072  ;;  %v5075_v34 = vpop.permute.xlu1 %5074 }
0x2238   : > { %9602 = vmatprep.mubr.f32.mxu0 %v4895_v7  ;;  %v5079_v21 = vmul.f32 %v13010_v57, %v5073_v9  ;;  %v5080_v24 = vmul.f32 %v13010_v57, %v5075_v34  ;;  %v7661_v34 = vld [vmem:[%s13980_s7 + $0x220] sm:$0xff] }
0x2239   : > { %9603 = vmatmul.mubr.f32.gmra.mrb[62].mxu0 %v4896_v61 }
0x223a   : > { %v10898_v30 = vpack.c.bf16 %v5079_v21, %v5078_v27  ;;  %v7662_v27 = vld [vmem:[%s13980_s7 + $0x228] sm:$0xff] }
0x223b   : > { %v5077_v36 = vpop.permute.xlu0 %5076  ;;  %v5083_v40 = vpop.permute.xlu1 %5082 }
0x223c   : > { %v5081_v20 = vmul.f32 %v13010_v57, %v5077_v36  ;;  %v5090_v48 = vmul.f32 %v13019_v2, %v5083_v40 }
0x223e   : > { %v10902_v37 = vpack.c.bf16 %v5081_v20, %v5080_v24 }
0x223f   : > { %v5085_v38 = vpop.permute.xlu0 %5084  ;;  %v5087_v51 = vpop.permute.xlu1 %5086 }
0x2240   : > { %v5091_v44 = vmul.f32 %v13019_v2, %v5085_v38  ;;  %v5092_v50 = vmul.f32 %v13019_v2, %v5087_v51 }
0x2242   : > { %v10914_v5 = vpack.c.bf16 %v5091_v44, %v5090_v48 }
0x2243   : > { %v5089_v47 = vpop.permute.xlu0 %5088 }
0x2244   : > { %v5093_v42 = vmul.f32 %v13019_v2, %v5089_v47 }
0x2246   : > { %v10918_v52 = vpack.c.bf16 %v5093_v42, %v5092_v50 }
0x2250   : > { %v5107_v32 = vpop.permute.xlu1 %5106 }
0x2254   : > { %v5112_v43 = vpop.permute.xlu0 %5111  ;;  %v5117_v9 = vpop.permute.xlu1 %5116 }
0x2258   : > { %v5122_v4 = vpop.permute.xlu0 %5121 }
0x2308   : > { %v9601_v13 = vpop.f32.mrb[60].mxu0 }
0x2309   : > { %v4963_v14 = vpop.f32.mrb[61].mxu0 }
0x230a   : > { %v10893_v17 = vpack.c.bf16 %v9601_v13, %v4963_v14 }
0x230c   : > { %v9604_v23 = vpop.f32.mrb[62].mxu0  ;;  %10894 = vmatpush3.bf16.msra.mxu1 %v10893_v17 }
0x230d   : > { %v4973_v60 = vpop.f32.mrb[63].mxu0  ;;  %10895 = vmatprep.subr.bf16.mxu1 %v11553_v62 }
0x230e   : > { %v10896_v49 = vpack.c.bf16 %v9604_v23, %v4973_v60  ;;  %v7657_v60 = vld [vmem:[%s13979_s6 + $0x220] sm:$0xff] }
0x230f   : > { %9670 = vmatprep.mubr.msk.f32.mxu0 %vm934_vm2, %v7657_v60 }
0x2310   : > { %10897 = vmatpush3.bf16.msra.mxu1 %v10896_v49  ;;  %v7664_v49 = vld [vmem:[%s13980_s7 + $0x238] sm:$0xff] }
0x2311   : > { %10899 = vmatprep.subr.bf16.mxu1 %v10898_v30 }
0x2313   : > { %9614 = vmatmul.mubr.msk.f32.vlgmr.msra.gmra.mrb[62].mxu1 %vm1845_vm4, %v7642_v31 }
0x2314   : > { %10901 = vmatpush3.bf16.msra.mxu1 %v10898_v30  ;;  %9640 = vmatprep.mubr.msk.f32.mxu1 %vm934_vm2, %v7645_v33  ;;  %v7663_v30 = vld [vmem:[%s13980_s7 + $0x230] sm:$0xff] }
0x2315   : > { %10903 = vmatprep.subr.bf16.mxu1 %v10902_v37 }
0x2318   : > { %10905 = vmatpush3.bf16.msra.mxu1 %v10902_v37 }
0x2319   : > { %10907 = vmatprep.subr.bf16.mxu1 %v10906_v39 }
0x231c   : > { %10909 = vmatpush3.bf16.msra.mxu1 %v10906_v39 }
0x231d   : > { %10911 = vmatprep.subr.bf16.mxu1 %v10910_v45 }
0x2320   : > { %10913 = vmatpush3.bf16.msra.mxu1 %v10910_v45 }
0x2321   : > { %10915 = vmatprep.subr.bf16.mxu1 %v10914_v5 }
0x2324   : > { %10917 = vmatpush3.bf16.msra.mxu1 %v10914_v5 }
0x2325   : > { %10919 = vmatprep.subr.bf16.mxu1 %v10918_v52 }
0x2328   : > { %10921 = vmatpush3.bf16.msra.mxu1 %v10918_v52 }
0x232b   : > { %9641 = vmatmul.mubr.msk.f32.vlgmr.msra.gmra.mrb[64].mxu1 %vm934_vm2, %v7646_v56 }
0x232c   : > { %9643 = vmatprep.mubr.msk.f32.mxu1 %vm934_vm2, %v7647_v26 }
0x232f   : > { %9644 = vmatmul.mubr.msk.f32.gmra.mrb[66].mxu1 %vm934_vm2, %v7648_v29 }
0x23e6   : > { %v13289_v58 = vpop.f32.mrb[62].mxu1 }
0x23e7   : > { %v9615_v12 = vpop.f32.mrb[63].mxu1 }
0x23e8   : > { %v7658_v12 = vld [vmem:[%s13979_s6 + $0x228] sm:$0xff] }
0x23fe   : > { %v9642_v0 = vpop.f32.mrb[64].mxu1 }
0x23ff   : > { %v5208_v46 = vadd.f32 %v9642_v0, %v5112_v43  ;;  %v5202_v54 = vpop.f32.mrb[65].mxu1  ;;  %v7659_v43 = vld [vmem:[%s13979_s6 + $0x230] sm:$0xff] }
0x2400   : > { %v5203_v35 = vadd.f32 %v5202_v54, %v5107_v32  ;;  %v7660_v32 = vld [vmem:[%s13979_s6 + $0x238] sm:$0xff] }
0x2401   : > { %v5222_v3 = vmax.f32 %v5208_v46, 0.0 }
0x2402   : > { %v5221_v7 = vmax.f32 %v5203_v35, 0.0  ;;  %v9645_v61 = vpop.f32.mrb[66].mxu1 }
0x2403   : > { %v5218_v10 = vadd.f32 %v9645_v61, %v5122_v4  ;;  %5227 = vrot.lane.b32.xlu0 %v5222_v3, %s14010_s28  ;;  %v5212_v13 = vpop.f32.mrb[67].mxu1 }
0x2404   : > { %v5213_v14 = vadd.f32 %v5212_v13, %v5117_v9  ;;  %5225 = vrot.lane.b32.xlu1 %v5221_v7, %s14010_s28  ;;  %v10930_v17 = vpack.c.bf16 %v5222_v3, %v5221_v7 }
0x2405   : > { %v5224_v21 = vmax.f32 %v5218_v10, 0.0 }
0x2406   : > { %v5223_v36 = vmax.f32 %v5213_v14, 0.0 }
0x2407   : > { %5231 = vrot.lane.b32.xlu0 %v5224_v21, %s14010_s28 }
0x2408   : > { %5229 = vrot.lane.b32.xlu1 %v5223_v36, %s14010_s28  ;;  %v10934_v23 = vpack.c.bf16 %v5224_v21, %v5223_v36 }
0x240b   : > { %5239 = vrot.lane.b32.xlu0 %v5222_v3, %s14009_s17 }
0x240c   : > { %5237 = vrot.lane.b32.xlu1 %v5221_v7, %s14009_s17 }
0x240f   : > { %5243 = vrot.lane.b32.xlu0 %v5224_v21, %s14009_s17 }
0x2410   : > { %5241 = vrot.lane.b32.xlu1 %v5223_v36, %s14009_s17 }
0x2413   : > { %5266 = vperm.xlu0 %11335, %v7662_v27  }
0x2414   : > { %5261 = vperm.xlu1 %11334, %v7661_v34   ;;  %v7674_v34 = vld [vmem:[%s13980_s7 + $0x248] sm:$0xff] }
0x2417   : > { %5276 = vperm.xlu0 %11335, %v7664_v49   ;;  %v7669_v49 = vld [vmem:[%s13979_s6 + $0x240] sm:$0xff] }
0x2418   : > { %5271 = vperm.xlu1 %11334, %v7663_v30   ;;  %v7673_v30 = vld [vmem:[%s13980_s7 + $0x240] sm:$0xff]  ;;  %9700 = vmatprep.mubr.msk.f32.mxu1 %vm934_vm2, %v7669_v49 }
0x2419   : > { %v7681_v49 = vld [vmem:[%s13979_s6 + $0x260] sm:$0xff] }
0x2475   : > { %v5228_v20 = vpop.permute.xlu0 %5227 }
0x2476   : > { %v5234_v31 = vmul.f32 %v13010_v57, %v5228_v20  ;;  %v5226_v24 = vpop.permute.xlu1 %5225  ;;  %v7676_v20 = vld [vmem:[%s13980_s7 + $0x258] sm:$0xff] }
0x2477   : > { %v5233_v33 = vmul.f32 %v13010_v57, %v5226_v24 }
0x2479   : > { %v10922_v37 = vpack.c.bf16 %v5234_v31, %v5233_v33  ;;  %v5232_v38 = vpop.permute.xlu0 %5231  ;;  %v7675_v31 = vld [vmem:[%s13980_s7 + $0x250] sm:$0xff] }
0x247a   : > { %v5236_v39 = vmul.f32 %v13010_v57, %v5232_v38  ;;  %v5230_v40 = vpop.permute.xlu1 %5229 }
0x247b   : > { %v5235_v44 = vmul.f32 %v13010_v57, %v5230_v40  ;;  %10923 = vmatprep.subr.bf16.mxu0 %v10922_v37 }
0x247c   : > { %10925 = vmatpush3.bf16.msra.mxu0 %v10922_v37 }
0x247d   : > { %v10926_v45 = vpack.c.bf16 %v5236_v39, %v5235_v44  ;;  %v5240_v47 = vpop.permute.xlu0 %5239 }
0x247e   : > { %v5238_v48 = vpop.permute.xlu1 %5237  ;;  %v5246_v51 = vmul.f32 %v13019_v2, %v5240_v47 }
0x247f   : > { %10927 = vmatprep.subr.bf16.mxu0 %v10926_v45  ;;  %v5245_v5 = vmul.f32 %v13019_v2, %v5238_v48 }
0x2480   : > { %10929 = vmatpush3.bf16.msra.mxu0 %v10926_v45 }
0x2481   : > { %10931 = vmatprep.subr.bf16.mxu0 %v10930_v17  ;;  %v5244_v42 = vpop.permute.xlu0 %5243  ;;  %v10938_v52 = vpack.c.bf16 %v5246_v51, %v5245_v5 }
0x2482   : > { %v5242_v50 = vpop.permute.xlu1 %5241  ;;  %v5248_v56 = vmul.f32 %v13019_v2, %v5244_v42 }
0x2483   : > { %v5247_v26 = vmul.f32 %v13019_v2, %v5242_v50 }
0x2484   : > { %10933 = vmatpush3.bf16.msra.mxu0 %v10930_v17 }
0x2485   : > { %10935 = vmatprep.subr.bf16.mxu0 %v10934_v23  ;;  %v10942_v29 = vpack.c.bf16 %v5248_v56, %v5247_v26 }
0x2488   : > { %10937 = vmatpush3.bf16.msra.mxu0 %v10934_v23 }
0x2489   : > { %10939 = vmatprep.subr.bf16.mxu0 %v10938_v52 }
0x248c   : > { %10941 = vmatpush3.bf16.msra.mxu0 %v10938_v52 }
0x248d   : > { %10943 = vmatprep.subr.bf16.mxu0 %v10942_v29 }
0x2490   : > { %10945 = vmatpush3.bf16.msra.mxu0 %v10942_v29 }
0x2492   : > { %v5267_v0 = vpop.permute.xlu0 %5266 }
0x2493   : > { %9671 = vmatmul.mubr.msk.f32.vlgmr.msra.gmra.mrb[64].mxu0 %vm934_vm2, %v7658_v12  ;;  %v5262_v46 = vpop.permute.xlu1 %5261 }
0x2494   : > { %9673 = vmatprep.mubr.msk.f32.mxu0 %vm934_vm2, %v7659_v43  ;;  %v7670_v43 = vld [vmem:[%s13979_s6 + $0x248] sm:$0xff] }
0x2496   : > { %v5277_v61 = vpop.permute.xlu0 %5276 }
0x2497   : > { %9674 = vmatmul.mubr.msk.f32.gmra.mrb[66].mxu0 %vm934_vm2, %v7660_v32  ;;  %v5272_v13 = vpop.permute.xlu1 %5271  ;;  %v7671_v32 = vld [vmem:[%s13979_s6 + $0x250] sm:$0xff] }
0x2498   : > { %9730 = vmatprep.mubr.msk.f32.mxu0 %vm934_vm2, %v7681_v49 }
0x2566   : > { %v9672_v54 = vpop.f32.mrb[64].mxu0 }
0x2567   : > { %v5363_v35 = vadd.f32 %v9672_v54, %v5267_v0  ;;  %v5357_v3 = vpop.f32.mrb[65].mxu0 }
0x2568   : > { %v5358_v4 = vadd.f32 %v5357_v3, %v5262_v46 }
0x2569   : > { %v5377_v7 = vmax.f32 %v5363_v35, 0.0 }
0x256a   : > { %v5376_v9 = vmax.f32 %v5358_v4, 0.0  ;;  %v9675_v10 = vpop.f32.mrb[66].mxu0 }
0x256b   : > { %v5373_v14 = vadd.f32 %v9675_v10, %v5277_v61  ;;  %5382 = vrot.lane.b32.xlu0 %v5377_v7, %s14010_s28  ;;  %v5367_v17 = vpop.f32.mrb[67].mxu0 }
0x256c   : > { %v5368_v21 = vadd.f32 %v5367_v17, %v5272_v13  ;;  %5380 = vrot.lane.b32.xlu1 %v5376_v9, %s14010_s28  ;;  %v10954_v36 = vpack.c.bf16 %v5377_v7, %v5376_v9 }
0x256d   : > { %v5379_v23 = vmax.f32 %v5373_v14, 0.0 }
0x256e   : > { %v5378_v27 = vmax.f32 %v5368_v21, 0.0 }
0x256f   : > { %5386 = vrot.lane.b32.xlu0 %v5379_v23, %s14010_s28 }
0x2570   : > { %5384 = vrot.lane.b32.xlu1 %v5378_v27, %s14010_s28  ;;  %v10958_v60 = vpack.c.bf16 %v5379_v23, %v5378_v27 }
0x2573   : > { %5394 = vrot.lane.b32.xlu0 %v5377_v7, %s14009_s17 }
0x2574   : > { %5392 = vrot.lane.b32.xlu1 %v5376_v9, %s14009_s17 }
0x2577   : > { %5398 = vrot.lane.b32.xlu0 %v5379_v23, %s14009_s17 }
0x2578   : > { %5396 = vrot.lane.b32.xlu1 %v5378_v27, %s14009_s17 }
0x257b   : > { %5421 = vperm.xlu0 %11335, %v7674_v34   ;;  %v7686_v34 = vld [vmem:[%s13980_s7 + $0x268] sm:$0xff] }
0x257c   : > { %5416 = vperm.xlu1 %11334, %v7673_v30   ;;  %v7685_v30 = vld [vmem:[%s13980_s7 + $0x260] sm:$0xff] }
0x257f   : > { %5431 = vperm.xlu0 %11335, %v7676_v20   ;;  %v7688_v20 = vld [vmem:[%s13980_s7 + $0x278] sm:$0xff] }
0x2580   : > { %5426 = vperm.xlu1 %11334, %v7675_v31   ;;  %v7687_v31 = vld [vmem:[%s13980_s7 + $0x270] sm:$0xff] }
0x25dd   : > { %v5383_v24 = vpop.permute.xlu0 %5382 }
0x25de   : > { %v5389_v33 = vmul.f32 %v13010_v57, %v5383_v24  ;;  %v5381_v37 = vpop.permute.xlu1 %5380  ;;  %v7693_v24 = vld [vmem:[%s13981_s8 + $0x200] sm:$0xff] }
0x25df   : > { %v5388_v38 = vmul.f32 %v13010_v57, %v5381_v37 }
0x25e1   : > { %v10946_v39 = vpack.c.bf16 %v5389_v33, %v5388_v38  ;;  %v5387_v40 = vpop.permute.xlu0 %5386  ;;  %v7694_v33 = vld [vmem:[%s13981_s8 + $0x208] sm:$0xff]  ;;  %v7695_v38 = vld [vmem:[%s13981_s8 + $0x210] sm:$0xff] }
0x25e2   : > { %v5391_v44 = vmul.f32 %v13010_v57, %v5387_v40  ;;  %v5385_v45 = vpop.permute.xlu1 %5384  ;;  %v10994_v37 = vpack.c.bf16 %v7694_v33, %v7693_v24  ;;  %v7713_v33 = vld [vmem:[%s13983_s10 + $0x210] sm:$0xff] }
0x25e3   : > { %v5390_v47 = vmul.f32 %v13010_v57, %v5385_v45  ;;  %10947 = vmatprep.subr.bf16.mxu1 %v10946_v39  ;;  %v7698_v45 = vld [vmem:[%s13981_s8 + $0x228] sm:$0xff] }
0x25e4   : > { %10949 = vmatpush3.bf16.msra.mxu1 %v10946_v39  ;;  %v7696_v39 = vld [vmem:[%s13981_s8 + $0x218] sm:$0xff] }
0x25e5   : > { %v10950_v48 = vpack.c.bf16 %v5391_v44, %v5390_v47  ;;  %v5395_v51 = vpop.permute.xlu0 %5394  ;;  %v10998_v40 = vpack.c.bf16 %v7696_v39, %v7695_v38  ;;  %v7697_v44 = vld [vmem:[%s13981_s8 + $0x220] sm:$0xff]  ;;  %v7683_v38 = vld [vmem:[%s13979_s6 + $0x270] sm:$0xff] }
0x25e6   : > { %v5393_v5 = vpop.permute.xlu1 %5392  ;;  %v5401_v42 = vmul.f32 %v13019_v2, %v5395_v51  ;;  %v11002_v47 = vpack.c.bf16 %v7698_v45, %v7697_v44  ;;  %v7700_v51 = vld [vmem:[%s13981_s8 + $0x238] sm:$0xff]  ;;  %v7716_v44 = vld [vmem:[%s13983_s10 + $0x228] sm:$0xff] }
0x25e7   : > { %10951 = vmatprep.subr.bf16.mxu1 %v10950_v48  ;;  %v5400_v50 = vmul.f32 %v13019_v2, %v5393_v5  ;;  %v7684_v45 = vld [vmem:[%s13979_s6 + $0x278] sm:$0xff] }
0x25e8   : > { %10953 = vmatpush3.bf16.msra.mxu1 %v10950_v48  ;;  %v7699_v48 = vld [vmem:[%s13981_s8 + $0x230] sm:$0xff] }
0x25e9   : > { %10955 = vmatprep.subr.bf16.mxu1 %v10954_v36  ;;  %v5399_v52 = vpop.permute.xlu0 %5398  ;;  %v10962_v26 = vpack.c.bf16 %v5401_v42, %v5400_v50  ;;  %v11006_v5 = vpack.c.bf16 %v7700_v51, %v7699_v48  ;;  %v7701_v42 = vld [vmem:[%s13981_s8 + $0x240] sm:$0xff]  ;;  %v7702_v50 = vld [vmem:[%s13981_s8 + $0x248] sm:$0xff]  ;;  %v7717_v48 = vld [vmem:[%s13983_s10 + $0x230] sm:$0xff] }
0x25ea   : > { %v5397_v56 = vpop.permute.xlu1 %5396  ;;  %v5403_v29 = vmul.f32 %v13019_v2, %v5399_v52  ;;  %v11010_v52 = vpack.c.bf16 %v7702_v50, %v7701_v42  ;;  %v7718_v51 = vld [vmem:[%s13983_s10 + $0x238] sm:$0xff]  ;;  %v7719_v42 = vld [vmem:[%s13983_s10 + $0x240] sm:$0xff]  ;;  %v7720_v50 = vld [vmem:[%s13983_s10 + $0x248] sm:$0xff] }
0x25eb   : > { %v5402_v57 = vmul.f32 %v13019_v2, %v5397_v56  ;;  %v7672_v2 = vld [vmem:[%s13979_s6 + $0x258] sm:$0xff]  ;;  %v7703_v56 = vld [vmem:[%s13981_s8 + $0x250] sm:$0xff] }
0x25ec   : > { %10957 = vmatpush3.bf16.msra.mxu1 %v10954_v36 }
0x25ed   : > { %10959 = vmatprep.subr.bf16.mxu1 %v10958_v60  ;;  %v10966_v12 = vpack.c.bf16 %v5403_v29, %v5402_v57  ;;  %v7705_v57 = vld [vmem:[%s13981_s8 + $0x260] sm:$0xff] }
0x25f0   : > { %10961 = vmatpush3.bf16.msra.mxu1 %v10958_v60 }
0x25f1   : > { %10963 = vmatprep.subr.bf16.mxu1 %v10962_v26 }
0x25f4   : > { %10965 = vmatpush3.bf16.msra.mxu1 %v10962_v26  ;;  %v7704_v26 = vld [vmem:[%s13981_s8 + $0x258] sm:$0xff] }
0x25f5   : > { %10967 = vmatprep.subr.bf16.mxu1 %v10966_v12  ;;  %v11014_v29 = vpack.c.bf16 %v7704_v26, %v7703_v56  ;;  %v7721_v56 = vld [vmem:[%s13983_s10 + $0x250] sm:$0xff]  ;;  %v7722_v26 = vld [vmem:[%s13983_s10 + $0x258] sm:$0xff] }
0x25f8   : > { %10969 = vmatpush3.bf16.msra.mxu1 %v10966_v12  ;;  %v7706_v12 = vld [vmem:[%s13981_s8 + $0x268] sm:$0xff] }
0x25f9   : > { %10995 = vmatprep.subr.bf16.mxu1 %v10994_v37 }
0x25fa   : > { %v5422_v0 = vpop.permute.xlu0 %5421 }
0x25fb   : > { %9701 = vmatmul.mubr.msk.f32.vlgmr.msra.gmra.mrb[68].mxu1 %vm934_vm2, %v7670_v43  ;;  %v5417_v46 = vpop.permute.xlu1 %5416  ;;  %v11018_v43 = vpack.c.bf16 %v7706_v12, %v7705_v57  ;;  %v7723_v57 = vld [vmem:[%s13983_s10 + $0x260] sm:$0xff]  ;;  %v7724_v12 = vld [vmem:[%s13983_s10 + $0x268] sm:$0xff] }
0x25fc   : > { %9703 = vmatprep.mubr.msk.f32.mxu1 %vm934_vm2, %v7671_v32  ;;  %10997 = vmatpush3.bf16.msra.mxu1 %v10994_v37  ;;  %v7682_v37 = vld [vmem:[%s13979_s6 + $0x268] sm:$0xff] }
0x25fd   : > { %10999 = vmatprep.subr.bf16.mxu1 %v10998_v40 }
0x25fe   : > { %v5432_v61 = vpop.permute.xlu0 %5431 }
0x25ff   : > { %9704 = vmatmul.mubr.msk.f32.gmra.mrb[70].mxu1 %vm934_vm2, %v7672_v2  ;;  %v5427_v13 = vpop.permute.xlu1 %5426  ;;  %v13452_v2 = vld [vmem:[%s13974_s1] ss:$0 sm:$0xff] }
0x2600   : > { %11001 = vmatpush3.bf16.msra.mxu1 %v10998_v40  ;;  %v7715_v40 = vld [vmem:[%s13983_s10 + $0x220] sm:$0xff] }
0x2601   : > { %11003 = vmatprep.subr.bf16.mxu1 %v11002_v47 }
0x2604   : > { %11005 = vmatpush3.bf16.msra.mxu1 %v11002_v47  ;;  %v11034_v47 = vpack.c.bf16 %v7716_v44, %v7715_v40 }
0x2605   : > { %11007 = vmatprep.subr.bf16.mxu1 %v11006_v5 }
0x2608   : > { %11009 = vmatpush3.bf16.msra.mxu1 %v11006_v5  ;;  %v11038_v5 = vpack.c.bf16 %v7718_v51, %v7717_v48 }
0x2609   : > { %11011 = vmatprep.subr.bf16.mxu1 %v11010_v52 }
0x260c   : > { %11013 = vmatpush3.bf16.msra.mxu1 %v11010_v52  ;;  %v11042_v52 = vpack.c.bf16 %v7720_v50, %v7719_v42 }
0x260d   : > { %11015 = vmatprep.subr.bf16.mxu1 %v11014_v29 }
0x2610   : > { %11017 = vmatpush3.bf16.msra.mxu1 %v11014_v29  ;;  %v11046_v29 = vpack.c.bf16 %v7722_v26, %v7721_v56 }
0x2611   : > { %11019 = vmatprep.subr.bf16.mxu1 %v11018_v43 }
0x2614   : > { %11021 = vmatpush3.bf16.msra.mxu1 %v11018_v43  ;;  %v11050_v43 = vpack.c.bf16 %v7724_v12, %v7723_v57 }
0x26ce   : > { %v9702_v54 = vpop.f32.mrb[68].mxu1 }
0x26cf   : > { %v5518_v35 = vadd.f32 %v9702_v54, %v5422_v0  ;;  %v5512_v3 = vpop.f32.mrb[69].mxu1 }
0x26d0   : > { %v5513_v4 = vadd.f32 %v5512_v3, %v5417_v46 }
0x26d1   : > { %v5532_v7 = vmax.f32 %v5518_v35, 0.0 }
0x26d2   : > { %v5531_v9 = vmax.f32 %v5513_v4, 0.0  ;;  %v9705_v10 = vpop.f32.mrb[70].mxu1 }
0x26d3   : > { %v5528_v14 = vadd.f32 %v9705_v10, %v5432_v61  ;;  %5537 = vrot.lane.b32.xlu0 %v5532_v7, %s14010_s28  ;;  %v5522_v17 = vpop.f32.mrb[71].mxu1 }
0x26d4   : > { %v5523_v21 = vadd.f32 %v5522_v17, %v5427_v13  ;;  %5535 = vrot.lane.b32.xlu1 %v5531_v9, %s14010_s28  ;;  %v13381_v36 = vpack.c.bf16 %v5532_v7, %v5531_v9 }
0x26d5   : > { %v5534_v23 = vmax.f32 %v5528_v14, 0.0  ;;  %v13462_v14 = vld [vmem:[%s13975_s2] ss:$0 sm:$0xff] }
0x26d6   : > { %v5533_v27 = vmax.f32 %v5523_v21, 0.0 }
0x26d7   : > { %5541 = vrot.lane.b32.xlu0 %v5534_v23, %s14010_s28 }
0x26d8   : > { %5539 = vrot.lane.b32.xlu1 %v5533_v27, %s14010_s28  ;;  %v13385_v60 = vpack.c.bf16 %v5534_v23, %v5533_v27 }
0x26db   : > { %5549 = vrot.lane.b32.xlu0 %v5532_v7, %s14009_s17 }
0x26dc   : > { %5547 = vrot.lane.b32.xlu1 %v5531_v9, %s14009_s17 }
0x26df   : > { %5553 = vrot.lane.b32.xlu0 %v5534_v23, %s14009_s17 }
0x26e0   : > { %5551 = vrot.lane.b32.xlu1 %v5533_v27, %s14009_s17 }
0x26e3   : > { %5576 = vperm.xlu0 %11335, %v7686_v34  }
0x26e4   : > { %5571 = vperm.xlu1 %11334, %v7685_v30  }
0x26e7   : > { %5586 = vperm.xlu0 %11335, %v7688_v20   ;;  %v7711_v20 = vld [vmem:[%s13983_s10 + $0x200] sm:$0xff] }
0x26e8   : > { %5581 = vperm.xlu1 %11334, %v7687_v31   ;;  %v7712_v31 = vld [vmem:[%s13983_s10 + $0x208] sm:$0xff] }
0x2745   : > { %v5538_v32 = vpop.permute.xlu0 %5537 }
0x2746   : > { %v5544_v0 = vmul.f32 %v13452_v2, %v5538_v32  ;;  %v5536_v46 = vpop.permute.xlu1 %5535  ;;  %v7707_v32 = vld [vmem:[%s13981_s8 + $0x270] sm:$0xff] }
0x2747   : > { %v5543_v54 = vmul.f32 %v13452_v2, %v5536_v46  ;;  %v7725_v46 = vld [vmem:[%s13983_s10 + $0x270] sm:$0xff] }
0x2749   : > { %v10970_v35 = vpack.c.bf16 %v5544_v0, %v5543_v54  ;;  %v5542_v3 = vpop.permute.xlu0 %5541  ;;  %v7708_v0 = vld [vmem:[%s13981_s8 + $0x278] sm:$0xff] }
0x274a   : > { %v5546_v4 = vmul.f32 %v13452_v2, %v5542_v3  ;;  %v5540_v7 = vpop.permute.xlu1 %5539  ;;  %v11022_v54 = vpack.c.bf16 %v7708_v0, %v7707_v32 }
0x274b   : > { %v5545_v61 = vmul.f32 %v13452_v2, %v5540_v7  ;;  %10971 = vmatprep.subr.bf16.mxu0 %v10970_v35 }
0x274c   : > { %10973 = vmatpush3.bf16.msra.mxu0 %v10970_v35  ;;  %v7726_v35 = vld [vmem:[%s13983_s10 + $0x278] sm:$0xff]  ;;  %11023 = vmatprep.subr.bf16.mxu1 %v11022_v54 }
0x274d   : > { %v10974_v9 = vpack.c.bf16 %v5546_v4, %v5545_v61  ;;  %v5550_v10 = vpop.permute.xlu0 %5549  ;;  %v11054_v3 = vpack.c.bf16 %v7726_v35, %v7725_v46  ;;  %11025 = vmatpush3.bf16.msra.mxu1 %v11022_v54 }
0x274e   : > { %v5548_v13 = vpop.permute.xlu1 %5547  ;;  %v5556_v17 = vmul.f32 %v13462_v14, %v5550_v10  ;;  %11059 = vmatprep.subr.bf16.mxu1 %v12077_v6 }
0x274f   : > { %10975 = vmatprep.subr.bf16.mxu0 %v10974_v9  ;;  %v5555_v21 = vmul.f32 %v13462_v14, %v5548_v13 }
0x2750   : > { %10977 = vmatpush3.bf16.msra.mxu0 %v10974_v9 }
0x2751   : > { %10979 = vmatprep.subr.bf16.mxu0 %v13381_v36  ;;  %v5554_v23 = vpop.permute.xlu0 %5553  ;;  %v10986_v34 = vpack.c.bf16 %v5556_v17, %v5555_v21 }
0x2752   : > { %v5552_v27 = vpop.permute.xlu1 %5551  ;;  %v5558_v49 = vmul.f32 %v13462_v14, %v5554_v23 }
0x2753   : > { %v5557_v30 = vmul.f32 %v13462_v14, %v5552_v27 }
0x2754   : > { %10981 = vmatpush3.bf16.msra.mxu0 %v13381_v36  ;;  %v11026_v36 = vpack.c.bf16 %v7712_v31, %v7711_v20 }
0x2755   : > { %10983 = vmatprep.subr.bf16.mxu0 %v13385_v60  ;;  %v10990_v24 = vpack.c.bf16 %v5558_v49, %v5557_v30 }
0x2758   : > { %10985 = vmatpush3.bf16.msra.mxu0 %v13385_v60  ;;  %v7714_v60 = vld [vmem:[%s13983_s10 + $0x218] sm:$0xff] }
0x2759   : > { %10987 = vmatprep.subr.bf16.mxu0 %v10986_v34  ;;  %v11030_v39 = vpack.c.bf16 %v7714_v60, %v7713_v33 }
0x275c   : > { %10989 = vmatpush3.bf16.msra.mxu0 %v10986_v34 }
0x275d   : > { %10991 = vmatprep.subr.bf16.mxu0 %v10990_v24 }
0x2760   : > { %10993 = vmatpush3.bf16.msra.mxu0 %v10990_v24 }
0x2761   : > { %11027 = vmatprep.subr.bf16.mxu0 %v11026_v36 }
0x2762   : > { %v5577_v4 = vpop.permute.xlu0 %5576 }
0x2763   : > { %9731 = vmatmul.mubr.msk.f32.vlgmr.msra.gmra.mrb[68].mxu0 %vm934_vm2, %v7682_v37  ;;  %v5572_v7 = vpop.permute.xlu1 %5571 }
0x2764   : > { %9733 = vmatprep.mubr.msk.f32.mxu0 %vm934_vm2, %v7683_v38  ;;  %11029 = vmatpush3.bf16.msra.mxu0 %v11026_v36  ;;  %v7728_v36 = vld [vmem:[%s13984_s11 + $0x4] ss:$0 sm:$0xff] }
0x2765   : > { %11031 = vmatprep.subr.bf16.mxu0 %v11030_v39 }
0x2766   : > { %v5587_v17 = vpop.permute.xlu0 %5586 }
0x2767   : > { %9734 = vmatmul.mubr.msk.f32.gmra.mrb[70].mxu0 %vm934_vm2, %v7684_v45  ;;  %v5582_v27 = vpop.permute.xlu1 %5581 }
0x2768   : > { %11033 = vmatpush3.bf16.msra.mxu0 %v11030_v39 }
0x2769   : > { %11035 = vmatprep.subr.bf16.mxu0 %v11034_v47 }
0x276c   : > { %11037 = vmatpush3.bf16.msra.mxu0 %v11034_v47 }
0x276d   : > { %11039 = vmatprep.subr.bf16.mxu0 %v11038_v5 }
0x2770   : > { %11041 = vmatpush3.bf16.msra.mxu0 %v11038_v5 }
0x2771   : > { %11043 = vmatprep.subr.bf16.mxu0 %v11042_v52 }
0x2774   : > { %11045 = vmatpush3.bf16.msra.mxu0 %v11042_v52 }
0x2775   : > { %11047 = vmatprep.subr.bf16.mxu0 %v11046_v29 }
0x2778   : > { %11049 = vmatpush3.bf16.msra.mxu0 %v11046_v29 }
0x2779   : > { %11051 = vmatprep.subr.bf16.mxu0 %v11050_v43 }
0x277c   : > { %11053 = vmatpush3.bf16.msra.mxu0 %v11050_v43 }
0x277d   : > { %11055 = vmatprep.subr.bf16.mxu0 %v11054_v3 }
0x2780   : > { %11057 = vmatpush3.bf16.msra.mxu0 %v11054_v3 }
0x2781   : > { %11090 = vmatprep.subr.bf16.mxu0 %v11553_v62 }
0x2836   : > { %v9732_v61 = vpop.f32.mrb[68].mxu0 }
0x2837   : > { %v5673_v9 = vadd.f32 %v9732_v61, %v5577_v4  ;;  %v5667_v10 = vpop.f32.mrb[69].mxu0  ;;  %v7710_v61 = vld [vmem:[%s13982_s9 + $0x4] ss:$0 sm:$0xff] }
0x2838   : > { %v5668_v13 = vadd.f32 %v5667_v10, %v5572_v7 }
0x2839   : > { %v5687_v34 = vmax.f32 %v5673_v9, 0.0 }
0x283a   : > { %v5686_v21 = vmax.f32 %v5668_v13, 0.0  ;;  %v9735_v23 = vpop.f32.mrb[70].mxu0 }
0x283b   : > { %v5683_v49 = vadd.f32 %v9735_v23, %v5587_v17  ;;  %v5677_v30 = vpop.f32.mrb[71].mxu0 }
0x283c   : > { %v5678_v20 = vadd.f32 %v5677_v30, %v5582_v27  ;;  %9768 = vmatprep.mubr.f32.mxu1 %v5686_v21  ;;  %9806 = vmatprep.mubr.f32.mxu0 %v5686_v21 }
0x283d   : > { %9769 = vmatmul.mubr.f32.vlgmr.msra.gmra.mrb[72].mxu1 %v5687_v34  ;;  %9807 = vmatmul.mubr.f32.vlgmr.msra.gmra.mrb[72].mxu0 %v5687_v34  ;;  %v5689_v24 = vmax.f32 %v5683_v49, 0.0 }
0x283e   : > { %v5688_v31 = vmax.f32 %v5678_v20, 0.0  ;;  %11061 = vmatpush3.bf16.msra.mxu1 %v12077_v6 }
0x283f   : > { %11063 = vmatprep.subr.bf16.mxu1 %v12082_v8 }
0x2840   : > { %9771 = vmatprep.mubr.f32.mxu1 %v5688_v31  ;;  %9809 = vmatprep.mubr.f32.mxu0 %v5688_v31 }
0x2841   : > { %9772 = vmatmul.mubr.f32.gmra.mrb[74].mxu1 %v5689_v24  ;;  %9810 = vmatmul.mubr.f32.gmra.mrb[74].mxu0 %v5689_v24 }
0x2842   : > { %11065 = vmatpush3.bf16.msra.mxu1 %v12082_v8  ;;  %9858 = vmatprep.mubr.msk.f32.mxu0 %vm11554_vm3, %v11555_v63 }
0x2843   : > { %11067 = vmatprep.subr.bf16.mxu1 %v12093_v11 }
0x2846   : > { %11069 = vmatpush3.bf16.msra.mxu1 %v12093_v11 }
0x2847   : > { %11071 = vmatprep.subr.bf16.mxu1 %v12103_v15 }
0x284a   : > { %11073 = vmatpush3.bf16.msra.mxu1 %v12103_v15 }
0x284b   : > { %11075 = vmatprep.subr.bf16.mxu1 %v12113_v19 }
0x284e   : > { %11077 = vmatpush3.bf16.msra.mxu1 %v12113_v19 }
0x284f   : > { %11079 = vmatprep.subr.bf16.mxu1 %v12123_v22 }
0x2852   : > { %11081 = vmatpush3.bf16.msra.mxu1 %v12123_v22 }
0x2853   : > { %11083 = vmatprep.subr.bf16.mxu1 %v12133_v25 }
0x2856   : > { %11085 = vmatpush3.bf16.msra.mxu1 %v12133_v25 }
0x2857   : > { %11087 = vmatprep.subr.bf16.mxu1 %v12144_v28 }
0x285a   : > { %11089 = vmatpush3.bf16.msra.mxu1 %v12144_v28 }
0x2910   : > { %v9770_v33 = vpop.f32.mrb[72].mxu1  ;;  %v9808_v60 = vpop.f32.mrb[72].mxu0 }
0x2911   : > { %v5897_v37 = vadd.f32 %v9808_v60, %v7728_v36  ;;  %v5781_v38 = vpop.f32.mrb[73].mxu1  ;;  %v5891_v39 = vpop.f32.mrb[73].mxu0  ;;  %v5787_v30 = vadd.f32 %v9770_v33, %v7710_v61  ;;  %v7739_v33 = vld [vmem:[%s13980_s7 + $0x298] sm:$0xff] }
0x2912   : > { %v5892_v40 = vadd.f32 %v7728_v36, %v5891_v39  ;;  %v5782_v17 = vadd.f32 %v7710_v61, %v5781_v38 }
0x2914   : > { %v11456_v44 = vpack.i.bf16 %v5897_v37, %v5892_v40  ;;  %v9773_v45 = vpop.f32.mrb[74].mxu1  ;;  %v9811_v47 = vpop.f32.mrb[74].mxu0  ;;  %v13568_v20 = vsub.f32 %v13216_v41, %v5782_v17 }
0x2915   : > { %v5907_v48 = vadd.f32 %v9811_v47, %v7728_v36  ;;  %v5791_v51 = vpop.f32.mrb[75].mxu1  ;;  %v5901_v5 = vpop.f32.mrb[75].mxu0  ;;  %v5797_v60 = vadd.f32 %v9773_v45, %v7710_v61 }
0x2916   : > { %v5902_v42 = vadd.f32 %v7728_v36, %v5901_v5  ;;  %11457 = vrot.lane.b32.xlu1 %v11456_v44, %s14009_s17  ;;  %v5792_v31 = vadd.f32 %v7710_v61, %v5791_v51  ;;  %v13574_v36 = vsub.f32 %v13222_v55, %v5787_v30  ;;  %v7736_v55 = vld [vmem:[%s13980_s7 + $0x280] sm:$0xff] }
0x2917   : > { %v13584_v41 = vsub.f32 %v13232_v18, %v5797_v60  ;;  %v7738_v18 = vld [vmem:[%s13980_s7 + $0x290] sm:$0xff]  ;;  %v7732_v61 = vld [vmem:[%s13979_s6 + $0x280] sm:$0xff] }
0x2918   : > { %v11461_v50 = vpack.i.bf16 %v5907_v48, %v5902_v42 }
0x291a   : > { %11462 = vrot.lane.b32.xlu0 %v11461_v50, %s14009_s17 }
0x2988   : > { %v11458_v52 = vpop.permute.xlu1 %11457 }
0x2989   : > { %v11460_v56 = vunpack.i.h.bf16 %v11458_v52  ;;  %v11459_v26 = vunpack.i.l.bf16 %v11458_v52 }
0x298b   : > { %v5919_v29 = vmax.f32 %v5897_v37, %v11460_v56  ;;  %v5918_v57 = vmax.f32 %v5892_v40, %v11459_v26  ;;  %v13577_v37 = vsub.f32 %v13225_v16, %v5792_v31  ;;  %v7737_v16 = vld [vmem:[%s13980_s7 + $0x288] sm:$0xff] }
0x298c   : > { %v11463_v12 = vpop.permute.xlu0 %11462 }
0x298d   : > { %v11466_v43 = vpack.i.bf16 %v5919_v29, %v5918_v57  ;;  %v11465_v32 = vunpack.i.h.bf16 %v11463_v12  ;;  %v11464_v0 = vunpack.i.l.bf16 %v11463_v12 }
0x298f   : > { %v5921_v46 = vmax.f32 %v5907_v48, %v11465_v32  ;;  %v5920_v54 = vmax.f32 %v5902_v42, %v11464_v0  ;;  %11467 = vrot.lane.b32.xlu1 %v11466_v43, %s14012_s23 }
0x2991   : > { %v11471_v35 = vpack.i.bf16 %v5921_v46, %v5920_v54 }
0x2993   : > { %11472 = vrot.lane.b32.xlu0 %v11471_v35, %s14012_s23 }
0x2a01   : > { %v11468_v3 = vpop.permute.xlu1 %11467 }
0x2a02   : > { %v11470_v4 = vunpack.i.h.bf16 %v11468_v3  ;;  %v11469_v7 = vunpack.i.l.bf16 %v11468_v3 }
0x2a04   : > { %v5931_v9 = vmax.f32 %v5919_v29, %v11470_v4  ;;  %v5930_v10 = vmax.f32 %v5918_v57, %v11469_v7  ;;  %v7729_v4 = vld [vmem:[%s13985_s12 + $0x20] sm:$0xff] }
0x2a05   : > { %v11473_v13 = vpop.permute.xlu0 %11472 }
0x2a06   : > { %v11476_v21 = vpack.i.bf16 %v5931_v9, %v5930_v10  ;;  %v11475_v23 = vunpack.i.h.bf16 %v11473_v13  ;;  %v11474_v27 = vunpack.i.l.bf16 %v11473_v13  ;;  %v11104_v13 = vpack.c.bf16 %v13574_v36, %v13568_v20 }
0x2a08   : > { %v5933_v34 = vmax.f32 %v5921_v46, %v11475_v23  ;;  %v5932_v49 = vmax.f32 %v5920_v54, %v11474_v27  ;;  %11477 = vrot.lane.b32.xlu1 %v11476_v21, %s14013_s25  ;;  %v11108_v23 = vpack.c.bf16 %v13584_v41, %v13577_v37 }
0x2a0a   : > { %v11481_v24 = vpack.i.bf16 %v5933_v34, %v5932_v49 }
0x2a0c   : > { %11482 = vrot.lane.b32.xlu0 %v11481_v24, %s14013_s25  ;;  %6119 = vrot.lane.b32.xlu1 %v13568_v20, %s14010_s28 }
0x2a10   : > { %6121 = vrot.lane.b32.xlu0 %v13574_v36, %s14010_s28  ;;  %6123 = vrot.lane.b32.xlu1 %v13577_v37, %s14010_s28 }
0x2a14   : > { %6125 = vrot.lane.b32.xlu0 %v13584_v41, %s14010_s28  ;;  %6131 = vrot.lane.b32.xlu1 %v13568_v20, %s14009_s17 }
0x2a18   : > { %6133 = vrot.lane.b32.xlu0 %v13574_v36, %s14009_s17  ;;  %6135 = vrot.lane.b32.xlu1 %v13577_v37, %s14009_s17 }
0x2a1c   : > { %6137 = vrot.lane.b32.xlu0 %v13584_v41, %s14009_s17  ;;  %6155 = vperm.xlu1 %11334, %v7736_v55   ;;  %v7733_v55 = vld [vmem:[%s13979_s6 + $0x288] sm:$0xff] }
0x2a20   : > { %6160 = vperm.xlu0 %11335, %v7737_v16   ;;  %6165 = vperm.xlu1 %11334, %v7738_v18   ;;  %v7734_v16 = vld [vmem:[%s13979_s6 + $0x290] sm:$0xff]  ;;  %v7735_v18 = vld [vmem:[%s13979_s6 + $0x298] sm:$0xff] }
0x2a24   : > { %6170 = vperm.xlu0 %11335, %v7739_v33  }
0x2a7a   : > { %v11478_v38 = vpop.permute.xlu1 %11477 }
0x2a7b   : > { %v11480_v39 = vunpack.i.h.bf16 %v11478_v38  ;;  %v11479_v40 = vunpack.i.l.bf16 %v11478_v38 }
0x2a7d   : > { %v5943_v44 = vmax.f32 %v5931_v9, %v11480_v39  ;;  %v5942_v45 = vmax.f32 %v5930_v10, %v11479_v40 }
0x2a7e   : > { %v11483_v47 = vpop.permute.xlu0 %11482  ;;  %v6120_v52 = vpop.permute.xlu1 %6119 }
0x2a7f   : > { %v11485_v48 = vunpack.i.h.bf16 %v11483_v47  ;;  %v11484_v51 = vunpack.i.l.bf16 %v11483_v47  ;;  %9844 = vmatprep.mubr.f32.mxu1 %v5942_v45  ;;  %v6127_v32 = vmul.f32 %v13452_v2, %v6120_v52 }
0x2a80   : > { %9845 = vmatmul.mubr.f32.vlgmr.msra.gmra.mrb[76].mxu1 %v5943_v44 }
0x2a81   : > { %v5945_v5 = vmax.f32 %v5933_v34, %v11485_v48  ;;  %v5944_v42 = vmax.f32 %v5932_v49, %v11484_v51 }
0x2a82   : > { %v6122_v50 = vpop.permute.xlu0 %6121  ;;  %v6124_v46 = vpop.permute.xlu1 %6123 }
0x2a83   : > { %9847 = vmatprep.mubr.f32.mxu1 %v5944_v42  ;;  %v6128_v57 = vmul.f32 %v13452_v2, %v6122_v50  ;;  %v6129_v7 = vmul.f32 %v13452_v2, %v6124_v46  ;;  %v7744_v46 = vld [vmem:[%s13979_s6 + $0x2a0] sm:$0xff] }
0x2a84   : > { %9848 = vmatmul.mubr.f32.gmra.mrb[78].mxu1 %v5945_v5 }
0x2a85   : > { %v11096_v35 = vpack.c.bf16 %v6128_v57, %v6127_v32  ;;  %9915 = vmatprep.mubr.msk.f32.mxu1 %vm934_vm2, %v7744_v46 }
0x2a86   : > { %v6126_v12 = vpop.permute.xlu0 %6125  ;;  %v6132_v17 = vpop.permute.xlu1 %6131 }
0x2a87   : > { %v6130_v3 = vmul.f32 %v13452_v2, %v6126_v12  ;;  %v6139_v34 = vmul.f32 %v13462_v14, %v6132_v17 }
0x2a89   : > { %v11100_v9 = vpack.c.bf16 %v6130_v3, %v6129_v7  ;;  %v7750_v3 = vld [vmem:[%s13980_s7 + $0x2b0] sm:$0xff] }
0x2a8a   : > { %v6134_v10 = vpop.permute.xlu0 %6133  ;;  %v6136_v49 = vpop.permute.xlu1 %6135 }
0x2a8b   : > { %v6140_v21 = vmul.f32 %v13462_v14, %v6134_v10  ;;  %v6141_v24 = vmul.f32 %v13462_v14, %v6136_v49 }
0x2a8d   : > { %v11112_v30 = vpack.c.bf16 %v6140_v21, %v6139_v34 }
0x2a8e   : > { %v6138_v27 = vpop.permute.xlu0 %6137 }
0x2a8f   : > { %v6142_v31 = vmul.f32 %v13462_v14, %v6138_v27 }
0x2a91   : > { %v11116_v60 = vpack.c.bf16 %v6142_v31, %v6141_v24 }
0x2a9b   : > { %v6156_v40 = vpop.permute.xlu1 %6155 }
0x2a9f   : > { %v6161_v39 = vpop.permute.xlu0 %6160  ;;  %v6166_v52 = vpop.permute.xlu1 %6165 }
0x2aa3   : > { %v6171_v5 = vpop.permute.xlu0 %6170 }
0x2b53   : > { %v9846_v56 = vpop.f32.mrb[76].mxu1 }
0x2b54   : > { %v6012_v26 = vpop.f32.mrb[77].mxu1 }
0x2b55   : > { %v11091_v29 = vpack.c.bf16 %v9846_v56, %v6012_v26 }
0x2b57   : > { %v9849_v43 = vpop.f32.mrb[78].mxu1  ;;  %11092 = vmatpush3.bf16.msra.mxu0 %v11091_v29 }
0x2b58   : > { %v6022_v0 = vpop.f32.mrb[79].mxu1  ;;  %11093 = vmatprep.subr.bf16.mxu0 %v11553_v62 }
0x2b59   : > { %v11094_v54 = vpack.c.bf16 %v9849_v43, %v6022_v0  ;;  %v7749_v0 = vld [vmem:[%s13980_s7 + $0x2a8] sm:$0xff] }
0x2b5b   : > { %11095 = vmatpush3.bf16.msra.mxu0 %v11094_v54  ;;  %v7748_v54 = vld [vmem:[%s13980_s7 + $0x2a0] sm:$0xff] }
0x2b5c   : > { %11097 = vmatprep.subr.bf16.mxu0 %v11096_v35 }
0x2b5e   : > { %9859 = vmatmul.mubr.msk.f32.vlgmr.msra.gmra.mrb[76].mxu0 %vm1845_vm4, %v7729_v4 }
0x2b5f   : > { %11099 = vmatpush3.bf16.msra.mxu0 %v11096_v35  ;;  %9885 = vmatprep.mubr.msk.f32.mxu0 %vm934_vm2, %v7732_v61  ;;  %v7751_v35 = vld [vmem:[%s13980_s7 + $0x2b8] sm:$0xff] }
0x2b60   : > { %11101 = vmatprep.subr.bf16.mxu0 %v11100_v9 }
0x2b63   : > { %11103 = vmatpush3.bf16.msra.mxu0 %v11100_v9 }
0x2b64   : > { %11105 = vmatprep.subr.bf16.mxu0 %v11104_v13 }
0x2b67   : > { %11107 = vmatpush3.bf16.msra.mxu0 %v11104_v13 }
0x2b68   : > { %11109 = vmatprep.subr.bf16.mxu0 %v11108_v23 }
0x2b6b   : > { %11111 = vmatpush3.bf16.msra.mxu0 %v11108_v23 }
0x2b6c   : > { %11113 = vmatprep.subr.bf16.mxu0 %v11112_v30 }
0x2b6f   : > { %11115 = vmatpush3.bf16.msra.mxu0 %v11112_v30 }
0x2b70   : > { %11117 = vmatprep.subr.bf16.mxu0 %v11116_v60 }
0x2b73   : > { %11119 = vmatpush3.bf16.msra.mxu0 %v11116_v60 }
0x2b76   : > { %9886 = vmatmul.mubr.msk.f32.vlgmr.msra.gmra.mrb[78].mxu0 %vm934_vm2, %v7733_v55 }
0x2b77   : > { %9888 = vmatprep.mubr.msk.f32.mxu0 %vm934_vm2, %v7734_v16 }
0x2b7a   : > { %9889 = vmatmul.mubr.msk.f32.gmra.mrb[80].mxu0 %vm934_vm2, %v7735_v18 }
0x2c31   : > { %v13641_v33 = vpop.f32.mrb[76].mxu0 }
0x2c32   : > { %v9860_v38 = vpop.f32.mrb[77].mxu0 }
0x2c49   : > { %v9887_v44 = vpop.f32.mrb[78].mxu0 }
0x2c4a   : > { %v6257_v45 = vadd.f32 %v9887_v44, %v6161_v39  ;;  %v6251_v47 = vpop.f32.mrb[79].mxu0  ;;  %v7745_v39 = vld [vmem:[%s13979_s6 + $0x2a8] sm:$0xff]  ;;  %v7747_v44 = vld [vmem:[%s13979_s6 + $0x2b8] sm:$0xff] }
0x2c4b   : > { %v6252_v48 = vadd.f32 %v6251_v47, %v6156_v40  ;;  %v7746_v40 = vld [vmem:[%s13979_s6 + $0x2b0] sm:$0xff] }
0x2c4c   : > { %v6271_v51 = vmax.f32 %v6257_v45, 0.0 }
0x2c4d   : > { %v6270_v42 = vmax.f32 %v6252_v48, 0.0  ;;  %v9890_v50 = vpop.f32.mrb[80].mxu0 }
0x2c4e   : > { %v6267_v56 = vadd.f32 %v9890_v50, %v6171_v5  ;;  %6276 = vrot.lane.b32.xlu0 %v6271_v51, %s14010_s28  ;;  %v6261_v26 = vpop.f32.mrb[81].mxu0 }
0x2c4f   : > { %v6262_v29 = vadd.f32 %v6261_v26, %v6166_v52  ;;  %6274 = vrot.lane.b32.xlu1 %v6270_v42, %s14010_s28  ;;  %v11128_v57 = vpack.c.bf16 %v6271_v51, %v6270_v42 }
0x2c50   : > { %v6273_v12 = vmax.f32 %v6267_v56, 0.0 }
0x2c51   : > { %v6272_v43 = vmax.f32 %v6262_v29, 0.0 }
0x2c52   : > { %6280 = vrot.lane.b32.xlu0 %v6273_v12, %s14010_s28 }
0x2c53   : > { %6278 = vrot.lane.b32.xlu1 %v6272_v43, %s14010_s28  ;;  %v11132_v32 = vpack.c.bf16 %v6273_v12, %v6272_v43 }
0x2c56   : > { %6288 = vrot.lane.b32.xlu0 %v6271_v51, %s14009_s17 }
0x2c57   : > { %6286 = vrot.lane.b32.xlu1 %v6270_v42, %s14009_s17 }
0x2c5a   : > { %6292 = vrot.lane.b32.xlu0 %v6273_v12, %s14009_s17 }
0x2c5b   : > { %6290 = vrot.lane.b32.xlu1 %v6272_v43, %s14009_s17 }
0x2c5e   : > { %6315 = vperm.xlu0 %11335, %v7749_v0  }
0x2c5f   : > { %6310 = vperm.xlu1 %11334, %v7748_v54  }
0x2c62   : > { %6325 = vperm.xlu0 %11335, %v7751_v35   ;;  %v7761_v35 = vld [vmem:[%s13980_s7 + $0x2c8] sm:$0xff] }
0x2c63   : > { %6320 = vperm.xlu1 %11334, %v7750_v3   ;;  %v7756_v3 = vld [vmem:[%s13979_s6 + $0x2c0] sm:$0xff] }
0x2c64   : > { %9945 = vmatprep.mubr.msk.f32.mxu0 %vm934_vm2, %v7756_v3 }
0x2cc0   : > { %v6277_v4 = vpop.permute.xlu0 %6276 }
0x2cc1   : > { %v6283_v7 = vmul.f32 %v13452_v2, %v6277_v4  ;;  %v6275_v61 = vpop.permute.xlu1 %6274  ;;  %v7760_v4 = vld [vmem:[%s13980_s7 + $0x2c0] sm:$0xff] }
0x2cc2   : > { %v6282_v9 = vmul.f32 %v13452_v2, %v6275_v61  ;;  %v7762_v61 = vld [vmem:[%s13980_s7 + $0x2d0] sm:$0xff] }
0x2cc4   : > { %v11120_v10 = vpack.c.bf16 %v6283_v7, %v6282_v9  ;;  %v6281_v13 = vpop.permute.xlu0 %6280  ;;  %v7763_v7 = vld [vmem:[%s13980_s7 + $0x2d8] sm:$0xff] }
0x2cc5   : > { %v6285_v17 = vmul.f32 %v13452_v2, %v6281_v13  ;;  %v6279_v21 = vpop.permute.xlu1 %6278 }
0x2cc6   : > { %v6284_v23 = vmul.f32 %v13452_v2, %v6279_v21  ;;  %11121 = vmatprep.subr.bf16.mxu1 %v11120_v10 }
0x2cc7   : > { %11123 = vmatpush3.bf16.msra.mxu1 %v11120_v10 }
0x2cc8   : > { %v11124_v27 = vpack.c.bf16 %v6285_v17, %v6284_v23  ;;  %v6289_v34 = vpop.permute.xlu0 %6288 }
0x2cc9   : > { %v6287_v49 = vpop.permute.xlu1 %6286  ;;  %v6295_v30 = vmul.f32 %v13462_v14, %v6289_v34 }
0x2cca   : > { %11125 = vmatprep.subr.bf16.mxu1 %v11124_v27  ;;  %v6294_v31 = vmul.f32 %v13462_v14, %v6287_v49 }
0x2ccb   : > { %11127 = vmatpush3.bf16.msra.mxu1 %v11124_v27 }
0x2ccc   : > { %11129 = vmatprep.subr.bf16.mxu1 %v11128_v57  ;;  %v6293_v24 = vpop.permute.xlu0 %6292  ;;  %v11136_v55 = vpack.c.bf16 %v6295_v30, %v6294_v31 }
0x2ccd   : > { %v6291_v60 = vpop.permute.xlu1 %6290  ;;  %v6297_v16 = vmul.f32 %v13462_v14, %v6293_v24 }
0x2cce   : > { %v6296_v18 = vmul.f32 %v13462_v14, %v6291_v60 }
0x2ccf   : > { %11131 = vmatpush3.bf16.msra.mxu1 %v11128_v57 }
0x2cd0   : > { %11133 = vmatprep.subr.bf16.mxu1 %v11132_v32  ;;  %v11140_v38 = vpack.c.bf16 %v6297_v16, %v6296_v18 }
0x2cd3   : > { %11135 = vmatpush3.bf16.msra.mxu1 %v11132_v32 }
0x2cd4   : > { %11137 = vmatprep.subr.bf16.mxu1 %v11136_v55 }
0x2cd7   : > { %11139 = vmatpush3.bf16.msra.mxu1 %v11136_v55 }
0x2cd8   : > { %11141 = vmatprep.subr.bf16.mxu1 %v11140_v38 }
0x2cdb   : > { %11143 = vmatpush3.bf16.msra.mxu1 %v11140_v38 }
0x2cdd   : > { %v6316_v45 = vpop.permute.xlu0 %6315 }
0x2cde   : > { %9916 = vmatmul.mubr.msk.f32.vlgmr.msra.gmra.mrb[80].mxu1 %vm934_vm2, %v7745_v39  ;;  %v6311_v47 = vpop.permute.xlu1 %6310 }
0x2cdf   : > { %9918 = vmatprep.mubr.msk.f32.mxu1 %vm934_vm2, %v7746_v40 }
0x2ce1   : > { %v6326_v52 = vpop.permute.xlu0 %6325 }
0x2ce2   : > { %9919 = vmatmul.mubr.msk.f32.gmra.mrb[82].mxu1 %vm934_vm2, %v7747_v44  ;;  %v6321_v29 = vpop.permute.xlu1 %6320 }
0x2db1   : > { %v9917_v48 = vpop.f32.mrb[80].mxu1 }
0x2db2   : > { %v6412_v51 = vadd.f32 %v9917_v48, %v6316_v45  ;;  %v6406_v5 = vpop.f32.mrb[81].mxu1  ;;  %v7757_v45 = vld [vmem:[%s13979_s6 + $0x2c8] sm:$0xff]  ;;  %v7759_v48 = vld [vmem:[%s13979_s6 + $0x2d8] sm:$0xff] }
0x2db3   : > { %v6407_v42 = vadd.f32 %v6406_v5, %v6311_v47  ;;  %v7758_v47 = vld [vmem:[%s13979_s6 + $0x2d0] sm:$0xff] }
0x2db4   : > { %v6426_v50 = vmax.f32 %v6412_v51, 0.0 }
0x2db5   : > { %v6425_v56 = vmax.f32 %v6407_v42, 0.0  ;;  %v9920_v26 = vpop.f32.mrb[82].mxu1 }
0x2db6   : > { %v6422_v57 = vadd.f32 %v9920_v26, %v6326_v52  ;;  %6431 = vrot.lane.b32.xlu0 %v6426_v50, %s14010_s28  ;;  %v6416_v12 = vpop.f32.mrb[83].mxu1 }
0x2db7   : > { %v6417_v43 = vadd.f32 %v6416_v12, %v6321_v29  ;;  %6429 = vrot.lane.b32.xlu1 %v6425_v56, %s14010_s28  ;;  %v11152_v32 = vpack.c.bf16 %v6426_v50, %v6425_v56 }
0x2db8   : > { %v6428_v0 = vmax.f32 %v6422_v57, 0.0 }
0x2db9   : > { %v6427_v46 = vmax.f32 %v6417_v43, 0.0 }
0x2dba   : > { %6435 = vrot.lane.b32.xlu0 %v6428_v0, %s14010_s28 }
0x2dbb   : > { %6433 = vrot.lane.b32.xlu1 %v6427_v46, %s14010_s28  ;;  %v11156_v54 = vpack.c.bf16 %v6428_v0, %v6427_v46 }
0x2dbe   : > { %6443 = vrot.lane.b32.xlu0 %v6426_v50, %s14009_s17 }
0x2dbf   : > { %6441 = vrot.lane.b32.xlu1 %v6425_v56, %s14009_s17 }
0x2dc2   : > { %6447 = vrot.lane.b32.xlu0 %v6428_v0, %s14009_s17 }
0x2dc3   : > { %6445 = vrot.lane.b32.xlu1 %v6427_v46, %s14009_s17 }
0x2dc6   : > { %6470 = vperm.xlu0 %11335, %v7761_v35  }
0x2dc7   : > { %6465 = vperm.xlu1 %11334, %v7760_v4  }
0x2dca   : > { %6480 = vperm.xlu0 %11335, %v7763_v7   ;;  %v7773_v7 = vld [vmem:[%s13980_s7 + $0x2e8] sm:$0xff] }
0x2dcb   : > { %6475 = vperm.xlu1 %11334, %v7762_v61   ;;  %v7768_v61 = vld [vmem:[%s13979_s6 + $0x2e0] sm:$0xff] }
0x2dcc   : > { %9975 = vmatprep.mubr.msk.f32.mxu1 %vm934_vm2, %v7768_v61 }
0x2e28   : > { %v6432_v9 = vpop.permute.xlu0 %6431 }
0x2e29   : > { %v6438_v10 = vmul.f32 %v13452_v2, %v6432_v9  ;;  %v6430_v13 = vpop.permute.xlu1 %6429  ;;  %v7772_v9 = vld [vmem:[%s13980_s7 + $0x2e0] sm:$0xff] }
0x2e2a   : > { %v6437_v17 = vmul.f32 %v13452_v2, %v6430_v13  ;;  %v7774_v13 = vld [vmem:[%s13980_s7 + $0x2f0] sm:$0xff] }
0x2e2c   : > { %v11144_v21 = vpack.c.bf16 %v6438_v10, %v6437_v17  ;;  %v6436_v23 = vpop.permute.xlu0 %6435  ;;  %v7775_v10 = vld [vmem:[%s13980_s7 + $0x2f8] sm:$0xff]  ;;  %v7780_v17 = vld [vmem:[%s13981_s8 + $0x280] sm:$0xff] }
0x2e2d   : > { %v6440_v27 = vmul.f32 %v13452_v2, %v6436_v23  ;;  %v6434_v34 = vpop.permute.xlu1 %6433 }
0x2e2e   : > { %v6439_v49 = vmul.f32 %v13452_v2, %v6434_v34  ;;  %11145 = vmatprep.subr.bf16.mxu0 %v11144_v21  ;;  %v7783_v34 = vld [vmem:[%s13981_s8 + $0x298] sm:$0xff] }
0x2e2f   : > { %11147 = vmatpush3.bf16.msra.mxu0 %v11144_v21  ;;  %v7781_v21 = vld [vmem:[%s13981_s8 + $0x288] sm:$0xff] }
0x2e30   : > { %v11148_v30 = vpack.c.bf16 %v6440_v27, %v6439_v49  ;;  %v6444_v31 = vpop.permute.xlu0 %6443  ;;  %v11192_v23 = vpack.c.bf16 %v7781_v21, %v7780_v17  ;;  %v7782_v27 = vld [vmem:[%s13981_s8 + $0x290] sm:$0xff] }
0x2e31   : > { %v6442_v24 = vpop.permute.xlu1 %6441  ;;  %v6450_v60 = vmul.f32 %v13462_v14, %v6444_v31  ;;  %v11196_v49 = vpack.c.bf16 %v7783_v34, %v7782_v27  ;;  %v7785_v31 = vld [vmem:[%s13981_s8 + $0x2a8] sm:$0xff]  ;;  %v7800_v21 = vld [vmem:[%s13983_s10 + $0x290] sm:$0xff]  ;;  %v7802_v34 = vld [vmem:[%s13983_s10 + $0x2a0] sm:$0xff] }
0x2e32   : > { %11149 = vmatprep.subr.bf16.mxu0 %v11148_v30  ;;  %v6449_v55 = vmul.f32 %v13462_v14, %v6442_v24 }
0x2e33   : > { %11151 = vmatpush3.bf16.msra.mxu0 %v11148_v30  ;;  %v7784_v30 = vld [vmem:[%s13981_s8 + $0x2a0] sm:$0xff] }
0x2e34   : > { %11153 = vmatprep.subr.bf16.mxu0 %v11152_v32  ;;  %v6448_v16 = vpop.permute.xlu0 %6447  ;;  %v11160_v38 = vpack.c.bf16 %v6450_v60, %v6449_v55  ;;  %v11200_v24 = vpack.c.bf16 %v7785_v31, %v7784_v30  ;;  %v7786_v60 = vld [vmem:[%s13981_s8 + $0x2b0] sm:$0xff]  ;;  %v7787_v55 = vld [vmem:[%s13981_s8 + $0x2b8] sm:$0xff] }
0x2e35   : > { %v6446_v18 = vpop.permute.xlu1 %6445  ;;  %v6452_v39 = vmul.f32 %v13462_v14, %v6448_v16  ;;  %v11204_v16 = vpack.c.bf16 %v7787_v55, %v7786_v60  ;;  %v7771_v30 = vld [vmem:[%s13979_s6 + $0x2f8] sm:$0xff] }
0x2e36   : > { %v6451_v40 = vmul.f32 %v13462_v14, %v6446_v18  ;;  %v7788_v18 = vld [vmem:[%s13981_s8 + $0x2c0] sm:$0xff]  ;;  %v7805_v60 = vld [vmem:[%s13983_s10 + $0x2b8] sm:$0xff] }
0x2e37   : > { %11155 = vmatpush3.bf16.msra.mxu0 %v11152_v32 }
0x2e38   : > { %11157 = vmatprep.subr.bf16.mxu0 %v11156_v54  ;;  %v11164_v44 = vpack.c.bf16 %v6452_v39, %v6451_v40  ;;  %v7790_v40 = vld [vmem:[%s13981_s8 + $0x2d0] sm:$0xff] }
0x2e3b   : > { %11159 = vmatpush3.bf16.msra.mxu0 %v11156_v54 }
0x2e3c   : > { %11161 = vmatprep.subr.bf16.mxu0 %v11160_v38 }
0x2e3f   : > { %11163 = vmatpush3.bf16.msra.mxu0 %v11160_v38  ;;  %v7789_v38 = vld [vmem:[%s13981_s8 + $0x2c8] sm:$0xff] }
0x2e40   : > { %11165 = vmatprep.subr.bf16.mxu0 %v11164_v44  ;;  %v11208_v39 = vpack.c.bf16 %v7789_v38, %v7788_v18  ;;  %v7807_v18 = vld [vmem:[%s13983_s10 + $0x2c8] sm:$0xff] }
0x2e43   : > { %11167 = vmatpush3.bf16.msra.mxu0 %v11164_v44  ;;  %v7791_v44 = vld [vmem:[%s13981_s8 + $0x2d8] sm:$0xff] }
0x2e44   : > { %11193 = vmatprep.subr.bf16.mxu0 %v11192_v23 }
0x2e45   : > { %v6471_v51 = vpop.permute.xlu0 %6470 }
0x2e46   : > { %9946 = vmatmul.mubr.msk.f32.vlgmr.msra.gmra.mrb[82].mxu0 %vm934_vm2, %v7757_v45  ;;  %v6466_v5 = vpop.permute.xlu1 %6465  ;;  %v11212_v45 = vpack.c.bf16 %v7791_v44, %v7790_v40  ;;  %v7809_v40 = vld [vmem:[%s13983_s10 + $0x2d8] sm:$0xff] }
0x2e47   : > { %9948 = vmatprep.mubr.msk.f32.mxu0 %vm934_vm2, %v7758_v47  ;;  %11195 = vmatpush3.bf16.msra.mxu0 %v11192_v23  ;;  %v7792_v47 = vld [vmem:[%s13981_s8 + $0x2e0] sm:$0xff]  ;;  %v7770_v23 = vld [vmem:[%s13979_s6 + $0x2f0] sm:$0xff] }
0x2e48   : > { %11197 = vmatprep.subr.bf16.mxu0 %v11196_v49 }
0x2e49   : > { %v6481_v29 = vpop.permute.xlu0 %6480 }
0x2e4a   : > { %9949 = vmatmul.mubr.msk.f32.gmra.mrb[84].mxu0 %vm934_vm2, %v7759_v48  ;;  %v6476_v43 = vpop.permute.xlu1 %6475  ;;  %v7793_v48 = vld [vmem:[%s13981_s8 + $0x2e8] sm:$0xff] }
0x2e4b   : > { %11199 = vmatpush3.bf16.msra.mxu0 %v11196_v49  ;;  %v7803_v49 = vld [vmem:[%s13983_s10 + $0x2a8] sm:$0xff] }
0x2e4c   : > { %11201 = vmatprep.subr.bf16.mxu0 %v11200_v24  ;;  %v11232_v31 = vpack.c.bf16 %v7803_v49, %v7802_v34 }
0x2e4f   : > { %11203 = vmatpush3.bf16.msra.mxu0 %v11200_v24  ;;  %v7804_v24 = vld [vmem:[%s13983_s10 + $0x2b0] sm:$0xff] }
0x2e50   : > { %11205 = vmatprep.subr.bf16.mxu0 %v11204_v16  ;;  %v11236_v55 = vpack.c.bf16 %v7805_v60, %v7804_v24 }
0x2e53   : > { %11207 = vmatpush3.bf16.msra.mxu0 %v11204_v16  ;;  %v7806_v16 = vld [vmem:[%s13983_s10 + $0x2c0] sm:$0xff] }
0x2e54   : > { %11209 = vmatprep.subr.bf16.mxu0 %v11208_v39  ;;  %v11240_v38 = vpack.c.bf16 %v7807_v18, %v7806_v16 }
0x2e57   : > { %11211 = vmatpush3.bf16.msra.mxu0 %v11208_v39  ;;  %v7808_v39 = vld [vmem:[%s13983_s10 + $0x2d0] sm:$0xff] }
0x2e58   : > { %11213 = vmatprep.subr.bf16.mxu0 %v11212_v45  ;;  %v11244_v44 = vpack.c.bf16 %v7809_v40, %v7808_v39 }
0x2e5b   : > { %11215 = vmatpush3.bf16.msra.mxu0 %v11212_v45  ;;  %v7810_v45 = vld [vmem:[%s13983_s10 + $0x2e0] sm:$0xff] }
0x2f19   : > { %v9947_v42 = vpop.f32.mrb[82].mxu0 }
0x2f1a   : > { %v6567_v50 = vadd.f32 %v9947_v42, %v6471_v51  ;;  %v6561_v52 = vpop.f32.mrb[83].mxu0  ;;  %v11216_v51 = vpack.c.bf16 %v7793_v48, %v7792_v47  ;;  %v7811_v47 = vld [vmem:[%s13983_s10 + $0x2e8] sm:$0xff] }
0x2f1b   : > { %v6562_v56 = vadd.f32 %v6561_v52, %v6466_v5  ;;  %v11248_v48 = vpack.c.bf16 %v7811_v47, %v7810_v45 }
0x2f1c   : > { %v6581_v26 = vmax.f32 %v6567_v50, 0.0  ;;  %11217 = vmatprep.subr.bf16.mxu0 %v11216_v51 }
0x2f1d   : > { %v6580_v57 = vmax.f32 %v6562_v56, 0.0  ;;  %v9950_v12 = vpop.f32.mrb[84].mxu0  ;;  %11219 = vmatpush3.bf16.msra.mxu0 %v11216_v51  ;;  %v7794_v51 = vld [vmem:[%s13981_s8 + $0x2f0] sm:$0xff] }
0x2f1e   : > { %v6577_v32 = vadd.f32 %v9950_v12, %v6481_v29  ;;  %6586 = vrot.lane.b32.xlu0 %v6581_v26, %s14010_s28  ;;  %v6571_v0 = vpop.f32.mrb[85].mxu0 }
0x2f1f   : > { %v6572_v46 = vadd.f32 %v6571_v0, %v6476_v43  ;;  %6584 = vrot.lane.b32.xlu1 %v6580_v57, %s14010_s28  ;;  %v13733_v54 = vpack.c.bf16 %v6581_v26, %v6580_v57 }
0x2f20   : > { %v6583_v35 = vmax.f32 %v6577_v32, 0.0 }
0x2f21   : > { %v6582_v3 = vmax.f32 %v6572_v46, 0.0 }
0x2f22   : > { %6590 = vrot.lane.b32.xlu0 %v6583_v35, %s14010_s28 }
0x2f23   : > { %6588 = vrot.lane.b32.xlu1 %v6582_v3, %s14010_s28  ;;  %v13737_v4 = vpack.c.bf16 %v6583_v35, %v6582_v3 }
0x2f26   : > { %6598 = vrot.lane.b32.xlu0 %v6581_v26, %s14009_s17 }
0x2f27   : > { %6596 = vrot.lane.b32.xlu1 %v6580_v57, %s14009_s17 }
0x2f2a   : > { %6602 = vrot.lane.b32.xlu0 %v6583_v35, %s14009_s17 }
0x2f2b   : > { %6600 = vrot.lane.b32.xlu1 %v6582_v3, %s14009_s17 }
0x2f2e   : > { %6625 = vperm.xlu0 %11335, %v7773_v7  }
0x2f2f   : > { %6620 = vperm.xlu1 %11334, %v7772_v9  }
0x2f32   : > { %6635 = vperm.xlu0 %11335, %v7775_v10   ;;  %v7798_v10 = vld [vmem:[%s13983_s10 + $0x280] sm:$0xff] }
0x2f33   : > { %6630 = vperm.xlu1 %11334, %v7774_v13   ;;  %v7799_v13 = vld [vmem:[%s13983_s10 + $0x288] sm:$0xff] }
0x2f90   : > { %v6587_v5 = vpop.permute.xlu0 %6586 }
0x2f91   : > { %v6593_v42 = vmul.f32 %v13452_v2, %v6587_v5  ;;  %v6585_v50 = vpop.permute.xlu1 %6584  ;;  %v7795_v5 = vld [vmem:[%s13981_s8 + $0x2f8] sm:$0xff] }
0x2f92   : > { %v6592_v52 = vmul.f32 %v13452_v2, %v6585_v50  ;;  %v11220_v50 = vpack.c.bf16 %v7795_v5, %v7794_v51 }
0x2f94   : > { %v11168_v56 = vpack.c.bf16 %v6593_v42, %v6592_v52  ;;  %v6591_v26 = vpop.permute.xlu0 %6590  ;;  %v7812_v42 = vld [vmem:[%s13983_s10 + $0x2f0] sm:$0xff]  ;;  %v7813_v52 = vld [vmem:[%s13983_s10 + $0x2f8] sm:$0xff]  ;;  %11221 = vmatprep.subr.bf16.mxu0 %v11220_v50 }
0x2f95   : > { %v6595_v29 = vmul.f32 %v13452_v2, %v6591_v26  ;;  %v6589_v57 = vpop.permute.xlu1 %6588  ;;  %11223 = vmatpush3.bf16.msra.mxu0 %v11220_v50 }
0x2f96   : > { %v6594_v12 = vmul.f32 %v13452_v2, %v6589_v57  ;;  %11169 = vmatprep.subr.bf16.mxu1 %v11168_v56  ;;  %11257 = vmatprep.subr.bf16.mxu0 %v12077_v6 }
0x2f97   : > { %11171 = vmatpush3.bf16.msra.mxu1 %v11168_v56  ;;  %v11252_v56 = vpack.c.bf16 %v7813_v52, %v7812_v42 }
0x2f98   : > { %v11172_v43 = vpack.c.bf16 %v6595_v29, %v6594_v12  ;;  %v6599_v32 = vpop.permute.xlu0 %6598 }
0x2f99   : > { %v6597_v0 = vpop.permute.xlu1 %6596  ;;  %v6605_v46 = vmul.f32 %v13462_v14, %v6599_v32 }
0x2f9a   : > { %11173 = vmatprep.subr.bf16.mxu1 %v11172_v43  ;;  %v6604_v35 = vmul.f32 %v13462_v14, %v6597_v0 }
0x2f9b   : > { %11175 = vmatpush3.bf16.msra.mxu1 %v11172_v43 }
0x2f9c   : > { %11177 = vmatprep.subr.bf16.mxu1 %v13733_v54  ;;  %v6603_v3 = vpop.permute.xlu0 %6602  ;;  %v11184_v2 = vpack.c.bf16 %v6605_v46, %v6604_v35 }
0x2f9d   : > { %v6601_v7 = vpop.permute.xlu1 %6600  ;;  %v6607_v61 = vmul.f32 %v13462_v14, %v6603_v3 }
0x2f9e   : > { %v6606_v9 = vmul.f32 %v13462_v14, %v6601_v7  ;;  %v7801_v14 = vld [vmem:[%s13983_s10 + $0x298] sm:$0xff] }
0x2f9f   : > { %11179 = vmatpush3.bf16.msra.mxu1 %v13733_v54  ;;  %v11224_v54 = vpack.c.bf16 %v7799_v13, %v7798_v10  ;;  %v11228_v27 = vpack.c.bf16 %v7801_v14, %v7800_v21 }
0x2fa0   : > { %11181 = vmatprep.subr.bf16.mxu1 %v13737_v4  ;;  %v11188_v17 = vpack.c.bf16 %v6607_v61, %v6606_v9 }
0x2fa3   : > { %11183 = vmatpush3.bf16.msra.mxu1 %v13737_v4  ;;  %v7769_v4 = vld [vmem:[%s13979_s6 + $0x2e8] sm:$0xff] }
0x2fa4   : > { %11185 = vmatprep.subr.bf16.mxu1 %v11184_v2 }
0x2fa7   : > { %11187 = vmatpush3.bf16.msra.mxu1 %v11184_v2 }
0x2fa8   : > { %11189 = vmatprep.subr.bf16.mxu1 %v11188_v17 }
0x2fab   : > { %11191 = vmatpush3.bf16.msra.mxu1 %v11188_v17 }
0x2fac   : > { %11225 = vmatprep.subr.bf16.mxu1 %v11224_v54 }
0x2fad   : > { %v6626_v26 = vpop.permute.xlu0 %6625 }
0x2fae   : > { %9976 = vmatmul.mubr.msk.f32.vlgmr.msra.gmra.mrb[84].mxu1 %vm934_vm2, %v7769_v4  ;;  %v6621_v29 = vpop.permute.xlu1 %6620 }
0x2faf   : > { %9978 = vmatprep.mubr.msk.f32.mxu1 %vm934_vm2, %v7770_v23  ;;  %11227 = vmatpush3.bf16.msra.mxu1 %v11224_v54 }
0x2fb0   : > { %11229 = vmatprep.subr.bf16.mxu1 %v11228_v27 }
0x2fb1   : > { %v6636_v0 = vpop.permute.xlu0 %6635 }
0x2fb2   : > { %9979 = vmatmul.mubr.msk.f32.gmra.mrb[86].mxu1 %vm934_vm2, %v7771_v30  ;;  %v6631_v3 = vpop.permute.xlu1 %6630 }
0x2fb3   : > { %11231 = vmatpush3.bf16.msra.mxu1 %v11228_v27 }
0x2fb4   : > { %11233 = vmatprep.subr.bf16.mxu1 %v11232_v31 }
0x2fb7   : > { %11235 = vmatpush3.bf16.msra.mxu1 %v11232_v31 }
0x2fb8   : > { %11237 = vmatprep.subr.bf16.mxu1 %v11236_v55 }
0x2fbb   : > { %11239 = vmatpush3.bf16.msra.mxu1 %v11236_v55 }
0x2fbc   : > { %11241 = vmatprep.subr.bf16.mxu1 %v11240_v38 }
0x2fbf   : > { %11243 = vmatpush3.bf16.msra.mxu1 %v11240_v38 }
0x2fc0   : > { %11245 = vmatprep.subr.bf16.mxu1 %v11244_v44 }
0x2fc3   : > { %11247 = vmatpush3.bf16.msra.mxu1 %v11244_v44 }
0x2fc4   : > { %11249 = vmatprep.subr.bf16.mxu1 %v11248_v48 }
0x2fc7   : > { %11251 = vmatpush3.bf16.msra.mxu1 %v11248_v48 }
0x2fc8   : > { %11253 = vmatprep.subr.bf16.mxu1 %v11252_v56 }
0x2fcb   : > { %11255 = vmatpush3.bf16.msra.mxu1 %v11252_v56 }
0x2fcc   : > { %11288 = vmatprep.subr.bf16.mxu1 %v11553_v62 }
0x3081   : > { %v9977_v57 = vpop.f32.mrb[84].mxu1 }
0x3082   : > { %v6722_v12 = vadd.f32 %v9977_v57, %v6626_v26  ;;  %v6716_v43 = vpop.f32.mrb[85].mxu1 }
0x3083   : > { %v6717_v32 = vadd.f32 %v6716_v43, %v6621_v29 }
0x3084   : > { %v6736_v7 = vmax.f32 %v6722_v12, 0.0 }
0x3085   : > { %v6735_v46 = vmax.f32 %v6717_v32, 0.0  ;;  %v9980_v35 = vpop.f32.mrb[86].mxu1  ;;  %v1839_v32 = vld [vmem:[%s13986_s13] sm:$0xff] }
0x3086   : > { %v6732_v2 = vadd.f32 %v9980_v35, %v6636_v0  ;;  %v6726_v61 = vpop.f32.mrb[87].mxu1  ;;  %v7557_v35 = vld [vmem:[%s13986_s13 + $0x10] sm:$0xff] }
0x3087   : > { %v6727_v9 = vadd.f32 %v6726_v61, %v6631_v3  ;;  %10013 = vmatprep.mubr.f32.mxu0 %v6735_v46  ;;  %10051 = vmatprep.mubr.f32.mxu1 %v6735_v46  ;;  %v7470_v46 = vld [vmem:[%s13986_s13 + $0x8] sm:$0xff]  ;;  %v7644_v3 = vld [vmem:[%s13986_s13 + $0x18] sm:$0xff] }
0x3088   : > { %10014 = vmatmul.mubr.f32.vlgmr.msra.gmra.mrb[86].mxu0 %v6736_v7  ;;  %10052 = vmatmul.mubr.f32.vlgmr.msra.gmra.mrb[88].mxu1 %v6736_v7  ;;  %v6738_v13 = vmax.f32 %v6732_v2, 0.0  ;;  %v7731_v7 = vld [vmem:[%s13986_s13 + $0x20] sm:$0xff]  ;;  %v7818_v2 = vld [vmem:[%s13986_s13 + $0x28] sm:$0xff] }
0x3089   : > { %v6737_v10 = vmax.f32 %v6727_v9, 0.0  ;;  %11259 = vmatpush3.bf16.msra.mxu0 %v12077_v6  ;;  %v7797_v6 = vld [vmem:[%s13982_s9 + $0x5] ss:$0 sm:$0xff] }
0x308a   : > { %11261 = vmatprep.subr.bf16.mxu0 %v12082_v8 }
0x308b   : > { %10016 = vmatprep.mubr.f32.mxu0 %v6737_v10  ;;  %10054 = vmatprep.mubr.f32.mxu1 %v6737_v10 }
0x308c   : > { %10017 = vmatmul.mubr.f32.gmra.mrb[88].mxu0 %v6738_v13  ;;  %10055 = vmatmul.mubr.f32.gmra.mrb[90].mxu1 %v6738_v13 }
0x308d   : > { %11263 = vmatpush3.bf16.msra.mxu0 %v12082_v8  ;;  %10103 = vmatprep.mubr.msk.f32.mxu1 %vm11554_vm3, %v11555_v63  ;;  %v7815_v8 = vld [vmem:[%s13984_s11 + $0x5] ss:$0 sm:$0xff] }
0x308e   : > { %11265 = vmatprep.subr.bf16.mxu0 %v12093_v11 }
0x3091   : > { %11267 = vmatpush3.bf16.msra.mxu0 %v12093_v11 }
0x3092   : > { %11269 = vmatprep.subr.bf16.mxu0 %v12103_v15 }
0x3095   : > { %11271 = vmatpush3.bf16.msra.mxu0 %v12103_v15 }
0x3096   : > { %11273 = vmatprep.subr.bf16.mxu0 %v12113_v19 }
0x3099   : > { %11275 = vmatpush3.bf16.msra.mxu0 %v12113_v19 }
0x309a   : > { %11277 = vmatprep.subr.bf16.mxu0 %v12123_v22 }
0x309d   : > { %11279 = vmatpush3.bf16.msra.mxu0 %v12123_v22 }
0x309e   : > { %11281 = vmatprep.subr.bf16.mxu0 %v12133_v25 }
0x30a1   : > { %11283 = vmatpush3.bf16.msra.mxu0 %v12133_v25 }
0x30a2   : > { %11285 = vmatprep.subr.bf16.mxu0 %v12144_v28 }
0x30a5   : > { %11287 = vmatpush3.bf16.msra.mxu0 %v12144_v28 }
0x315b   : > { %v10015_v11 = vpop.f32.mrb[86].mxu0  ;;  %v10053_v15 = vpop.f32.mrb[88].mxu1 }
0x315c   : > { %v6836_v19 = vadd.f32 %v10015_v11, %v7797_v6  ;;  %v6946_v22 = vadd.f32 %v10053_v15, %v7815_v8  ;;  %v6830_v63 = vpop.f32.mrb[87].mxu0  ;;  %v6940_v25 = vpop.f32.mrb[89].mxu1 }
0x315d   : > { %v6831_v17 = vadd.f32 %v7797_v6, %v6830_v63  ;;  %v6941_v54 = vadd.f32 %v7815_v8, %v6940_v25 }
0x315e   : > { %v7165_v28 = vsub.f32 %v13574_v36, %v6836_v19 }
0x315f   : > { %v7164_v21 = vsub.f32 %v13568_v20, %v6831_v17  ;;  %v11486_v14 = vpack.i.bf16 %v6946_v22, %v6941_v54  ;;  %v10018_v4 = vpop.f32.mrb[88].mxu0  ;;  %v10056_v23 = vpop.f32.mrb[90].mxu1 }
0x3160   : > { %7169 = vst [vmem:[%s13907_s18 + $0x8] sm:$0xff] %v7165_v28  ;;  %v6846_v27 = vadd.f32 %v10018_v4, %v7797_v6  ;;  %v6956_v34 = vadd.f32 %v10056_v23, %v7815_v8  ;;  %v6840_v49 = vpop.f32.mrb[89].mxu0  ;;  %v6950_v30 = vpop.f32.mrb[91].mxu1 }
0x3161   : > { %7168 = vst [vmem:[%s13907_s18] sm:$0xff] %v7164_v21  ;;  %v6841_v31 = vadd.f32 %v7797_v6, %v6840_v49  ;;  %v6951_v24 = vadd.f32 %v7815_v8, %v6950_v30  ;;  %11487 = vrot.lane.b32.xlu1 %v11486_v14, %s14009_s17 }
0x3162   : > { %v7167_v20 = vsub.f32 %v13584_v41, %v6846_v27 }
0x3163   : > { %v7166_v36 = vsub.f32 %v13577_v37, %v6841_v31  ;;  %v11491_v60 = vpack.i.bf16 %v6956_v34, %v6951_v24 }
0x3164   : > { %7171 = vst [vmem:[%s13907_s18 + $0x18] sm:$0xff] %v7167_v20 }
0x3165   : > { %7170 = vst [vmem:[%s13907_s18 + $0x10] sm:$0xff] %v7166_v36  ;;  %11492 = vrot.lane.b32.xlu0 %v11491_v60, %s14009_s17  ;;  %s7315_s17 = sshll.u32 %s11671_s29, 3  ;;  %s7820_s29 = sshll.u32 (%p11661_p4), %s11649_s21, 3 }
0x3166   : > { %s496_s20 = scalar_lea.vmem %s13988_s15, %s7315_s17  ;;  %s7186_s27 = scalar_lea.vmem (%p11661_p4), %s13987_s14, %s7820_s29 }
0x31d3   : > { %v11488_v55 = vpop.permute.xlu1 %11487 }
0x31d4   : > { %v11490_v16 = vunpack.i.h.bf16 %v11488_v55  ;;  %v11489_v18 = vunpack.i.l.bf16 %v11488_v55 }
0x31d6   : > { %v6968_v38 = vmax.f32 %v6946_v22, %v11490_v16  ;;  %v6967_v39 = vmax.f32 %v6941_v54, %v11489_v18  ;;  %v7220_v18 = vld [vmem:[%s13907_s18] sm:$0xff] (%p11661_p4) }
0x31d7   : > { %v11493_v40 = vpop.permute.xlu0 %11492  ;;  %7221 = vst [vmem:[%s7186_s27] sm:$0xff] (%p11661_p4), %v7220_v18 }
0x31d8   : > { %v11496_v44 = vpack.i.bf16 %v6968_v38, %v6967_v39  ;;  %v11495_v45 = vunpack.i.h.bf16 %v11493_v40  ;;  %v11494_v47 = vunpack.i.l.bf16 %v11493_v40  ;;  %v7226_v40 = vld [vmem:[%s13907_s18 + $0x18] sm:$0xff] (%p11661_p4) }
0x31d9   : > { %7227 = vst [vmem:[%s7186_s27 + $0x30] sm:$0xff] (%p11661_p4), %v7226_v40 }
0x31da   : > { %v6970_v48 = vmax.f32 %v6956_v34, %v11495_v45  ;;  %v6969_v51 = vmax.f32 %v6951_v24, %v11494_v47  ;;  %11497 = vrot.lane.b32.xlu1 %v11496_v44, %s14012_s23 }
0x31dc   : > { %v11501_v41 = vpack.i.bf16 %v6970_v48, %v6969_v51 }
0x31de   : > { %11502 = vrot.lane.b32.xlu0 %v11501_v41, %s14012_s23 }
0x324c   : > { %v11498_v37 = vpop.permute.xlu1 %11497 }
0x324d   : > { %v11500_v5 = vunpack.i.h.bf16 %v11498_v37  ;;  %v11499_v42 = vunpack.i.l.bf16 %v11498_v37 }
0x324f   : > { %v6980_v50 = vmax.f32 %v6968_v38, %v11500_v5  ;;  %v6979_v52 = vmax.f32 %v6967_v39, %v11499_v42  ;;  %v7222_v38 = vld [vmem:[%s13907_s18 + $0x8] sm:$0xff] (%p11661_p4)  ;;  %v7224_v39 = vld [vmem:[%s13907_s18 + $0x10] sm:$0xff] (%p11661_p4) }
0x3250   : > { %v11503_v56 = vpop.permute.xlu0 %11502  ;;  %7223 = vst [vmem:[%s7186_s27 + $0x10] sm:$0xff] (%p11661_p4), %v7222_v38  ;;  %7225 = vst [vmem:[%s7186_s27 + $0x20] sm:$0xff] (%p11661_p4), %v7224_v39 }
0x3251   : > { %v11506_v26 = vpack.i.bf16 %v6980_v50, %v6979_v52  ;;  %v11505_v29 = vunpack.i.h.bf16 %v11503_v56  ;;  %v11504_v57 = vunpack.i.l.bf16 %v11503_v56 }
0x3253   : > { %v6982_v12 = vmax.f32 %v6970_v48, %v11505_v29  ;;  %v6981_v43 = vmax.f32 %v6969_v51, %v11504_v57  ;;  %11507 = vrot.lane.b32.xlu1 %v11506_v26, %s14013_s25 }
0x3255   : > { %v11511_v0 = vpack.i.bf16 %v6982_v12, %v6981_v43 }
0x3257   : > { %11512 = vrot.lane.b32.xlu0 %v11511_v0, %s14013_s25  ;;  %1842 = vperm.xlu1 %11334, %v1839_v32  }
0x325b   : > { %2964 = vperm.xlu0 %11335, %v7470_v46   ;;  %4013 = vperm.xlu1 %11334, %v7557_v35  }
0x325f   : > { %5062 = vperm.xlu0 %11335, %v7644_v3   ;;  %6111 = vperm.xlu1 %11334, %v7731_v7  }
0x3263   : > { %7160 = vperm.xlu0 %11335, %v7818_v2  }
0x32c5   : > { %v11508_v61 = vpop.permute.xlu1 %11507 }
0x32c6   : > { %v11510_v9 = vunpack.i.h.bf16 %v11508_v61  ;;  %v11509_v10 = vunpack.i.l.bf16 %v11508_v61 }
0x32c8   : > { %v6992_v13 = vmax.f32 %v6980_v50, %v11510_v9  ;;  %v6991_v6 = vmax.f32 %v6979_v52, %v11509_v10 }
0x32c9   : > { %v11513_v8 = vpop.permute.xlu0 %11512 }
0x32ca   : > { %v11515_v11 = vunpack.i.h.bf16 %v11513_v8  ;;  %v11514_v15 = vunpack.i.l.bf16 %v11513_v8  ;;  %10089 = vmatprep.mubr.f32.mxu0 %v6991_v6 }
0x32cb   : > { %10090 = vmatmul.mubr.f32.vlgmr.msra.gmra.mrb[90].mxu0 %v6992_v13 }
0x32cc   : > { %v6994_v19 = vmax.f32 %v6982_v12, %v11515_v11  ;;  %v6993_v22 = vmax.f32 %v6981_v43, %v11514_v15 }
0x32ce   : > { %10092 = vmatprep.mubr.f32.mxu0 %v6993_v22 }
0x32cf   : > { %10093 = vmatmul.mubr.f32.gmra.mrb[92].mxu0 %v6994_v19 }
0x32d6   : > { %v1843_v63 = vpop.permute.xlu1 %1842 }
0x32d7   : > { %v1916_v25 = vadd.f32 %v12243_v53, %v1843_v63 }
0x32d9   : > { %v2959_v17 = vadd.f32 %v12585_v59, %v1916_v25 }
0x32da   : > { %v2965_v54 = vpop.permute.xlu0 %2964  ;;  %v4014_v14 = vpop.permute.xlu1 %4013 }
0x32db   : > { %v2967_v28 = vadd.f32 %v2965_v54, %v2959_v17 }
0x32dd   : > { %v4008_v21 = vadd.f32 %v12937_v1, %v2967_v28  ;;  %v7816_v1 = vld [vmem:[%s13985_s12 + $0x28] sm:$0xff] }
0x32de   : > { %v5063_v27 = vpop.permute.xlu0 %5062 }
0x32df   : > { %v4016_v4 = vadd.f32 %v4014_v14, %v4008_v21 }
0x32e1   : > { %v5057_v23 = vadd.f32 %v13289_v58, %v4016_v4  ;;  %v6112_v58 = vpop.permute.xlu1 %6111 }
0x32e2   : > { %v7161_v16 = vpop.permute.xlu0 %7160 }
0x32e3   : > { %v5065_v34 = vadd.f32 %v5063_v27, %v5057_v23 }
0x32e5   : > { %v6106_v49 = vadd.f32 %v13641_v33, %v5065_v34 }
0x32e7   : > { %v6114_v36 = vadd.f32 %v6112_v58, %v6106_v49 }
0x339e   : > { %v10091_v30 = vpop.f32.mrb[90].mxu0 }
0x339f   : > { %v7061_v31 = vpop.f32.mrb[91].mxu0 }
0x33a0   : > { %v11289_v24 = vpack.c.bf16 %v10091_v30, %v7061_v31 }
0x33a2   : > { %v10094_v20 = vpop.f32.mrb[92].mxu0  ;;  %11290 = vmatpush3.bf16.msra.mxu1 %v11289_v24 }
0x33a3   : > { %v7071_v53 = vpop.f32.mrb[93].mxu0  ;;  %11291 = vmatprep.subr.bf16.mxu1 %v11553_v62 }
0x33a4   : > { %v11292_v59 = vpack.c.bf16 %v10094_v20, %v7071_v53 }
0x33a6   : > { %11293 = vmatpush3.bf16.msra.mxu1 %v11292_v59 }
0x33a9   : > { %10104 = vmatmul.mubr.msk.f32.vlgmr.msra.gmra.mrb[92].mxu1 %vm1845_vm4, %v7816_v1 }
0x347b   : > { %7184 = sbr.rel (!%p11661_p4) target bundleno = 13442 (0x3482), region = 80 }
0x347c   : > { %v7151_v33 = vpop.f32.mrb[92].mxu1 }
0x347d   : > { %v7155_v60 = vadd.f32 %v7151_v33, %v6114_v36  ;;  %v10105_v55 = vpop.f32.mrb[93].mxu1 }
0x347f   : > { %v7163_v62 = vadd.f32 %v7161_v16, %v7155_v60 }
0x3481   : > { %7173 = vst.msk [vmem:[%s496_s20] sm:$0xff] %vm7172_vm5, %v7163_v62 }
0x3482 PF: > { %s14014_s20 = sld [smem:[#allocation4_spill]]  ;;  %s14015_s18 = sld [smem:[#allocation3_spill]] }
0x3483   : > { %s14016_s19 = sld [smem:[#allocation5_spill]] }
0x3488   : > { %p23_p8 = scmp.ge.s32.totalorder %s14014_s20, 4  }
0x348a   :  { %25 = sbr.rel (!%p23_p8) target bundleno = 6 (0x6), region = 234 }

</bundles_post_ra>
